<compile_context>
chip_gen: v6e
topology: v6e:2x2x1
jax: 0.10.0
libtpu: 0.0.40
codegen_flags: <defaults>
</compile_context>

<pallas_src>
import functools

import numpy as np
import jax
import jax.numpy as jnp
from jax.experimental import pallas as pl
from jax.experimental.pallas import tpu as pltpu


POOL_SCALES = (1, 2, 3, 6)
PPM_INTER = 128          # ppm_inter_conv_planes
PPM_LAST = 256           # ppm_last_conv_planes
BN_EPS = 1e-5


def _round_up(a, m):
    return (a + m - 1) // m * m


# ----------------------------- Pallas kernels -----------------------------

def _branch_conv_kernel(x_ref, w_ref, o_ref):
    # All 4 pyramid branches in ONE grid step: batched (4,Mp,Cin)x(4,Cin,128)
    # bf16 matmul with f32 accumulation.  BN scale is pre-folded into w.
    o_ref[...] = jnp.einsum(
        "bmc,bck->bmk", x_ref[...], w_ref[...],
        preferred_element_type=jnp.float32)


def branch_conv1x1(pooled_rows, w_stack):
    """pooled_rows: (B, Mp, Cin) bf16; w_stack: (B, Cin, Cout) bf16 -> (B, Mp, Cout) f32."""
    B, Mp, Cin = pooled_rows.shape
    Cout = w_stack.shape[-1]
    return pl.pallas_call(
        _branch_conv_kernel,
        out_shape=jax.ShapeDtypeStruct((B, Mp, Cout), jnp.float32),
        grid_spec=pltpu.PrefetchScalarGridSpec(
            num_scalar_prefetch=0,
            grid=(1,),
            in_specs=[
                pl.BlockSpec((B, Mp, Cin), lambda i: (0, 0, 0)),
                pl.BlockSpec((B, Cin, Cout), lambda i: (0, 0, 0)),
            ],
            out_specs=pl.BlockSpec((B, Mp, Cout), lambda i: (0, 0, 0)),
        ),
        compiler_params=pltpu.CompilerParams(
            dimension_semantics=("arbitrary",)),
    )(pooled_rows, w_stack)


def _conv3x3_bias_relu_kernel(x_ref, w_ref, b_ref, o_ref, *, th, w_out):
    # x_ref: (1, H+2, W+2, Kp) bf16 full spatially-padded image (Kp % 128 == 0)
    # w_ref: (3, 3, Kp, Cout) bf16 (BN scale folded); b_ref: (1, Cout) f32
    # o_ref: (1, TH, W, Cout) f32 output row band (lane-dense, Cout=256).
    kp = x_ref.shape[3]
    cout = o_ref.shape[3]
    band = pl.program_id(1)
    r0 = pl.multiple_of(band * th, th)           # th-aligned band start
    acc = jnp.zeros((th * w_out, cout), jnp.float32)
    for dy in range(3):
        for dx in range(3):
            # Direct per-tap (th, W, Kp) load feeding its matmul: no resident
            # (TH+2, W+2, Kp) slab / dx-shifted copies -> low vreg pressure,
            # loads overlap the MXU.  Reshape is layout-free (W % 8 == 0).
            patch = x_ref[0, pl.ds(r0 + dy, th), pl.ds(dx, w_out), :]
            acc = acc + jnp.dot(patch.reshape(th * w_out, kp), w_ref[dy, dx],
                                preferred_element_type=jnp.float32)
    y = jnp.maximum(acc + b_ref[...], 0.0)
    o_ref[0] = y.reshape(th, w_out, cout).astype(o_ref.dtype)


def conv3x3_bias_relu(x_padded, w, bias, *, th=8):
    """x_padded: (N, H+2, W+2, Kp) bf16; w: (3,3,Kp,Cout) bf16; bias: (1,Cout) f32."""
    N, Hp, Wp, Kp = x_padded.shape
    H, W = Hp - 2, Wp - 2
    Cout = w.shape[-1]
    assert H % th == 0 and W % 8 == 0 and Kp % 128 == 0, (H, W, Kp)
    kernel = functools.partial(_conv3x3_bias_relu_kernel, th=th, w_out=W)
    return pl.pallas_call(
        kernel,
        out_shape=jax.ShapeDtypeStruct((N, H, W, Cout), jnp.float32),
        grid_spec=pltpu.PrefetchScalarGridSpec(
            num_scalar_prefetch=0,
            grid=(N, H // th),
            in_specs=[
                # Full padded image; block index depends only on n, and the
                # band axis is "arbitrary" (sequential per core), so the same
                # VMEM tile is reused across bands with no re-DMA.
                pl.BlockSpec((1, Hp, Wp, Kp), lambda n, b: (n, 0, 0, 0)),
                pl.BlockSpec((3, 3, Kp, Cout), lambda n, b: (0, 0, 0, 0)),
                pl.BlockSpec((1, Cout), lambda n, b: (0, 0)),
            ],
            out_specs=pl.BlockSpec((1, th, W, Cout), lambda n, b: (n, b, 0, 0)),
        ),
        compiler_params=pltpu.CompilerParams(
            dimension_semantics=("parallel", "arbitrary")),
    )(x_padded, w, bias)


# -------------------- pooling / resize matrices (glue) --------------------

def adaptive_avg_pool_matrix(out_size, in_size):
    """Row-stochastic matrix reproducing nn.AdaptiveAvgPool2d bin averaging (1D)."""
    P = np.zeros((out_size, in_size), np.float32)
    for i in range(out_size):
        start = (i * in_size) // out_size
        end = int(np.ceil((i + 1) * in_size / out_size))
        P[i, start:end] = 1.0 / (end - start)
    return P


def bilinear_resize_matrix(out_size, in_size):
    """1D bilinear interpolation matrix, F.interpolate(align_corners=False)."""
    U = np.zeros((out_size, in_size), np.float32)
    scale = in_size / out_size
    for o in range(out_size):
        src = max((o + 0.5) * scale - 0.5, 0.0)
        i0 = min(int(np.floor(src)), in_size - 1)
        i1 = min(i0 + 1, in_size - 1)
        f = src - i0
        U[o, i0] += 1.0 - f
        U[o, i1] += f
    return U


# ----------------------------- PPM parameters -----------------------------

def init_ppm_params(key, c_enc):
    """Deterministic synthetic init mirroring weight_init (kaiming conv, BN identity)."""
    keys = jax.random.split(key, len(POOL_SCALES) + 1)
    params = {}
    std1 = float(np.sqrt(2.0 / c_enc))
    params["w1"] = [std1 * jax.random.normal(keys[i], (c_enc, PPM_INTER), jnp.float32)
                    for i in range(len(POOL_SCALES))]
    c_cat = c_enc + len(POOL_SCALES) * PPM_INTER
    std3 = float(np.sqrt(2.0 / (c_cat * 9)))
    params["w3"] = std3 * jax.random.normal(keys[-1], (3, 3, c_cat, PPM_LAST), jnp.float32)
    # BN (eval): gamma=1, beta=0, running_mean=0, running_var=1
    bn_scale = np.float32(1.0 / np.sqrt(1.0 + BN_EPS))
    params["bn1_scale"] = [jnp.full((PPM_INTER,), bn_scale, jnp.float32) for _ in POOL_SCALES]
    params["bn1_shift"] = [jnp.zeros((PPM_INTER,), jnp.float32) for _ in POOL_SCALES]
    params["bn3_scale"] = jnp.full((PPM_LAST,), bn_scale, jnp.float32)
    params["bn3_shift"] = jnp.zeros((PPM_LAST,), jnp.float32)
    return params


# ------------------------------ PPM forward -------------------------------

def ppm_forward(params, x_nchw):
    """Matches PPM.forward: returns (N, ppm_last_conv_planes, H, W) in NCHW."""
    N, C, H, W = x_nchw.shape
    x = jnp.transpose(x_nchw, (0, 2, 3, 1)).astype(jnp.float32)    # NHWC

    # ---- adaptive-avg pool each branch, pack rows, one fused 1x1-conv call ----
    smax = max(POOL_SCALES)
    mp = _round_up(N * smax * smax, 16)                             # bf16 sublane packing
    rows = []
    for s in POOL_SCALES:
        ph = jnp.asarray(adaptive_avg_pool_matrix(s, H))
        pw = jnp.asarray(adaptive_avg_pool_matrix(s, W))
        pooled = jnp.einsum("ph,qw,nhwc->npqc", ph, pw, x)          # (N, s, s, C)
        rows.append(jnp.pad(pooled.reshape(N * s * s, C),
                            ((0, mp - N * s * s), (0, 0))))
    pooled_rows = jnp.stack(rows).astype(jnp.bfloat16)              # (4, mp, C)

    w1_stack = jnp.stack([
        (params["w1"][i] * params["bn1_scale"][i][None, :]).astype(jnp.bfloat16)
        for i in range(len(POOL_SCALES))])                          # (4, C, 128)
    conv_pooled = branch_conv1x1(pooled_rows, w1_stack)             # (4, mp, 128) f32

    # ---- bilinear upsample (128 ch) + BN shift + ReLU, bf16 per branch ----
    branches = [x.astype(jnp.bfloat16)]
    for i, s in enumerate(POOL_SCALES):
        y = conv_pooled[i, :N * s * s].reshape(N, s, s, PPM_INTER)
        uh = jnp.asarray(bilinear_resize_matrix(H, s))
        uw = jnp.asarray(bilinear_resize_matrix(W, s))
        up = jnp.einsum("yp,xq,npqc->nyxc", uh, uw, y)              # (N, H, W, 128) f32
        shift = params["bn1_shift"][i].reshape(1, 1, 1, PPM_INTER)
        branches.append(jnp.maximum(up + shift, 0.0).astype(jnp.bfloat16))

    # ---- bf16 concat, channel pad to 128-multiple, spatial pad for 3x3 ----
    cat = jnp.concatenate(branches, axis=-1)                        # (N, H, W, 544) bf16
    c_cat = cat.shape[-1]
    kp = _round_up(c_cat, 128)                                      # 544 -> 640
    cat = jnp.pad(cat, ((0, 0), (1, 1), (1, 1), (0, kp - c_cat)))   # bf16

    w3 = params["w3"] * params["bn3_scale"][None, None, None, :]    # fold BN scale
    w3 = jnp.pad(w3, ((0, 0), (0, 0), (0, kp - c_cat), (0, 0))).astype(jnp.bfloat16)
    bias3 = params["bn3_shift"].reshape(1, PPM_LAST)

    out = conv3x3_bias_relu(cat, w3, bias3, th=8)                   # (N, H, W, 256) f32
    # TODO(synk): if the consumer accepts NHWC (and/or bf16), skip this
    # full-tensor f32 transpose (biggest relative cost on v5e).
    return jnp.transpose(out, (0, 3, 1, 2))                         # back to NCHW


# --------------------------------- main ------------------------------------

if __name__ == "__main__":
    key = jax.random.PRNGKey(0)
    kx, kp = jax.random.split(key)

    N, C_ENC, H, W = 2, 32, 16, 16                                  # encoder_planes[-1] = 32
    x = jax.random.normal(kx, (N, C_ENC, H, W), jnp.float32)        # NCHW, like conv5
    params = init_ppm_params(kp, C_ENC)

    out = jax.jit(ppm_forward)(params, x)
    out = jax.block_until_ready(out)

    assert out.shape == (N, PPM_LAST, H, W), out.shape
    assert bool(jnp.all(jnp.isfinite(out)))
    print("KERNEL_OK")
</pallas_src>

<mosaic_0001>
module attributes {stable_mosaic.version = 11 : i64} {
  func.func @_branch_conv_kernel(%arg0: i32, %arg1: memref<4x80x32xbf16, #tpu.memory_space<vmem>>, %arg2: memref<4x32x128xbf16, #tpu.memory_space<vmem>>, %arg3: memref<4x80x128xf32, #tpu.memory_space<vmem>>) attributes {dimension_semantics = [#tpu.dimension_semantics<arbitrary>], iteration_bounds = array<i64: 1>, scalar_prefetch = 0 : i64, scratch_operands = 0 : i64, tpu.core_type = #tpu.core_type<tc>, window_params = [{pipeline_mode = #tpu.pipeline_mode<synchronous>, transform_indices = @transform_0, window_bounds = array<i64: 4, 80, 32>}, {pipeline_mode = #tpu.pipeline_mode<synchronous>, transform_indices = @transform_1, window_bounds = array<i64: 4, 32, 128>}, {pipeline_mode = #tpu.pipeline_mode<synchronous>, transform_indices = @transform_2, window_bounds = array<i64: 4, 80, 128>}]} {
    %c0 = arith.constant 0 : index
    %c0_0 = arith.constant 0 : index
    %c0_1 = arith.constant 0 : index
    %0 = vector.load %arg1[%c0, %c0_0, %c0_1] : memref<4x80x32xbf16, #tpu.memory_space<vmem>>, vector<4x80x32xbf16>
    %c0_2 = arith.constant 0 : index
    %c0_3 = arith.constant 0 : index
    %c0_4 = arith.constant 0 : index
    %1 = vector.load %arg2[%c0_2, %c0_3, %c0_4] : memref<4x32x128xbf16, #tpu.memory_space<vmem>>, vector<4x32x128xbf16>
    "tpu.trace_start"() <{level = 10 : i32, message = "bmc,bck->bmk"}> : () -> ()
    %cst = arith.constant dense<0.000000e+00> : vector<4x80x128xf32>
    %2 = tpu.matmul %0, %1, %cst {dimension_numbers = #tpu.dot_dimension_numbers<[2], [1], [1], [2], [0, 0, 0, 1, 1, 2], [0], [0]>} : vector<4x80x32xbf16>, vector<4x32x128xbf16>, vector<4x80x128xf32> -> vector<4x80x128xf32>
    "tpu.trace_stop"() : () -> ()
    %c0_5 = arith.constant 0 : index
    %c0_6 = arith.constant 0 : index
    %c0_7 = arith.constant 0 : index
    %3 = vector.load %arg3[%c0_5, %c0_6, %c0_7] : memref<4x80x128xf32, #tpu.memory_space<vmem>>, vector<4x80x128xf32>
    tpu.vector_store %arg3[%c0_5, %c0_6, %c0_7], %2 {strides = array<i32>} : memref<4x80x128xf32, #tpu.memory_space<vmem>>, vector<4x80x128xf32>,
    return
  }
  func.func @transform_0(%arg0: i32) -> (i32, i32, i32) {
    %c0_i32 = arith.constant 0 : i32
    %c0_i32_0 = arith.constant 0 : i32
    %c0_i32_1 = arith.constant 0 : i32
    %c0_i32_2 = arith.constant 0 : i32
    return %c0_i32, %c0_i32_0, %c0_i32_1 : i32, i32, i32
  }
  func.func @transform_1(%arg0: i32) -> (i32, i32, i32) {
    %c0_i32 = arith.constant 0 : i32
    %c0_i32_0 = arith.constant 0 : i32
    %c0_i32_1 = arith.constant 0 : i32
    %c0_i32_2 = arith.constant 0 : i32
    return %c0_i32, %c0_i32_0, %c0_i32_1 : i32, i32, i32
  }
  func.func @transform_2(%arg0: i32) -> (i32, i32, i32) {
    %c0_i32 = arith.constant 0 : i32
    %c0_i32_0 = arith.constant 0 : i32
    %c0_i32_1 = arith.constant 0 : i32
    %c0_i32_2 = arith.constant 0 : i32
    return %c0_i32, %c0_i32_0, %c0_i32_1 : i32, i32, i32
  }
}

module attributes {stable_mosaic.version = 11 : i64} {
  func.func @_conv3x3_bias_relu_kernel(%arg0: i32, %arg1: i32, %arg2: memref<1x18x18x640xbf16, #tpu.memory_space<vmem>>, %arg3: memref<3x3x640x256xbf16, #tpu.memory_space<vmem>>, %arg4: memref<1x256xf32, #tpu.memory_space<vmem>>, %arg5: memref<1x8x16x256xf32, #tpu.memory_space<vmem>>) attributes {dimension_semantics = [#tpu.dimension_semantics<parallel>, #tpu.dimension_semantics<arbitrary>], iteration_bounds = array<i64: 2, 2>, scalar_prefetch = 0 : i64, scratch_operands = 0 : i64, tpu.core_type = #tpu.core_type<tc>, window_params = [{transform_indices = @transform_0, window_bounds = array<i64: 1, 18, 18, 640>}, {pipeline_mode = #tpu.pipeline_mode<synchronous>, transform_indices = @transform_1, window_bounds = array<i64: 3, 3, 640, 256>}, {pipeline_mode = #tpu.pipeline_mode<synchronous>, transform_indices = @transform_2, window_bounds = array<i64: 1, 256>}, {transform_indices = @transform_3, window_bounds = array<i64: 1, 8, 16, 256>}]} {
    %c8_i32 = arith.constant 8 : i32
    %0 = arith.muli %arg1, %c8_i32 : i32
    %1 = tpu.assume_multiple %0, 8 : i32
    %cst = arith.constant 0.000000e+00 : f32
    %2 = vector.broadcast %cst : f32 to vector<128x256xf32>
    %c0_i32 = arith.constant 0 : i32
    %3 = arith.addi %1, %c0_i32 : i32
    %c0 = arith.constant 0 : index
    %4 = arith.index_cast %3 : i32 to index
    %c0_0 = arith.constant 0 : index
    %c0_1 = arith.constant 0 : index
    %5 = vector.load %arg2[%c0, %4, %c0_0, %c0_1] : memref<1x18x18x640xbf16, #tpu.memory_space<vmem>>, vector<1x8x16x640xbf16>
    %6 = vector.shape_cast %5 : vector<1x8x16x640xbf16> to vector<8x16x640xbf16>
    %7 = vector.shape_cast %6 : vector<8x16x640xbf16> to vector<128x640xbf16>
    %c0_2 = arith.constant 0 : index
    %c0_3 = arith.constant 0 : index
    %c0_4 = arith.constant 0 : index
    %c0_5 = arith.constant 0 : index
    %8 = vector.load %arg3[%c0_2, %c0_3, %c0_4, %c0_5] : memref<3x3x640x256xbf16, #tpu.memory_space<vmem>>, vector<1x1x640x256xbf16>
    %9 = vector.shape_cast %8 : vector<1x1x640x256xbf16> to vector<640x256xbf16>
    %cst_6 = arith.constant dense<0.000000e+00> : vector<128x256xf32>
    %10 = tpu.matmul %7, %9, %cst_6 {dimension_numbers = #tpu.dot_dimension_numbers<[1], [0], [0], [1], [0, 0, 1, 1], [], []>} : vector<128x640xbf16>, vector<640x256xbf16>, vector<128x256xf32> -> vector<128x256xf32>
    %11 = arith.addf %2, %10 : vector<128x256xf32>
    %c0_i32_7 = arith.constant 0 : i32
    %12 = arith.addi %1, %c0_i32_7 : i32
    %c0_8 = arith.constant 0 : index
    %13 = arith.index_cast %12 : i32 to index
    %c1 = arith.constant 1 : index
    %c0_9 = arith.constant 0 : index
    %14 = vector.load %arg2[%c0_8, %13, %c1, %c0_9] : memref<1x18x18x640xbf16, #tpu.memory_space<vmem>>, vector<1x8x16x640xbf16>
    %15 = vector.shape_cast %14 : vector<1x8x16x640xbf16> to vector<8x16x640xbf16>
    %16 = vector.shape_cast %15 : vector<8x16x640xbf16> to vector<128x640xbf16>
    %c0_10 = arith.constant 0 : index
    %c1_11 = arith.constant 1 : index
    %c0_12 = arith.constant 0 : index
    %c0_13 = arith.constant 0 : index
    %17 = vector.load %arg3[%c0_10, %c1_11, %c0_12, %c0_13] : memref<3x3x640x256xbf16, #tpu.memory_space<vmem>>, vector<1x1x640x256xbf16>
    %18 = vector.shape_cast %17 : vector<1x1x640x256xbf16> to vector<640x256xbf16>
    %cst_14 = arith.constant dense<0.000000e+00> : vector<128x256xf32>
    %19 = tpu.matmul %16, %18, %cst_14 {dimension_numbers = #tpu.dot_dimension_numbers<[1], [0], [0], [1], [0, 0, 1, 1], [], []>} : vector<128x640xbf16>, vector<640x256xbf16>, vector<128x256xf32> -> vector<128x256xf32>
    %20 = arith.addf %11, %19 : vector<128x256xf32>
    %c0_i32_15 = arith.constant 0 : i32
    %21 = arith.addi %1, %c0_i32_15 : i32
    %c0_16 = arith.constant 0 : index
    %22 = arith.index_cast %21 : i32 to index
    %c2 = arith.constant 2 : index
    %c0_17 = arith.constant 0 : index
    %23 = vector.load %arg2[%c0_16, %22, %c2, %c0_17] : memref<1x18x18x640xbf16, #tpu.memory_space<vmem>>, vector<1x8x16x640xbf16>
    %24 = vector.shape_cast %23 : vector<1x8x16x640xbf16> to vector<8x16x640xbf16>
    %25 = vector.shape_cast %24 : vector<8x16x640xbf16> to vector<128x640xbf16>
    %c0_18 = arith.constant 0 : index
    %c2_19 = arith.constant 2 : index
    %c0_20 = arith.constant 0 : index
    %c0_21 = arith.constant 0 : index
    %26 = vector.load %arg3[%c0_18, %c2_19, %c0_20, %c0_21] : memref<3x3x640x256xbf16, #tpu.memory_space<vmem>>, vector<1x1x640x256xbf16>
    %27 = vector.shape_cast %26 : vector<1x1x640x256xbf16> to vector<640x256xbf16>
    %cst_22 = arith.constant dense<0.000000e+00> : vector<128x256xf32>
    %28 = tpu.matmul %25, %27, %cst_22 {dimension_numbers = #tpu.dot_dimension_numbers<[1], [0], [0], [1], [0, 0, 1, 1], [], []>} : vector<128x640xbf16>, vector<640x256xbf16>, vector<128x256xf32> -> vector<128x256xf32>
    %29 = arith.addf %20, %28 : vector<128x256xf32>
    %c1_i32 = arith.constant 1 : i32
    %30 = arith.addi %1, %c1_i32 : i32
    %c0_23 = arith.constant 0 : index
    %31 = arith.index_cast %30 : i32 to index
    %c0_24 = arith.constant 0 : index
    %c0_25 = arith.constant 0 : index
    %32 = vector.load %arg2[%c0_23, %31, %c0_24, %c0_25] : memref<1x18x18x640xbf16, #tpu.memory_space<vmem>>, vector<1x8x16x640xbf16>
    %33 = vector.shape_cast %32 : vector<1x8x16x640xbf16> to vector<8x16x640xbf16>
    %34 = vector.shape_cast %33 : vector<8x16x640xbf16> to vector<128x640xbf16>
    %c1_26 = arith.constant 1 : index
    %c0_27 = arith.constant 0 : index
    %c0_28 = arith.constant 0 : index
    %c0_29 = arith.constant 0 : index
    %35 = vector.load %arg3[%c1_26, %c0_27, %c0_28, %c0_29] : memref<3x3x640x256xbf16, #tpu.memory_space<vmem>>, vector<1x1x640x256xbf16>
    %36 = vector.shape_cast %35 : vector<1x1x640x256xbf16> to vector<640x256xbf16>
    %cst_30 = arith.constant dense<0.000000e+00> : vector<128x256xf32>
    %37 = tpu.matmul %34, %36, %cst_30 {dimension_numbers = #tpu.dot_dimension_numbers<[1], [0], [0], [1], [0, 0, 1, 1], [], []>} : vector<128x640xbf16>, vector<640x256xbf16>, vector<128x256xf32> -> vector<128x256xf32>
    %38 = arith.addf %29, %37 : vector<128x256xf32>
    %c1_i32_31 = arith.constant 1 : i32
    %39 = arith.addi %1, %c1_i32_31 : i32
    %c0_32 = arith.constant 0 : index
    %40 = arith.index_cast %39 : i32 to index
    %c1_33 = arith.constant 1 : index
    %c0_34 = arith.constant 0 : index
    %41 = vector.load %arg2[%c0_32, %40, %c1_33, %c0_34] : memref<1x18x18x640xbf16, #tpu.memory_space<vmem>>, vector<1x8x16x640xbf16>
    %42 = vector.shape_cast %41 : vector<1x8x16x640xbf16> to vector<8x16x640xbf16>
    %43 = vector.shape_cast %42 : vector<8x16x640xbf16> to vector<128x640xbf16>
    %c1_35 = arith.constant 1 : index
    %c1_36 = arith.constant 1 : index
    %c0_37 = arith.constant 0 : index
    %c0_38 = arith.constant 0 : index
    %44 = vector.load %arg3[%c1_35, %c1_36, %c0_37, %c0_38] : memref<3x3x640x256xbf16, #tpu.memory_space<vmem>>, vector<1x1x640x256xbf16>
    %45 = vector.shape_cast %44 : vector<1x1x640x256xbf16> to vector<640x256xbf16>
    %cst_39 = arith.constant dense<0.000000e+00> : vector<128x256xf32>
    %46 = tpu.matmul %43, %45, %cst_39 {dimension_numbers = #tpu.dot_dimension_numbers<[1], [0], [0], [1], [0, 0, 1, 1], [], []>} : vector<128x640xbf16>, vector<640x256xbf16>, vector<128x256xf32> -> vector<128x256xf32>
    %47 = arith.addf %38, %46 : vector<128x256xf32>
    %c1_i32_40 = arith.constant 1 : i32
    %48 = arith.addi %1, %c1_i32_40 : i32
    %c0_41 = arith.constant 0 : index
    %49 = arith.index_cast %48 : i32 to index
    %c2_42 = arith.constant 2 : index
    %c0_43 = arith.constant 0 : index
    %50 = vector.load %arg2[%c0_41, %49, %c2_42, %c0_43] : memref<1x18x18x640xbf16, #tpu.memory_space<vmem>>, vector<1x8x16x640xbf16>
    %51 = vector.shape_cast %50 : vector<1x8x16x640xbf16> to vector<8x16x640xbf16>
    %52 = vector.shape_cast %51 : vector<8x16x640xbf16> to vector<128x640xbf16>
    %c1_44 = arith.constant 1 : index
    %c2_45 = arith.constant 2 : index
    %c0_46 = arith.constant 0 : index
    %c0_47 = arith.constant 0 : index
    %53 = vector.load %arg3[%c1_44, %c2_45, %c0_46, %c0_47] : memref<3x3x640x256xbf16, #tpu.memory_space<vmem>>, vector<1x1x640x256xbf16>
    %54 = vector.shape_cast %53 : vector<1x1x640x256xbf16> to vector<640x256xbf16>
    %cst_48 = arith.constant dense<0.000000e+00> : vector<128x256xf32>
    %55 = tpu.matmul %52, %54, %cst_48 {dimension_numbers = #tpu.dot_dimension_numbers<[1], [0], [0], [1], [0, 0, 1, 1], [], []>} : vector<128x640xbf16>, vector<640x256xbf16>, vector<128x256xf32> -> vector<128x256xf32>
    %56 = arith.addf %47, %55 : vector<128x256xf32>
    %c2_i32 = arith.constant 2 : i32
    %57 = arith.addi %1, %c2_i32 : i32
    %c0_49 = arith.constant 0 : index
    %58 = arith.index_cast %57 : i32 to index
    %c0_50 = arith.constant 0 : index
    %c0_51 = arith.constant 0 : index
    %59 = vector.load %arg2[%c0_49, %58, %c0_50, %c0_51] : memref<1x18x18x640xbf16, #tpu.memory_space<vmem>>, vector<1x8x16x640xbf16>
    %60 = vector.shape_cast %59 : vector<1x8x16x640xbf16> to vector<8x16x640xbf16>
    %61 = vector.shape_cast %60 : vector<8x16x640xbf16> to vector<128x640xbf16>
    %c2_52 = arith.constant 2 : index
    %c0_53 = arith.constant 0 : index
    %c0_54 = arith.constant 0 : index
    %c0_55 = arith.constant 0 : index
    %62 = vector.load %arg3[%c2_52, %c0_53, %c0_54, %c0_55] : memref<3x3x640x256xbf16, #tpu.memory_space<vmem>>, vector<1x1x640x256xbf16>
    %63 = vector.shape_cast %62 : vector<1x1x640x256xbf16> to vector<640x256xbf16>
    %cst_56 = arith.constant dense<0.000000e+00> : vector<128x256xf32>
    %64 = tpu.matmul %61, %63, %cst_56 {dimension_numbers = #tpu.dot_dimension_numbers<[1], [0], [0], [1], [0, 0, 1, 1], [], []>} : vector<128x640xbf16>, vector<640x256xbf16>, vector<128x256xf32> -> vector<128x256xf32>
    %65 = arith.addf %56, %64 : vector<128x256xf32>
    %c2_i32_57 = arith.constant 2 : i32
    %66 = arith.addi %1, %c2_i32_57 : i32
    %c0_58 = arith.constant 0 : index
    %67 = arith.index_cast %66 : i32 to index
    %c1_59 = arith.constant 1 : index
    %c0_60 = arith.constant 0 : index
    %68 = vector.load %arg2[%c0_58, %67, %c1_59, %c0_60] : memref<1x18x18x640xbf16, #tpu.memory_space<vmem>>, vector<1x8x16x640xbf16>
    %69 = vector.shape_cast %68 : vector<1x8x16x640xbf16> to vector<8x16x640xbf16>
    %70 = vector.shape_cast %69 : vector<8x16x640xbf16> to vector<128x640xbf16>
    %c2_61 = arith.constant 2 : index
    %c1_62 = arith.constant 1 : index
    %c0_63 = arith.constant 0 : index
    %c0_64 = arith.constant 0 : index
    %71 = vector.load %arg3[%c2_61, %c1_62, %c0_63, %c0_64] : memref<3x3x640x256xbf16, #tpu.memory_space<vmem>>, vector<1x1x640x256xbf16>
    %72 = vector.shape_cast %71 : vector<1x1x640x256xbf16> to vector<640x256xbf16>
    %cst_65 = arith.constant dense<0.000000e+00> : vector<128x256xf32>
    %73 = tpu.matmul %70, %72, %cst_65 {dimension_numbers = #tpu.dot_dimension_numbers<[1], [0], [0], [1], [0, 0, 1, 1], [], []>} : vector<128x640xbf16>, vector<640x256xbf16>, vector<128x256xf32> -> vector<128x256xf32>
    %74 = arith.addf %65, %73 : vector<128x256xf32>
    %c2_i32_66 = arith.constant 2 : i32
    %75 = arith.addi %1, %c2_i32_66 : i32
    %c0_67 = arith.constant 0 : index
    %76 = arith.index_cast %75 : i32 to index
    %c2_68 = arith.constant 2 : index
    %c0_69 = arith.constant 0 : index
    %77 = vector.load %arg2[%c0_67, %76, %c2_68, %c0_69] : memref<1x18x18x640xbf16, #tpu.memory_space<vmem>>, vector<1x8x16x640xbf16>
    %78 = vector.shape_cast %77 : vector<1x8x16x640xbf16> to vector<8x16x640xbf16>
    %79 = vector.shape_cast %78 : vector<8x16x640xbf16> to vector<128x640xbf16>
    %c2_70 = arith.constant 2 : index
    %c2_71 = arith.constant 2 : index
    %c0_72 = arith.constant 0 : index
    %c0_73 = arith.constant 0 : index
    %80 = vector.load %arg3[%c2_70, %c2_71, %c0_72, %c0_73] : memref<3x3x640x256xbf16, #tpu.memory_space<vmem>>, vector<1x1x640x256xbf16>
    %81 = vector.shape_cast %80 : vector<1x1x640x256xbf16> to vector<640x256xbf16>
    %cst_74 = arith.constant dense<0.000000e+00> : vector<128x256xf32>
    %82 = tpu.matmul %79, %81, %cst_74 {dimension_numbers = #tpu.dot_dimension_numbers<[1], [0], [0], [1], [0, 0, 1, 1], [], []>} : vector<128x640xbf16>, vector<640x256xbf16>, vector<128x256xf32> -> vector<128x256xf32>
    %83 = arith.addf %74, %82 : vector<128x256xf32>
    %c0_75 = arith.constant 0 : index
    %c0_76 = arith.constant 0 : index
    %84 = vector.load %arg4[%c0_75, %c0_76] : memref<1x256xf32, #tpu.memory_space<vmem>>, vector<1x256xf32>
    %85 = vector.broadcast %84 : vector<1x256xf32> to vector<128x256xf32>
    %86 = arith.addf %83, %85 : vector<128x256xf32>
    %cst_77 = arith.constant 0.000000e+00 : f32
    %87 = vector.broadcast %cst_77 : f32 to vector<128x256xf32>
    %88 = arith.maximumf %86, %87 : vector<128x256xf32>
    %89 = vector.shape_cast %88 : vector<128x256xf32> to vector<8x16x256xf32>
    %c0_78 = arith.constant 0 : index
    %c0_79 = arith.constant 0 : index
    %c0_80 = arith.constant 0 : index
    %c0_81 = arith.constant 0 : index
    %90 = vector.load %arg5[%c0_78, %c0_79, %c0_80, %c0_81] : memref<1x8x16x256xf32, #tpu.memory_space<vmem>>, vector<1x8x16x256xf32>
    %91 = vector.shape_cast %90 : vector<1x8x16x256xf32> to vector<8x16x256xf32>
    %92 = vector.shape_cast %89 : vector<8x16x256xf32> to vector<1x8x16x256xf32>
    tpu.vector_store %arg5[%c0_78, %c0_79, %c0_80, %c0_81], %92 {strides = array<i32>} : memref<1x8x16x256xf32, #tpu.memory_space<vmem>>, vector<1x8x16x256xf32>,
    return
  }
  func.func @transform_0(%arg0: i32, %arg1: i32) -> (i32, i32, i32, i32) {
    %c0_i32 = arith.constant 0 : i32
    %c0_i32_0 = arith.constant 0 : i32
    %c0_i32_1 = arith.constant 0 : i32
    %c0_i32_2 = arith.constant 0 : i32
    return %arg0, %c0_i32, %c0_i32_0, %c0_i32_1 : i32, i32, i32, i32
  }
  func.func @transform_1(%arg0: i32, %arg1: i32) -> (i32, i32, i32, i32) {
    %c0_i32 = arith.constant 0 : i32
    %c0_i32_0 = arith.constant 0 : i32
    %c0_i32_1 = arith.constant 0 : i32
    %c0_i32_2 = arith.constant 0 : i32
    %c0_i32_3 = arith.constant 0 : i32
    return %c0_i32, %c0_i32_0, %c0_i32_1, %c0_i32_2 : i32, i32, i32, i32
  }
  func.func @transform_2(%arg0: i32, %arg1: i32) -> (i32, i32) {
    %c0_i32 = arith.constant 0 : i32
    %c0_i32_0 = arith.constant 0 : i32
    %c0_i32_1 = arith.constant 0 : i32
    return %c0_i32, %c0_i32_0 : i32, i32
  }
  func.func @transform_3(%arg0: i32, %arg1: i32) -> (i32, i32, i32, i32) {
    %c0_i32 = arith.constant 0 : i32
    %c0_i32_0 = arith.constant 0 : i32
    %c0_i32_1 = arith.constant 0 : i32
    return %arg0, %arg1, %c0_i32, %c0_i32_0 : i32, i32, i32, i32
  }
}

</mosaic_0001>

<bundles_post_ra>
// kernel: squeeze.6
= control target key start
LH: loop header
LB: loop body
LE: loop exit
PB: predicated region body
PF: predicated region fallthrough
CT: control target
= control target key end

     0   :  { %v136_v8 = vmov 0.0   ;;  %s171_s0 = inlined_call_operand.vmem [shape: bf16[1,18,128], index: 0, kind: input, shape index: {}]   ;;  %s172_s1 = inlined_call_operand.vmem [shape: bf16[2,3,3,128], index: 1, kind: output, shape index: {}]  }
   0x1   :  { %v124_v0 = vld [vmem:[%s171_s0 + $0x8] sm:$0xf]  ;;  %v132_v1 = vld [vmem:[%s171_s0] sm:$0xff]  }
   0x2   :  { %v18_v2 = vunpack.c.l.bf16 %v124_v0  ;;  %v133_v3 = vunpack.c.l.bf16 %v132_v1  ;;  %v134_v4 = vunpack.c.h.bf16 %v132_v1 }
   0x4   :  { %21 = vst [vmem:[#allocation1] sm:$0xff] %v18_v2  ;;  %51 = vst [vmem:[#allocation0] ss:$14 sps:$4 sm:$0xc7] %v133_v3  }
   0x5   :  { %53 = vst [vmem:[#allocation0 + $0x5] sm:$0x38] %v133_v3   ;;  %59 = vst [vmem:[#allocation0 + $0x12] ss:$6 sm:$0x3] %v134_v4  }
   0x6   :  { %61 = vst [vmem:[#allocation0 + $0x17] ss:$9 sps:$4 sm:$0x7c] %v134_v4   ;;  %65 = vst [vmem:[#allocation0 + $0x21] sm:$0x80] %v134_v4  }
   0xb   :  { %v67_v5 = vld [vmem:[#allocation1] sm:$0x3]   ;;  %v75_v6 = vld [vmem:[#allocation0] sm:$0xf] }
   0xc   :  { %v81_v7 = vld [vmem:[#allocation0 + $0x8] sm:$0xf]  ;;  %69 = vst [vmem:[#allocation0 + $0x29] sm:$0x3] %v67_v5   ;;  %v76_v9 = vpack.c.bf16 %v136_v8, %v75_v6  ;;  %v88_v11 = vld [vmem:[#allocation0 + $0x10] sm:$0xf] }
   0xd   :  { %v82_v10 = vpack.c.bf16 %v136_v8, %v81_v7  ;;  %v96_v12 = vld [vmem:[#allocation0 + $0x18] sm:$0xf]  ;;  %v104_v13 = vld [vmem:[#allocation0 + $0x20] sm:$0xf]  ;;  %v89_v14 = vpack.c.bf16 %v136_v8, %v88_v11 }
   0xe   :  { %v97_v15 = vpack.c.bf16 %v136_v8, %v96_v12  ;;  %v105_v16 = vpack.c.bf16 %v136_v8, %v104_v13  ;;  %79 = vst [vmem:[%s172_s1] sm:$0x3] %v76_v9 }
   0xf   :  { %126 = vst [vmem:[%s172_s1 + $0x2] sm:$0x3] %v82_v10  ;;  %127 = vst [vmem:[%s172_s1 + $0x4] sm:$0x3] %v89_v14 }
  0x10   :  { %128 = vst [vmem:[%s172_s1 + $0x6] sm:$0x3] %v97_v15  ;;  %129 = vst [vmem:[%s172_s1 + $0x8] sm:$0x3] %v105_v16 }
  0x13   :  { %v112_v17 = vld [vmem:[#allocation0 + $0x28] sm:$0xf] }
  0x14   :  { %v113_v18 = vpack.c.bf16 %v136_v8, %v112_v17 }
  0x16   :  { %130 = vst [vmem:[%s172_s1 + $0xa] sm:$0x3] %v113_v18 }

// kernel: squeeze.7
= control target key start
LH: loop header
LB: loop body
LE: loop exit
PB: predicated region body
PF: predicated region fallthrough
CT: control target
= control target key end

     0   :  { %s428_s0 = inlined_call_operand.vmem [shape: bf16[1,72,128], index: 0, kind: input, shape index: {}]   ;;  %s429_s1 = inlined_call_operand.vmem [shape: bf16[2,6,6,128], index: 1, kind: output, shape index: {}]  }
   0x1   :  { %v312_v0 = vld [vmem:[%s428_s0 + $0x20] sm:$0xf]  ;;  %v377_v1 = vld [vmem:[%s428_s0 + $0x18] sm:$0xff]   ;;  %v378_v2 = vld [vmem:[%s428_s0 + $0x10] sm:$0xff]  }
   0x2   :  { %v18_v3 = vunpack.c.l.bf16 %v312_v0  ;;  %v333_v4 = vunpack.c.l.bf16 %v377_v1  ;;  %v334_v5 = vunpack.c.h.bf16 %v377_v1  ;;  %v337_v6 = vunpack.c.l.bf16 %v378_v2  ;;  %v379_v7 = vld [vmem:[%s428_s0 + $0x8] sm:$0xff]   ;;  %v344_v8 = vld [vmem:[%s428_s0] sm:$0xff]  }
   0x3   :  { %v338_v9 = vunpack.c.h.bf16 %v378_v2  ;;  %v341_v10 = vunpack.c.l.bf16 %v379_v7  ;;  %v342_v11 = vunpack.c.h.bf16 %v379_v7  ;;  %v345_v12 = vunpack.c.l.bf16 %v344_v8 }
   0x4   :  { %v346_v13 = vunpack.c.h.bf16 %v344_v8  ;;  %171 = vst [vmem:[#allocation0 + $0x2a] ss:$6 sps:$4 sm:$0xff] %v337_v6   ;;  %183 = vst [vmem:[#allocation0 + $0x40] sm:$0x3f] %v333_v4  }
   0x5   :  { %185 = vst [vmem:[#allocation0 + $0x42] sm:$0xc0] %v333_v4   ;;  %189 = vst [vmem:[#allocation0 + $0x4a] ss:$6 sps:$4 sm:$0xff] %v334_v5  }
   0x6   :  { %195 = vst [vmem:[#allocation0 + $0x54] sm:$0x3] %v18_v3   ;;  %197 = vst [vmem:[#allocation0 + $0x56] sm:$0xfc] %v18_v3  }
   0x7   :  { %147 = vst [vmem:[#allocation0] sm:$0x3f] %v345_v12   ;;  %149 = vst [vmem:[#allocation0 + $0x2] sm:$0xc0] %v345_v12  }
   0x8   :  { %159 = vst [vmem:[#allocation0 + $0x14] sm:$0x3] %v341_v10   ;;  %161 = vst [vmem:[#allocation0 + $0x16] sm:$0xfc] %v341_v10  }
   0x9   :  { %165 = vst [vmem:[#allocation0 + $0x20] sm:$0x3f] %v342_v11   ;;  %167 = vst [vmem:[#allocation0 + $0x22] sm:$0xc0] %v342_v11  }
   0xa   :  { %177 = vst [vmem:[#allocation0 + $0x34] sm:$0x3] %v338_v9   ;;  %179 = vst [vmem:[#allocation0 + $0x36] sm:$0xfc] %v338_v9  }
   0xb   :  { %153 = vst [vmem:[#allocation0 + $0xa] ss:$6 sps:$4 sm:$0xff] %v346_v13   ;;  %v264_v14 = vld [vmem:[#allocation0 + $0x40] sm:$0xff] }
   0xc   :  { %v272_v15 = vld [vmem:[#allocation0 + $0x48] sm:$0xff] }
   0xd   :  { %v280_v16 = vld [vmem:[#allocation0 + $0x50] sm:$0xff]  ;;  %v370_v20 = vpack.c.bf16 %v272_v15, %v264_v14  ;;  %v288_v29 = vld [vmem:[#allocation0 + $0x58] sm:$0xff] }
   0xe   :  { %v203_v17 = vld [vmem:[#allocation0] sm:$0xff]  ;;  %v375_v31 = vpack.c.bf16 %v288_v29, %v280_v16 }
   0xf   :  { %v224_v18 = vld [vmem:[#allocation0 + $0x18] sm:$0xff]  ;;  %383 = vst [vmem:[%s429_s1 + $0x20] sm:$0xff] %v370_v20  }
  0x10   :  { %v232_v19 = vld [vmem:[#allocation0 + $0x20] sm:$0xff]  ;;  %v240_v23 = vld [vmem:[#allocation0 + $0x28] sm:$0xff]  ;;  %384 = vst [vmem:[%s429_s1 + $0x28] sm:$0xff] %v375_v31  }
  0x11   :  { %v360_v26 = vpack.c.bf16 %v240_v23, %v232_v19  ;;  %v248_v27 = vld [vmem:[#allocation0 + $0x30] sm:$0xff]  ;;  %v256_v28 = vld [vmem:[#allocation0 + $0x38] sm:$0xff] }
  0x12   :  { %v209_v21 = vld [vmem:[#allocation0 + $0x8] sm:$0xff]  ;;  %v216_v22 = vld [vmem:[#allocation0 + $0x10] sm:$0xff]  ;;  %v365_v30 = vpack.c.bf16 %v256_v28, %v248_v27 }
  0x13   :  { %v350_v24 = vpack.c.bf16 %v209_v21, %v203_v17  ;;  %v355_v25 = vpack.c.bf16 %v224_v18, %v216_v22  ;;  %381 = vst [vmem:[%s429_s1 + $0x10] sm:$0xff] %v360_v26  }
  0x14   :  { %382 = vst [vmem:[%s429_s1 + $0x18] sm:$0xff] %v365_v30  }
  0x15   :  { %351 = vst [vmem:[%s429_s1] sm:$0xff] %v350_v24   ;;  %380 = vst [vmem:[%s429_s1 + $0x8] sm:$0xff] %v355_v25  }

// kernel: ppm_forward.2
= control target key start
LH: loop header
LB: loop body
LE: loop exit
PB: predicated region body
PF: predicated region fallthrough
CT: control target
= control target key end

     0   :  { %v815_v0 = vmov 0.0   ;;  %vm816_vm0 = vmmov 0   ;;  %vm105_vm1 = vcmask 261120   ;;  %s1104_s1 = inlined_call_operand.vmem [shape: bf16[4,32,128], index: 1, kind: input, shape index: {}]   ;;  %s1105_s0 = inlined_call_operand.vmem [shape: bf16[4,80,32], index: 0, kind: input, shape index: {}]   ;;  %s1106_s2 = inlined_call_operand.vmem [shape: f32[4,80,128], index: 2, kind: output, shape index: {}]  }
   0x1   :  { %689 = vmatprep.subr.bf16.mxu0 %v815_v0  ;;  %713 = vmatprep.subr.bf16.mxu1 %v815_v0  ;;  %v787_v1 = vld [vmem:[%s1104_s1 + $0x8] sm:$0xff]   ;;  %v788_v2 = vld [vmem:[%s1104_s1 + $0x18] sm:$0xff]   ;;  %v789_v3 = vld [vmem:[%s1104_s1] sm:$0xff]  }
   0x2   :  { %693 = vmatprep.mubr.msk.bf16.mxu0 %vm816_vm0, %v815_v0  ;;  %717 = vmatprep.mubr.msk.bf16.mxu1 %vm816_vm0, %v815_v0  ;;  %v790_v4 = vld [vmem:[%s1104_s1 + $0x10] sm:$0xff]   ;;  %v791_v5 = vld [vmem:[%s1105_s0] sm:$0xff]   ;;  %v792_v6 = vld [vmem:[%s1105_s0 + $0x28] sm:$0xff]  }
   0x3   :  { %690 = vmatpush3.bf16.msra.mxu0 %v787_v1  ;;  %714 = vmatpush3.bf16.msra.mxu1 %v788_v2  ;;  %v793_v7 = vld [vmem:[%s1104_s1 + $0x28] sm:$0xff]   ;;  %v794_v8 = vld [vmem:[%s1104_s1 + $0x38] sm:$0xff]   ;;  %v799_v10 = vld [vmem:[%s1104_s1 + $0x20] sm:$0xff]  }
   0x4   :  { %691 = vmatprep.subr.bf16.mxu0 %v815_v0  ;;  %715 = vmatprep.subr.bf16.mxu1 %v815_v0  ;;  %v795_v9 = vld [vmem:[%s1105_s0 + $0x8] sm:$0xff]   ;;  %v800_v11 = vld [vmem:[%s1104_s1 + $0x30] sm:$0xff]   ;;  %v798_v14 = vld [vmem:[%s1105_s0 + $0x38] sm:$0xff]  }
   0x5   :  { %v796_v12 = vld [vmem:[%s1105_s0 + $0x30] sm:$0xff]   ;;  %v801_v15 = vld [vmem:[%s1105_s0 + $0x18] sm:$0xff]   ;;  %v802_v16 = vld [vmem:[%s1105_s0 + $0x40] sm:$0xff]  }
   0x6   :  { %v797_v13 = vld [vmem:[%s1105_s0 + $0x10] sm:$0xff]   ;;  %v803_v17 = vld [vmem:[%s1105_s0 + $0x20] sm:$0xff]   ;;  %v804_v18 = vld [vmem:[%s1105_s0 + $0x48] sm:$0xff]  }
   0x7   :  { %692 = vmatpush3.bf16.msra.mxu0 %v789_v3  ;;  %716 = vmatpush3.bf16.msra.mxu1 %v790_v4  ;;  %v805_v19 = vld [vmem:[%s1105_s0 + $0x50] sm:$0xff]   ;;  %v806_v20 = vld [vmem:[%s1105_s0 + $0x78] sm:$0xff]   ;;  %v808_v22 = vld [vmem:[%s1105_s0 + $0x80] sm:$0xff]  }
   0x8   :  { %737 = vmatprep.subr.bf16.mxu0 %v815_v0  ;;  %761 = vmatprep.subr.bf16.mxu1 %v815_v0  ;;  %v807_v21 = vld [vmem:[%s1105_s0 + $0x58] sm:$0xff]   ;;  %v809_v23 = vld [vmem:[%s1105_s0 + $0x60] sm:$0xff]   ;;  %v810_v24 = vld [vmem:[%s1105_s0 + $0x88] sm:$0xff]  }
   0x9   :  { %v811_v25 = vld [vmem:[%s1105_s0 + $0x68] sm:$0xff]   ;;  %v812_v26 = vld [vmem:[%s1105_s0 + $0x90] sm:$0xff]   ;;  %v814_v28 = vld [vmem:[%s1105_s0 + $0x98] sm:$0xff]  }
   0xa   :  { %694 = vmatmul.mubr.msk.bf16.vlgmr.msra.gmra.mxu0 %vm105_vm1, %v791_v5  ;;  %718 = vmatmul.mubr.msk.bf16.vlgmr.msra.gmra.mxu1 %vm105_vm1, %v792_v6  ;;  %v813_v27 = vld [vmem:[%s1105_s0 + $0x70] sm:$0xff]  }
   0xb   :  { %738 = vmatpush3.bf16.msra.mxu0 %v793_v7  ;;  %762 = vmatpush3.bf16.msra.mxu1 %v794_v8 }
   0xc   :  { %697 = vmatprep.mubr.msk.bf16.mxu0 %vm816_vm0, %v815_v0  ;;  %721 = vmatprep.mubr.msk.bf16.mxu1 %vm816_vm0, %v815_v0 }
   0xd   :  { %739 = vmatprep.subr.bf16.mxu0 %v815_v0  ;;  %763 = vmatprep.subr.bf16.mxu1 %v815_v0 }
   0xf   :  { %740 = vmatpush3.bf16.msra.mxu0 %v799_v10  ;;  %764 = vmatpush3.bf16.msra.mxu1 %v800_v11 }
  0x12   :  { %698 = vmatmul.mubr.msk.bf16.gmra.mxu0 %vm105_vm1, %v795_v9  ;;  %722 = vmatmul.mubr.msk.bf16.gmra.mxu1 %vm105_vm1, %v796_v12 }
  0x13   :  { %701 = vmatprep.mubr.msk.bf16.mxu0 %vm816_vm0, %v815_v0  ;;  %725 = vmatprep.mubr.msk.bf16.mxu1 %vm816_vm0, %v815_v0 }
  0x1a   :  { %702 = vmatmul.mubr.msk.bf16.gmra.mxu0 %vm105_vm1, %v797_v13  ;;  %726 = vmatmul.mubr.msk.bf16.gmra.mxu1 %vm105_vm1, %v798_v14 }
  0x1b   :  { %705 = vmatprep.mubr.msk.bf16.mxu0 %vm816_vm0, %v815_v0  ;;  %729 = vmatprep.mubr.msk.bf16.mxu1 %vm816_vm0, %v815_v0 }
  0x22   :  { %706 = vmatmul.mubr.msk.bf16.gmra.mxu0 %vm105_vm1, %v801_v15  ;;  %730 = vmatmul.mubr.msk.bf16.gmra.mxu1 %vm105_vm1, %v802_v16 }
  0x23   :  { %709 = vmatprep.mubr.msk.bf16.mxu0 %vm816_vm0, %v815_v0  ;;  %733 = vmatprep.mubr.msk.bf16.mxu1 %vm816_vm0, %v815_v0 }
  0x2a   :  { %710 = vmatmul.mubr.msk.bf16.gmra.mxu0 %vm105_vm1, %v803_v17  ;;  %734 = vmatmul.mubr.msk.bf16.gmra.mxu1 %vm105_vm1, %v804_v18 }
  0x2b   :  { %741 = vmatprep.mubr.msk.bf16.mxu0 %vm816_vm0, %v815_v0  ;;  %765 = vmatprep.mubr.msk.bf16.mxu1 %vm816_vm0, %v815_v0 }
  0x32   :  { %742 = vmatmul.mubr.msk.bf16.vlgmr.msra.gmra.mxu0 %vm105_vm1, %v805_v19  ;;  %766 = vmatmul.mubr.msk.bf16.vlgmr.msra.gmra.mxu1 %vm105_vm1, %v806_v20 }
  0x33   :  { %745 = vmatprep.mubr.msk.bf16.mxu0 %vm816_vm0, %v815_v0  ;;  %769 = vmatprep.mubr.msk.bf16.mxu1 %vm816_vm0, %v815_v0 }
  0x3a   :  { %746 = vmatmul.mubr.msk.bf16.gmra.mxu0 %vm105_vm1, %v807_v21  ;;  %770 = vmatmul.mubr.msk.bf16.gmra.mxu1 %vm105_vm1, %v808_v22 }
  0x3b   :  { %749 = vmatprep.mubr.msk.bf16.mxu0 %vm816_vm0, %v815_v0  ;;  %773 = vmatprep.mubr.msk.bf16.mxu1 %vm816_vm0, %v815_v0 }
  0x42   :  { %750 = vmatmul.mubr.msk.bf16.gmra.mxu0 %vm105_vm1, %v809_v23  ;;  %774 = vmatmul.mubr.msk.bf16.gmra.mxu1 %vm105_vm1, %v810_v24 }
  0x43   :  { %753 = vmatprep.mubr.msk.bf16.mxu0 %vm816_vm0, %v815_v0  ;;  %777 = vmatprep.mubr.msk.bf16.mxu1 %vm816_vm0, %v815_v0 }
  0x4a   :  { %754 = vmatmul.mubr.msk.bf16.gmra.mxu0 %vm105_vm1, %v811_v25  ;;  %778 = vmatmul.mubr.msk.bf16.gmra.mxu1 %vm105_vm1, %v812_v26 }
  0x4b   :  { %757 = vmatprep.mubr.msk.bf16.mxu0 %vm816_vm0, %v815_v0  ;;  %781 = vmatprep.mubr.msk.bf16.mxu1 %vm816_vm0, %v815_v0 }
  0x52   :  { %758 = vmatmul.mubr.msk.bf16.gmra.mxu0 %vm105_vm1, %v813_v27  ;;  %782 = vmatmul.mubr.msk.bf16.gmra.mxu1 %vm105_vm1, %v814_v28 }
  0xca   :  { %v155_v29 = vpop.f32.mrf.mxu0  ;;  %v280_v30 = vpop.f32.mrf.mxu1 }
  0xcb   :  { %569 = vst [vmem:[%s1106_s2] sm:$0xff] %v155_v29  ;;  %579 = vst [vmem:[%s1106_s2 + $0x50] sm:$0xff] %v280_v30 }
  0xcc   :  { %v695_v31 = vpop.f32.mrf.mxu0  ;;  %v719_v32 = vpop.f32.mrf.mxu1 }
  0xce   :  { %v158_v33 = vpop.f32.mrf.mxu0  ;;  %v283_v34 = vpop.f32.mrf.mxu1 }
  0xcf   :  { %570 = vst [vmem:[%s1106_s2 + $0x8] sm:$0xff] %v158_v33  ;;  %580 = vst [vmem:[%s1106_s2 + $0x58] sm:$0xff] %v283_v34 }
  0xd0   :  { %v696_v35 = vpop.f32.mrf.mxu0  ;;  %v720_v36 = vpop.f32.mrf.mxu1 }
  0xd2   :  { %v163_v37 = vpop.f32.mrf.mxu0  ;;  %v288_v38 = vpop.f32.mrf.mxu1 }
  0xd3   :  { %571 = vst [vmem:[%s1106_s2 + $0x10] sm:$0xff] %v163_v37  ;;  %581 = vst [vmem:[%s1106_s2 + $0x60] sm:$0xff] %v288_v38 }
  0xd4   :  { %v699_v39 = vpop.f32.mrf.mxu0  ;;  %v723_v40 = vpop.f32.mrf.mxu1 }
  0xd6   :  { %v166_v41 = vpop.f32.mrf.mxu0  ;;  %v291_v42 = vpop.f32.mrf.mxu1 }
  0xd7   :  { %572 = vst [vmem:[%s1106_s2 + $0x18] sm:$0xff] %v166_v41  ;;  %582 = vst [vmem:[%s1106_s2 + $0x68] sm:$0xff] %v291_v42 }
  0xd8   :  { %v700_v43 = vpop.f32.mrf.mxu0  ;;  %v724_v44 = vpop.f32.mrf.mxu1 }
  0xda   :  { %v171_v45 = vpop.f32.mrf.mxu0  ;;  %v296_v46 = vpop.f32.mrf.mxu1 }
  0xdb   :  { %573 = vst [vmem:[%s1106_s2 + $0x20] sm:$0xff] %v171_v45  ;;  %583 = vst [vmem:[%s1106_s2 + $0x70] sm:$0xff] %v296_v46 }
  0xdc   :  { %v703_v47 = vpop.f32.mrf.mxu0  ;;  %v727_v48 = vpop.f32.mrf.mxu1 }
  0xde   :  { %v174_v49 = vpop.f32.mrf.mxu0  ;;  %v299_v50 = vpop.f32.mrf.mxu1 }
  0xdf   :  { %574 = vst [vmem:[%s1106_s2 + $0x28] sm:$0xff] %v174_v49  ;;  %584 = vst [vmem:[%s1106_s2 + $0x78] sm:$0xff] %v299_v50 }
  0xe0   :  { %v704_v51 = vpop.f32.mrf.mxu0  ;;  %v728_v52 = vpop.f32.mrf.mxu1 }
  0xe2   :  { %v179_v53 = vpop.f32.mrf.mxu0  ;;  %v304_v54 = vpop.f32.mrf.mxu1 }
  0xe3   :  { %575 = vst [vmem:[%s1106_s2 + $0x30] sm:$0xff] %v179_v53  ;;  %585 = vst [vmem:[%s1106_s2 + $0x80] sm:$0xff] %v304_v54 }
  0xe4   :  { %v707_v55 = vpop.f32.mrf.mxu0  ;;  %v731_v56 = vpop.f32.mrf.mxu1 }
  0xe6   :  { %v182_v57 = vpop.f32.mrf.mxu0  ;;  %v307_v58 = vpop.f32.mrf.mxu1 }
  0xe7   :  { %576 = vst [vmem:[%s1106_s2 + $0x38] sm:$0xff] %v182_v57  ;;  %586 = vst [vmem:[%s1106_s2 + $0x88] sm:$0xff] %v307_v58 }
  0xe8   :  { %v708_v59 = vpop.f32.mrf.mxu0  ;;  %v732_v60 = vpop.f32.mrf.mxu1 }
  0xea   :  { %v187_v61 = vpop.f32.mrf.mxu0  ;;  %v312_v62 = vpop.f32.mrf.mxu1 }
  0xeb   :  { %577 = vst [vmem:[%s1106_s2 + $0x40] sm:$0xff] %v187_v61  ;;  %587 = vst [vmem:[%s1106_s2 + $0x90] sm:$0xff] %v312_v62 }
  0xec   :  { %v711_v63 = vpop.f32.mrf.mxu0  ;;  %v735_v0 = vpop.f32.mrf.mxu1 }
  0xee   :  { %v190_v1 = vpop.f32.mrf.mxu0  ;;  %v315_v2 = vpop.f32.mrf.mxu1 }
  0xef   :  { %578 = vst [vmem:[%s1106_s2 + $0x48] sm:$0xff] %v190_v1  ;;  %588 = vst [vmem:[%s1106_s2 + $0x98] sm:$0xff] %v315_v2 }
  0xf0   :  { %v712_v3 = vpop.f32.mrf.mxu0  ;;  %v736_v4 = vpop.f32.mrf.mxu1 }
  0xf2   :  { %v405_v5 = vpop.f32.mrf.mxu0  ;;  %v530_v6 = vpop.f32.mrf.mxu1 }
  0xf3   :  { %589 = vst [vmem:[%s1106_s2 + $0xa0] sm:$0xff] %v405_v5  ;;  %599 = vst [vmem:[%s1106_s2 + $0xf0] sm:$0xff] %v530_v6 }
  0xf4   :  { %v743_v7 = vpop.f32.mrf.mxu0  ;;  %v767_v8 = vpop.f32.mrf.mxu1 }
  0xf6   :  { %v408_v9 = vpop.f32.mrf.mxu0  ;;  %v533_v10 = vpop.f32.mrf.mxu1 }
  0xf7   :  { %590 = vst [vmem:[%s1106_s2 + $0xa8] sm:$0xff] %v408_v9  ;;  %600 = vst [vmem:[%s1106_s2 + $0xf8] sm:$0xff] %v533_v10 }
  0xf8   :  { %v744_v11 = vpop.f32.mrf.mxu0  ;;  %v768_v12 = vpop.f32.mrf.mxu1 }
  0xfa   :  { %v413_v13 = vpop.f32.mrf.mxu0  ;;  %v538_v14 = vpop.f32.mrf.mxu1 }
  0xfb   :  { %591 = vst [vmem:[%s1106_s2 + $0xb0] sm:$0xff] %v413_v13  ;;  %601 = vst [vmem:[%s1106_s2 + $0x100] sm:$0xff] %v538_v14 }
  0xfc   :  { %v747_v15 = vpop.f32.mrf.mxu0  ;;  %v771_v16 = vpop.f32.mrf.mxu1 }
  0xfe   :  { %v416_v17 = vpop.f32.mrf.mxu0  ;;  %v541_v18 = vpop.f32.mrf.mxu1 }
  0xff   :  { %592 = vst [vmem:[%s1106_s2 + $0xb8] sm:$0xff] %v416_v17  ;;  %602 = vst [vmem:[%s1106_s2 + $0x108] sm:$0xff] %v541_v18 }
 0x100   :  { %v748_v19 = vpop.f32.mrf.mxu0  ;;  %v772_v20 = vpop.f32.mrf.mxu1 }
 0x102   :  { %v421_v21 = vpop.f32.mrf.mxu0  ;;  %v546_v22 = vpop.f32.mrf.mxu1 }
 0x103   :  { %593 = vst [vmem:[%s1106_s2 + $0xc0] sm:$0xff] %v421_v21  ;;  %603 = vst [vmem:[%s1106_s2 + $0x110] sm:$0xff] %v546_v22 }
 0x104   :  { %v751_v23 = vpop.f32.mrf.mxu0  ;;  %v775_v24 = vpop.f32.mrf.mxu1 }
 0x106   :  { %v424_v25 = vpop.f32.mrf.mxu0  ;;  %v549_v26 = vpop.f32.mrf.mxu1 }
 0x107   :  { %594 = vst [vmem:[%s1106_s2 + $0xc8] sm:$0xff] %v424_v25  ;;  %604 = vst [vmem:[%s1106_s2 + $0x118] sm:$0xff] %v549_v26 }
 0x108   :  { %v752_v27 = vpop.f32.mrf.mxu0  ;;  %v776_v28 = vpop.f32.mrf.mxu1 }
 0x10a   :  { %v429_v29 = vpop.f32.mrf.mxu0  ;;  %v554_v30 = vpop.f32.mrf.mxu1 }
 0x10b   :  { %595 = vst [vmem:[%s1106_s2 + $0xd0] sm:$0xff] %v429_v29  ;;  %605 = vst [vmem:[%s1106_s2 + $0x120] sm:$0xff] %v554_v30 }
 0x10c   :  { %v755_v31 = vpop.f32.mrf.mxu0  ;;  %v779_v32 = vpop.f32.mrf.mxu1 }
 0x10e   :  { %v432_v33 = vpop.f32.mrf.mxu0  ;;  %v557_v34 = vpop.f32.mrf.mxu1 }
 0x10f   :  { %596 = vst [vmem:[%s1106_s2 + $0xd8] sm:$0xff] %v432_v33  ;;  %606 = vst [vmem:[%s1106_s2 + $0x128] sm:$0xff] %v557_v34 }
 0x110   :  { %v756_v35 = vpop.f32.mrf.mxu0  ;;  %v780_v36 = vpop.f32.mrf.mxu1 }
 0x112   :  { %v437_v37 = vpop.f32.mrf.mxu0  ;;  %v562_v38 = vpop.f32.mrf.mxu1 }
 0x113   :  { %597 = vst [vmem:[%s1106_s2 + $0xe0] sm:$0xff] %v437_v37  ;;  %607 = vst [vmem:[%s1106_s2 + $0x130] sm:$0xff] %v562_v38 }
 0x114   :  { %v759_v39 = vpop.f32.mrf.mxu0  ;;  %v783_v40 = vpop.f32.mrf.mxu1 }
 0x116   :  { %v440_v41 = vpop.f32.mrf.mxu0  ;;  %v565_v42 = vpop.f32.mrf.mxu1 }
 0x117   :  { %598 = vst [vmem:[%s1106_s2 + $0xe8] sm:$0xff] %v440_v41  ;;  %608 = vst [vmem:[%s1106_s2 + $0x138] sm:$0xff] %v565_v42 }
 0x118   :  { %v760_v43 = vpop.f32.mrf.mxu0  ;;  %v784_v44 = vpop.f32.mrf.mxu1 }

// kernel: ppm_forward.3
= control target key start
LH: loop header
LB: loop body
LE: loop exit
PB: predicated region body
PF: predicated region fallthrough
CT: control target
= control target key end

     0   :  { %8 = vsyncpa [#allocation3], 0  ;;  %s23310_s0 = inlined_call_operand.vmem [shape: bf16[2,18,18,640], index: 0, kind: input, shape index: {}]   ;;  %s23311_s1 = inlined_call_operand.vmem [shape: bf16[3,3,640,256], index: 1, kind: input, shape index: {}]   ;;  %s23312_s2 = inlined_call_operand.vmem [shape: f32[1,256], index: 2, kind: input, shape index: {}]   ;;  %s23313_s3 = inlined_call_operand.hbm [shape: f32[2,16,16,256], index: 3, kind: output, shape index: {}]  }
   0x1   :  { %10 = vsyncpa [#allocation3 + $0x1], 0  ;;  %s16081_s12 = smov 0   ;;  %s16083_s13 = smov 0  }
   0x2   :  { %s16085_s14 = smov 0   ;;  %s16087_s15 = smov 0  }
   0x3   :  { %s16089_s16 = smov 0   ;;  %s16091_s17 = smov 0  }
   0x4   :  { %s16093_s18 = smov 0   ;;  %s16095_s19 = smov 0  }
   0x5 LB: > { %s12409_s20 = sadd.s32 4294967295, %s16055_s19   ;;  %s12410_s21 = sadd.s32 4294967294, %s16055_s19   ;;  %s16055_s19 = sphi %s16095_s19, %s16_s19   ;;  %s16051_s18 = sphi %s16093_s18, %s24055_s18   ;;  %s16047_s17 = sphi %s16091_s17, %s24054_s17   ;;  %s16043_s16 = sphi %s16089_s16, %s24053_s16   ;;  %s16039_s15 = sphi %s16087_s15, %s24052_s15   ;;  %s16035_s14 = sphi %s16085_s14, %s24051_s14   ;;  %s16031_s13 = sphi %s16083_s13, %s24050_s13   ;;  %s16027_s12 = sphi %s16081_s12, %s24049_s12  }
   0x6   : > { %s25_s22 = sadd.s32 1, %s16047_s17  ;;  %s28_s23 = sadd.s32 1, %s16051_s18 }
   0x7   : > { %p26_p0 = scmp.ge.s32.totalorder %s25_s22, 2  ;;  %p115_p1 = scmp.ne.s32.totalorder %s16035_s14, %s16031_s13 }
   0x8   : > { %p116_p2 = scmp.eq.s32.totalorder %s12409_s20, 3  ;;  %p121_p5 = scmp.ne.s32.totalorder %s16031_s13, %s16027_s12 }
   0x9   : > { %s24057_s22 = smov (%p26_p0, %s25_s22), 0  ;;  %s24059_s23 = smov (!%p26_p0, %s28_s23), %s16051_s18 }
   0xa   : > { %s101_s24 = ssub.s32 %s16047_s17, %s24057_s22  ;;  %p16132_p3 = por %p116_p2, %p115_p1 }
   0xb   : > { %p30_p4 = scmp.ge.s32.totalorder %s24059_s23, 2  ;;  %p122_p6 = scmp.eq.s32.totalorder %s12410_s21, 3 }
   0xc   : > { %p12413_p7 = scmp.ge.s32.totalorder %s16055_s19, 1  ;;  %p154_p9 = scmp.lt.s32.totalorder %s16055_s19, 5 }
   0xd   : > { %s24061_s23 = smov (%p30_p4, %s24059_s23), 0  ;;  %p16141_p8 = por %p122_p6, %p121_p5 }
   0xe   : > { %s100_s27 = ssub.s32 %s16051_s18, %s24061_s23  ;;  %s105_s28 = sadd.s32 1, %s16035_s14 }
   0xf   : > { %s102_s29 = sor.u32 %s101_s24, %s100_s27  ;;  %p155_p10 = pnand %p12413_p7, %p154_p9 }
  0x10   : > { %p103_p11 = scmp.eq.s32.totalorder %s102_s29, 0 }
  0x11   : > { %158 = sbr.rel (%p155_p10) target bundleno = 1184 (0x4a0), region = 32 }
  0x12   : > { %s16150_s30 = scalar_select %p103_p11, %s16035_s14, %s105_s28  }
  0x16   : > { %v14603_v0 = vld [vmem:[%s23311_s1 + $0x2f4] ss:$8 sps:$4 sm:$0xff]   ;;  %v14607_v2 = vld [vmem:[%s23311_s1 + $0x2f0] ss:$8 sps:$4 sm:$0xff]   ;;  %v14609_v4 = vld [vmem:[%s23311_s1 + $0x2e4] ss:$8 sps:$4 sm:$0xff]  }
  0x17   : > { %v14605_v1 = vld [vmem:[%s23311_s1 + $0x3f4] ss:$8 sps:$4 sm:$0xff]   ;;  %1561 = vmatprep.subr.bf16.mxu0 %v14603_v0  ;;  %v14608_v3 = vld [vmem:[%s23311_s1 + $0x3f0] ss:$8 sps:$4 sm:$0xff]   ;;  %v14611_v5 = vld [vmem:[%s23311_s1 + $0x3e4] ss:$8 sps:$4 sm:$0xff]  }
  0x18   : > { %1674 = vmatprep.subr.bf16.mxu1 %v14605_v1  ;;  %1562 = vmatpush1.bf16.msra.mxu0 %v14607_v2  ;;  %v14613_v6 = vld [vmem:[%s23311_s1 + $0x2e0] ss:$8 sps:$4 sm:$0xff]   ;;  %v14615_v8 = vld [vmem:[%s23311_s1 + $0x2d4] ss:$8 sps:$4 sm:$0xff]   ;;  %v14619_v10 = vld [vmem:[%s23311_s1 + $0x2d0] ss:$8 sps:$4 sm:$0xff]  }
  0x19   : > { %1675 = vmatpush1.bf16.msra.mxu1 %v14608_v3  ;;  %1563 = vmatprep.subr.bf16.mxu0 %v14609_v4  ;;  %v14614_v7 = vld [vmem:[%s23311_s1 + $0x3e0] ss:$8 sps:$4 sm:$0xff]   ;;  %v14617_v9 = vld [vmem:[%s23311_s1 + $0x3d4] ss:$8 sps:$4 sm:$0xff]   ;;  %v14620_v11 = vld [vmem:[%s23311_s1 + $0x3d0] ss:$8 sps:$4 sm:$0xff]  }
  0x1a   : > { %1676 = vmatprep.subr.bf16.mxu1 %v14611_v5  ;;  %v14621_v12 = vld [vmem:[%s23311_s1 + $0x2c4] ss:$8 sps:$4 sm:$0xff]   ;;  %v14625_v14 = vld [vmem:[%s23311_s1 + $0x2c0] ss:$8 sps:$4 sm:$0xff]   ;;  %v14627_v16 = vld [vmem:[%s23311_s1 + $0x2b4] ss:$8 sps:$4 sm:$0xff]  }
  0x1b   : > { %v14623_v13 = vld [vmem:[%s23311_s1 + $0x3c4] ss:$8 sps:$4 sm:$0xff]   ;;  %v14626_v15 = vld [vmem:[%s23311_s1 + $0x3c0] ss:$8 sps:$4 sm:$0xff]   ;;  %v14629_v17 = vld [vmem:[%s23311_s1 + $0x3b4] ss:$8 sps:$4 sm:$0xff]  }
  0x1c   : > { %1564 = vmatpush1.bf16.msra.mxu0 %v14613_v6  ;;  %v14631_v18 = vld [vmem:[%s23311_s1 + $0x2b0] ss:$8 sps:$4 sm:$0xff]   ;;  %v14633_v20 = vld [vmem:[%s23311_s1 + $0x2a4] ss:$8 sps:$4 sm:$0xff]   ;;  %v14637_v22 = vld [vmem:[%s23311_s1 + $0x2a0] ss:$8 sps:$4 sm:$0xff]  }
  0x1d   : > { %1677 = vmatpush1.bf16.msra.mxu1 %v14614_v7  ;;  %1565 = vmatprep.subr.bf16.mxu0 %v14615_v8  ;;  %v14632_v19 = vld [vmem:[%s23311_s1 + $0x3b0] ss:$8 sps:$4 sm:$0xff]   ;;  %v14635_v21 = vld [vmem:[%s23311_s1 + $0x3a4] ss:$8 sps:$4 sm:$0xff]   ;;  %v14638_v23 = vld [vmem:[%s23311_s1 + $0x3a0] ss:$8 sps:$4 sm:$0xff]  }
  0x1e   : > { %1678 = vmatprep.subr.bf16.mxu1 %v14617_v9  ;;  %v14639_v24 = vld [vmem:[%s23311_s1 + $0x294] ss:$8 sps:$4 sm:$0xff]   ;;  %v14643_v26 = vld [vmem:[%s23311_s1 + $0x290] ss:$8 sps:$4 sm:$0xff]   ;;  %v14645_v28 = vld [vmem:[%s23311_s1 + $0x284] ss:$8 sps:$4 sm:$0xff]  }
  0x1f   : > { %v14641_v25 = vld [vmem:[%s23311_s1 + $0x394] ss:$8 sps:$4 sm:$0xff]   ;;  %v14644_v27 = vld [vmem:[%s23311_s1 + $0x390] ss:$8 sps:$4 sm:$0xff]   ;;  %p178_p12 = scmp.lt.s32.totalorder %s16043_s16, 1  ;;  %s14510_s27 = smul.u32 480, %s16039_s15 }
  0x20   : > { %1566 = vmatpush1.bf16.msra.mxu0 %v14619_v10  ;;  %v14647_v29 = vld [vmem:[%s23311_s1 + $0x384] ss:$8 sps:$4 sm:$0xff]   ;;  %v14649_v30 = vld [vmem:[%s23311_s1 + $0x280] ss:$8 sps:$4 sm:$0xff]   ;;  %v14651_v32 = vld [vmem:[%s23311_s1 + $0x374] ss:$8 sps:$4 sm:$0xff]  }
  0x21   : > { %1679 = vmatpush1.bf16.msra.mxu1 %v14620_v11  ;;  %1567 = vmatprep.subr.bf16.mxu0 %v14621_v12  ;;  %v14650_v31 = vld [vmem:[%s23311_s1 + $0x380] ss:$8 sps:$4 sm:$0xff]   ;;  %s179_s24 = scalar_select %p178_p12, %s16043_s16, 1  ;;  %v14653_v33 = vld [vmem:[%s23311_s1 + $0x474] ss:$8 sps:$4 sm:$0xff]   ;;  %v23358_v10 = vmov 0 }
  0x22   : > { %1680 = vmatprep.subr.bf16.mxu1 %v14623_v13  ;;  %v14655_v34 = vld [vmem:[%s23311_s1 + $0x370] ss:$8 sps:$4 sm:$0xff]   ;;  %v14657_v36 = vld [vmem:[%s23311_s1 + $0x364] ss:$8 sps:$4 sm:$0xff]   ;;  %v14661_v38 = vld [vmem:[%s23311_s1 + $0x360] ss:$8 sps:$4 sm:$0xff]  }
  0x23   : > { %v14656_v35 = vld [vmem:[%s23311_s1 + $0x470] ss:$8 sps:$4 sm:$0xff]   ;;  %s14528_s9 = smul.u32 1080, %s179_s24  ;;  %v14659_v37 = vld [vmem:[%s23311_s1 + $0x464] ss:$8 sps:$4 sm:$0xff]   ;;  %vm2919_vm3 = vcmask 1042432  }
  0x24   : > { %1568 = vmatpush1.bf16.msra.mxu0 %v14625_v14  ;;  %v14662_v39 = vld [vmem:[%s23311_s1 + $0x460] ss:$8 sps:$4 sm:$0xff]   ;;  %v14663_v40 = vld [vmem:[%s23311_s1 + $0x354] ss:$8 sps:$4 sm:$0xff]   ;;  %v14667_v42 = vld [vmem:[%s23311_s1 + $0x350] ss:$8 sps:$4 sm:$0xff]  }
  0x25   : > { %1681 = vmatpush1.bf16.msra.mxu1 %v14626_v15  ;;  %1569 = vmatprep.subr.bf16.mxu0 %v14627_v16  ;;  %s182_s7 = scalar_lea.vmem %s23310_s0, %s14528_s9  ;;  %v14665_v41 = vld [vmem:[%s23311_s1 + $0x454] ss:$8 sps:$4 sm:$0xff]   ;;  %v14668_v43 = vld [vmem:[%s23311_s1 + $0x450] ss:$8 sps:$4 sm:$0xff]   ;;  %v14669_v44 = vld [vmem:[%s23311_s1 + $0x344] ss:$8 sps:$4 sm:$0xff]  }
  0x26   : > { %1682 = vmatprep.subr.bf16.mxu1 %v14629_v17  ;;  %s16290_s29 = scalar_lea.vmem %s182_s7, %s14510_s27  ;;  %vm341_vm0 = vsmask.f32 3328  ;;  %v14671_v45 = vld [vmem:[%s23311_s1 + $0x444] ss:$8 sps:$4 sm:$0xff]   ;;  %vm342_vm1 = vsmask.f32 7440 }
  0x27   : > { %v14673_v46 = vld [vmem:[%s23311_s1 + $0x340] ss:$8 sps:$4 sm:$0xff]   ;;  %v14675_v49 = vld [vmem:[%s23311_s1 + $0x334] ss:$8 sps:$4 sm:$0xff]   ;;  %v14679_v4 = vld [vmem:[%s23311_s1 + $0x330] ss:$8 sps:$4 sm:$0xff]  }
  0x28   : > { %1570 = vmatpush1.bf16.msra.mxu0 %v14631_v18  ;;  %v14674_v47 = vld [vmem:[%s23311_s1 + $0x440] ss:$8 sps:$4 sm:$0xff]   ;;  %v14677_v50 = vld [vmem:[%s23311_s1 + $0x434] ss:$8 sps:$4 sm:$0xff]   ;;  %v14680_v9 = vld [vmem:[%s23311_s1 + $0x430] ss:$8 sps:$4 sm:$0xff]  }
  0x29   : > { %1683 = vmatpush1.bf16.msra.mxu1 %v14632_v19  ;;  %1571 = vmatprep.subr.bf16.mxu0 %v14633_v20  ;;  %v189_v48 = vld [vmem:[%s16290_s29] sm:$0xff]  ;;  %v192_v51 = vld [vmem:[%s16290_s29 + $0x14] sm:$0xff]  ;;  %v317_v52 = vld [vmem:[%s16290_s29 + $0x28] sm:$0x11]  ;;  %vm2920_vm4 = vcmask 1046532   ;;  %s175_s4 = sand.u32 1, %s16031_s13  }
  0x2a   : > { %1684 = vmatprep.subr.bf16.mxu1 %v14635_v21  ;;  %v345_v53 = vshrl.u32 %v189_v48, 16  ;;  %v348_v54 = vshll.u32 %v189_v48, 16  ;;  %v354_v55 = vshll.u32 %v192_v51, 16  ;;  %v386_v56 = vshrl.u32 %v192_v51, 16  ;;  %v190_v58 = vld [vmem:[%s16290_s29 + $0x8] sm:$0xff]  ;;  %v193_v59 = vld [vmem:[%s16290_s29 + $0x1c] sm:$0xff]  ;;  %vm16324_vm2 = vmor %vm341_vm0, %vm342_vm1 }
  0x2b   : > { %v392_v57 = vshll.u32 %v317_v52, 16  ;;  %v318_v62 = vld [vmem:[%s16290_s29 + $0x30] sm:$0x11]  ;;  %v359_v63 = vshrl.u32 %v190_v58, 16  ;;  %v362_v0 = vshll.u32 %v190_v58, 16  ;;  %v368_v3 = vshll.u32 %v193_v59, 16  ;;  %vm17271_vm5 = vmor %vm2919_vm3, %vm2920_vm4 }
  0x2c   : > { %1572 = vmatpush1.bf16.msra.mxu0 %v14637_v22  ;;  %v347_v60 = vrot.slane %v345_v53, 4  ;;  %v350_v61 = vrot.slane %v348_v54, 5  ;;  %v356_v1 = vrot.slane %v354_v55, 5  ;;  %v388_v2 = vrot.slane %v386_v56, 4  ;;  %v14681_v15 = vld [vmem:[%s23311_s1 + $0x324] ss:$8 sps:$4 sm:$0xff]  }
  0x2d   : > { %1685 = vmatpush1.bf16.msra.mxu1 %v14638_v23  ;;  %1573 = vmatprep.subr.bf16.mxu0 %v14639_v24  ;;  %v361_v6 = vrot.slane %v359_v63, 4  ;;  %v364_v7 = vrot.slane %v362_v0, 5  ;;  %v396_v8 = vshrl.u32 %v193_v59, 16  ;;  %v23359_v10 = vsel %vm16324_vm2, 4294967295, %v23358_v10  ;;  %v14683_v16 = vld [vmem:[%s23311_s1 + $0x424] ss:$8 sps:$4 sm:$0xff]  }
  0x2e   : > { %1686 = vmatprep.subr.bf16.mxu1 %v14641_v25  ;;  %v351_v5 = vor.u32 %v350_v61, %v347_v60  ;;  %23360 = vst [vmem:[#allocation5_spill] sm:$0xff] %v23359_v10  ;;  %v389_v11 = vor.u32 %v388_v2, %v356_v1  ;;  %v394_v12 = vrot.slane %v392_v57, 5  ;;  %v370_v13 = vrot.slane %v368_v3, 5  ;;  %v14685_v20 = vld [vmem:[%s23311_s1 + $0x320] ss:$8 sps:$4 sm:$0xff]   ;;  %v15909_v10 = vld [vmem:[%s16290_s29 + $0x94] sm:$0xff] }
  0x2f   : > { %v402_v14 = vshll.u32 %v318_v62, 16  ;;  %v365_v18 = vor.u32 %v364_v7, %v361_v6  ;;  %v398_v19 = vrot.slane %v396_v8, 4  ;;  %v14686_v21 = vld [vmem:[%s23311_s1 + $0x420] ss:$8 sps:$4 sm:$0xff]   ;;  %v14687_v23 = vld [vmem:[%s23311_s1 + $0x314] ss:$8 sps:$4 sm:$0xff]  }
  0x30   : > { %1574 = vmatpush1.bf16.msra.mxu0 %v14643_v26  ;;  %v352_v17 = vrot.slane %v351_v5, 4  ;;  %v390_v22 = vrot.slane %v389_v11, 4  ;;  %v321_v48 = vld [vmem:[%s16290_s29 + $0x6c] sm:$0x11]  ;;  %v14697_v61 = vld [vmem:[%s23311_s1 + $0x300] ss:$8 sps:$4 sm:$0xff]  }
  0x31   : > { %1687 = vmatpush1.bf16.msra.mxu1 %v14644_v27  ;;  %1575 = vmatprep.subr.bf16.mxu0 %v14645_v28  ;;  %v366_v25 = vrot.slane %v365_v18, 4  ;;  %v399_v26 = vor.u32 %v398_v19, %v370_v13  ;;  %v404_v27 = vrot.slane %v402_v14, 5  ;;  %v195_v28 = vld [vmem:[%s16290_s29 + $0x3c] sm:$0xff]  ;;  %v14692_v51 = vld [vmem:[%s23311_s1 + $0x410] ss:$8 sps:$4 sm:$0xff]   ;;  %v474_v2 = vshll.u32 %v321_v48, 16 }
  0x32   : > { %1688 = vmatprep.subr.bf16.mxu1 %v14647_v29  ;;  %v16345_v24 = vsel %vm16324_vm2, %v352_v17, %v356_v1  ;;  %v198_v29 = vld [vmem:[%s16290_s29 + $0x50] sm:$0xff]  ;;  %v14693_v52 = vld [vmem:[%s23311_s1 + $0x304] ss:$8 sps:$4 sm:$0xff]   ;;  %v14698_v62 = vld [vmem:[%s23311_s1 + $0x400] ss:$8 sps:$4 sm:$0xff]   ;;  %s12414_s5 = sshll.u32 %s175_s4, 8 }
  0x33   : > { %v14695_v56 = vld [vmem:[%s23311_s1 + $0x404] ss:$8 sps:$4 sm:$0xff]   ;;  %v14701_v5 = vld [vmem:[%s23311_s1 + $0x4f4] ss:$8 sps:$4 sm:$0xff]   ;;  %s23136_s24 = scalar_lea.vmem [#allocation2], %s12414_s5  ;;  %s14511_s27 = sshll.u32 %s16039_s15, 5 }
  0x34   : > { %1576 = vmatpush1.bf16.msra.mxu0 %v14649_v30  ;;  %v16351_v30 = vsel %vm16324_vm2, %v390_v22, %v394_v12  ;;  %v14704_v6 = vld [vmem:[%s23311_s1 + $0x74] ss:$8 sps:$4 sm:$0xff]   ;;  %v204_v11 = vld [vmem:[%s16290_s29 + $0x8c] sm:$0xff]  ;;  %s14506_s6 = sshll.u32 %s16043_s16, 6  ;;  %s12323_s7 = sshll.u32 %s23136_s24, 4  ;;  %s23252_s7 = int_to_ptr.vmem [resolvable:$true] %s12323_s7 }
  0x35   : > { %1689 = vmatpush1.bf16.msra.mxu1 %v14650_v31  ;;  %1577 = vmatprep.subr.bf16.mxu0 %v14651_v32  ;;  %v320_v31 = vld [vmem:[%s16290_s29 + $0x64] sm:$0x11]  ;;  %v417_v32 = vshrl.u32 %v195_v28, 16  ;;  %v12499_v3 = vcombine.low %v16345_v24, %v16351_v30  ;;  %s12320_s15 = sadd.s32 %s14511_s27, %s14506_s6  ;;  %s23259_s20 = scalar_lea.sflag [#allocation3], %s175_s4 }
  0x36   : > { %1690 = vmatprep.subr.bf16.mxu1 %v14653_v33  ;;  %v420_v33 = vshll.u32 %v195_v28, 16  ;;  %v14702_v28 = vld [vmem:[%s23311_s1 + $0x70] ss:$8 sps:$4 sm:$0xff]   ;;  %s14507_s16 = sshll.u32 %s12320_s15, 7  ;;  %s15963_s21 = scalar_lea.vmem %s23252_s7, 4096 }
  0x37   : > { %s23250_s11 = scalar_lea.hbm %s23313_s3, %s14507_s16  ;;  %p15964_p13 = scmp.ne.s32.totalorder %s23252_s7, %s15963_s21 }
  0x38   : > { %1578 = vmatpush2.bf16.msra.mxu0 %v14655_v34  ;;  %v426_v34 = vshll.u32 %v198_v29, 16  ;;  %s16058_s28 = smov [#allocation2]  }
  0x39   : > { %1691 = vmatpush2.bf16.msra.mxu1 %v14656_v35  ;;  %1579 = vmatprep.subr.bf16.mxu0 %v14657_v36  ;;  %v196_v35 = vld [vmem:[%s16290_s29 + $0x44] sm:$0xff]  ;;  %v14689_v36 = vld [vmem:[%s23311_s1 + $0x414] ss:$8 sps:$4 sm:$0xff]   ;;  %p15965_p0 = pnand %p15964_p13, %p16132_p3 }
  0x3a   : > { %1692 = vmatprep.subr.bf16.mxu1 %v14659_v37  ;;  %v12500_v37 = vcombine.high %v16345_v24, %v16351_v30  ;;  %v530_v24 = vshrl.u32 %v204_v11, 16 }
  0x3b   : > { %p15966_p1 = pneg %p15965_p0 }
  0x3c   : > { %1580 = vmatpush2.bf16.msra.mxu0 %v14661_v38  ;;  %v16362_v38 = vsel %vm16324_vm2, %v366_v25, %v370_v13  ;;  %1593 = vmatprep.mubr.bf16.mxu0 %v12500_v37  ;;  %v532_v37 = vrot.slane %v530_v24, 4 }
  0x3d   : > { %1693 = vmatpush2.bf16.msra.mxu1 %v14662_v39  ;;  %1581 = vmatprep.subr.bf16.mxu0 %v14663_v40  ;;  %v400_v39 = vrot.slane %v399_v26, 4  ;;  %v199_v40 = vld [vmem:[%s16290_s29 + $0x58] sm:$0xff] }
  0x3e   : > { %1694 = vmatprep.subr.bf16.mxu1 %v14665_v41  ;;  %v14691_v41 = vld [vmem:[%s23311_s1 + $0x310] ss:$8 sps:$4 sm:$0xff]   ;;  %v440_v60 = vshll.u32 %v199_v40, 16  ;;  %v468_v1 = vshrl.u32 %v199_v40, 16 }
  0x3f   : > { %v205_v26 = vld [vmem:[%s16290_s29 + $0x94] sm:$0xff] }
  0x40   : > { %1582 = vmatpush2.bf16.msra.mxu0 %v14667_v42  ;;  %v419_v42 = vrot.slane %v417_v32, 4  ;;  %v442_v8 = vrot.slane %v440_v60, 5  ;;  %v470_v14 = vrot.slane %v468_v1, 4  ;;  %v540_v48 = vshrl.u32 %v205_v26, 16 }
  0x41   : > { %1695 = vmatpush2.bf16.msra.mxu1 %v14668_v43  ;;  %1583 = vmatprep.subr.bf16.mxu0 %v14669_v44  ;;  %v422_v43 = vrot.slane %v420_v33, 5  ;;  %v428_v44 = vrot.slane %v426_v34, 5  ;;  %v14707_v33 = vld [vmem:[%s23311_s1 + $0x64] ss:$8 sps:$4 sm:$0xff]  }
  0x42   : > { %1696 = vmatprep.subr.bf16.mxu1 %v14671_v45  ;;  %v458_v45 = vshrl.u32 %v198_v29, 16  ;;  %v542_v60 = vrot.slane %v540_v48, 4  ;;  %v214_v48 = vld [vmem:[%s16290_s29 + $0xf8] sm:$0xff] }
  0x43   : > { %v423_v54 = vor.u32 %v422_v43, %v419_v42  ;;  %v512_v42 = vshll.u32 %v205_v26, 16  ;;  %v14705_v43 = vld [vmem:[%s23311_s1 + $0x60] ss:$8 sps:$4 sm:$0xff]  }
  0x44   : > { %1584 = vmatpush2.bf16.msra.mxu0 %v14673_v46  ;;  %v16370_v46 = vsel %vm16324_vm2, %v400_v39, %v404_v27  ;;  %v460_v55 = vrot.slane %v458_v45, 4  ;;  %v14699_v27 = vld [vmem:[%s23311_s1 + $0x4f0] ss:$8 sps:$4 sm:$0xff]  }
  0x45   : > { %1697 = vmatpush2.bf16.msra.mxu1 %v14674_v47  ;;  %1585 = vmatprep.subr.bf16.mxu0 %v14675_v49  ;;  %v464_v47 = vshll.u32 %v320_v31, 16  ;;  %v431_v49 = vshrl.u32 %v196_v35, 16  ;;  %v12502_v53 = vcombine.high %v16362_v38, %v16370_v46  ;;  %v424_v63 = vrot.slane %v423_v54, 4  ;;  %v207_v54 = vld [vmem:[%s16290_s29 + $0xb4] sm:$0xff] }
  0x46   : > { %1698 = vmatprep.subr.bf16.mxu1 %v14677_v50  ;;  %v434_v50 = vshll.u32 %v196_v35, 16  ;;  %v461_v0 = vor.u32 %v460_v55, %v428_v44  ;;  %v210_v55 = vld [vmem:[%s16290_s29 + $0xc8] sm:$0xff]  ;;  %v564_v1 = vshll.u32 %v207_v54, 16 }
  0x47   : > { %v466_v57 = vrot.slane %v464_v47, 5  ;;  %v433_v58 = vrot.slane %v431_v49, 4  ;;  %1706 = vmatprep.mubr.bf16.mxu1 %v12502_v53  ;;  %v16404_v12 = vsel %vm16324_vm2, %v424_v63, %v428_v44  ;;  %v324_v47 = vld [vmem:[%s16290_s29 + $0xa8] sm:$0x11]  ;;  %v14719_v63 = vld [vmem:[%s23311_s1 + $0x4d4] ss:$8 sps:$4 sm:$0xff]  }
  0x48   : > { %1586 = vmatpush2.bf16.msra.mxu0 %v14679_v4  ;;  %v436_v59 = vrot.slane %v434_v50, 5  ;;  %v12501_v4 = vcombine.low %v16362_v38, %v16370_v46  ;;  %v462_v13 = vrot.slane %v461_v0, 4  ;;  %v14710_v38 = vld [vmem:[%s23311_s1 + $0x4e4] ss:$8 sps:$4 sm:$0xff]   ;;  %v561_v0 = vshrl.u32 %v207_v54, 16 }
  0x49   : > { %1699 = vmatpush2.bf16.msra.mxu1 %v14680_v9  ;;  %1587 = vmatprep.subr.bf16.mxu0 %v14681_v15  ;;  %v201_v9 = vld [vmem:[%s16290_s29 + $0x78] sm:$0xff]  ;;  %v476_v15 = vrot.slane %v474_v2, 5  ;;  %v602_v24 = vshrl.u32 %v210_v55, 16 }
  0x4a   : > { %1700 = vmatprep.subr.bf16.mxu1 %v14683_v16  ;;  %v437_v7 = vor.u32 %v436_v59, %v433_v58  ;;  %v323_v16 = vld [vmem:[%s16290_s29 + $0xa0] sm:$0x11]  ;;  %v489_v18 = vshrl.u32 %v201_v9, 16  ;;  %v492_v19 = vshll.u32 %v201_v9, 16  ;;  %v16410_v22 = vsel %vm16324_vm2, %v462_v13, %v466_v57  ;;  %v14711_v2 = vld [vmem:[%s23311_s1 + $0x50] ss:$8 sps:$4 sm:$0xff]  }
  0x4b   : > { %v536_v25 = vshll.u32 %v323_v16, 16  ;;  %v12505_v29 = vcombine.high %v16404_v12, %v16410_v22  ;;  %v12504_v31 = vcombine.low %v16404_v12, %v16410_v22  ;;  %v514_v59 = vrot.slane %v512_v42, 5  ;;  %v14716_v16 = vld [vmem:[%s23311_s1 + $0x44] ss:$8 sps:$4 sm:$0xff]   ;;  %v14722_v12 = vld [vmem:[%s23311_s1 + $0x34] ss:$8 sps:$4 sm:$0xff]  }
  0x4c   : > { %1588 = vmatpush2.bf16.msra.mxu0 %v14685_v20  ;;  %v438_v17 = vrot.slane %v437_v7, 4  ;;  %v498_v20 = vshll.u32 %v204_v11, 16  ;;  %v491_v32 = vrot.slane %v489_v18, 4  ;;  %v494_v35 = vrot.slane %v492_v19, 5 }
  0x4d   : > { %1701 = vmatpush2.bf16.msra.mxu1 %v14686_v21  ;;  %1589 = vmatprep.subr.bf16.mxu0 %v14687_v23  ;;  %v202_v21 = vld [vmem:[%s16290_s29 + $0x80] sm:$0xff]  ;;  %v471_v23 = vor.u32 %v470_v14, %v442_v8  ;;  %v538_v39 = vrot.slane %v536_v25, 5  ;;  %v570_v7 = vshll.u32 %v210_v55, 16  ;;  %v563_v18 = vrot.slane %v561_v0, 4 }
  0x4e   : > { %1702 = vmatprep.subr.bf16.mxu1 %v14689_v36  ;;  %v16423_v30 = vsel %vm16324_vm2, %v438_v17, %v442_v8  ;;  %v500_v36 = vrot.slane %v498_v20, 5  ;;  %v503_v40 = vshrl.u32 %v202_v21, 16  ;;  %v495_v45 = vor.u32 %v494_v35, %v491_v32  ;;  %v208_v8 = vld [vmem:[%s16290_s29 + $0xbc] sm:$0xff]  ;;  %v14725_v55 = vld [vmem:[%s23311_s1 + $0x24] ss:$8 sps:$4 sm:$0xff]  }
  0x4f   : > { %v472_v34 = vrot.slane %v471_v23, 4  ;;  %v566_v19 = vrot.slane %v564_v1, 5  ;;  %v572_v20 = vrot.slane %v570_v7, 5  ;;  %v14717_v23 = vld [vmem:[%s23311_s1 + $0x4d0] ss:$8 sps:$4 sm:$0xff]   ;;  %v575_v26 = vshrl.u32 %v208_v8, 16 }
  0x50   : > { %1590 = vmatpush2.bf16.msra.mxu0 %v14691_v41  ;;  %v506_v41 = vshll.u32 %v202_v21, 16  ;;  %v533_v46 = vor.u32 %v532_v37, %v500_v36  ;;  %v496_v57 = vrot.slane %v495_v45, 4  ;;  %v578_v32 = vshll.u32 %v208_v8, 16  ;;  %v14737_v8 = vld [vmem:[%s23311_s1 + $0x4b4] ss:$8 sps:$4 sm:$0xff]  }
  0x51   : > { %1703 = vmatpush2.bf16.msra.mxu1 %v14692_v51  ;;  %1591 = vmatprep.subr.bf16.mxu0 %v14693_v52  ;;  %v16438_v44 = vsel %vm16324_vm2, %v472_v34, %v476_v15  ;;  %v14708_v51 = vld [vmem:[%s23311_s1 + $0x4e0] ss:$8 sps:$4 sm:$0xff]   ;;  %v505_v52 = vrot.slane %v503_v40, 4  ;;  %v211_v15 = vld [vmem:[%s16290_s29 + $0xd0] sm:$0xff]  ;;  %v604_v37 = vrot.slane %v602_v24, 4  ;;  %v647_v7 = vshrl.u32 %v214_v48, 16 }
  0x52   : > { %1704 = vmatprep.subr.bf16.mxu1 %v14695_v56  ;;  %v12507_v49 = vcombine.high %v16423_v30, %v16438_v44  ;;  %v12506_v50 = vcombine.low %v16423_v30, %v16438_v44  ;;  %v508_v53 = vrot.slane %v506_v41, 5  ;;  %v14713_v56 = vld [vmem:[%s23311_s1 + $0x54] ss:$8 sps:$4 sm:$0xff]   ;;  %v534_v58 = vrot.slane %v533_v46, 4  ;;  %v327_v30 = vld [vmem:[%s16290_s29 + $0xe4] sm:$0x11] }
  0x53   : > { %v213_v34 = vld [vmem:[%s16290_s29 + $0xf0] sm:$0xff]  ;;  %v216_v40 = vld [vmem:[%s16290_s29 + $0x104] sm:$0xff]  ;;  %v580_v41 = vrot.slane %v578_v32, 5  ;;  %v612_v44 = vshrl.u32 %v211_v15, 16  ;;  %v618_v45 = vshll.u32 %v327_v30, 16  ;;  %v650_v24 = vshll.u32 %v214_v48, 16 }
  0x54   : > { %1592 = vmatpush2.bf16.msra.mxu0 %v14697_v61  ;;  %v509_v61 = vor.u32 %v508_v53, %v505_v52  ;;  %v14726_v46 = vld [vmem:[%s23311_s1 + $0x4c0] ss:$8 sps:$4 sm:$0xff]   ;;  %v329_v52 = vld [vmem:[%s16290_s29 + $0x118] sm:$0x11]  ;;  %v636_v53 = vshll.u32 %v213_v34, 16  ;;  %v642_v54 = vshll.u32 %v216_v40, 16 }
  0x55   : > { %1705 = vmatpush2.bf16.msra.mxu1 %v14698_v62  ;;  %1787 = vmatprep.subr.bf16.mxu0 %v14701_v5  ;;  %v546_v62 = vshll.u32 %v324_v47, 16  ;;  %v543_v5 = vor.u32 %v542_v60, %v514_v59  ;;  %v633_v47 = vshrl.u32 %v213_v34, 16  ;;  %v217_v60 = vld [vmem:[%s16290_s29 + $0x10c] sm:$0xff]  ;;  %v674_v0 = vshrl.u32 %v216_v40, 16 }
  0x56   : > { %2508 = vmatprep.subr.bf16.mxu1 %v14704_v6  ;;  %v326_v6 = vld [vmem:[%s16290_s29 + $0xdc] sm:$0x11]  ;;  %v510_v11 = vrot.slane %v509_v61, 4  ;;  %v14729_v34 = vld [vmem:[%s23311_s1 + $0x10] ss:$8 sps:$4 sm:$0xff]  }
  0x57   : > { %1594 = vmatmul.mubr.bf16.vlgmr.msra.gmra.mxu0 %v12499_v3  ;;  %v16461_v3 = vsel %vm16324_vm2, %v496_v57, %v500_v36  ;;  %v548_v13 = vrot.slane %v546_v62, 5  ;;  %v544_v17 = vrot.slane %v543_v5, 4  ;;  %v608_v25 = vshll.u32 %v326_v6, 16  ;;  %v330_v6 = vld [vmem:[%s16290_s29 + $0x120] sm:$0x11] }
  0x58   : > { %1707 = vmatmul.mubr.bf16.vlgmr.msra.gmra.mxu1 %v12501_v4  ;;  %1788 = vmatpush1.bf16.msra.mxu0 %v14699_v27  ;;  %v16465_v4 = vsel %vm16324_vm2, %v534_v58, %v538_v39  ;;  %v16479_v21 = vsel %vm16324_vm2, %v510_v11, %v514_v59  ;;  %v14714_v27 = vld [vmem:[%s23311_s1 + $0x40] ss:$8 sps:$4 sm:$0xff]   ;;  %v14728_v39 = vld [vmem:[%s23311_s1 + $0x4c4] ss:$8 sps:$4 sm:$0xff]   ;;  %v614_v57 = vrot.slane %v612_v44, 4  ;;  %v620_v58 = vrot.slane %v618_v45, 5 }
  0x59   : > { %2509 = vmatpush1.bf16.msra.mxu1 %v14702_v28  ;;  %1603 = vmatprep.mubr.bf16.mxu0 %v12505_v29  ;;  %v12510_v9 = vcombine.high %v16461_v3, %v16465_v4  ;;  %v12509_v14 = vcombine.low %v16461_v3, %v16465_v4  ;;  %v549_v28 = vsel %vm16324_vm2, %v544_v17, %v548_v13  ;;  %v635_v59 = vrot.slane %v633_v47, 4  ;;  %v14723_v17 = vld [vmem:[%s23311_s1 + $0x20] ss:$8 sps:$4 sm:$0xff]   ;;  %v14731_v4 = vld [vmem:[%s23311_s1 + $0x14] ss:$8 sps:$4 sm:$0xff]  }
  0x5a   : > { %2510 = vmatprep.subr.bf16.mxu1 %v14707_v33  ;;  %1716 = vmatprep.mubr.bf16.mxu1 %v12507_v49  ;;  %v567_v29 = vor.u32 %v566_v19, %v563_v18  ;;  %v584_v33 = vshll.u32 %v211_v15, 16  ;;  %v12512_v35 = vcombine.high %v16479_v21, %v549_v28  ;;  %v12511_v36 = vcombine.low %v16479_v21, %v549_v28  ;;  %v14720_v49 = vld [vmem:[%s23311_s1 + $0x30] ss:$8 sps:$4 sm:$0xff]   ;;  %v14746_v45 = vld [vmem:[%s23311_s1 + $0x4a4] ss:$8 sps:$4 sm:$0xff]  }
  0x5b   : > { %1789 = vmatprep.subr.bf16.mxu0 %v14710_v38  ;;  %v610_v38 = vrot.slane %v608_v25, 5  ;;  %v638_v62 = vrot.slane %v636_v53, 5  ;;  %v680_v5 = vshll.u32 %v329_v52, 16  ;;  %v676_v19 = vrot.slane %v674_v0, 4 }
  0x5c   : > { %1790 = vmatpush1.bf16.msra.mxu0 %v14708_v51  ;;  %v568_v22 = vrot.slane %v567_v29, 4  ;;  %v586_v42 = vrot.slane %v584_v33, 5  ;;  %v649_v21 = vrot.slane %v647_v7, 4  ;;  %v656_v25 = vshll.u32 %v217_v60, 16  ;;  %v16549_v29 = vld [vmem:[%s16290_s29 + $0x140] sm:$0xff] }
  0x5d   : > { %2511 = vmatpush1.bf16.msra.mxu1 %v14705_v43  ;;  %1791 = vmatprep.subr.bf16.mxu0 %v14719_v63  ;;  %v605_v43 = vor.u32 %v604_v37, %v572_v20  ;;  %v644_v63 = vrot.slane %v642_v54, 5  ;;  %v639_v15 = vor.u32 %v638_v62, %v635_v59  ;;  %v690_v28 = vshll.u32 %v330_v6, 16  ;;  %v332_v37 = vld [vmem:[%s16290_s29 + $0x154] sm:$0x11]  ;;  %v333_v6 = vld [vmem:[%s16290_s29 + $0x15c] sm:$0x11] }
  0x5e   : > { %2512 = vmatprep.subr.bf16.mxu1 %v14713_v56  ;;  %v658_v40 = vrot.slane %v656_v25, 5  ;;  %v714_v44 = vshll.u32 %v16549_v29, 16  ;;  %v746_v48 = vshrl.u32 %v16549_v29, 16  ;;  %v14740_v62 = vld [vmem:[%s23311_s1 + $0xf4] ss:$8 sps:$4 sm:$0xff]  }
  0x5f   : > { %1604 = vmatmul.mubr.bf16.gmra.mxu0 %v12504_v31  ;;  %v577_v31 = vrot.slane %v575_v26, 4  ;;  %v606_v56 = vrot.slane %v605_v43, 4  ;;  %v684_v26 = vshrl.u32 %v217_v60, 16  ;;  %v14732_v60 = vld [vmem:[%s23311_s1] ss:$8 sps:$4 sm:$0xff]   ;;  %v226_v25 = vld [vmem:[%s16290_s29 + $0x170] sm:$0xff] }
  0x60   : > { %1717 = vmatmul.mubr.bf16.gmra.mxu1 %v12506_v50  ;;  %1613 = vmatprep.mubr.bf16.mxu0 %v12510_v9  ;;  %v16512_v50 = vsel %vm16324_vm2, %v568_v22, %v572_v20  ;;  %v682_v20 = vrot.slane %v680_v5, 5  ;;  %v692_v22 = vrot.slane %v690_v28, 5 }
  0x61   : > { %2513 = vmatpush1.bf16.msra.mxu1 %v14711_v2  ;;  %1726 = vmatprep.mubr.bf16.mxu1 %v12512_v35  ;;  %v581_v51 = vor.u32 %v580_v41, %v577_v31  ;;  %v16521_v1 = vsel %vm16324_vm2, %v606_v56, %v610_v38  ;;  %v615_v2 = vor.u32 %v614_v57, %v586_v42  ;;  %v14734_v38 = vld [vmem:[%s23311_s1 + $0x4] ss:$8 sps:$4 sm:$0xff]   ;;  %v220_v31 = vld [vmem:[%s16290_s29 + $0x134] sm:$0xff]  ;;  %v716_v57 = vrot.slane %v714_v44, 5 }
  0x62   : > { %2514 = vmatprep.subr.bf16.mxu1 %v14716_v16  ;;  %1792 = vmatpush1.bf16.msra.mxu0 %v14717_v23  ;;  %v12515_v9 = vcombine.high %v16512_v50, %v16521_v1  ;;  %v12514_v13 = vcombine.low %v16512_v50, %v16521_v1  ;;  %v14735_v16 = vld [vmem:[%s23311_s1 + $0x4b0] ss:$8 sps:$4 sm:$0xff]   ;;  %v640_v23 = vrot.slane %v639_v15, 4  ;;  %v14744_v50 = vld [vmem:[%s23311_s1 + $0x4a0] ss:$8 sps:$4 sm:$0xff]   ;;  %v719_v0 = vshrl.u32 %v220_v31, 16 }
  0x63   : > { %1793 = vmatprep.subr.bf16.mxu0 %v14728_v39  ;;  %v582_v61 = vrot.slane %v581_v51, 4  ;;  %v616_v18 = vrot.slane %v615_v2, 4  ;;  %v722_v1 = vshll.u32 %v220_v31, 16  ;;  %v14738_v15 = vld [vmem:[%s23311_s1 + $0xf0] ss:$8 sps:$4 sm:$0xff]  }
  0x64   : > { %v16556_v35 = vsel %vm16324_vm2, %v640_v23, %v644_v63 }
  0x65   : > { %2515 = vmatpush1.bf16.msra.mxu1 %v14714_v27  ;;  %v587_v11 = vsel %vm16324_vm2, %v582_v61, %v586_v42  ;;  %v219_v27 = vld [vmem:[%s16290_s29 + $0x12c] sm:$0xff]  ;;  %v621_v3 = vsel %vm16324_vm2, %v616_v18, %v620_v58  ;;  %v748_v58 = vrot.slane %v746_v48, 4  ;;  %v16598_v18 = vld [vmem:[%s16290_s29 + $0x17c] sm:$0xff] }
  0x66   : > { %2516 = vmatprep.subr.bf16.mxu1 %v14722_v12  ;;  %1794 = vmatpush1.bf16.msra.mxu0 %v14726_v46  ;;  %v705_v30 = vshrl.u32 %v219_v27, 16  ;;  %v12517_v32 = vcombine.high %v587_v11, %v621_v3  ;;  %v12516_v33 = vcombine.low %v587_v11, %v621_v3  ;;  %v686_v12 = vrot.slane %v684_v26, 4 }
  0x67   : > { %1614 = vmatmul.mubr.bf16.gmra.mxu0 %v12509_v14  ;;  %v677_v14 = vor.u32 %v676_v19, %v644_v63  ;;  %1795 = vmatprep.subr.bf16.mxu0 %v14737_v8  ;;  %v708_v43 = vshll.u32 %v219_v27, 16  ;;  %v749_v5 = vor.u32 %v748_v58, %v716_v57  ;;  %v14743_v19 = vld [vmem:[%s23311_s1 + $0xe4] ss:$8 sps:$4 sm:$0xff]   ;;  %v762_v27 = vshll.u32 %v333_v6, 16 }
  0x68   : > { %1727 = vmatmul.mubr.bf16.gmra.mxu1 %v12511_v36  ;;  %1623 = vmatprep.mubr.bf16.mxu0 %v12515_v9  ;;  %v652_v36 = vrot.slane %v650_v24, 5  ;;  %v707_v42 = vrot.slane %v705_v30, 4  ;;  %v687_v47 = vor.u32 %v686_v12, %v658_v40  ;;  %v16592_v9 = vld [vmem:[%s16290_s29 + $0x168] sm:$0xff]  ;;  %v818_v44 = vshrl.u32 %v16598_v18, 16 }
  0x69   : > { %2517 = vmatpush1.bf16.msra.mxu1 %v14720_v49  ;;  %v678_v39 = vrot.slane %v677_v14, 4  ;;  %1736 = vmatprep.mubr.bf16.mxu1 %v12517_v32  ;;  %v752_v49 = vshll.u32 %v332_v37, 16  ;;  %v710_v54 = vrot.slane %v708_v43, 5  ;;  %v777_v3 = vshrl.u32 %v16592_v9, 16  ;;  %v14755_v14 = vld [vmem:[%s23311_s1 + $0x494] ss:$8 sps:$4 sm:$0xff]  }
  0x6a   : > { %2518 = vmatprep.subr.bf16.mxu1 %v14725_v55  ;;  %1796 = vmatpush1.bf16.msra.mxu0 %v14735_v16  ;;  %v653_v41 = vor.u32 %v652_v36, %v649_v21  ;;  %v223_v55 = vld [vmem:[%s16290_s29 + $0x148] sm:$0xff]  ;;  %v688_v56 = vrot.slane %v687_v47, 4  ;;  %v724_v21 = vrot.slane %v722_v1, 5  ;;  %v764_v37 = vrot.slane %v762_v27, 5  ;;  %v14749_v43 = vld [vmem:[%s23311_s1 + $0xd4] ss:$8 sps:$4 sm:$0xff]  }
  0x6b   : > { %v16569_v46 = vsel %vm16324_vm2, %v678_v39, %v682_v20  ;;  %1797 = vmatprep.subr.bf16.mxu0 %v14746_v45  ;;  %v754_v59 = vrot.slane %v752_v49, 5  ;;  %v711_v63 = vor.u32 %v710_v54, %v707_v42  ;;  %v728_v7 = vshll.u32 %v223_v55, 16  ;;  %v14741_v12 = vld [vmem:[%s23311_s1 + $0xe0] ss:$8 sps:$4 sm:$0xff]   ;;  %v16643_v54 = vld [vmem:[%s16290_s29 + $0x1b8] sm:$0xff] }
  0x6c   : > { %v12520_v51 = vcombine.high %v16556_v35, %v16569_v46  ;;  %v654_v52 = vrot.slane %v653_v41, 4  ;;  %v12519_v53 = vcombine.low %v16556_v35, %v16569_v46  ;;  %v693_v2 = vsel %vm16324_vm2, %v688_v56, %v692_v22  ;;  %v14753_v35 = vld [vmem:[%s23311_s1 + $0x490] ss:$8 sps:$4 sm:$0xff]  }
  0x6d   : > { %2519 = vmatpush1.bf16.msra.mxu1 %v14723_v17  ;;  %v756_v8 = vshrl.u32 %v223_v55, 16  ;;  %v712_v16 = vrot.slane %v711_v63, 4  ;;  %v721_v17 = vrot.slane %v719_v0, 4  ;;  %v750_v20 = vrot.slane %v749_v5, 4 }
  0x6e   : > { %2520 = vmatprep.subr.bf16.mxu1 %v14731_v4  ;;  %v659_v61 = vsel %vm16324_vm2, %v654_v52, %v658_v40  ;;  %1798 = vmatpush1.bf16.msra.mxu0 %v14744_v50  ;;  %v730_v23 = vrot.slane %v728_v7, 5  ;;  %v780_v4 = vshll.u32 %v16592_v9, 16  ;;  %v779_v39 = vrot.slane %v777_v3, 4  ;;  %v229_v40 = vld [vmem:[%s16290_s29 + $0x184] sm:$0xff] }
  0x6f   : > { %1624 = vmatmul.mubr.bf16.gmra.mxu0 %v12514_v13  ;;  %v12522_v11 = vcombine.high %v659_v61, %v693_v2  ;;  %v12521_v13 = vcombine.low %v659_v61, %v693_v2  ;;  %v758_v24 = vrot.slane %v756_v8, 4  ;;  %v16606_v26 = vsel %vm16324_vm2, %v712_v16, %v716_v57  ;;  %1799 = vmatprep.subr.bf16.mxu0 %v14755_v14  ;;  %v14747_v57 = vld [vmem:[%s23311_s1 + $0xd0] ss:$8 sps:$4 sm:$0xff]   ;;  %v14752_v61 = vld [vmem:[%s23311_s1 + $0xc4] ss:$8 sps:$4 sm:$0xff]  }
  0x70   : > { %1737 = vmatmul.mubr.bf16.gmra.mxu1 %v12516_v33  ;;  %1633 = vmatprep.mubr.bf16.mxu0 %v12520_v51  ;;  %v16615_v28 = vsel %vm16324_vm2, %v750_v20, %v754_v59  ;;  %v725_v30 = vor.u32 %v724_v21, %v721_v17  ;;  %v335_v33 = vld [vmem:[%s16290_s29 + $0x190] sm:$0x11]  ;;  %v782_v41 = vrot.slane %v780_v4, 5  ;;  %v791_v46 = vshrl.u32 %v226_v25, 16  ;;  %v336_v51 = vld [vmem:[%s16290_s29 + $0x198] sm:$0x11] }
  0x71   : > { %2521 = vmatpush1.bf16.msra.mxu1 %v14729_v34  ;;  %1746 = vmatprep.mubr.bf16.mxu1 %v12522_v11  ;;  %v759_v32 = vor.u32 %v758_v24, %v730_v23  ;;  %v786_v34 = vshll.u32 %v16598_v18, 16  ;;  %v12525_v36 = vcombine.high %v16606_v26, %v16615_v28  ;;  %v824_v45 = vshll.u32 %v335_v33, 16  ;;  %v14764_v2 = vld [vmem:[%s23311_s1 + $0x484] ss:$8 sps:$4 sm:$0xff]  }
  0x72   : > { %2522 = vmatprep.subr.bf16.mxu1 %v14734_v38  ;;  %v12524_v38 = vcombine.low %v16606_v26, %v16615_v28  ;;  %v726_v22 = vrot.slane %v725_v30, 4  ;;  %v794_v47 = vshll.u32 %v226_v25, 16  ;;  %v783_v50 = vor.u32 %v782_v41, %v779_v39  ;;  %1800 = vmatpush1.bf16.msra.mxu0 %v14753_v35  ;;  %v14750_v25 = vld [vmem:[%s23311_s1 + $0xc0] ss:$8 sps:$4 sm:$0xff]   ;;  %v14758_v30 = vld [vmem:[%s23311_s1 + $0xb4] ss:$8 sps:$4 sm:$0xff]  }
  0x73   : > { %v760_v31 = vrot.slane %v759_v32, 4  ;;  %v788_v42 = vrot.slane %v786_v34, 5  ;;  %v800_v52 = vshll.u32 %v229_v40, 16  ;;  %v820_v58 = vrot.slane %v818_v44, 4  ;;  %1801 = vmatprep.subr.bf16.mxu0 %v14764_v2  ;;  %v235_v33 = vld [vmem:[%s16290_s29 + $0x1c0] sm:$0xff] }
  0x74   : > { %v731_v48 = vsel %vm16324_vm2, %v726_v22, %v730_v23  ;;  %v826_v59 = vrot.slane %v824_v45, 5  ;;  %v793_v63 = vrot.slane %v791_v46, 4  ;;  %v796_v0 = vrot.slane %v794_v47, 5  ;;  %v339_v39 = vld [vmem:[%s16290_s29 + $0x1d4] sm:$0x11] }
  0x75   : > { %2523 = vmatpush1.bf16.msra.mxu1 %v14732_v60  ;;  %v765_v49 = vsel %vm16324_vm2, %v760_v31, %v764_v37  ;;  %v14762_v60 = vld [vmem:[%s23311_s1 + $0x480] ss:$8 sps:$4 sm:$0xff]   ;;  %v802_v1 = vrot.slane %v800_v52, 5  ;;  %v821_v5 = vor.u32 %v820_v58, %v788_v42  ;;  %v828_v6 = vshrl.u32 %v229_v40, 16  ;;  %v16682_v40 = vld [vmem:[%s16290_s29 + $0x10] sm:$0xf] }
  0x76   : > { %2524 = vmatprep.subr.bf16.mxu1 %v14740_v62  ;;  %v12527_v55 = vcombine.high %v731_v48, %v765_v49  ;;  %v12526_v56 = vcombine.low %v731_v48, %v765_v49  ;;  %v784_v62 = vrot.slane %v783_v50, 4  ;;  %v834_v7 = vshll.u32 %v336_v51, 16  ;;  %1802 = vmatpush1.bf16.msra.mxu0 %v14762_v60  ;;  %v14775_v47 = vld [vmem:[%s23311_s1 + $0x174] ss:$8 sps:$4 sm:$0xff]   ;;  %v16693_v51 = vld [vmem:[%s16290_s29 + $0x24] sm:$0xf] }
  0x77   : > { %1634 = vmatmul.mubr.bf16.gmra.mxu0 %v12519_v53  ;;  %v16640_v53 = vld [vmem:[%s16290_s29 + $0x1a4] sm:$0xff]  ;;  %v858_v17 = vshll.u32 %v16643_v54, 16  ;;  %v822_v20 = vrot.slane %v821_v5, 4  ;;  %v830_v21 = vrot.slane %v828_v6, 4  ;;  %v890_v4 = vshrl.u32 %v16643_v54, 16  ;;  %2621 = vmatprep.subr.bf16.mxu0 %v14775_v47 }
  0x78   : > { %1747 = vmatmul.mubr.bf16.gmra.mxu1 %v12521_v13  ;;  %1643 = vmatprep.mubr.bf16.mxu0 %v12525_v36  ;;  %v849_v8 = vshrl.u32 %v16640_v53, 16  ;;  %v16660_v11 = vsel %vm16324_vm2, %v784_v62, %v788_v42  ;;  %v797_v13 = vor.u32 %v796_v0, %v793_v63  ;;  %v852_v16 = vshll.u32 %v16640_v53, 16  ;;  %v14756_v42 = vld [vmem:[%s23311_s1 + $0xb0] ss:$8 sps:$4 sm:$0xff]   ;;  %v14761_v60 = vld [vmem:[%s23311_s1 + $0xa4] ss:$8 sps:$4 sm:$0xff]  }
  0x79   : > { %2525 = vmatpush2.bf16.msra.mxu1 %v14738_v15  ;;  %1756 = vmatprep.mubr.bf16.mxu1 %v12527_v55  ;;  %v338_v15 = vld [vmem:[%s16290_s29 + $0x1cc] sm:$0x11]  ;;  %v836_v23 = vrot.slane %v834_v7, 5  ;;  %v860_v3 = vrot.slane %v858_v17, 5  ;;  %v827_v14 = vsel %vm16324_vm2, %v822_v20, %v826_v59  ;;  %v831_v28 = vor.u32 %v830_v21, %v802_v1  ;;  %v319_v59 = vld [vmem:[%s16290_s29 + $0x38] sm:$0x1] }
  0x7a   : > { %2526 = vmatprep.subr.bf16.mxu1 %v14743_v19  ;;  %v232_v19 = vld [vmem:[%s16290_s29 + $0x1ac] sm:$0xff]  ;;  %v851_v24 = vrot.slane %v849_v8, 4  ;;  %v798_v26 = vrot.slane %v797_v13, 4  ;;  %v854_v27 = vrot.slane %v852_v16, 5  ;;  %v896_v32 = vshll.u32 %v338_v15, 16  ;;  %v16714_v20 = vld [vmem:[%s16290_s29] sm:$0xff] }
  0x7b   : > { %v863_v34 = vshrl.u32 %v232_v19, 16  ;;  %v12530_v35 = vcombine.high %v16660_v11, %v827_v14  ;;  %v12529_v37 = vcombine.low %v16660_v11, %v827_v14  ;;  %v892_v22 = vrot.slane %v890_v4, 4  ;;  %v14759_v7 = vld [vmem:[%s23311_s1 + $0xa0] ss:$8 sps:$4 sm:$0xff]   ;;  %v16711_v16 = vld [vmem:[%s16290_s29 + $0x4c] sm:$0xf] }
  0x7c   : > { %v803_v36 = vsel %vm16324_vm2, %v798_v26, %v802_v1  ;;  %v898_v31 = vrot.slane %v896_v32, 5  ;;  %v866_v44 = vshll.u32 %v232_v19, 16  ;;  %v872_v45 = vshll.u32 %v235_v33, 16  ;;  %v16717_v21 = vld [vmem:[%s16290_s29 + $0x14] sm:$0xff] }
  0x7d   : > { %2527 = vmatpush2.bf16.msra.mxu1 %v14741_v12  ;;  %v832_v12 = vrot.slane %v831_v28, 4  ;;  %v865_v41 = vrot.slane %v863_v34, 4  ;;  %v900_v46 = vshrl.u32 %v235_v33, 16  ;;  %v893_v49 = vor.u32 %v892_v22, %v860_v3  ;;  %v14765_v22 = vld [vmem:[%s23311_s1 + $0x90] ss:$8 sps:$4 sm:$0xff]  }
  0x7e   : > { %2528 = vmatprep.subr.bf16.mxu1 %v14749_v43  ;;  %v906_v50 = vshll.u32 %v339_v39, 16  ;;  %v373_v52 = vshrl.u32 %v16682_v40, 16  ;;  %v868_v58 = vrot.slane %v866_v44, 5  ;;  %v874_v62 = vrot.slane %v872_v45, 5 }
  0x7f   : > { %1644 = vmatmul.mubr.bf16.gmra.mxu0 %v12524_v38  ;;  %v855_v38 = vor.u32 %v854_v27, %v851_v24  ;;  %v837_v48 = vsel %vm16324_vm2, %v832_v12, %v836_v23  ;;  %v902_v63 = vrot.slane %v900_v46, 4  ;;  %v376_v5 = vshll.u32 %v16682_v40, 16 }
  0x80   : > { %1757 = vmatmul.mubr.bf16.gmra.mxu1 %v12526_v56  ;;  %1653 = vmatprep.mubr.bf16.mxu0 %v12530_v35  ;;  %v12532_v55 = vcombine.high %v803_v36, %v837_v48  ;;  %v12531_v56 = vcombine.low %v803_v36, %v837_v48  ;;  %v908_v0 = vrot.slane %v906_v50, 5  ;;  %v869_v1 = vor.u32 %v868_v58, %v865_v41  ;;  %v322_v36 = vld [vmem:[%s16290_s29 + $0x74] sm:$0x1]  ;;  %v16750_v50 = vld [vmem:[%s16290_s29 + $0x9c] sm:$0xf] }
  0x81   : > { %2529 = vmatpush2.bf16.msra.mxu1 %v14747_v57  ;;  %v856_v43 = vrot.slane %v855_v38, 4  ;;  %v375_v2 = vrot.slane %v373_v52, 4  ;;  %v382_v6 = vshll.u32 %v16693_v51, 16  ;;  %v903_v11 = vor.u32 %v902_v63, %v874_v62  ;;  %v14778_v63 = vld [vmem:[%s23311_s1 + $0x274] ss:$8 sps:$4 sm:$0xff]  }
  0x82   : > { %2530 = vmatprep.subr.bf16.mxu1 %v14752_v61  ;;  %v894_v61 = vrot.slane %v893_v49, 4  ;;  %1766 = vmatprep.mubr.bf16.mxu1 %v12532_v55  ;;  %v406_v13 = vshrl.u32 %v16693_v51, 16  ;;  %v412_v15 = vshll.u32 %v319_v59, 16  ;;  %v870_v19 = vrot.slane %v869_v1, 4  ;;  %v16747_v49 = vld [vmem:[%s16290_s29 + $0x88] sm:$0xf] }
  0x83   : > { %v861_v57 = vsel %vm16324_vm2, %v856_v43, %v860_v3  ;;  %v12620_v23 = vcombine.high %v16714_v20, %v16717_v21  ;;  %v378_v24 = vrot.slane %v376_v5, 5  ;;  %v904_v26 = vrot.slane %v903_v11, 4  ;;  %v14767_v3 = vld [vmem:[%s23311_s1 + $0x94] ss:$8 sps:$4 sm:$0xff]   ;;  %v14768_v59 = vld [vmem:[%s23311_s1 + $0x80] ss:$8 sps:$4 sm:$0xff]  }
  0x84   : > { %v899_v8 = vsel %vm16324_vm2, %v894_v61, %v898_v31  ;;  %v384_v4 = vrot.slane %v382_v6, 5  ;;  %v408_v14 = vrot.slane %v406_v13, 4  ;;  %v875_v28 = vsel %vm16324_vm2, %v870_v19, %v874_v62 }
  0x85   : > { %2531 = vmatpush2.bf16.msra.mxu1 %v14750_v25  ;;  %v12535_v17 = vcombine.high %v861_v57, %v899_v8  ;;  %v16722_v25 = vld [vmem:[%s16290_s29 + $0x60] sm:$0xf]  ;;  %v12534_v27 = vcombine.low %v861_v57, %v899_v8  ;;  %v414_v32 = vrot.slane %v412_v15, 5  ;;  %v445_v33 = vshrl.u32 %v16711_v16, 16  ;;  %v14773_v15 = vld [vmem:[%s23311_s1 + $0x170] ss:$8 sps:$4 sm:$0xff]  }
  0x86   : > { %2532 = vmatprep.subr.bf16.mxu1 %v14758_v30  ;;  %v379_v30 = vor.u32 %v378_v24, %v375_v2  ;;  %v909_v34 = vsel %vm16324_vm2, %v904_v26, %v908_v0  ;;  %v409_v35 = vor.u32 %v408_v14, %v384_v4  ;;  %v454_v38 = vshll.u32 %v16722_v25, 16  ;;  %v14781_v24 = vld [vmem:[%s23311_s1 + $0x164] ss:$8 sps:$4 sm:$0xff]   ;;  %v15825_v26 = vld [vmem:[%s16290_s29 + $0x3c] sm:$0xff] }
  0x87   : > { %1654 = vmatmul.mubr.bf16.gmra.mxu0 %v12529_v37  ;;  %v448_v37 = vshll.u32 %v16711_v16, 16  ;;  %v12537_v39 = vcombine.high %v875_v28, %v909_v34  ;;  %v12536_v12 = vcombine.low %v875_v28, %v909_v34  ;;  %v447_v41 = vrot.slane %v445_v33, 4  ;;  %v16784_v14 = vld [vmem:[%s16290_s29 + $0xc4] sm:$0xf]  ;;  %v16787_v28 = vld [vmem:[%s16290_s29 + $0xd8] sm:$0xf] }
  0x88   : > { %1767 = vmatmul.mubr.bf16.gmra.mxu1 %v12531_v56  ;;  %1663 = vmatprep.mubr.bf16.mxu0 %v12535_v17  ;;  %v380_v31 = vrot.slane %v379_v30, 4  ;;  %v410_v43 = vrot.slane %v409_v35, 4  ;;  %v16741_v45 = vrot.slane %v454_v38, 5  ;;  %v478_v46 = vshrl.u32 %v16722_v25, 16  ;;  %v14789_v33 = vld [vmem:[%s23311_s1 + $0x264] ss:$8 sps:$4 sm:$0xff]  }
  0x89   : > { %2533 = vmatpush2.bf16.msra.mxu1 %v14756_v42  ;;  %v14770_v42 = vld [vmem:[%s23311_s1 + $0x84] ss:$8 sps:$4 sm:$0xff]   ;;  %v450_v44 = vrot.slane %v448_v37, 5  ;;  %1776 = vmatprep.mubr.bf16.mxu1 %v12537_v39  ;;  %v484_v48 = vshll.u32 %v322_v36, 16  ;;  %v23314_v52 = vmov 0   ;;  %v517_v58 = vshrl.u32 %v16747_v49, 16 }
  0x8a   : > { %2534 = vmatprep.subr.bf16.mxu1 %v14761_v60  ;;  %v385_v47 = vsel %vm16324_vm2, %v380_v31, %v384_v4  ;;  %v415_v55 = vsel %vm16324_vm2, %v410_v43, %v414_v32  ;;  %v480_v57 = vrot.slane %v478_v46, 4  ;;  %v520_v60 = vshll.u32 %v16747_v49, 16  ;;  %v14779_v36 = vld [vmem:[%s23311_s1 + $0x160] ss:$8 sps:$4 sm:$0xff]   ;;  %v14786_v37 = vld [vmem:[%s23311_s1 + $0x154] ss:$8 sps:$4 sm:$0xff]  }
  0x8b   : > { %v451_v56 = vor.u32 %v450_v44, %v447_v41  ;;  %v526_v61 = vshll.u32 %v16750_v50, 16  ;;  %v12503_v62 = vcombine.low %v385_v47, %v415_v55  ;;  %v519_v1 = vrot.slane %v517_v58, 4  ;;  %v328_v44 = vld [vmem:[%s16290_s29 + $0xec] sm:$0x1]  ;;  %v16824_v58 = vld [vmem:[%s16290_s29 + $0x100] sm:$0xf] }
  0x8c   : > { %v481_v0 = vor.u32 %v480_v57, %v16741_v45  ;;  %v550_v2 = vshrl.u32 %v16750_v50, 16  ;;  %v486_v6 = vrot.slane %v484_v48, 5  ;;  %v522_v8 = vrot.slane %v520_v60, 5  ;;  %v14792_v57 = vld [vmem:[%s23311_s1 + $0x144] ss:$8 sps:$4 sm:$0xff]   ;;  %v15827_v60 = vld [vmem:[%s16290_s29 + $0x78] sm:$0xff] }
  0x8d   : > { %2535 = vmatpush2.bf16.msra.mxu1 %v14759_v7  ;;  %v452_v5 = vrot.slane %v451_v56, 4  ;;  %v325_v7 = vld [vmem:[%s16290_s29 + $0xb0] sm:$0x1]  ;;  %v16767_v11 = vrot.slane %v526_v61, 5  ;;  %v12619_v13 = vcombine.low %v16714_v20, %v16717_v21  ;;  %v589_v34 = vshrl.u32 %v16784_v14, 16 }
  0x8e   : > { %2536 = vmatprep.subr.bf16.mxu1 %v14767_v3  ;;  %v482_v17 = vrot.slane %v481_v0, 4  ;;  %v552_v19 = vrot.slane %v550_v2, 4  ;;  %v523_v20 = vor.u32 %v522_v8, %v519_v1  ;;  %v556_v4 = vshll.u32 %v325_v7, 16  ;;  %v14784_v56 = vld [vmem:[%s23311_s1 + $0x150] ss:$8 sps:$4 sm:$0xff]  }
  0x8f   : > { %1664 = vmatmul.mubr.bf16.gmra.mxu0 %v12534_v27  ;;  %v15826_v27 = vld [vmem:[%s16290_s29 + $0x50] sm:$0xff]  ;;  %v457_v30 = vsel %vm16324_vm2, %v452_v5, %v16741_v45  ;;  %v592_v35 = vshll.u32 %v16784_v14, 16  ;;  %v598_v38 = vshll.u32 %v16787_v28, 16  ;;  %v622_v39 = vshrl.u32 %v16787_v28, 16  ;;  %v14790_v1 = vld [vmem:[%s23311_s1 + $0x140] ss:$8 sps:$4 sm:$0xff]  }
  0x90   : > { %1777 = vmatmul.mubr.bf16.gmra.mxu1 %v12536_v12  ;;  %1819 = vmatprep.mubr.bf16.mxu0 %v23314_v52  ;;  %v12625_v3 = vcombine.high %v15825_v26, %v15826_v27  ;;  %v553_v21 = vor.u32 %v552_v19, %v16767_v11  ;;  %v487_v32 = vsel %vm16324_vm2, %v482_v17, %v486_v6  ;;  %v14787_v12 = vld [vmem:[%s23311_s1 + $0x260] ss:$8 sps:$4 sm:$0xff]   ;;  %v524_v41 = vrot.slane %v523_v20, 4  ;;  %v15828_v61 = vld [vmem:[%s16290_s29 + $0x8c] sm:$0xff]  ;;  %v14797_v19 = vld [vmem:[%s23311_s1 + $0x134] ss:$8 sps:$4 sm:$0xff]  }
  0x91   : > { %2537 = vmatpush2.bf16.msra.mxu1 %v14765_v22  ;;  %2540 = vmatprep.mubr.bf16.mxu1 %v12620_v23  ;;  %v14776_v23 = vld [vmem:[%s23311_s1 + $0x270] ss:$8 sps:$4 sm:$0xff]   ;;  %v14800_v22 = vld [vmem:[%s23311_s1 + $0x254] ss:$8 sps:$4 sm:$0xff]   ;;  %v12508_v31 = vcombine.low %v457_v30, %v487_v32  ;;  %v558_v43 = vrot.slane %v556_v4, 5  ;;  %v591_v45 = vrot.slane %v589_v34, 4  ;;  %v12624_v55 = vcombine.low %v15825_v26, %v15826_v27 }
  0x92   : > { %2538 = vmatprep.subr.bf16.mxu1 %v14770_v42  ;;  %v554_v42 = vrot.slane %v553_v21, 4  ;;  %v594_v46 = vrot.slane %v592_v35, 5  ;;  %v16815_v47 = vrot.slane %v598_v38, 5  ;;  %v624_v48 = vrot.slane %v622_v39, 4  ;;  %v14811_v8 = vld [vmem:[%s23311_s1 + $0x244] ss:$8 sps:$4 sm:$0xff]  }
  0x93   : > { %v628_v0 = vshll.u32 %v328_v44, 16  ;;  %v529_v2 = vsel %vm16324_vm2, %v524_v41, %v16767_v11  ;;  %v14809_v26 = vld [vmem:[%s23311_s1 + $0x240] ss:$8 sps:$4 sm:$0xff]   ;;  %v16861_v27 = vld [vmem:[%s16290_s29 + $0x13c] sm:$0xf]  ;;  %v12629_v20 = vcombine.low %v15827_v60, %v15828_v61 }
  0x94   : > { %v559_v5 = vsel %vm16324_vm2, %v554_v42, %v558_v43  ;;  %v595_v6 = vor.u32 %v594_v46, %v591_v45  ;;  %v625_v7 = vor.u32 %v624_v48, %v16815_v47  ;;  %v14803_v21 = vld [vmem:[%s23311_s1 + $0x124] ss:$8 sps:$4 sm:$0xff]   ;;  %v14822_v32 = vld [vmem:[%s23311_s1 + $0x234] ss:$8 sps:$4 sm:$0xff]   ;;  %v331_v38 = vld [vmem:[%s16290_s29 + $0x128] sm:$0x1] }
  0x95   : > { %2539 = vmatpush2.bf16.msra.mxu1 %v14768_v59  ;;  %v16827_v59 = vld [vmem:[%s16290_s29 + $0x114] sm:$0xf]  ;;  %v733_v39 = vshrl.u32 %v16861_v27, 16  ;;  %v14820_v42 = vld [vmem:[%s23311_s1 + $0x230] ss:$8 sps:$4 sm:$0xff]  }
  0x96   : > { %2734 = vmatprep.subr.bf16.mxu1 %v14778_v63  ;;  %v14798_v63 = vld [vmem:[%s23311_s1 + $0x250] ss:$8 sps:$4 sm:$0xff]   ;;  %v670_v17 = vshll.u32 %v16827_v59, 16  ;;  %v694_v11 = vshrl.u32 %v16827_v59, 16  ;;  %v596_v4 = vrot.slane %v595_v6, 4  ;;  %v626_v30 = vrot.slane %v625_v7, 4 }
  0x97   : > { %1820 = vmatmul.mubr.bf16.vlgmr.msra.gmra.mxu0 %v12503_v62  ;;  %v12630_v62 = vcombine.high %v15827_v60, %v15828_v61  ;;  %v14833_v46 = vld [vmem:[%s23311_s1 + $0x224] ss:$8 sps:$4 sm:$0xff]   ;;  %v14801_v48 = vld [vmem:[%s23311_s1 + $0x120] ss:$8 sps:$4 sm:$0xff]   ;;  %v700_v60 = vshll.u32 %v331_v38, 16 }
  0x98   : > { %2541 = vmatmul.mubr.bf16.vlgmr.msra.gmra.mxu1 %v12619_v13  ;;  %2622 = vmatpush1.bf16.msra.mxu0 %v14773_v15  ;;  %v661_v13 = vshrl.u32 %v16824_v58, 16  ;;  %v664_v15 = vshll.u32 %v16824_v58, 16  ;;  %v601_v45 = vsel %vm16324_vm2, %v596_v4, %v16815_v47  ;;  %v14808_v47 = vld [vmem:[%s23311_s1 + $0x114] ss:$8 sps:$4 sm:$0xff]   ;;  %v334_v61 = vld [vmem:[%s16290_s29 + $0x164] sm:$0x1] }
  0x99   : > { %2735 = vmatpush1.bf16.msra.mxu1 %v14776_v23  ;;  %2623 = vmatprep.subr.bf16.mxu0 %v14781_v24  ;;  %v14795_v23 = vld [vmem:[%s23311_s1 + $0x130] ss:$8 sps:$4 sm:$0xff]   ;;  %v630_v24 = vrot.slane %v628_v0, 5  ;;  %v14812_v38 = vld [vmem:[%s23311_s1 + $0x100] ss:$8 sps:$4 sm:$0xff]  }
  0x9a   : > { %1829 = vmatprep.mubr.bf16.mxu0 %v23314_v52  ;;  %2550 = vmatprep.mubr.bf16.mxu1 %v12625_v3  ;;  %v12513_v3 = vcombine.low %v529_v2, %v559_v5  ;;  %v663_v34 = vrot.slane %v661_v13, 4  ;;  %v666_v35 = vrot.slane %v664_v15, 5  ;;  %v14831_v2 = vld [vmem:[%s23311_s1 + $0x220] ss:$8 sps:$4 sm:$0xff]   ;;  %v14806_v6 = vld [vmem:[%s23311_s1 + $0x110] ss:$8 sps:$4 sm:$0xff]  }
  0x9b   : > { %2736 = vmatprep.subr.bf16.mxu1 %v14789_v33  ;;  %v16870_v33 = vld [vmem:[%s16290_s29 + $0x150] sm:$0xf]  ;;  %v16910_v7 = vld [vmem:[%s16290_s29 + $0x178] sm:$0xf] }
  0x9c   : > { %2624 = vmatpush1.bf16.msra.mxu0 %v14779_v36  ;;  %v16872_v36 = vrot.slane %v670_v17, 5  ;;  %v742_v43 = vshll.u32 %v16870_v33, 16  ;;  %v766_v44 = vshrl.u32 %v16870_v33, 16  ;;  %v702_v17 = vrot.slane %v700_v60, 5 }
  0x9d   : > { %2625 = vmatprep.subr.bf16.mxu0 %v14786_v37  ;;  %2737 = vmatpush1.bf16.msra.mxu1 %v14787_v12  ;;  %v696_v37 = vrot.slane %v694_v11, 4  ;;  %v736_v12 = vshll.u32 %v16861_v27, 16  ;;  %v16913_v11 = vld [vmem:[%s16290_s29 + $0x18c] sm:$0xf] }
  0x9e   : > { %2738 = vmatprep.subr.bf16.mxu1 %v14800_v22  ;;  %v15829_v22 = vld [vmem:[%s16290_s29 + $0xb4] sm:$0xff]  ;;  %v16901_v0 = vrot.slane %v742_v43, 5  ;;  %v337_v43 = vld [vmem:[%s16290_s29 + $0x1a0] sm:$0x1] }
  0x9f   : > { %1830 = vmatmul.mubr.bf16.gmra.mxu0 %v12508_v31  ;;  %v15830_v31 = vld [vmem:[%s16290_s29 + $0xc8] sm:$0xff] }
  0xa0   : > { %2551 = vmatmul.mubr.bf16.gmra.mxu1 %v12624_v55  ;;  %2626 = vmatpush1.bf16.msra.mxu0 %v14784_v56  ;;  %v12635_v41 = vcombine.high %v15829_v22, %v15830_v31  ;;  %v631_v55 = vsel %vm16324_vm2, %v626_v30, %v630_v24  ;;  %v667_v56 = vor.u32 %v666_v35, %v663_v34  ;;  %v772_v24 = vshll.u32 %v334_v61, 16  ;;  %v14855_v61 = vld [vmem:[%s23311_s1 + $0x204] ss:$8 sps:$4 sm:$0xff]  }
  0xa1   : > { %2627 = vmatprep.subr.bf16.mxu0 %v14792_v57  ;;  %1839 = vmatprep.mubr.bf16.mxu0 %v23314_v52  ;;  %v697_v57 = vor.u32 %v696_v37, %v16872_v36  ;;  %v12518_v5 = vcombine.low %v601_v45, %v631_v55  ;;  %v805_v30 = vshrl.u32 %v16910_v7, 16  ;;  %v808_v34 = vshll.u32 %v16910_v7, 16 }
  0xa2   : > { %2560 = vmatprep.mubr.bf16.mxu1 %v12630_v62  ;;  %2739 = vmatpush1.bf16.msra.mxu1 %v14798_v63  ;;  %v735_v62 = vrot.slane %v733_v39, 4  ;;  %v738_v63 = vrot.slane %v736_v12, 5  ;;  %v668_v13 = vrot.slane %v667_v56, 4  ;;  %v814_v35 = vshll.u32 %v16913_v11, 16 }
  0xa3   : > { %2740 = vmatprep.subr.bf16.mxu1 %v14811_v8  ;;  %v12634_v8 = vcombine.low %v15829_v22, %v15830_v31  ;;  %v698_v15 = vrot.slane %v697_v57, 4  ;;  %v838_v37 = vshrl.u32 %v16913_v11, 16  ;;  %v14819_v22 = vld [vmem:[%s23311_s1 + $0x1f4] ss:$8 sps:$4 sm:$0xff]   ;;  %v14853_v57 = vld [vmem:[%s23311_s1 + $0x200] ss:$8 sps:$4 sm:$0xff]  }
  0xa4   : > { %2628 = vmatpush1.bf16.msra.mxu0 %v14790_v1  ;;  %v768_v1 = vrot.slane %v766_v44, 4  ;;  %v673_v39 = vsel %vm16324_vm2, %v668_v13, %v16872_v36  ;;  %v807_v44 = vrot.slane %v805_v30, 4  ;;  %v816_v55 = vrot.slane %v814_v35, 5 }
  0xa5   : > { %2629 = vmatprep.subr.bf16.mxu0 %v14797_v19  ;;  %v14814_v19 = vld [vmem:[%s23311_s1 + $0x104] ss:$8 sps:$4 sm:$0xff]   ;;  %v703_v12 = vsel %vm16324_vm2, %v698_v15, %v702_v17  ;;  %v840_v56 = vrot.slane %v838_v37, 4  ;;  %v844_v15 = vshll.u32 %v337_v43, 16 }
  0xa6   : > { %2741 = vmatpush1.bf16.msra.mxu1 %v14809_v26  ;;  %v14844_v26 = vld [vmem:[%s23311_s1 + $0x214] ss:$8 sps:$4 sm:$0xff]   ;;  %v769_v4 = vor.u32 %v768_v1, %v16901_v0  ;;  %v12523_v45 = vcombine.low %v673_v39, %v703_v12 }
  0xa7   : > { %1840 = vmatmul.mubr.bf16.gmra.mxu0 %v12513_v3  ;;  %2742 = vmatprep.subr.bf16.mxu1 %v14822_v32  ;;  %v15831_v3 = vld [vmem:[%s16290_s29 + $0xf0] sm:$0xff]  ;;  %v841_v13 = vor.u32 %v840_v56, %v816_v55  ;;  %v340_v12 = vld [vmem:[%s16290_s29 + $0x1dc] sm:$0x1] }
  0xa8   : > { %2561 = vmatmul.mubr.bf16.gmra.mxu1 %v12629_v20  ;;  %2630 = vmatpush1.bf16.msra.mxu0 %v14795_v23  ;;  %v739_v23 = vor.u32 %v738_v63, %v735_v62  ;;  %v15832_v20 = vld [vmem:[%s16290_s29 + $0x104] sm:$0xff]  ;;  %v14842_v32 = vld [vmem:[%s23311_s1 + $0x210] ss:$8 sps:$4 sm:$0xff]   ;;  %v770_v36 = vrot.slane %v769_v4, 4 }
  0xa9   : > { %2631 = vmatprep.subr.bf16.mxu0 %v14803_v21  ;;  %1849 = vmatprep.mubr.bf16.mxu0 %v23314_v52  ;;  %v12640_v21 = vcombine.high %v15831_v3, %v15832_v20  ;;  %v12639_v60 = vcombine.low %v15831_v3, %v15832_v20  ;;  %v16960_v62 = vld [vmem:[%s16290_s29 + $0x1c8] sm:$0xf]  ;;  %v15833_v63 = vld [vmem:[%s16290_s29 + $0x12c] sm:$0xff] }
  0xaa   : > { %2570 = vmatprep.mubr.bf16.mxu1 %v12635_v41  ;;  %2743 = vmatpush1.bf16.msra.mxu1 %v14820_v42  ;;  %v740_v31 = vrot.slane %v739_v23, 4  ;;  %v774_v41 = vrot.slane %v772_v24, 5  ;;  %v14817_v42 = vld [vmem:[%s23311_s1 + $0x1f0] ss:$8 sps:$4 sm:$0xff]   ;;  %v12645_v1 = vcombine.high %v15833_v63, %v16549_v29  ;;  %v14867_v29 = vld [vmem:[%s23311_s1 + $0x674] ss:$8 sps:$4 sm:$0xff]  }
  0xab   : > { %2744 = vmatprep.subr.bf16.mxu1 %v14833_v46  ;;  %v14825_v46 = vld [vmem:[%s23311_s1 + $0x1e4] ss:$8 sps:$4 sm:$0xff]   ;;  %v910_v23 = vshrl.u32 %v16960_v62, 16  ;;  %v14830_v24 = vld [vmem:[%s23311_s1 + $0x1d4] ss:$8 sps:$4 sm:$0xff]  }
  0xac   : > { %2632 = vmatpush1.bf16.msra.mxu0 %v14801_v48  ;;  %v810_v48 = vrot.slane %v808_v34, 5  ;;  %v14828_v20 = vld [vmem:[%s23311_s1 + $0x1d0] ss:$8 sps:$4 sm:$0xff]   ;;  %v14836_v4 = vld [vmem:[%s23311_s1 + $0x1c4] ss:$8 sps:$4 sm:$0xff]   ;;  %v846_v34 = vrot.slane %v844_v15, 5 }
  0xad   : > { %2633 = vmatprep.subr.bf16.mxu0 %v14808_v47  ;;  %v16954_v47 = vld [vmem:[%s16290_s29 + $0x1b4] sm:$0xf]  ;;  %v912_v39 = vrot.slane %v910_v23, 4  ;;  %v14850_v15 = vld [vmem:[%s23311_s1 + $0x190] ss:$8 sps:$4 sm:$0xff]  }
  0xae   : > { %2745 = vmatpush1.bf16.msra.mxu1 %v14831_v2  ;;  %v745_v2 = vsel %vm16324_vm2, %v740_v31, %v16901_v0  ;;  %v877_v0 = vshrl.u32 %v16954_v47, 16  ;;  %v880_v17 = vshll.u32 %v16954_v47, 16 }
  0xaf   : > { %1850 = vmatmul.mubr.bf16.gmra.mxu0 %v12518_v5  ;;  %2746 = vmatprep.subr.bf16.mxu1 %v14844_v26  ;;  %v14823_v5 = vld [vmem:[%s23311_s1 + $0x1e0] ss:$8 sps:$4 sm:$0xff]  }
  0xb0   : > { %2571 = vmatmul.mubr.bf16.gmra.mxu1 %v12634_v8  ;;  %2634 = vmatpush1.bf16.msra.mxu0 %v14806_v6  ;;  %v775_v6 = vsel %vm16324_vm2, %v770_v36, %v774_v41  ;;  %v811_v8 = vor.u32 %v810_v48, %v807_v44  ;;  %v15834_v26 = vld [vmem:[%s16290_s29 + $0x140] sm:$0xff]  ;;  %v879_v35 = vrot.slane %v877_v0, 4  ;;  %v882_v37 = vrot.slane %v880_v17, 5  ;;  %v15837_v0 = vld [vmem:[%s16290_s29 + $0x8] sm:$0xff] }
  0xb1   : > { %2635 = vmatprep.subr.bf16.mxu0 %v14814_v19  ;;  %1859 = vmatprep.mubr.bf16.mxu0 %v23314_v52  ;;  %v886_v19 = vshll.u32 %v16960_v62, 16  ;;  %v12644_v3 = vcombine.low %v15833_v63, %v15834_v26  ;;  %v14834_v41 = vld [vmem:[%s23311_s1 + $0x1c0] ss:$8 sps:$4 sm:$0xff]   ;;  %v916_v44 = vshll.u32 %v340_v12, 16  ;;  %v12655_v63 = vcombine.high %v16640_v53, %v16643_v54  ;;  %v14880_v12 = vld [vmem:[%s23311_s1 + $0x650] ss:$8 sps:$4 sm:$0xff]  }
  0xb2   : > { %2580 = vmatprep.mubr.bf16.mxu1 %v12640_v21  ;;  %2747 = vmatpush1.bf16.msra.mxu1 %v14842_v32  ;;  %v12528_v21 = vcombine.low %v745_v2, %v775_v6  ;;  %v812_v30 = vrot.slane %v811_v8, 4  ;;  %v842_v32 = vrot.slane %v841_v13, 4  ;;  %v883_v36 = vor.u32 %v882_v37, %v879_v35  ;;  %v15836_v48 = vld [vmem:[%s16290_s29 + $0x17c] sm:$0xff] }
  0xb3   : > { %2748 = vmatprep.subr.bf16.mxu1 %v14855_v61  ;;  %v14847_v61 = vld [vmem:[%s23311_s1 + $0x1a4] ss:$8 sps:$4 sm:$0xff]   ;;  %v14852_v6 = vld [vmem:[%s23311_s1 + $0x194] ss:$8 sps:$4 sm:$0xff]   ;;  %v12654_v13 = vcombine.low %v16640_v53, %v16643_v54  ;;  %v14856_v53 = vld [vmem:[%s23311_s1 + $0x180] ss:$8 sps:$4 sm:$0xff]   ;;  %v12623_v26 = vcombine.low %v16682_v40, %v16693_v51 }
  0xb4   : > { %2636 = vmatpush1.bf16.msra.mxu0 %v14812_v38  ;;  %v888_v38 = vrot.slane %v886_v19, 5  ;;  %v817_v31 = vsel %vm16324_vm2, %v812_v30, %v816_v55  ;;  %v884_v56 = vrot.slane %v883_v36, 4  ;;  %v17035_v17 = vld [vmem:[%s16290_s29 + $0x1c] sm:$0xff] }
  0xb5   : > { %2637 = vmatprep.subr.bf16.mxu0 %v14819_v22  ;;  %v12650_v22 = vcombine.high %v16592_v9, %v16598_v18  ;;  %v14841_v9 = vld [vmem:[%s23311_s1 + $0x1b4] ss:$8 sps:$4 sm:$0xff]   ;;  %v12622_v19 = vcombine.high %v15837_v0, %v17035_v17  ;;  %v12621_v23 = vcombine.low %v15837_v0, %v17035_v17  ;;  %v14868_v40 = vld [vmem:[%s23311_s1 + $0x560] ss:$8 sps:$4 sm:$0xff]  }
  0xb6   : > { %2749 = vmatpush1.bf16.msra.mxu1 %v14853_v57  ;;  %v913_v43 = vor.u32 %v912_v39, %v888_v38  ;;  %v889_v2 = vsel %vm16324_vm2, %v884_v56, %v888_v38  ;;  %v14864_v54 = vld [vmem:[%s23311_s1 + $0x574] ss:$8 sps:$4 sm:$0xff]   ;;  %v14871_v51 = vld [vmem:[%s23311_s1 + $0x660] ss:$8 sps:$4 sm:$0xff]   ;;  %v14877_v38 = vld [vmem:[%s23311_s1 + $0x550] ss:$8 sps:$4 sm:$0xff]   ;;  %v12628_v39 = vcombine.low %v16711_v16, %v16722_v25 }
  0xb7   : > { %1860 = vmatmul.mubr.bf16.gmra.mxu0 %v12523_v45  ;;  %3844 = vmatprep.subr.bf16.mxu1 %v14867_v29  ;;  %v14839_v45 = vld [vmem:[%s23311_s1 + $0x1b0] ss:$8 sps:$4 sm:$0xff]   ;;  %v14858_v29 = vld [vmem:[%s23311_s1 + $0x184] ss:$8 sps:$4 sm:$0xff]   ;;  %v14882_v35 = vld [vmem:[%s23311_s1 + $0x654] ss:$8 sps:$4 sm:$0xff]  }
  0xb8   : > { %2581 = vmatmul.mubr.bf16.gmra.mxu1 %v12639_v60  ;;  %2638 = vmatpush2.bf16.msra.mxu0 %v14817_v42  ;;  %v847_v42 = vsel %vm16324_vm2, %v842_v32, %v846_v34  ;;  %v914_v57 = vrot.slane %v913_v43, 4  ;;  %v918_v60 = vrot.slane %v916_v44, 5  ;;  %v17062_v30 = vld [vmem:[%s16290_s29 + $0x58] sm:$0xff]  ;;  %v14883_v25 = vld [vmem:[%s23311_s1 + $0x540] ss:$8 sps:$4 sm:$0xff]  }
  0xb9   : > { %2639 = vmatprep.subr.bf16.mxu0 %v14825_v46  ;;  %1869 = vmatprep.mubr.bf16.mxu0 %v23314_v52  ;;  %v12533_v18 = vcombine.low %v817_v31, %v847_v42  ;;  %v15835_v46 = vld [vmem:[%s16290_s29 + $0x168] sm:$0xff]  ;;  %v14879_v34 = vld [vmem:[%s23311_s1 + $0x554] ss:$8 sps:$4 sm:$0xff]  }
  0xba   : > { %2590 = vmatprep.mubr.bf16.mxu1 %v12645_v1  ;;  %v12649_v55 = vcombine.low %v15835_v46, %v15836_v48  ;;  %v14845_v1 = vld [vmem:[%s23311_s1 + $0x1a0] ss:$8 sps:$4 sm:$0xff]   ;;  %v14888_v31 = vld [vmem:[%s23311_s1 + $0x644] ss:$8 sps:$4 sm:$0xff]   ;;  %v17095_v42 = vld [vmem:[%s16290_s29 + $0x94] sm:$0xff] }
  0xbb   : > { %v14886_v36 = vld [vmem:[%s23311_s1 + $0x640] ss:$8 sps:$4 sm:$0xff]   ;;  %v14894_v43 = vld [vmem:[%s23311_s1 + $0x534] ss:$8 sps:$4 sm:$0xff]   ;;  %v14895_v46 = vld [vmem:[%s23311_s1 + $0x630] ss:$8 sps:$4 sm:$0xff]  }
  0xbc   : > { %2640 = vmatpush2.bf16.msra.mxu0 %v14823_v5  ;;  %v919_v5 = vsel %vm16324_vm2, %v914_v57, %v918_v60  ;;  %v14897_v44 = vld [vmem:[%s23311_s1 + $0x634] ss:$8 sps:$4 sm:$0xff]   ;;  %v14900_v48 = vld [vmem:[%s23311_s1 + $0x524] ss:$8 sps:$4 sm:$0xff]   ;;  %v14898_v57 = vld [vmem:[%s23311_s1 + $0x520] ss:$8 sps:$4 sm:$0xff]  }
  0xbd   : > { %2641 = vmatprep.subr.bf16.mxu0 %v14830_v24  ;;  %v12538_v8 = vcombine.low %v889_v2, %v919_v5  ;;  %v14862_v24 = vld [vmem:[%s23311_s1 + $0x570] ss:$8 sps:$4 sm:$0xff]   ;;  %v14901_v60 = vld [vmem:[%s23311_s1 + $0x620] ss:$8 sps:$4 sm:$0xff]   ;;  %v12638_v2 = vcombine.low %v16784_v14, %v16787_v28 }
  0xbe   : > { %v14907_v5 = vld [vmem:[%s23311_s1 + $0x510] ss:$8 sps:$4 sm:$0xff]   ;;  %v14916_v0 = vld [vmem:[%s23311_s1 + $0x600] ss:$8 sps:$4 sm:$0xff]  }
  0xbf   : > { %1870 = vmatmul.mubr.bf16.gmra.mxu0 %v12528_v21  ;;  %v14873_v21 = vld [vmem:[%s23311_s1 + $0x664] ss:$8 sps:$4 sm:$0xff]   ;;  %v15845_v14 = vld [vmem:[%s16290_s29 + $0xf8] sm:$0xff] }
  0xc0   : > { %2591 = vmatmul.mubr.bf16.gmra.mxu1 %v12644_v3  ;;  %2642 = vmatpush2.bf16.msra.mxu0 %v14828_v20  ;;  %v14865_v3 = vld [vmem:[%s23311_s1 + $0x670] ss:$8 sps:$4 sm:$0xff]   ;;  %v14870_v20 = vld [vmem:[%s23311_s1 + $0x564] ss:$8 sps:$4 sm:$0xff]  }
  0xc1   : > { %2643 = vmatprep.subr.bf16.mxu0 %v14836_v4  ;;  %1879 = vmatprep.mubr.bf16.mxu0 %v23314_v52  ;;  %v15839_v4 = vld [vmem:[%s16290_s29 + $0x44] sm:$0xff]  ;;  %v17161_v28 = vld [vmem:[%s16290_s29 + $0x10c] sm:$0xff] }
  0xc2   : > { %2600 = vmatprep.mubr.bf16.mxu1 %v12650_v22  ;;  %v12627_v32 = vcombine.high %v15839_v4, %v17062_v30  ;;  %v12626_v37 = vcombine.low %v15839_v4, %v17062_v30  ;;  %v14885_v22 = vld [vmem:[%s23311_s1 + $0x544] ss:$8 sps:$4 sm:$0xff]   ;;  %v14928_v4 = vld [vmem:[%s23311_s1 + $0x5e0] ss:$8 sps:$4 sm:$0xff]  }
  0xc4   : > { %2644 = vmatpush2.bf16.msra.mxu0 %v14834_v41  ;;  %v15841_v41 = vld [vmem:[%s16290_s29 + $0x80] sm:$0xff] }
  0xc5   : > { %2645 = vmatprep.subr.bf16.mxu0 %v14841_v9  ;;  %v12632_v16 = vcombine.high %v15841_v41, %v17095_v42  ;;  %v12631_v9 = vcombine.low %v15841_v41, %v17095_v42  ;;  %v14946_v41 = vld [vmem:[%s23311_s1 + $0x6c0] ss:$8 sps:$4 sm:$0xff]  }
  0xc7   : > { %1880 = vmatmul.mubr.bf16.gmra.mxu0 %v12533_v18  ;;  %v12633_v18 = vcombine.low %v16747_v49, %v16750_v50  ;;  %v15843_v49 = vld [vmem:[%s16290_s29 + $0xbc] sm:$0xff]  ;;  %v17128_v50 = vld [vmem:[%s16290_s29 + $0xd0] sm:$0xff] }
  0xc8   : > { %2601 = vmatmul.mubr.bf16.gmra.mxu1 %v12649_v55  ;;  %2646 = vmatpush2.bf16.msra.mxu0 %v14839_v45  ;;  %v14892_v45 = vld [vmem:[%s23311_s1 + $0x530] ss:$8 sps:$4 sm:$0xff]   ;;  %v14903_v55 = vld [vmem:[%s23311_s1 + $0x624] ss:$8 sps:$4 sm:$0xff]   ;;  %v12637_v56 = vcombine.high %v15843_v49, %v17128_v50 }
  0xc9   : > { %2647 = vmatprep.subr.bf16.mxu0 %v14847_v61  ;;  %1889 = vmatprep.mubr.bf16.mxu0 %v23314_v52  ;;  %v14909_v61 = vld [vmem:[%s23311_s1 + $0x514] ss:$8 sps:$4 sm:$0xff]  }
  0xca   : > { %2610 = vmatprep.mubr.bf16.mxu1 %v12655_v63  ;;  %v14912_v63 = vld [vmem:[%s23311_s1 + $0x614] ss:$8 sps:$4 sm:$0xff]  }
  0xcc   : > { %2648 = vmatpush2.bf16.msra.mxu0 %v14845_v1  ;;  %v12636_v1 = vcombine.low %v15843_v49, %v17128_v50  ;;  %v2848_v49 = vld [vmem:[%s16290_s29 + $0x8] sm:$0xee] }
  0xcd   : > { %2649 = vmatprep.subr.bf16.mxu0 %v14852_v6  ;;  %v14910_v6 = vld [vmem:[%s23311_s1 + $0x610] ss:$8 sps:$4 sm:$0xff]  }
  0xcf   : > { %1890 = vmatmul.mubr.bf16.gmra.mxu0 %v12538_v8  ;;  %v14915_v8 = vld [vmem:[%s23311_s1 + $0x504] ss:$8 sps:$4 sm:$0xff]  }
  0xd0   : > { %2611 = vmatmul.mubr.bf16.gmra.mxu1 %v12654_v13  ;;  %2650 = vmatpush2.bf16.msra.mxu0 %v14850_v15  ;;  %v14918_v13 = vld [vmem:[%s23311_s1 + $0x604] ss:$8 sps:$4 sm:$0xff]   ;;  %v12642_v15 = vcombine.high %v15845_v14, %v17161_v28 }
  0xd1   : > { %2651 = vmatprep.subr.bf16.mxu0 %v14858_v29  ;;  %2653 = vmatprep.mubr.bf16.mxu0 %v12622_v19  ;;  %v14913_v29 = vld [vmem:[%s23311_s1 + $0x500] ss:$8 sps:$4 sm:$0xff]   ;;  %v14924_v19 = vld [vmem:[%s23311_s1 + $0x5f4] ss:$8 sps:$4 sm:$0xff]  }
  0xd2   : > { %2766 = vmatprep.mubr.bf16.mxu1 %v23314_v52 }
  0xd4   : > { %2652 = vmatpush2.bf16.msra.mxu0 %v14856_v53  ;;  %v14927_v53 = vld [vmem:[%s23311_s1 + $0x6f4] ss:$8 sps:$4 sm:$0xff]  }
  0xd5   : > { %3731 = vmatprep.subr.bf16.mxu0 %v14864_v54  ;;  %v12641_v54 = vcombine.low %v15845_v14, %v17161_v28  ;;  %v14961_v14 = vld [vmem:[%s23311_s1 + $0x6a0] ss:$8 sps:$4 sm:$0xff]  }
  0xd7   : > { %2654 = vmatmul.mubr.bf16.vlgmr.msra.gmra.mxu0 %v12621_v23  ;;  %v12643_v23 = vcombine.low %v16824_v58, %v16827_v59  ;;  %v15847_v58 = vld [vmem:[%s16290_s29 + $0x134] sm:$0xff]  ;;  %v17194_v59 = vld [vmem:[%s16290_s29 + $0x148] sm:$0xff] }
  0xd8   : > { %2767 = vmatmul.mubr.bf16.vlgmr.msra.gmra.mxu1 %v12623_v26  ;;  %3732 = vmatpush1.bf16.msra.mxu0 %v14862_v24  ;;  %v14922_v24 = vld [vmem:[%s23311_s1 + $0x5f0] ss:$8 sps:$4 sm:$0xff]  }
  0xd9   : > { %3845 = vmatpush1.bf16.msra.mxu1 %v14865_v3  ;;  %3733 = vmatprep.subr.bf16.mxu0 %v14870_v20  ;;  %v14925_v26 = vld [vmem:[%s23311_s1 + $0x6f0] ss:$8 sps:$4 sm:$0xff]   ;;  %v14930_v3 = vld [vmem:[%s23311_s1 + $0x5e4] ss:$8 sps:$4 sm:$0xff]  }
  0xda   : > { %3846 = vmatprep.subr.bf16.mxu1 %v14873_v21  ;;  %2663 = vmatprep.mubr.bf16.mxu0 %v12627_v32  ;;  %v14933_v20 = vld [vmem:[%s23311_s1 + $0x6e4] ss:$8 sps:$4 sm:$0xff]   ;;  %v12647_v21 = vcombine.high %v15847_v58, %v17194_v59  ;;  %v14931_v32 = vld [vmem:[%s23311_s1 + $0x6e0] ss:$8 sps:$4 sm:$0xff]  }
  0xdb   : > { %2776 = vmatprep.mubr.bf16.mxu1 %v23314_v52 }
  0xdc   : > { %3734 = vmatpush1.bf16.msra.mxu0 %v14868_v40  ;;  %v14939_v40 = vld [vmem:[%s23311_s1 + $0x5d4] ss:$8 sps:$4 sm:$0xff]  }
  0xdd   : > { %3847 = vmatpush1.bf16.msra.mxu1 %v14871_v51  ;;  %3735 = vmatprep.subr.bf16.mxu0 %v14879_v34  ;;  %v14942_v51 = vld [vmem:[%s23311_s1 + $0x6d4] ss:$8 sps:$4 sm:$0xff]   ;;  %v12646_v34 = vcombine.low %v15847_v58, %v17194_v59 }
  0xde   : > { %3848 = vmatprep.subr.bf16.mxu1 %v14882_v35  ;;  %v12648_v35 = vcombine.low %v16861_v27, %v16870_v33  ;;  %v15849_v27 = vld [vmem:[%s16290_s29 + $0x170] sm:$0xff]  ;;  %v17227_v33 = vld [vmem:[%s16290_s29 + $0x184] sm:$0xff] }
  0xdf   : > { %2664 = vmatmul.mubr.bf16.gmra.mxu0 %v12626_v37  ;;  %v14937_v37 = vld [vmem:[%s23311_s1 + $0x5d0] ss:$8 sps:$4 sm:$0xff]  }
  0xe0   : > { %2777 = vmatmul.mubr.bf16.gmra.mxu1 %v12628_v39  ;;  %3736 = vmatpush1.bf16.msra.mxu0 %v14877_v38  ;;  %v14940_v38 = vld [vmem:[%s23311_s1 + $0x6d0] ss:$8 sps:$4 sm:$0xff]   ;;  %v14945_v39 = vld [vmem:[%s23311_s1 + $0x5c4] ss:$8 sps:$4 sm:$0xff]  }
  0xe1   : > { %3849 = vmatpush1.bf16.msra.mxu1 %v14880_v12  ;;  %3737 = vmatprep.subr.bf16.mxu0 %v14885_v22  ;;  %v14948_v12 = vld [vmem:[%s23311_s1 + $0x6c4] ss:$8 sps:$4 sm:$0xff]   ;;  %v12652_v22 = vcombine.high %v15849_v27, %v17227_v33 }
  0xe2   : > { %3850 = vmatprep.subr.bf16.mxu1 %v14888_v31  ;;  %2673 = vmatprep.mubr.bf16.mxu0 %v12632_v16  ;;  %v14943_v31 = vld [vmem:[%s23311_s1 + $0x5c0] ss:$8 sps:$4 sm:$0xff]   ;;  %v14954_v16 = vld [vmem:[%s23311_s1 + $0x5b4] ss:$8 sps:$4 sm:$0xff]  }
  0xe3   : > { %2786 = vmatprep.mubr.bf16.mxu1 %v23314_v52 }
  0xe4   : > { %3738 = vmatpush1.bf16.msra.mxu0 %v14883_v25  ;;  %v14952_v25 = vld [vmem:[%s23311_s1 + $0x5b0] ss:$8 sps:$4 sm:$0xff]  }
  0xe5   : > { %3851 = vmatpush1.bf16.msra.mxu1 %v14886_v36  ;;  %3739 = vmatprep.subr.bf16.mxu0 %v14894_v43  ;;  %v14957_v36 = vld [vmem:[%s23311_s1 + $0x6b4] ss:$8 sps:$4 sm:$0xff]   ;;  %v12651_v43 = vcombine.low %v15849_v27, %v17227_v33 }
  0xe6   : > { %3852 = vmatprep.subr.bf16.mxu1 %v14897_v44  ;;  %v14955_v44 = vld [vmem:[%s23311_s1 + $0x6b0] ss:$8 sps:$4 sm:$0xff]  }
  0xe7   : > { %2674 = vmatmul.mubr.bf16.gmra.mxu0 %v12631_v9  ;;  %v14960_v9 = vld [vmem:[%s23311_s1 + $0x5a4] ss:$8 sps:$4 sm:$0xff]  }
  0xe8   : > { %2787 = vmatmul.mubr.bf16.gmra.mxu1 %v12633_v18  ;;  %3740 = vmatpush1.bf16.msra.mxu0 %v14892_v45  ;;  %v15851_v18 = vld [vmem:[%s16290_s29 + $0x14] sm:$0xff] }
  0xe9   : > { %3853 = vmatpush1.bf16.msra.mxu1 %v14895_v46  ;;  %3741 = vmatprep.subr.bf16.mxu0 %v14900_v48  ;;  %v2924_v45 = vrot.slane %v15851_v18, 5  ;;  %v12653_v46 = vcombine.low %v16910_v7, %v16913_v11  ;;  %v2847_v48 = vld [vmem:[%s16290_s29] sm:$0xee]  ;;  %v15855_v7 = vld [vmem:[%s16290_s29 + $0x30] sm:$0x11]  ;;  %v2970_v18 = vrot.slane %v17095_v42, 5 }
  0xea   : > { %3854 = vmatprep.subr.bf16.mxu1 %v14903_v55  ;;  %2683 = vmatprep.mubr.bf16.mxu0 %v12637_v56  ;;  %v2928_v55 = vrot.slane %v17035_v17, 5  ;;  %v14963_v56 = vld [vmem:[%s23311_s1 + $0x6a4] ss:$8 sps:$4 sm:$0xff]   ;;  %v2938_v11 = vrot.slane %v15855_v7, 5  ;;  %v23361_v17 = vmov 0 }
  0xeb   : > { %2796 = vmatprep.mubr.bf16.mxu1 %v23314_v52  ;;  %v23362_v17 = vsel %vm17271_vm5, 4294967295, %v23361_v17  ;;  %v14979_v42 = vld [vmem:[%s23311_s1 + $0x770] ss:$8 sps:$4 sm:$0xff]  }
  0xec   : > { %3742 = vmatpush1.bf16.msra.mxu0 %v14898_v57  ;;  %v15852_v57 = vld [vmem:[%s16290_s29 + $0x1ac] sm:$0xff]  ;;  %23363 = vst [vmem:[#allocation6_spill] sm:$0xff] %v23362_v17 }
  0xed   : > { %3855 = vmatpush1.bf16.msra.mxu1 %v14901_v60  ;;  %3743 = vmatprep.subr.bf16.mxu0 %v14909_v61  ;;  %v17264_v60 = vld [vmem:[%s16290_s29 + $0x1c0] sm:$0xff] }
  0xee   : > { %3856 = vmatprep.subr.bf16.mxu1 %v14912_v63  ;;  %v12657_v61 = vcombine.high %v15852_v57, %v17264_v60  ;;  %v15854_v63 = vld [vmem:[%s16290_s29 + $0x28] sm:$0x11] }
  0xef   : > { %2684 = vmatmul.mubr.bf16.gmra.mxu0 %v12636_v1  ;;  %v2935_v1 = vrot.slane %v15854_v63, 5  ;;  %v14982_v63 = vld [vmem:[%s23311_s1 + $0x7f0] ss:$8 sps:$4 sm:$0xff]  }
  0xf0   : > { %2797 = vmatmul.mubr.bf16.gmra.mxu1 %v12638_v2  ;;  %3744 = vmatpush1.bf16.msra.mxu0 %v14907_v5  ;;  %v12739_v2 = vrot.slane %v2847_v48, 9  ;;  %v2934_v5 = vrot.slane %v2924_v45, 4 }
  0xf1   : > { %3857 = vmatpush1.bf16.msra.mxu1 %v14910_v6  ;;  %3745 = vmatprep.subr.bf16.mxu0 %v14915_v8  ;;  %v14958_v6 = vld [vmem:[%s23311_s1 + $0x5a0] ss:$8 sps:$4 sm:$0xff]   ;;  %v12740_v8 = vrot.slane %v2848_v49, 9 }
  0xf2   : > { %3858 = vmatprep.subr.bf16.mxu1 %v14918_v13  ;;  %2693 = vmatprep.mubr.bf16.mxu0 %v12642_v15  ;;  %v2937_v13 = vrot.slane %v2928_v55, 4  ;;  %v14969_v15 = vld [vmem:[%s23311_s1 + $0x594] ss:$8 sps:$4 sm:$0xff]  }
  0xf3   : > { %2806 = vmatprep.mubr.bf16.mxu1 %v23314_v52  ;;  %v17307_v58 = vsel %vm17271_vm5, %v12740_v8, %v2928_v55  ;;  %v2854_v55 = vld [vmem:[%s16290_s29 + $0x80] sm:$0xee] }
  0xf4   : > { %3746 = vmatpush1.bf16.msra.mxu0 %v14913_v29  ;;  %v14972_v29 = vld [vmem:[%s23311_s1 + $0x694] ss:$8 sps:$4 sm:$0xff]   ;;  %v12746_v8 = vrot.slane %v2854_v55, 9 }
  0xf5   : > { %3859 = vmatpush1.bf16.msra.mxu1 %v14916_v0  ;;  %3747 = vmatprep.subr.bf16.mxu0 %v14924_v19  ;;  %v15856_v0 = vld [vmem:[%s16290_s29 + $0x50] sm:$0xff] }
  0xf6   : > { %3860 = vmatprep.subr.bf16.mxu1 %v14927_v53  ;;  %v2945_v19 = vrot.slane %v15856_v0, 5  ;;  %v12656_v53 = vcombine.low %v15852_v57, %v17264_v60  ;;  %v15860_v57 = vld [vmem:[%s16290_s29 + $0xa0] sm:$0x11] }
  0xf7   : > { %2694 = vmatmul.mubr.bf16.gmra.mxu0 %v12641_v54  ;;  %v17292_v54 = vsel %vm17271_vm5, %v12739_v2, %v2924_v45  ;;  %v14990_v0 = vld [vmem:[%s23311_s1 + $0x764] ss:$8 sps:$4 sm:$0xff]  }
  0xf8   : > { %2807 = vmatmul.mubr.bf16.gmra.mxu1 %v12643_v23  ;;  %3748 = vmatpush2.bf16.msra.mxu0 %v14922_v24  ;;  %v17296_v23 = vsel %vm17271_vm5, %v2934_v5, %v2935_v1  ;;  %v2850_v24 = vld [vmem:[%s16290_s29 + $0x3c] sm:$0xee]  ;;  %v14987_v5 = vld [vmem:[%s23311_s1 + $0x7e4] ss:$8 sps:$4 sm:$0xff]  }
  0xf9   : > { %3861 = vmatpush2.bf16.msra.mxu1 %v14925_v26  ;;  %3749 = vmatprep.subr.bf16.mxu0 %v14930_v3  ;;  %v2949_v26 = vrot.slane %v17062_v30, 5  ;;  %v12658_v3 = vcombine.low %v16954_v47, %v16960_v62  ;;  %v14970_v47 = vld [vmem:[%s23311_s1 + $0x690] ss:$8 sps:$4 sm:$0xff]   ;;  %v14975_v62 = vld [vmem:[%s23311_s1 + $0x584] ss:$8 sps:$4 sm:$0xff]   ;;  %v12843_v45 = vcombine.low %v17292_v54, %v17296_v23 }
  0xfa   : > { %3862 = vmatprep.subr.bf16.mxu1 %v14933_v20  ;;  %2703 = vmatprep.mubr.bf16.mxu0 %v12647_v21  ;;  %v14967_v20 = vld [vmem:[%s23311_s1 + $0x590] ss:$8 sps:$4 sm:$0xff]   ;;  %v17311_v21 = vsel %vm17271_vm5, %v2937_v13, %v2938_v11  ;;  %v15857_v30 = vld [vmem:[%s16290_s29 + $0x64] sm:$0x11]  ;;  %v2979_v13 = vrot.slane %v2970_v18, 4 }
  0xfb   : > { %2816 = vmatprep.mubr.bf16.mxu1 %v23314_v52  ;;  %v12845_v49 = vcombine.low %v17307_v58, %v17311_v21  ;;  %v15861_v11 = vld [vmem:[%s16290_s29 + $0xa8] sm:$0x11] }
  0xfc   : > { %3750 = vmatpush2.bf16.msra.mxu0 %v14928_v4  ;;  %v2851_v4 = vld [vmem:[%s16290_s29 + $0x44] sm:$0xee]  ;;  %v2980_v2 = vrot.slane %v15861_v11, 5 }
  0xfd   : > { %3863 = vmatpush2.bf16.msra.mxu1 %v14931_v32  ;;  %3751 = vmatprep.subr.bf16.mxu0 %v14939_v40  ;;  %v2956_v32 = vrot.slane %v15857_v30, 5  ;;  %v14978_v40 = vld [vmem:[%s23311_s1 + $0x684] ss:$8 sps:$4 sm:$0xff]  }
  0xfe   : > { %3864 = vmatprep.subr.bf16.mxu1 %v14942_v51  ;;  %v12844_v51 = vcombine.high %v17292_v54, %v17296_v23  ;;  %v14988_v23 = vld [vmem:[%s23311_s1 + $0x760] ss:$8 sps:$4 sm:$0xff]   ;;  %v17418_v30 = vsel %vm17271_vm5, %v2979_v13, %v2980_v2 }
  0xff   : > { %2704 = vmatmul.mubr.bf16.gmra.mxu0 %v12646_v34  ;;  %v12742_v34 = vrot.slane %v2850_v24, 9 }
 0x100   : > { %2817 = vmatmul.mubr.bf16.gmra.mxu1 %v12648_v35  ;;  %3752 = vmatpush2.bf16.msra.mxu0 %v14937_v37  ;;  %v2955_v35 = vrot.slane %v2945_v19, 4  ;;  %v12846_v37 = vcombine.high %v17307_v58, %v17311_v21  ;;  %v14999_v58 = vld [vmem:[%s23311_s1 + $0x754] ss:$8 sps:$4 sm:$0xff]   ;;  %v2991_v21 = vrot.slane %v17128_v50, 5 }
 0x101   : > { %3865 = vmatpush2.bf16.msra.mxu1 %v14940_v38  ;;  %3753 = vmatprep.subr.bf16.mxu0 %v14945_v39  ;;  %v12743_v38 = vrot.slane %v2851_v4, 9  ;;  %v2958_v39 = vrot.slane %v2949_v26, 4 }
 0x102   : > { %3866 = vmatprep.subr.bf16.mxu1 %v14948_v12  ;;  %2713 = vmatprep.mubr.bf16.mxu0 %v12652_v22  ;;  %v15858_v12 = vld [vmem:[%s16290_s29 + $0x6c] sm:$0x11]  ;;  %v14973_v22 = vld [vmem:[%s23311_s1 + $0x580] ss:$8 sps:$4 sm:$0xff]  }
 0x103   : > { %2826 = vmatprep.mubr.bf16.mxu1 %v23314_v52  ;;  %v2959_v27 = vrot.slane %v15858_v12, 5 }
 0x104   : > { %3754 = vmatpush2.bf16.msra.mxu0 %v14943_v31  ;;  %v14976_v31 = vld [vmem:[%s23311_s1 + $0x680] ss:$8 sps:$4 sm:$0xff]  }
 0x105   : > { %3867 = vmatpush2.bf16.msra.mxu1 %v14946_v41  ;;  %3755 = vmatprep.subr.bf16.mxu0 %v14954_v16  ;;  %v15859_v41 = vld [vmem:[%s16290_s29 + $0x8c] sm:$0xff]  ;;  %v17360_v48 = vsel %vm17271_vm5, %v2958_v39, %v2959_v27 }
 0x106   : > { %3868 = vmatprep.subr.bf16.mxu1 %v14957_v36  ;;  %v2966_v16 = vrot.slane %v15859_v41, 5  ;;  %v14984_v36 = vld [vmem:[%s23311_s1 + $0x7f4] ss:$8 sps:$4 sm:$0xff]  }
 0x107   : > { %2714 = vmatmul.mubr.bf16.gmra.mxu0 %v12651_v43  ;;  %v17344_v43 = vsel %vm17271_vm5, %v12742_v34, %v2945_v19  ;;  %v17387_v19 = vld [vmem:[%s16290_s29 + $0xc8] sm:$0xff] }
 0x108   : > { %2827 = vmatmul.mubr.bf16.gmra.mxu1 %v12653_v46  ;;  %3756 = vmatpush2.bf16.msra.mxu0 %v14952_v25  ;;  %v14981_v25 = vld [vmem:[%s23311_s1 + $0x774] ss:$8 sps:$4 sm:$0xff]   ;;  %v17356_v46 = vsel %vm17271_vm5, %v12743_v38, %v2949_v26 }
 0x109   : > { %3869 = vmatpush2.bf16.msra.mxu1 %v14955_v44  ;;  %3757 = vmatprep.subr.bf16.mxu0 %v14960_v9  ;;  %v17348_v44 = vsel %vm17271_vm5, %v2955_v35, %v2956_v32  ;;  %v2853_v9 = vld [vmem:[%s16290_s29 + $0x78] sm:$0xee]  ;;  %v15863_v35 = vld [vmem:[%s16290_s29 + $0xdc] sm:$0x11]  ;;  %v12850_v12 = vcombine.low %v17356_v46, %v17360_v48 }
 0x10a   : > { %3870 = vmatprep.subr.bf16.mxu1 %v14963_v56  ;;  %2723 = vmatprep.mubr.bf16.mxu0 %v12657_v61  ;;  %v2976_v56 = vrot.slane %v2966_v16, 4  ;;  %v2977_v61 = vrot.slane %v15860_v57, 5  ;;  %v12849_v1 = vcombine.high %v17344_v43, %v17348_v44  ;;  %v12745_v7 = vrot.slane %v2853_v9, 9  ;;  %v2856_v32 = vld [vmem:[%s16290_s29 + $0xb4] sm:$0xee]  ;;  %v17440_v9 = vld [vmem:[%s16290_s29 + $0x104] sm:$0xff] }
 0x10b   : > { %2836 = vmatprep.mubr.bf16.mxu1 %v23314_v52  ;;  %v2857_v38 = vld [vmem:[%s16290_s29 + $0xbc] sm:$0xee] }
 0x10c   : > { %3758 = vmatpush2.bf16.msra.mxu0 %v14958_v6  ;;  %v12851_v6 = vcombine.high %v17356_v46, %v17360_v48  ;;  %v14996_v46 = vld [vmem:[%s23311_s1 + $0x7c4] ss:$8 sps:$4 sm:$0xff]   ;;  %v14997_v48 = vld [vmem:[%s23311_s1 + $0x750] ss:$8 sps:$4 sm:$0xff]   ;;  %v12749_v55 = vrot.slane %v2857_v38, 9 }
 0x10d   : > { %3871 = vmatpush2.bf16.msra.mxu1 %v14961_v14  ;;  %3759 = vmatprep.subr.bf16.mxu0 %v14969_v15 }
 0x10e   : > { %3872 = vmatprep.subr.bf16.mxu1 %v14972_v29  ;;  %v14985_v29 = vld [vmem:[%s23311_s1 + $0x7e0] ss:$8 sps:$4 sm:$0xff]   ;;  %v17481_v13 = vsel %vm17271_vm5, %v12749_v55, %v2991_v21  ;;  %v2862_v55 = vld [vmem:[%s16290_s29 + $0x12c] sm:$0xee] }
 0x10f   : > { %2724 = vmatmul.mubr.bf16.gmra.mxu0 %v12656_v53  ;;  %v2987_v53 = vrot.slane %v17387_v19, 5 }
 0x110   : > { %2837 = vmatmul.mubr.bf16.gmra.mxu1 %v12658_v3  ;;  %3760 = vmatpush2.bf16.msra.mxu0 %v14967_v20  ;;  %v17397_v3 = vsel %vm17271_vm5, %v12745_v7, %v2966_v16  ;;  %v17401_v20 = vsel %vm17271_vm5, %v2976_v56, %v2977_v61  ;;  %v15008_v56 = vld [vmem:[%s23311_s1 + $0x744] ss:$8 sps:$4 sm:$0xff]   ;;  %v14994_v61 = vld [vmem:[%s23311_s1 + $0x7c0] ss:$8 sps:$4 sm:$0xff]   ;;  %v15002_v7 = vld [vmem:[%s23311_s1 + $0x7b4] ss:$8 sps:$4 sm:$0xff]  }
 0x111   : > { %3873 = vmatpush2.bf16.msra.mxu1 %v14970_v47  ;;  %3761 = vmatprep.subr.bf16.mxu0 %v14975_v62  ;;  %v14993_v47 = vld [vmem:[%s23311_s1 + $0x7d4] ss:$8 sps:$4 sm:$0xff]   ;;  %v17414_v62 = vsel %vm17271_vm5, %v12746_v8, %v2970_v18  ;;  %v2997_v34 = vrot.slane %v2987_v53, 4  ;;  %v12854_v27 = vcombine.high %v17397_v3, %v17401_v20  ;;  %v3008_v18 = vrot.slane %v17440_v9, 5 }
 0x112   : > { %3874 = vmatprep.subr.bf16.mxu1 %v14978_v40  ;;  %3763 = vmatprep.mubr.bf16.mxu0 %v12844_v51  ;;  %v12848_v51 = vcombine.low %v17344_v43, %v17348_v44  ;;  %v12748_v43 = vrot.slane %v2856_v32, 9  ;;  %v3000_v44 = vrot.slane %v2991_v21, 4 }
 0x113   : > { %3876 = vmatprep.mubr.bf16.mxu1 %v12846_v37  ;;  %v2998_v37 = vrot.slane %v15863_v35, 5  ;;  %v15005_v35 = vld [vmem:[%s23311_s1 + $0x7a4] ss:$8 sps:$4 sm:$0xff]  }
 0x114   : > { %3762 = vmatpush2.bf16.msra.mxu0 %v14973_v22  ;;  %v15864_v22 = vld [vmem:[%s16290_s29 + $0xe4] sm:$0x11]  ;;  %v17466_v11 = vsel %vm17271_vm5, %v12748_v43, %v2987_v53 }
 0x115   : > { %3875 = vmatpush2.bf16.msra.mxu1 %v14976_v31  ;;  %3957 = vmatprep.subr.bf16.mxu0 %v14981_v25  ;;  %v3001_v31 = vrot.slane %v15864_v22, 5  ;;  %v14991_v25 = vld [vmem:[%s23311_s1 + $0x7d0] ss:$8 sps:$4 sm:$0xff]   ;;  %v17470_v2 = vsel %vm17271_vm5, %v2997_v34, %v2998_v37 }
 0x116   : > { %4843 = vmatprep.subr.bf16.mxu1 %v14984_v36  ;;  %v12856_v36 = vcombine.high %v17414_v62, %v17418_v30  ;;  %v15000_v34 = vld [vmem:[%s23311_s1 + $0x7b0] ss:$8 sps:$4 sm:$0xff]  }
 0x117   : > { %v1595_v14 = vpop.f32.mrf.mxu0  ;;  %3764 = vmatmul.mubr.bf16.vlgmr.msra.gmra.mxu0 %v12843_v45 }
 0x118   : > { %v1708_v15 = vpop.f32.mrf.mxu1  ;;  %3877 = vmatmul.mubr.bf16.vlgmr.msra.gmra.mxu1 %v12845_v49  ;;  %3958 = vmatpush1.bf16.msra.mxu0 %v14979_v42 }
 0x119   : > { %v17390_v54 = vadd.f32 %v1708_v15, %v1595_v14  ;;  %4844 = vmatpush1.bf16.msra.mxu1 %v14982_v63  ;;  %v1597_v24 = vpop.f32.mrf.mxu0  ;;  %3773 = vmatprep.mubr.bf16.mxu0 %v12849_v1  ;;  %v17485_v14 = vsel %vm17271_vm5, %v3000_v44, %v3001_v31  ;;  %v2859_v15 = vld [vmem:[%s16290_s29 + $0xf0] sm:$0xee] }
 0x11a   : > { %v1710_v26 = vpop.f32.mrf.mxu1  ;;  %4845 = vmatprep.subr.bf16.mxu1 %v14987_v5  ;;  %3886 = vmatprep.mubr.bf16.mxu1 %v12851_v6  ;;  %v15006_v5 = vld [vmem:[%s23311_s1 + $0x740] ss:$8 sps:$4 sm:$0xff]   ;;  %v3018_v6 = vrot.slane %v3008_v18, 4 }
 0x11b   : > { %v17407_v4 = vadd.f32 %v1710_v26, %v1597_v24  ;;  %v1599_v40 = vpop.f32.mrf.mxu0  ;;  %3959 = vmatprep.subr.bf16.mxu0 %v14990_v0  ;;  %v3012_v0 = vrot.slane %v17161_v28, 5  ;;  %v15866_v24 = vld [vmem:[%s16290_s29 + $0x118] sm:$0x11]  ;;  %v12859_v28 = vcombine.high %v17466_v11, %v17470_v2 }
 0x11c   : > { %v1712_v50 = vpop.f32.mrf.mxu1  ;;  %3960 = vmatpush1.bf16.msra.mxu0 %v14988_v23  ;;  %v12853_v23 = vcombine.low %v17397_v3, %v17401_v20  ;;  %v3019_v26 = vrot.slane %v15866_v24, 5  ;;  %v15009_v24 = vld [vmem:[%s23311_s1 + $0x790] ss:$8 sps:$4 sm:$0xff]  }
 0x11d   : > { %v17427_v39 = vadd.f32 %v1712_v50, %v1599_v40  ;;  %4846 = vmatpush1.bf16.msra.mxu1 %v14985_v29  ;;  %v1601_v41 = vpop.f32.mrf.mxu0  ;;  %3961 = vmatprep.subr.bf16.mxu0 %v14999_v58  ;;  %v2860_v29 = vld [vmem:[%s16290_s29 + $0xf8] sm:$0xee]  ;;  %v15867_v58 = vld [vmem:[%s16290_s29 + $0x120] sm:$0x11]  ;;  %v12855_v40 = vcombine.low %v17414_v62, %v17418_v30  ;;  %v12861_v62 = vcombine.high %v17481_v13, %v17485_v14  ;;  %v12751_v30 = vrot.slane %v2859_v15, 9 }
 0x11e   : > { %v1714_v16 = vpop.f32.mrf.mxu1  ;;  %4847 = vmatprep.subr.bf16.mxu1 %v14993_v47  ;;  %v3022_v21 = vrot.slane %v15867_v58, 5  ;;  %v15017_v47 = vld [vmem:[%s23311_s1 + $0x734] ss:$8 sps:$4 sm:$0xff]   ;;  %v17504_v50 = vld [vmem:[%s16290_s29 + $0x140] sm:$0xff]  ;;  %v12752_v38 = vrot.slane %v2860_v29, 9  ;;  %v12754_v58 = vrot.slane %v2862_v55, 9 }
 0x11f   : > { %v17443_v45 = vadd.f32 %v1714_v16, %v1601_v41  ;;  %v1605_v49 = vpop.f32.mrf.mxu0  ;;  %3774 = vmatmul.mubr.bf16.gmra.mxu0 %v12848_v51  ;;  %v3029_v3 = vrot.slane %v17504_v50, 5  ;;  %v15026_v41 = vld [vmem:[%s23311_s1 + $0x724] ss:$8 sps:$4 sm:$0xff]   ;;  %v15035_v15 = vld [vmem:[%s23311_s1 + $0x714] ss:$8 sps:$4 sm:$0xff]  }
 0x120   : > { %v1718_v42 = vpop.f32.mrf.mxu1  ;;  %3887 = vmatmul.mubr.bf16.gmra.mxu1 %v12850_v12  ;;  %3783 = vmatprep.mubr.bf16.mxu0 %v12854_v27  ;;  %v3021_v12 = vrot.slane %v3012_v0, 4  ;;  %v15015_v27 = vld [vmem:[%s23311_s1 + $0x730] ss:$8 sps:$4 sm:$0xff]  }
 0x121   : > { %v17454_v57 = vadd.f32 %v1718_v42, %v1605_v49  ;;  %4848 = vmatpush1.bf16.msra.mxu1 %v14991_v25  ;;  %v1607_v63 = vpop.f32.mrf.mxu0  ;;  %3896 = vmatprep.mubr.bf16.mxu1 %v12856_v36  ;;  %v15003_v25 = vld [vmem:[%s23311_s1 + $0x7a0] ss:$8 sps:$4 sm:$0xff]   ;;  %v15011_v36 = vld [vmem:[%s23311_s1 + $0x794] ss:$8 sps:$4 sm:$0xff]   ;;  %v3033_v49 = vrot.slane %v17194_v59, 5 }
 0x122   : > { %v1720_v1 = vpop.f32.mrf.mxu1  ;;  %4849 = vmatprep.subr.bf16.mxu1 %v14996_v46  ;;  %3962 = vmatpush1.bf16.msra.mxu0 %v14997_v48  ;;  %v17535_v46 = vsel %vm17271_vm5, %v12751_v30, %v3008_v18  ;;  %v17539_v48 = vsel %vm17271_vm5, %v3018_v6, %v3019_v26  ;;  %v17551_v9 = vsel %vm17271_vm5, %v3021_v12, %v3022_v21  ;;  %v3039_v18 = vrot.slane %v3029_v3, 4  ;;  %v15024_v59 = vld [vmem:[%s23311_s1 + $0x720] ss:$8 sps:$4 sm:$0xff]   ;;  %v2863_v6 = vld [vmem:[%s16290_s29 + $0x134] sm:$0xee] }
 0x123   : > { %v17477_v8 = vadd.f32 %v1720_v1, %v1607_v63  ;;  %v1609_v19 = vpop.f32.mrf.mxu0  ;;  %3963 = vmatprep.subr.bf16.mxu0 %v15008_v56  ;;  %v17547_v56 = vsel %vm17271_vm5, %v12752_v38, %v3012_v0  ;;  %v12858_v1 = vcombine.low %v17466_v11, %v17470_v2  ;;  %v12860_v0 = vcombine.low %v17481_v13, %v17485_v14  ;;  %v15014_v13 = vld [vmem:[%s23311_s1 + $0x784] ss:$8 sps:$4 sm:$0xff]   ;;  %v15020_v38 = vld [vmem:[%s23311_s1 + $0x874] ss:$8 sps:$4 sm:$0xff]  }
 0x124   : > { %v1722_v53 = vpop.f32.mrf.mxu1  ;;  %v12866_v26 = vcombine.high %v17547_v56, %v17551_v9  ;;  %v3042_v21 = vrot.slane %v3033_v49, 4  ;;  %v12755_v14 = vrot.slane %v2863_v6, 9  ;;  %v17600_v12 = vsel %vm17271_vm5, %v12754_v58, %v3029_v3  ;;  %v2865_v3 = vld [vmem:[%s16290_s29 + $0x168] sm:$0xee]  ;;  %v15874_v58 = vld [vmem:[%s16290_s29 + $0x1b8] sm:$0xff] }
 0x125   : > { %v17497_v32 = vadd.f32 %v1722_v53, %v1609_v19  ;;  %4850 = vmatpush1.bf16.msra.mxu1 %v14994_v61  ;;  %v1611_v20 = vpop.f32.mrf.mxu0  ;;  %v12864_v19 = vcombine.high %v17535_v46, %v17539_v48  ;;  %v15870_v53 = vld [vmem:[%s16290_s29 + $0x15c] sm:$0x11] }
 0x126   : > { %v1724_v51 = vpop.f32.mrf.mxu1  ;;  %4851 = vmatprep.subr.bf16.mxu1 %v15002_v7  ;;  %3964 = vmatpush1.bf16.msra.mxu0 %v15006_v5  ;;  %v15869_v7 = vld [vmem:[%s16290_s29 + $0x154] sm:$0x11] }
 0x127   : > { %v17515_v37 = vadd.f32 %v1724_v51, %v1611_v20  ;;  %v1615_v22 = vpop.f32.mrf.mxu0  ;;  %3784 = vmatmul.mubr.bf16.gmra.mxu0 %v12853_v23  ;;  %3965 = vmatprep.subr.bf16.mxu0 %v15017_v47  ;;  %v3040_v5 = vrot.slane %v15869_v7, 5  ;;  %v3043_v23 = vrot.slane %v15870_v53, 5  ;;  %v15044_v51 = vld [vmem:[%s23311_s1 + $0x704] ss:$8 sps:$4 sm:$0xff]  }
 0x128   : > { %v1728_v31 = vpop.f32.mrf.mxu1  ;;  %3897 = vmatmul.mubr.bf16.gmra.mxu1 %v12855_v40  ;;  %3793 = vmatprep.mubr.bf16.mxu0 %v12859_v28  ;;  %v15033_v40 = vld [vmem:[%s23311_s1 + $0x710] ss:$8 sps:$4 sm:$0xff]  }
 0x129   : > { %v17523_v16 = vadd.f32 %v1728_v31, %v1615_v22  ;;  %4852 = vmatpush1.bf16.msra.mxu1 %v15000_v34  ;;  %v1617_v43 = vpop.f32.mrf.mxu0  ;;  %3906 = vmatprep.mubr.bf16.mxu1 %v12861_v62  ;;  %v15871_v22 = vld [vmem:[%s16290_s29 + $0x17c] sm:$0xff]  ;;  %v17616_v50 = vsel %vm17271_vm5, %v3042_v21, %v3043_v23  ;;  %v3071_v21 = vrot.slane %v15874_v58, 5 }
 0x12a   : > { %v1730_v44 = vpop.f32.mrf.mxu1  ;;  %4853 = vmatprep.subr.bf16.mxu1 %v15005_v35  ;;  %3966 = vmatpush1.bf16.msra.mxu0 %v15015_v27  ;;  %v15012_v35 = vld [vmem:[%s23311_s1 + $0x780] ss:$8 sps:$4 sm:$0xff]   ;;  %v17604_v27 = vsel %vm17271_vm5, %v3039_v18, %v3040_v5  ;;  %v3050_v31 = vrot.slane %v15871_v22, 5  ;;  %v12863_v18 = vcombine.low %v17535_v46, %v17539_v48  ;;  %v15018_v46 = vld [vmem:[%s23311_s1 + $0x870] ss:$8 sps:$4 sm:$0xff]   ;;  %v12757_v5 = vrot.slane %v2865_v3, 9 }
 0x12b   : > { %v17543_v42 = vadd.f32 %v1730_v44, %v1617_v43  ;;  %v1619_v61 = vpop.f32.mrf.mxu0  ;;  %3967 = vmatprep.subr.bf16.mxu0 %v15026_v41  ;;  %v3054_v41 = vrot.slane %v17227_v33, 5  ;;  %v2866_v43 = vld [vmem:[%s16290_s29 + $0x170] sm:$0xee]  ;;  %v15042_v44 = vld [vmem:[%s23311_s1 + $0x700] ss:$8 sps:$4 sm:$0xff]  }
 0x12c   : > { %v1732_v63 = vpop.f32.mrf.mxu1  ;;  %v3060_v6 = vrot.slane %v3050_v31, 4  ;;  %v15873_v23 = vld [vmem:[%s16290_s29 + $0x198] sm:$0x11]  ;;  %v2868_v22 = vld [vmem:[%s16290_s29 + $0x1a4] sm:$0xee] }
 0x12d   : > { %v17565_v29 = vadd.f32 %v1732_v63, %v1619_v61  ;;  %4854 = vmatpush1.bf16.msra.mxu1 %v15003_v25  ;;  %v1621_v11 = vpop.f32.mrf.mxu0  ;;  %v12865_v61 = vcombine.low %v17547_v56, %v17551_v9  ;;  %v12869_v63 = vcombine.high %v17600_v12, %v17604_v27  ;;  %v15023_v9 = vld [vmem:[%s23311_s1 + $0x864] ss:$8 sps:$4 sm:$0xff]   ;;  %v3063_v53 = vrot.slane %v3054_v41, 4 }
 0x12e   : > { %v1734_v2 = vpop.f32.mrf.mxu1  ;;  %4855 = vmatprep.subr.bf16.mxu1 %v15011_v36  ;;  %3968 = vmatpush1.bf16.msra.mxu0 %v15024_v59  ;;  %v17612_v36 = vsel %vm17271_vm5, %v12755_v14, %v3033_v49  ;;  %v15056_v49 = vld [vmem:[%s23311_s1 + $0x8f4] ss:$8 sps:$4 sm:$0xff]  }
 0x12f   : > { %v17577_v47 = vadd.f32 %v1734_v2, %v1621_v11  ;;  %v1625_v28 = vpop.f32.mrf.mxu0  ;;  %3794 = vmatmul.mubr.bf16.gmra.mxu0 %v12858_v1  ;;  %3969 = vmatprep.subr.bf16.mxu0 %v15035_v15  ;;  %v12871_v48 = vcombine.high %v17612_v36, %v17616_v50  ;;  %v15872_v15 = vld [vmem:[%s16290_s29 + $0x190] sm:$0x11]  ;;  %v3064_v11 = vrot.slane %v15873_v23, 5 }
 0x130   : > { %v1738_v20 = vpop.f32.mrf.mxu1  ;;  %3907 = vmatmul.mubr.bf16.gmra.mxu1 %v12860_v0  ;;  %3803 = vmatprep.mubr.bf16.mxu0 %v12864_v19  ;;  %v3061_v0 = vrot.slane %v15872_v15, 5  ;;  %v12758_v19 = vrot.slane %v2866_v43, 9  ;;  %v12868_v43 = vcombine.low %v17600_v12, %v17604_v27  ;;  %v12760_v12 = vrot.slane %v2868_v22, 9  ;;  %v15875_v27 = vld [vmem:[%s16290_s29 + $0x1cc] sm:$0x11] }
 0x131   : > { %v17588_v34 = vadd.f32 %v1738_v20, %v1625_v28  ;;  %4856 = vmatpush1.bf16.msra.mxu1 %v15009_v24  ;;  %v1627_v62 = vpop.f32.mrf.mxu0  ;;  %3916 = vmatprep.mubr.bf16.mxu1 %v12866_v26  ;;  %v15029_v28 = vld [vmem:[%s23311_s1 + $0x854] ss:$8 sps:$4 sm:$0xff]   ;;  %v17657_v20 = vsel %vm17271_vm5, %v12757_v5, %v3050_v31 }
 0x132   : > { %v1740_v30 = vpop.f32.mrf.mxu1  ;;  %4857 = vmatprep.subr.bf16.mxu1 %v15014_v13  ;;  %3970 = vmatpush1.bf16.msra.mxu0 %v15033_v40  ;;  %v15021_v40 = vld [vmem:[%s23311_s1 + $0x860] ss:$8 sps:$4 sm:$0xff]   ;;  %v3072_v23 = vsel %vm17271_vm5, %v12760_v12, %v3071_v21  ;;  %v15047_v12 = vld [vmem:[%s23311_s1 + $0x814] ss:$8 sps:$4 sm:$0xff]  }
 0x133   : > { %v17608_v25 = vadd.f32 %v1740_v30, %v1627_v62  ;;  %v1629_v33 = vpop.f32.mrf.mxu0  ;;  %3971 = vmatprep.subr.bf16.mxu0 %v15044_v51  ;;  %v17661_v51 = vsel %vm17271_vm5, %v3060_v6, %v3061_v0  ;;  %v17668_v30 = vsel %vm17271_vm5, %v12758_v19, %v3054_v41 }
 0x134   : > { %v1742_v55 = vpop.f32.mrf.mxu1  ;;  %v12874_v41 = vcombine.high %v17657_v20, %v17661_v51 }
 0x135   : > { %v17628_v59 = vadd.f32 %v1742_v55, %v1629_v33  ;;  %4858 = vmatpush1.bf16.msra.mxu1 %v15012_v35  ;;  %v1631_v1 = vpop.f32.mrf.mxu0  ;;  %v3075_v35 = vrot.slane %v17264_v60, 5  ;;  %v12870_v33 = vcombine.low %v17612_v36, %v17616_v50  ;;  %v3081_v55 = vrot.slane %v3071_v21, 4  ;;  %v15032_v36 = vld [vmem:[%s23311_s1 + $0x844] ss:$8 sps:$4 sm:$0xff]  }
 0x136   : > { %v1744_v7 = vpop.f32.mrf.mxu1  ;;  %4859 = vmatprep.subr.bf16.mxu1 %v15020_v38  ;;  %3972 = vmatpush1.bf16.msra.mxu0 %v15042_v44  ;;  %v3065_v38 = vsel %vm17271_vm5, %v3063_v53, %v3064_v11  ;;  %v2869_v44 = vld [vmem:[%s16290_s29 + $0x1ac] sm:$0xee]  ;;  %v15030_v53 = vld [vmem:[%s23311_s1 + $0x840] ss:$8 sps:$4 sm:$0xff]   ;;  %v12873_v21 = vcombine.low %v17657_v20, %v17661_v51 }
 0x137   : > { %v17640_v56 = vadd.f32 %v1744_v7, %v1631_v1  ;;  %v1635_v2 = vpop.f32.mrf.mxu0  ;;  %3804 = vmatmul.mubr.bf16.gmra.mxu0 %v12863_v18  ;;  %4956 = vmatprep.subr.bf16.mxu0 %v15056_v49  ;;  %v3082_v1 = vrot.slane %v15875_v27, 5  ;;  %v15876_v7 = vld [vmem:[%s16290_s29 + $0x1d4] sm:$0x11]  ;;  %v12761_v50 = vrot.slane %v2869_v44, 9  ;;  %v3084_v5 = vrot.slane %v3075_v35, 4 }
 0x138   : > { %v1748_v24 = vpop.f32.mrf.mxu1  ;;  %3917 = vmatmul.mubr.bf16.gmra.mxu1 %v12865_v61  ;;  %3813 = vmatprep.mubr.bf16.mxu0 %v12869_v63  ;;  %v15027_v61 = vld [vmem:[%s23311_s1 + $0x850] ss:$8 sps:$4 sm:$0xff]   ;;  %v12876_v63 = vcombine.high %v17668_v30, %v3065_v38  ;;  %v12875_v22 = vcombine.low %v17668_v30, %v3065_v38  ;;  %v15041_v20 = vld [vmem:[%s23311_s1 + $0x824] ss:$8 sps:$4 sm:$0xff]  }
 0x139   : > { %v17646_v26 = vadd.f32 %v1748_v24, %v1635_v2  ;;  %4860 = vmatpush2.bf16.msra.mxu1 %v15018_v46  ;;  %v1637_v13 = vpop.f32.mrf.mxu0  ;;  %3926 = vmatprep.mubr.bf16.mxu1 %v12871_v48  ;;  %v3085_v46 = vrot.slane %v15876_v7, 5  ;;  %v3083_v11 = vsel %vm17271_vm5, %v3081_v55, %v3082_v1  ;;  %v15038_v24 = vld [vmem:[%s23311_s1 + $0x834] ss:$8 sps:$4 sm:$0xff]   ;;  %v3076_v58 = vsel %vm17271_vm5, %v12761_v50, %v3075_v35  ;;  %v15036_v35 = vld [vmem:[%s23311_s1 + $0x830] ss:$8 sps:$4 sm:$0xff]  }
 0x13a   : > { %v1750_v14 = vpop.f32.mrf.mxu1  ;;  %4861 = vmatprep.subr.bf16.mxu1 %v15023_v9  ;;  %v15877_v30 = vld [vmem:[%s16290_s29 + $0x24] sm:$0xf]  ;;  %v15039_v55 = vld [vmem:[%s23311_s1 + $0x820] ss:$8 sps:$4 sm:$0xff]   ;;  %v15878_v27 = vld [vmem:[%s16290_s29 + $0x38] sm:$0x1] }
 0x13b   : > { %v17664_v62 = vadd.f32 %v1750_v14, %v1637_v13  ;;  %v1639_v31 = vpop.f32.mrf.mxu0  ;;  %v3086_v13 = vsel %vm17271_vm5, %v3084_v5, %v3085_v46  ;;  %v2932_v38 = vrot.slane %v15877_v30, 5  ;;  %v2941_v1 = vrot.slane %v15878_v27, 5  ;;  %v15880_v30 = vld [vmem:[%s16290_s29 + $0x74] sm:$0x1]  ;;  %v15054_v27 = vld [vmem:[%s23311_s1 + $0x8f0] ss:$8 sps:$4 sm:$0xff]  }
 0x13c   : > { %v1752_v3 = vpop.f32.mrf.mxu1  ;;  %v12881_v44 = vcombine.high %v3076_v58, %v3086_v13  ;;  %v12880_v5 = vcombine.low %v3076_v58, %v3086_v13  ;;  %v15879_v13 = vld [vmem:[%s16290_s29 + $0x60] sm:$0xf] }
 0x13d   : > { %v17676_v60 = vadd.f32 %v1752_v3, %v1639_v31  ;;  %4862 = vmatpush2.bf16.msra.mxu1 %v15021_v40  ;;  %v1641_v18 = vpop.f32.mrf.mxu0  ;;  %v12879_v31 = vcombine.high %v3072_v23, %v3083_v11 }
 0x13e   : > { %v1754_v49 = vpop.f32.mrf.mxu1  ;;  %4863 = vmatprep.subr.bf16.mxu1 %v15029_v28 }
 0x13f   : > { %v17688_v48 = vadd.f32 %v1754_v49, %v1641_v18  ;;  %v1645_v6 = vpop.f32.mrf.mxu0  ;;  %3814 = vmatmul.mubr.bf16.gmra.mxu0 %v12868_v43 }
 0x140   : > { %v1758_v15 = vpop.f32.mrf.mxu1  ;;  %3927 = vmatmul.mubr.bf16.gmra.mxu1 %v12870_v33  ;;  %3823 = vmatprep.mubr.bf16.mxu0 %v12874_v41 }
 0x141   : > { %v17693_v0 = vadd.f32 %v1758_v15, %v1645_v6  ;;  %4864 = vmatpush2.bf16.msra.mxu1 %v15027_v61  ;;  %v1647_v9 = vpop.f32.mrf.mxu0  ;;  %3936 = vmatprep.mubr.bf16.mxu1 %v12876_v63  ;;  %v2849_v61 = vld [vmem:[%s16290_s29 + $0x10] sm:$0xe] }
 0x142   : > { %v1760_v19 = vpop.f32.mrf.mxu1  ;;  %4865 = vmatprep.subr.bf16.mxu1 %v15032_v36  ;;  %v12878_v36 = vcombine.low %v3072_v23, %v3083_v11  ;;  %v15045_v6 = vld [vmem:[%s23311_s1 + $0x810] ss:$8 sps:$4 sm:$0xff]   ;;  %v12741_v15 = vrot.slane %v2849_v61, 9  ;;  %v15050_v23 = vld [vmem:[%s23311_s1 + $0x804] ss:$8 sps:$4 sm:$0xff]  }
 0x143   : > { %v17702_v2 = vadd.f32 %v1760_v19, %v1647_v9  ;;  %v1649_v14 = vpop.f32.mrf.mxu0  ;;  %v2940_v9 = vrot.slane %v2932_v38, 4 }
 0x144   : > { %v1762_v40 = vpop.f32.mrf.mxu1 }
 0x145   : > { %v17713_v28 = vadd.f32 %v1762_v40, %v1649_v14  ;;  %4866 = vmatpush2.bf16.msra.mxu1 %v15030_v53  ;;  %v1651_v3 = vpop.f32.mrf.mxu0  ;;  %v2953_v40 = vrot.slane %v15879_v13, 5 }
 0x146   : > { %v1764_v43 = vpop.f32.mrf.mxu1  ;;  %4867 = vmatprep.subr.bf16.mxu1 %v15038_v24  ;;  %v15053_v24 = vld [vmem:[%s16290_s29 + $0x40] ss:$20 sps:$4 sm:$0xff]  }
 0x147   : > { %v17719_v33 = vadd.f32 %v1764_v43, %v1651_v3  ;;  %v1655_v51 = vpop.f32.mrf.mxu0  ;;  %3824 = vmatmul.mubr.bf16.gmra.mxu0 %v12873_v21  ;;  %v2942_v3 = vsel %vm17271_vm5, %v2940_v9, %v2941_v1  ;;  %v15057_v1 = vld [vmem:[%s23311_s1 + $0x9f0] ss:$8 sps:$4 sm:$0xff]   ;;  %v15881_v9 = vld [vmem:[%s16290_s29 + $0x9c] sm:$0xf] }
 0x148   : > { %v1768_v41 = vpop.f32.mrf.mxu1  ;;  %3937 = vmatmul.mubr.bf16.gmra.mxu1 %v12875_v22  ;;  %3833 = vmatprep.mubr.bf16.mxu0 %v12879_v31  ;;  %v15048_v22 = vld [vmem:[%s23311_s1 + $0x800] ss:$8 sps:$4 sm:$0xff]   ;;  %v2933_v31 = vsel %vm17271_vm5, %v12741_v15, %v2932_v38  ;;  %v15065_v15 = vld [vmem:[%s16290_s29 + $0x7c] ss:$20 sps:$4 sm:$0xff]  }
 0x149   : > { %v17728_v18 = vadd.f32 %v1768_v41, %v1655_v51  ;;  %4868 = vmatpush2.bf16.msra.mxu1 %v15036_v35  ;;  %v1657_v49 = vpop.f32.mrf.mxu0  ;;  %3946 = vmatprep.mubr.bf16.mxu1 %v12881_v44  ;;  %v2852_v44 = vld [vmem:[%s16290_s29 + $0x4c] sm:$0xe]  ;;  %v15059_v51 = vld [vmem:[%s23311_s1 + $0x9f4] ss:$8 sps:$4 sm:$0xff]   ;;  %v2962_v41 = vrot.slane %v15880_v30, 5  ;;  %v12847_v61 = vcombine.low %v2933_v31, %v2942_v3 }
 0x14a   : > { %v1770_v63 = vpop.f32.mrf.mxu1  ;;  %4869 = vmatprep.subr.bf16.mxu1 %v15041_v20  ;;  %v15068_v3 = vld [vmem:[%s23311_s1 + $0x8d4] ss:$8 sps:$4 sm:$0xff]  }
 0x14b   : > { %v17735_v7 = vadd.f32 %v1770_v63, %v1657_v49  ;;  %v1659_v46 = vpop.f32.mrf.mxu0  ;;  %v15051_v49 = vld [vmem:[%s16290_s29 + $0x3c] ss:$20 sps:$4 sm:$0xff]   ;;  %v2961_v63 = vrot.slane %v2953_v40, 4 }
 0x14c   : > { %v1772_v50 = vpop.f32.mrf.mxu1  ;;  %v15083_v30 = vld [vmem:[%s23311_s1 + $0x9d4] ss:$8 sps:$4 sm:$0xff]  }
 0x14d   : > { %v17740_v19 = vadd.f32 %v1772_v50, %v1659_v46  ;;  %4870 = vmatpush2.bf16.msra.mxu1 %v15039_v55  ;;  %v1661_v53 = vpop.f32.mrf.mxu0  ;;  %v12744_v46 = vrot.slane %v2852_v44, 9  ;;  %v2963_v31 = vsel %vm17271_vm5, %v2961_v63, %v2962_v41  ;;  %v2855_v44 = vld [vmem:[%s16290_s29 + $0x88] sm:$0xe]  ;;  %v15882_v41 = vld [vmem:[%s16290_s29 + $0xb0] sm:$0x1] }
 0x14e   : > { %v1774_v14 = vpop.f32.mrf.mxu1  ;;  %4871 = vmatprep.subr.bf16.mxu1 %v15047_v12 }
 0x14f   : > { %v17746_v11 = vadd.f32 %v1774_v14, %v1661_v53  ;;  %v1665_v58 = vpop.f32.mrf.mxu0  ;;  %3834 = vmatmul.mubr.bf16.gmra.mxu0 %v12878_v36  ;;  %v2974_v53 = vrot.slane %v15881_v9, 5 }
 0x150   : > { %v1778_v21 = vpop.f32.mrf.mxu1  ;;  %3947 = vmatmul.mubr.bf16.gmra.mxu1 %v12880_v5  ;;  %3989 = vmatprep.mubr.bf16.mxu0 %v23314_v52  ;;  %v15062_v5 = vld [vmem:[%s23311_s1 + $0x8e4] ss:$8 sps:$4 sm:$0xff]  }
 0x151   : > { %v17757_v43 = vadd.f32 %v1778_v21, %v1665_v58  ;;  %4872 = vmatpush2.bf16.msra.mxu1 %v15045_v6  ;;  %v1667_v35 = vpop.f32.mrf.mxu0  ;;  %4875 = vmatprep.mubr.bf16.mxu1 %v15053_v24  ;;  %v15071_v58 = vld [vmem:[%s23311_s1 + $0x9e4] ss:$8 sps:$4 sm:$0xff]   ;;  %v2982_v63 = vrot.slane %v2974_v53, 4 }
 0x152   : > { %v1780_v20 = vpop.f32.mrf.mxu1  ;;  %4873 = vmatprep.subr.bf16.mxu1 %v15050_v23  ;;  %v15060_v23 = vld [vmem:[%s23311_s1 + $0x8e0] ss:$8 sps:$4 sm:$0xff]  }
 0x153   : > { %v17764_v55 = vadd.f32 %v1780_v20, %v1667_v35  ;;  %v1669_v38 = vpop.f32.mrf.mxu0 }
 0x154   : > { %v1782_v12 = vpop.f32.mrf.mxu1 }
 0x155   : > { %v17773_v36 = vadd.f32 %v1782_v12, %v1669_v38  ;;  %4874 = vmatpush2.bf16.msra.mxu1 %v15048_v22  ;;  %v1671_v50 = vpop.f32.mrf.mxu0  ;;  %v2954_v22 = vsel %vm17271_vm5, %v12744_v46, %v2953_v40  ;;  %v2983_v38 = vrot.slane %v15882_v41, 5  ;;  %v15066_v46 = vld [vmem:[%s23311_s1 + $0x8d0] ss:$8 sps:$4 sm:$0xff]  }
 0x156   : > { %v1784_v6 = vpop.f32.mrf.mxu1  ;;  %5069 = vmatprep.subr.bf16.mxu1 %v15059_v51 }
 0x157   : > { %v17780_v24 = vadd.f32 %v1784_v6, %v1671_v50  ;;  %v1821_v14 = vpop.f32.mrf.mxu0  ;;  %3990 = vmatmul.mubr.bf16.vlgmr.msra.gmra.mxu0 %v12847_v61  ;;  %v12852_v61 = vcombine.low %v2954_v22, %v2963_v31  ;;  %v12747_v50 = vrot.slane %v2855_v44, 9  ;;  %v15074_v6 = vld [vmem:[%s23311_s1 + $0x8c4] ss:$8 sps:$4 sm:$0xff]   ;;  %v2984_v22 = vsel %vm17271_vm5, %v2982_v63, %v2983_v38 }
 0x158   : > { %v1822_v13 = vadd.f32 %v1821_v14, %v17390_v54  ;;  %v2542_v21 = vpop.f32.mrf.mxu1  ;;  %4876 = vmatmul.mubr.bf16.vlgmr.msra.gmra.mxu1 %v15051_v49  ;;  %4957 = vmatpush1.bf16.msra.mxu0 %v15054_v27  ;;  %v15069_v54 = vld [vmem:[%s23311_s1 + $0x9e0] ss:$8 sps:$4 sm:$0xff]   ;;  %v15095_v31 = vld [vmem:[%s23311_s1 + $0x9c4] ss:$8 sps:$4 sm:$0xff]  }
 0x159   : > { %5070 = vmatpush1.bf16.msra.mxu1 %v15057_v1  ;;  %v1823_v35 = vpop.f32.mrf.mxu0  ;;  %4958 = vmatprep.subr.bf16.mxu0 %v15062_v5  ;;  %v15063_v1 = vld [vmem:[%s16290_s29 + $0x78] ss:$20 sps:$4 sm:$0xff]   ;;  %v2975_v44 = vsel %vm17271_vm5, %v12747_v50, %v2974_v53  ;;  %v15093_v53 = vld [vmem:[%s23311_s1 + $0x9c0] ss:$8 sps:$4 sm:$0xff]  }
 0x15a   : > { %v17800_v20 = vadd.f32 %v2542_v21, %v1822_v13  ;;  %v1824_v40 = vadd.f32 %v1823_v35, %v17407_v4  ;;  %v2544_v51 = vpop.f32.mrf.mxu1  ;;  %3999 = vmatprep.mubr.bf16.mxu0 %v23314_v52  ;;  %4885 = vmatprep.mubr.bf16.mxu1 %v15065_v15  ;;  %v15077_v15 = vld [vmem:[%s16290_s29 + $0xb8] ss:$20 sps:$4 sm:$0xff]  }
 0x15b   : > { %v1825_v49 = vpop.f32.mrf.mxu0  ;;  %5071 = vmatprep.subr.bf16.mxu1 %v15071_v58  ;;  %v15883_v58 = vld [vmem:[%s16290_s29 + $0xd8] sm:$0xf] }
 0x15c   : > { %v17808_v12 = vadd.f32 %v2544_v51, %v1824_v40  ;;  %v1826_v27 = vadd.f32 %v1825_v49, %v17427_v39  ;;  %v2546_v4 = vpop.f32.mrf.mxu1  ;;  %4959 = vmatpush1.bf16.msra.mxu0 %v15060_v23  ;;  %v15081_v23 = vld [vmem:[%s23311_s1 + $0x9d0] ss:$8 sps:$4 sm:$0xff]   ;;  %v2995_v13 = vrot.slane %v15883_v58, 5  ;;  %v15080_v51 = vld [vmem:[%s23311_s1 + $0x8b4] ss:$8 sps:$4 sm:$0xff]  }
 0x15d   : > { %v1827_v5 = vpop.f32.mrf.mxu0  ;;  %4960 = vmatprep.subr.bf16.mxu0 %v15068_v3  ;;  %5072 = vmatpush1.bf16.msra.mxu1 %v15069_v54  ;;  %v15072_v54 = vld [vmem:[%s23311_s1 + $0x8c0] ss:$8 sps:$4 sm:$0xff]  }
 0x15e   : > { %v17819_v9 = vadd.f32 %v2546_v4, %v1826_v27  ;;  %v1828_v39 = vadd.f32 %v1827_v5, %v17443_v45  ;;  %v2548_v14 = vpop.f32.mrf.mxu1  ;;  %5073 = vmatprep.subr.bf16.mxu1 %v15083_v30  ;;  %v15075_v49 = vld [vmem:[%s16290_s29 + $0xb4] ss:$20 sps:$4 sm:$0xff]   ;;  %v12857_v4 = vcombine.low %v2975_v44, %v2984_v22  ;;  %v15119_v44 = vld [vmem:[%s23311_s1 + $0x9a4] ss:$8 sps:$4 sm:$0xff]  }
 0x15f   : > { %v1831_v21 = vpop.f32.mrf.mxu0  ;;  %4000 = vmatmul.mubr.bf16.gmra.mxu0 %v12852_v61  ;;  %v15884_v61 = vld [vmem:[%s16290_s29 + $0xec] sm:$0x1]  ;;  %v15089_v22 = vld [vmem:[%s16290_s29 + $0xf4] ss:$20 sps:$4 sm:$0xff]  }
 0x160   : > { %v17831_v45 = vadd.f32 %v2548_v14, %v1828_v39  ;;  %v1832_v3 = vadd.f32 %v1831_v21, %v17454_v57  ;;  %v2552_v35 = vpop.f32.mrf.mxu1  ;;  %4886 = vmatmul.mubr.bf16.gmra.mxu1 %v15063_v1  ;;  %4961 = vmatpush1.bf16.msra.mxu0 %v15066_v46  ;;  %v2858_v57 = vld [vmem:[%s16290_s29 + $0xc4] sm:$0xe]  ;;  %v3004_v63 = vrot.slane %v15884_v61, 5  ;;  %v3003_v1 = vrot.slane %v2995_v13, 4  ;;  %v15107_v46 = vld [vmem:[%s23311_s1 + $0x9b4] ss:$8 sps:$4 sm:$0xff]  }
 0x161   : > { %v1833_v40 = vpop.f32.mrf.mxu0  ;;  %4962 = vmatprep.subr.bf16.mxu0 %v15074_v6  ;;  %4009 = vmatprep.mubr.bf16.mxu0 %v23314_v52  ;;  %v15078_v6 = vld [vmem:[%s23311_s1 + $0x8b0] ss:$8 sps:$4 sm:$0xff]   ;;  %v15086_v14 = vld [vmem:[%s23311_s1 + $0x8a4] ss:$8 sps:$4 sm:$0xff]   ;;  %v2861_v61 = vld [vmem:[%s16290_s29 + $0x100] sm:$0xe] }
 0x162   : > { %v17844_v30 = vadd.f32 %v2552_v35, %v1832_v3  ;;  %v1834_v41 = vadd.f32 %v1833_v40, %v17477_v8  ;;  %v2554_v38 = vpop.f32.mrf.mxu1  ;;  %4895 = vmatprep.mubr.bf16.mxu1 %v15077_v15  ;;  %5074 = vmatpush1.bf16.msra.mxu1 %v15081_v23  ;;  %v12750_v15 = vrot.slane %v2858_v57, 9  ;;  %v15105_v35 = vld [vmem:[%s23311_s1 + $0x9b0] ss:$8 sps:$4 sm:$0xff]  }
 0x163   : > { %v1835_v27 = vpop.f32.mrf.mxu0  ;;  %5075 = vmatprep.subr.bf16.mxu1 %v15095_v31  ;;  %v17872_v31 = vld [vmem:[%s16290_s29 + $0x114] sm:$0xf] }
 0x164   : > { %v17855_v8 = vadd.f32 %v2554_v38, %v1834_v41  ;;  %v1836_v50 = vadd.f32 %v1835_v27, %v17497_v32  ;;  %v2556_v5 = vpop.f32.mrf.mxu1  ;;  %4963 = vmatpush1.bf16.msra.mxu0 %v15072_v54  ;;  %v15084_v32 = vld [vmem:[%s23311_s1 + $0x8a0] ss:$8 sps:$4 sm:$0xff]   ;;  %v3016_v3 = vrot.slane %v17872_v31, 5  ;;  %v2996_v41 = vsel %vm17271_vm5, %v12750_v15, %v2995_v13  ;;  %v15092_v38 = vld [vmem:[%s23311_s1 + $0x894] ss:$8 sps:$4 sm:$0xff]  }
 0x165   : > { %v1837_v39 = vpop.f32.mrf.mxu0  ;;  %4964 = vmatprep.subr.bf16.mxu0 %v15080_v51  ;;  %v15117_v13 = vld [vmem:[%s23311_s1 + $0x9a0] ss:$8 sps:$4 sm:$0xff]  }
 0x166   : > { %v17864_v23 = vadd.f32 %v2556_v5, %v1836_v50  ;;  %v1838_v58 = vadd.f32 %v1837_v39, %v17515_v37  ;;  %v2558_v21 = vpop.f32.mrf.mxu1  ;;  %5076 = vmatpush1.bf16.msra.mxu1 %v15093_v53  ;;  %v3005_v37 = vsel %vm17271_vm5, %v3003_v1, %v3004_v63  ;;  %v15886_v63 = vld [vmem:[%s16290_s29 + $0x128] sm:$0x1]  ;;  %v3024_v5 = vrot.slane %v3016_v3, 4 }
 0x167   : > { %v1841_v54 = vpop.f32.mrf.mxu0  ;;  %4010 = vmatmul.mubr.bf16.gmra.mxu0 %v12857_v4  ;;  %5077 = vmatprep.subr.bf16.mxu1 %v15107_v46  ;;  %v3025_v27 = vrot.slane %v15886_v63, 5  ;;  %v15087_v46 = vld [vmem:[%s16290_s29 + $0xf0] ss:$20 sps:$4 sm:$0xff]   ;;  %v12862_v50 = vcombine.low %v2996_v41, %v3005_v37 }
 0x168   : > { %v17883_v40 = vadd.f32 %v2558_v21, %v1838_v58  ;;  %v1842_v51 = vadd.f32 %v1841_v54, %v17523_v16  ;;  %v2562_v57 = vpop.f32.mrf.mxu1  ;;  %4896 = vmatmul.mubr.bf16.gmra.mxu1 %v15075_v49  ;;  %4965 = vmatpush1.bf16.msra.mxu0 %v15078_v6  ;;  %v15131_v6 = vld [vmem:[%s23311_s1 + $0x994] ss:$8 sps:$4 sm:$0xff]   ;;  %v12753_v58 = vrot.slane %v2861_v61, 9  ;;  %v15096_v61 = vld [vmem:[%s23311_s1 + $0x880] ss:$8 sps:$4 sm:$0xff]  }
 0x169   : > { %v1843_v53 = vpop.f32.mrf.mxu0  ;;  %4966 = vmatprep.subr.bf16.mxu0 %v15086_v14  ;;  %4019 = vmatprep.mubr.bf16.mxu0 %v23314_v52  ;;  %v15090_v14 = vld [vmem:[%s23311_s1 + $0x890] ss:$8 sps:$4 sm:$0xff]  }
 0x16a   : > { %v17894_v4 = vadd.f32 %v2562_v57, %v1842_v51  ;;  %v1844_v16 = vadd.f32 %v1843_v53, %v17543_v42  ;;  %v2564_v49 = vpop.f32.mrf.mxu1  ;;  %4905 = vmatprep.mubr.bf16.mxu1 %v15089_v22  ;;  %5078 = vmatpush1.bf16.msra.mxu1 %v15105_v35  ;;  %v15098_v22 = vld [vmem:[%s23311_s1 + $0x884] ss:$8 sps:$4 sm:$0xff]   ;;  %v15887_v51 = vld [vmem:[%s16290_s29 + $0x150] sm:$0xf]  ;;  %v3017_v63 = vsel %vm17271_vm5, %v12753_v58, %v3016_v3  ;;  %v15141_v3 = vld [vmem:[%s23311_s1 + $0x980] ss:$8 sps:$4 sm:$0xff]  }
 0x16b   : > { %v1845_v1 = vpop.f32.mrf.mxu0  ;;  %5079 = vmatprep.subr.bf16.mxu1 %v15119_v44  ;;  %v3026_v44 = vsel %vm17271_vm5, %v3024_v5, %v3025_v27  ;;  %v3037_v57 = vrot.slane %v15887_v51, 5  ;;  %v15104_v27 = vld [vmem:[%s23311_s1 + $0x974] ss:$8 sps:$4 sm:$0xff]  }
 0x16c   : > { %v17904_v15 = vadd.f32 %v2564_v49, %v1844_v16  ;;  %v1846_v42 = vadd.f32 %v1845_v1, %v17565_v29  ;;  %v2566_v39 = vpop.f32.mrf.mxu1  ;;  %4967 = vmatpush1.bf16.msra.mxu0 %v15084_v32  ;;  %v15101_v29 = vld [vmem:[%s16290_s29 + $0x130] ss:$20 sps:$4 sm:$0xff]  }
 0x16d   : > { %v1847_v21 = vpop.f32.mrf.mxu0  ;;  %4968 = vmatprep.subr.bf16.mxu0 %v15092_v38  ;;  %v15129_v32 = vld [vmem:[%s23311_s1 + $0x990] ss:$8 sps:$4 sm:$0xff]  }
 0x16e   : > { %v17913_v31 = vadd.f32 %v2566_v39, %v1846_v42  ;;  %v1848_v35 = vadd.f32 %v1847_v21, %v17577_v47  ;;  %v2568_v54 = vpop.f32.mrf.mxu1  ;;  %5080 = vmatpush1.bf16.msra.mxu1 %v15117_v13  ;;  %v15143_v47 = vld [vmem:[%s23311_s1 + $0x984] ss:$8 sps:$4 sm:$0xff]   ;;  %v3045_v42 = vrot.slane %v3037_v57, 4  ;;  %v15155_v39 = vld [vmem:[%s23311_s1 + $0xb74] ss:$8 sps:$4 sm:$0xff]  }
 0x16f   : > { %v1851_v37 = vpop.f32.mrf.mxu0  ;;  %4020 = vmatmul.mubr.bf16.gmra.mxu0 %v12862_v50  ;;  %5081 = vmatprep.subr.bf16.mxu1 %v15131_v6  ;;  %v12867_v6 = vcombine.low %v3017_v63, %v3026_v44  ;;  %v15099_v21 = vld [vmem:[%s16290_s29 + $0x12c] ss:$20 sps:$4 sm:$0xff]  }
 0x170   : > { %v17926_v41 = vadd.f32 %v2568_v54, %v1848_v35  ;;  %v1852_v38 = vadd.f32 %v1851_v37, %v17588_v34  ;;  %v2572_v53 = vpop.f32.mrf.mxu1  ;;  %4906 = vmatmul.mubr.bf16.gmra.mxu1 %v15087_v46  ;;  %4969 = vmatpush1.bf16.msra.mxu0 %v15090_v14  ;;  %v2864_v34 = vld [vmem:[%s16290_s29 + $0x13c] sm:$0xe]  ;;  %v15888_v46 = vld [vmem:[%s16290_s29 + $0x164] sm:$0x1]  ;;  %v15113_v44 = vld [vmem:[%s16290_s29 + $0x16c] ss:$20 sps:$4 sm:$0xff]  }
 0x171   : > { %v1853_v16 = vpop.f32.mrf.mxu0  ;;  %4970 = vmatprep.subr.bf16.mxu0 %v15098_v22  ;;  %4029 = vmatprep.mubr.bf16.mxu0 %v23314_v52  ;;  %v3046_v50 = vrot.slane %v15888_v46, 5  ;;  %v15102_v22 = vld [vmem:[%s23311_s1 + $0x970] ss:$8 sps:$4 sm:$0xff]   ;;  %v12756_v35 = vrot.slane %v2864_v34, 9 }
 0x172   : > { %v17939_v49 = vadd.f32 %v2572_v53, %v1852_v38  ;;  %v1854_v13 = vadd.f32 %v1853_v16, %v17608_v25  ;;  %v2574_v1 = vpop.f32.mrf.mxu1  ;;  %4915 = vmatprep.mubr.bf16.mxu1 %v15101_v29  ;;  %5082 = vmatpush1.bf16.msra.mxu1 %v15129_v32  ;;  %v15110_v29 = vld [vmem:[%s23311_s1 + $0x964] ss:$8 sps:$4 sm:$0xff]  }
 0x173   : > { %v1855_v5 = vpop.f32.mrf.mxu0  ;;  %5083 = vmatprep.subr.bf16.mxu1 %v15143_v47  ;;  %v3047_v47 = vsel %vm17271_vm5, %v3045_v42, %v3046_v50  ;;  %v15889_v38 = vld [vmem:[%s16290_s29 + $0x18c] sm:$0xf]  ;;  %v3038_v16 = vsel %vm17271_vm5, %v12756_v35, %v3037_v57  ;;  %v15890_v50 = vld [vmem:[%s16290_s29 + $0x1a0] sm:$0x1]  ;;  %v15111_v57 = vld [vmem:[%s16290_s29 + $0x168] ss:$20 sps:$4 sm:$0xff]  }
 0x174   : > { %v17949_v25 = vadd.f32 %v2574_v1, %v1854_v13  ;;  %v1856_v14 = vadd.f32 %v1855_v5, %v17628_v59  ;;  %v2576_v58 = vpop.f32.mrf.mxu1  ;;  %4971 = vmatpush1.bf16.msra.mxu0 %v15096_v61  ;;  %v3058_v53 = vrot.slane %v15889_v38, 5  ;;  %v15116_v13 = vld [vmem:[%s23311_s1 + $0x954] ss:$8 sps:$4 sm:$0xff]   ;;  %v3067_v5 = vrot.slane %v15890_v50, 5 }
 0x175   : > { %v1857_v54 = vpop.f32.mrf.mxu0  ;;  %4972 = vmatprep.subr.bf16.mxu0 %v15104_v27  ;;  %v12872_v42 = vcombine.low %v3038_v16, %v3047_v47  ;;  %v15891_v47 = vld [vmem:[%s16290_s29 + $0x1c8] sm:$0xf]  ;;  %v15892_v50 = vld [vmem:[%s16290_s29 + $0x1dc] sm:$0x1] }
 0x176   : > { %v17959_v32 = vadd.f32 %v2576_v58, %v1856_v14  ;;  %v1858_v37 = vadd.f32 %v1857_v54, %v17640_v56  ;;  %v2578_v59 = vpop.f32.mrf.mxu1  ;;  %5084 = vmatpush1.bf16.msra.mxu1 %v15141_v3  ;;  %v15108_v56 = vld [vmem:[%s23311_s1 + $0x960] ss:$8 sps:$4 sm:$0xff]   ;;  %v15122_v54 = vld [vmem:[%s23311_s1 + $0x944] ss:$8 sps:$4 sm:$0xff]   ;;  %v3079_v38 = vrot.slane %v15891_v47, 5 }
 0x177   : > { %v1861_v51 = vpop.f32.mrf.mxu0  ;;  %4030 = vmatmul.mubr.bf16.gmra.mxu0 %v12867_v6  ;;  %6616 = vmatprep.subr.bf16.mxu1 %v15155_v39  ;;  %v3066_v39 = vrot.slane %v3058_v53, 4 }
 0x178   : > { %v17966_v61 = vadd.f32 %v2578_v59, %v1858_v37  ;;  %v1862_v63 = vadd.f32 %v1861_v51, %v17646_v26  ;;  %v2582_v27 = vpop.f32.mrf.mxu1  ;;  %4916 = vmatmul.mubr.bf16.gmra.mxu1 %v15099_v21  ;;  %4973 = vmatpush2.bf16.msra.mxu0 %v15102_v22  ;;  %v2867_v26 = vld [vmem:[%s16290_s29 + $0x178] sm:$0xe] }
 0x179   : > { %v1863_v34 = vpop.f32.mrf.mxu0  ;;  %4974 = vmatprep.subr.bf16.mxu0 %v15110_v29  ;;  %4039 = vmatprep.mubr.bf16.mxu0 %v23314_v52  ;;  %v12759_v22 = vrot.slane %v2867_v26, 9  ;;  %v3068_v51 = vsel %vm17271_vm5, %v3066_v39, %v3067_v5  ;;  %v3088_v5 = vrot.slane %v15892_v50, 5 }
 0x17a   : > { %v17979_v1 = vadd.f32 %v2582_v27, %v1862_v63  ;;  %v1864_v3 = vadd.f32 %v1863_v34, %v17664_v62  ;;  %v2584_v46 = vpop.f32.mrf.mxu1  ;;  %4925 = vmatprep.mubr.bf16.mxu1 %v15113_v44  ;;  %v15114_v62 = vld [vmem:[%s23311_s1 + $0x950] ss:$8 sps:$4 sm:$0xff]   ;;  %v15125_v44 = vld [vmem:[%s16290_s29 + $0x1a8] ss:$20 sps:$4 sm:$0xff]  }
 0x17b   : > { %v1865_v6 = vpop.f32.mrf.mxu0  ;;  %v3059_v16 = vsel %vm17271_vm5, %v12759_v22, %v3058_v53  ;;  %v15128_v34 = vld [vmem:[%s23311_s1 + $0x934] ss:$8 sps:$4 sm:$0xff]  }
 0x17c   : > { %v17984_v14 = vadd.f32 %v2584_v46, %v1864_v3  ;;  %v1866_v58 = vadd.f32 %v1865_v6, %v17676_v60  ;;  %v2586_v21 = vpop.f32.mrf.mxu1  ;;  %4975 = vmatpush2.bf16.msra.mxu0 %v15108_v56  ;;  %v12877_v53 = vcombine.low %v3059_v16, %v3068_v51  ;;  %v15140_v16 = vld [vmem:[%s23311_s1 + $0x914] ss:$8 sps:$4 sm:$0xff]  }
 0x17d   : > { %v1867_v35 = vpop.f32.mrf.mxu0  ;;  %4976 = vmatprep.subr.bf16.mxu0 %v15116_v13 }
 0x17e   : > { %v17993_v29 = vadd.f32 %v2586_v21, %v1866_v58  ;;  %v1868_v37 = vadd.f32 %v1867_v35, %v17688_v48  ;;  %v2588_v59 = vpop.f32.mrf.mxu1  ;;  %v15120_v48 = vld [vmem:[%s23311_s1 + $0x940] ss:$8 sps:$4 sm:$0xff]   ;;  %v15123_v21 = vld [vmem:[%s16290_s29 + $0x1a4] ss:$20 sps:$4 sm:$0xff]  }
 0x17f   : > { %v1871_v60 = vpop.f32.mrf.mxu0  ;;  %4040 = vmatmul.mubr.bf16.gmra.mxu0 %v12872_v42  ;;  %v15134_v35 = vld [vmem:[%s23311_s1 + $0x924] ss:$8 sps:$4 sm:$0xff]  }
 0x180   : > { %v18000_v63 = vadd.f32 %v2588_v59, %v1868_v37  ;;  %v1872_v27 = vadd.f32 %v1871_v60, %v17693_v0  ;;  %v2592_v56 = vpop.f32.mrf.mxu1  ;;  %4926 = vmatmul.mubr.bf16.gmra.mxu1 %v15111_v57  ;;  %4977 = vmatpush2.bf16.msra.mxu0 %v15114_v62  ;;  %v2870_v0 = vld [vmem:[%s16290_s29 + $0x1b4] sm:$0xe]  ;;  %v3087_v57 = vrot.slane %v3079_v38, 4  ;;  %v15126_v62 = vld [vmem:[%s23311_s1 + $0x930] ss:$8 sps:$4 sm:$0xff]  }
 0x181   : > { %v1873_v13 = vpop.f32.mrf.mxu0  ;;  %4978 = vmatprep.subr.bf16.mxu0 %v15122_v54  ;;  %4049 = vmatprep.mubr.bf16.mxu0 %v23314_v52 }
 0x182   : > { %v18013_v26 = vadd.f32 %v2592_v56, %v1872_v27  ;;  %v1874_v3 = vadd.f32 %v1873_v13, %v17702_v2  ;;  %v2594_v46 = vpop.f32.mrf.mxu1  ;;  %4935 = vmatprep.mubr.bf16.mxu1 %v15125_v44  ;;  %v12762_v2 = vrot.slane %v2870_v0, 9  ;;  %v3089_v60 = vsel %vm17271_vm5, %v3087_v57, %v3088_v5  ;;  %v18049_v0 = vld [vmem:[%s16290_s29 + $0x44] sm:$0xff]  ;;  %v15138_v57 = vld [vmem:[%s23311_s1 + $0x910] ss:$8 sps:$4 sm:$0xff]  }
 0x183   : > { %v1875_v6 = vpop.f32.mrf.mxu0 }
 0x184   : > { %v18017_v42 = vadd.f32 %v2594_v46, %v1874_v3  ;;  %v1876_v39 = vadd.f32 %v1875_v6, %v17713_v28  ;;  %v2596_v58 = vpop.f32.mrf.mxu1  ;;  %4979 = vmatpush2.bf16.msra.mxu0 %v15120_v48  ;;  %v15137_v28 = vld [vmem:[%s16290_s29 + $0x1e4] ss:$20 sps:$4 sm:$0xff]   ;;  %v3080_v56 = vsel %vm17271_vm5, %v12762_v2, %v3079_v38 }
 0x185   : > { %v1877_v22 = vpop.f32.mrf.mxu0  ;;  %4980 = vmatprep.subr.bf16.mxu0 %v15128_v34  ;;  %v18052_v3 = vld [vmem:[%s16290_s29 + $0x58] sm:$0xff]  ;;  %v12882_v46 = vcombine.low %v3080_v56, %v3089_v60 }
 0x186   : > { %v18027_v54 = vadd.f32 %v2596_v58, %v1876_v39  ;;  %v1878_v37 = vadd.f32 %v1877_v22, %v17719_v33  ;;  %v2598_v59 = vpop.f32.mrf.mxu1  ;;  %v15132_v33 = vld [vmem:[%s23311_s1 + $0x920] ss:$8 sps:$4 sm:$0xff]   ;;  %v15146_v39 = vld [vmem:[%s23311_s1 + $0x904] ss:$8 sps:$4 sm:$0xff]   ;;  %v13096_v58 = vcombine.high %v18049_v0, %v18052_v3 }
 0x187   : > { %v1881_v44 = vpop.f32.mrf.mxu0  ;;  %4050 = vmatmul.mubr.bf16.gmra.mxu0 %v12877_v53  ;;  %v15135_v53 = vld [vmem:[%s16290_s29 + $0x1e0] ss:$20 sps:$4 sm:$0xff]  }
 0x188   : > { %v18033_v51 = vadd.f32 %v2598_v59, %v1878_v37  ;;  %v1882_v47 = vadd.f32 %v1881_v44, %v17728_v18  ;;  %v2602_v27 = vpop.f32.mrf.mxu1  ;;  %4936 = vmatmul.mubr.bf16.gmra.mxu1 %v15123_v21  ;;  %4981 = vmatpush2.bf16.msra.mxu0 %v15126_v62  ;;  %v5301_v21 = vshrl.u32 %v18049_v0, 16  ;;  %v15144_v44 = vld [vmem:[%s23311_s1 + $0x900] ss:$8 sps:$4 sm:$0xff]  }
 0x189   : > { %v1883_v48 = vpop.f32.mrf.mxu0  ;;  %4982 = vmatprep.subr.bf16.mxu0 %v15134_v35  ;;  %4059 = vmatprep.mubr.bf16.mxu0 %v23314_v52 }
 0x18a   : > { %v18045_v18 = vadd.f32 %v2602_v27, %v1882_v47  ;;  %v1884_v34 = vadd.f32 %v1883_v48, %v17735_v7  ;;  %v2604_v13 = vpop.f32.mrf.mxu1  ;;  %4945 = vmatprep.mubr.bf16.mxu1 %v15137_v28  ;;  %v18081_v47 = vld [vmem:[%s16290_s29 + $0x80] sm:$0xff] }
 0x18b   : > { %v1885_v38 = vpop.f32.mrf.mxu0 }
 0x18c   : > { %v18054_v50 = vadd.f32 %v2604_v13, %v1884_v34  ;;  %v1886_v5 = vadd.f32 %v1885_v38, %v17740_v19  ;;  %v2606_v6 = vpop.f32.mrf.mxu1  ;;  %4983 = vmatpush2.bf16.msra.mxu0 %v15132_v33  ;;  %v5304_v19 = vshll.u32 %v18049_v0, 16  ;;  %v18091_v34 = vld [vmem:[%s16290_s29 + $0xbc] sm:$0xff]  ;;  %v18094_v13 = vld [vmem:[%s16290_s29 + $0xd0] sm:$0xff] }
 0x18d   : > { %v1887_v7 = vpop.f32.mrf.mxu0  ;;  %4984 = vmatprep.subr.bf16.mxu0 %v15140_v16  ;;  %v18088_v16 = vld [vmem:[%s16290_s29 + $0x94] sm:$0xff] }
 0x18e   : > { %v18068_v62 = vadd.f32 %v2606_v6, %v1886_v5  ;;  %v1888_v2 = vadd.f32 %v1887_v7, %v17746_v11  ;;  %v2608_v22 = vpop.f32.mrf.mxu1  ;;  %v15152_v11 = vld [vmem:[%s23311_s1 + $0xa74] ss:$8 sps:$4 sm:$0xff]   ;;  %v5306_v27 = vrot.slane %v5304_v19, 5  ;;  %v5310_v5 = vshll.u32 %v18052_v3, 16  ;;  %v15161_v19 = vld [vmem:[%s23311_s1 + $0xb64] ss:$8 sps:$4 sm:$0xff]  }
 0x18f   : > { %v1891_v35 = vpop.f32.mrf.mxu0  ;;  %4060 = vmatmul.mubr.bf16.gmra.mxu0 %v12882_v46  ;;  %v13095_v46 = vcombine.low %v18049_v0, %v18052_v3  ;;  %v5338_v6 = vshrl.u32 %v18052_v3, 16  ;;  %v5376_v0 = vshll.u32 %v18081_v47, 16  ;;  %v15153_v3 = vld [vmem:[%s23311_s1 + $0xb70] ss:$8 sps:$4 sm:$0xff]  }
 0x190   : > { %23364 = vst [vmem:[#allocation7_spill] sm:$0xff] %v18068_v62  ;;  %v18071_v37 = vadd.f32 %v2608_v22, %v1888_v2  ;;  %v1892_v59 = vadd.f32 %v1891_v35, %v17757_v43  ;;  %v2612_v28 = vpop.f32.mrf.mxu1  ;;  %4946 = vmatmul.mubr.bf16.gmra.mxu1 %v15135_v53  ;;  %4985 = vmatpush2.bf16.msra.mxu0 %v15138_v57  ;;  %v5303_v43 = vrot.slane %v5301_v21, 4  ;;  %v5373_v53 = vshrl.u32 %v18081_v47, 16  ;;  %v15170_v35 = vld [vmem:[%s23311_s1 + $0xb54] ss:$8 sps:$4 sm:$0xff]  }
 0x191   : > { %v1893_v60 = vpop.f32.mrf.mxu0  ;;  %4986 = vmatprep.subr.bf16.mxu0 %v15146_v39  ;;  %4988 = vmatprep.mubr.bf16.mxu0 %v13096_v58  ;;  %v15149_v39 = vld [vmem:[%s16290_s29 + $0x4c] ss:$20 sps:$4 sm:$0xff]   ;;  %v15150_v58 = vld [vmem:[%s23311_s1 + $0xa70] ss:$8 sps:$4 sm:$0xff]   ;;  %v13101_v22 = vcombine.high %v18081_v47, %v18088_v16  ;;  %v18137_v17 = vrot.slane %v5338_v6, 4 }
 0x192   : > { %23365 = vst [vmem:[#allocation8_spill] sm:$0xff] %v18071_v37  ;;  %v18083_v33 = vadd.f32 %v2612_v28, %v1892_v59  ;;  %v1894_v56 = vadd.f32 %v1893_v60, %v17764_v55  ;;  %v2614_v48 = vpop.f32.mrf.mxu1  ;;  %5101 = vmatprep.mubr.bf16.mxu1 %v23314_v52  ;;  %v5307_v59 = vor.u32 %v5306_v27, %v5303_v43  ;;  %v18128_v60 = vld [vmem:[%s16290_s29 + $0xf8] sm:$0xff]  ;;  %v18135_v52 = vrot.slane %v5310_v5, 5  ;;  %v15171_v62 = vld [vmem:[%s23311_s1 + $0xa40] ss:$8 sps:$4 sm:$0xff]  }
 0x193   : > { %v1895_v38 = vpop.f32.mrf.mxu0  ;;  %v18139_v43 = vrot.slane %v5373_v53, 4  ;;  %v5382_v27 = vshll.u32 %v18088_v16, 16  ;;  %v5410_v5 = vshrl.u32 %v18088_v16, 16  ;;  %v15167_v53 = vld [vmem:[%s23311_s1 + $0xa54] ss:$8 sps:$4 sm:$0xff]  }
 0x194   : > { %23366 = vst [vmem:[#allocation9_spill] sm:$0xff] %v18083_v33  ;;  %v18101_v55 = vadd.f32 %v2614_v48, %v1894_v56  ;;  %v1896_v57 = vadd.f32 %v1895_v38, %v17773_v36  ;;  %v2616_v7 = vpop.f32.mrf.mxu1  ;;  %4987 = vmatpush2.bf16.msra.mxu0 %v15144_v44  ;;  %v15158_v36 = vld [vmem:[%s23311_s1 + $0xa64] ss:$8 sps:$4 sm:$0xff]   ;;  %v5445_v48 = vshrl.u32 %v18091_v34, 16  ;;  %v5448_v38 = vshll.u32 %v18091_v34, 16 }
 0x195   : > { %v1897_v21 = vpop.f32.mrf.mxu0  ;;  %6503 = vmatprep.subr.bf16.mxu0 %v15152_v11  ;;  %v18131_v56 = vld [vmem:[%s16290_s29 + $0x10c] sm:$0xff] }
 0x196   : > { %23367 = vst [vmem:[#allocation10_spill] sm:$0xff] %v18101_v55  ;;  %v18124_v28 = vadd.f32 %v2616_v7, %v1896_v57  ;;  %v1898_v44 = vadd.f32 %v1897_v21, %v17780_v24  ;;  %v2618_v11 = vpop.f32.mrf.mxu1  ;;  %v15156_v21 = vld [vmem:[%s23311_s1 + $0xa60] ss:$8 sps:$4 sm:$0xff]  }
 0x197   : > { %v2655_v2 = vpop.f32.mrf.mxu0  ;;  %4989 = vmatmul.mubr.bf16.vlgmr.msra.gmra.mxu0 %v13095_v46  ;;  %v18148_v46 = vrot.slane %v5376_v0, 5  ;;  %v23371_v0 = vmov 0  }
 0x198   : > { %23368 = vst [vmem:[#allocation11_spill] sm:$0xff] %v18124_v28  ;;  %v18142_v24 = vadd.f32 %v2618_v11, %v1898_v44  ;;  %v2656_v57 = vadd.f32 %v2655_v2, %v17800_v20  ;;  %v2768_v7 = vpop.f32.mrf.mxu1  ;;  %5102 = vmatmul.mubr.bf16.vlgmr.msra.gmra.mxu1 %v15149_v39  ;;  %6504 = vmatpush1.bf16.msra.mxu0 %v15150_v58  ;;  %v15159_v20 = vld [vmem:[%s23311_s1 + $0xb60] ss:$8 sps:$4 sm:$0xff]   ;;  %v18172_v28 = vrot.slane %v5445_v48, 4  ;;  %v5450_v58 = vrot.slane %v5448_v38, 5 }
 0x199   : > { %6617 = vmatpush1.bf16.msra.mxu1 %v15153_v3  ;;  %v2657_v6 = vpop.f32.mrf.mxu0  ;;  %6505 = vmatprep.subr.bf16.mxu0 %v15158_v36  ;;  %v5308_v3 = vrot.slane %v5307_v59, 4  ;;  %v15164_v11 = vld [vmem:[%s16290_s29 + $0x88] ss:$20 sps:$4 sm:$0xff]   ;;  %v5454_v59 = vshll.u32 %v18094_v13, 16 }
 0x19a   : > { %23369 = vst [vmem:[#allocation12_spill] sm:$0xff] %v18142_v24  ;;  %v18163_v2 = vadd.f32 %v2768_v7, %v2656_v57  ;;  %v2658_v36 = vadd.f32 %v2657_v6, %v17808_v12  ;;  %v2770_v44 = vpop.f32.mrf.mxu1  ;;  %6618 = vmatprep.subr.bf16.mxu1 %v15161_v19  ;;  %4998 = vmatprep.mubr.bf16.mxu0 %v13101_v22  ;;  %v13213_v39 = vld [vmem:[%s16290_s29 + $0x3c] sm:$0xff]  ;;  %v13216_v24 = vld [vmem:[%s16290_s29 + $0x50] sm:$0xff]  ;;  %v18180_v22 = vrot.slane %v5382_v27, 5  ;;  %v5482_v57 = vshrl.u32 %v18094_v13, 16 }
 0x19b   : > { %v2659_v55 = vpop.f32.mrf.mxu0  ;;  %5111 = vmatprep.mubr.bf16.mxu1 %v23371_v0  ;;  %v15165_v12 = vld [vmem:[%s23311_s1 + $0xa50] ss:$8 sps:$4 sm:$0xff]   ;;  %v5341_v19 = vor.u32 %v18137_v17, %v18135_v52  ;;  %v15173_v17 = vld [vmem:[%s23311_s1 + $0xa44] ss:$8 sps:$4 sm:$0xff]   ;;  %v5379_v27 = vor.u32 %v18148_v46, %v18139_v43  ;;  %v18209_v46 = vsel %vm16324_vm2, %v5308_v3, %v18135_v52  ;;  %v5517_v52 = vshrl.u32 %v18128_v60, 16 }
 0x19c   : > { %23370 = vst [vmem:[#allocation13_spill] sm:$0xff] %v18163_v2  ;;  %v18184_v7 = vadd.f32 %v2770_v44, %v2658_v36  ;;  %v2660_v48 = vadd.f32 %v2659_v55, %v17819_v9  ;;  %v2772_v38 = vpop.f32.mrf.mxu1  ;;  %6506 = vmatpush1.bf16.msra.mxu0 %v15156_v21  ;;  %v15168_v6 = vld [vmem:[%s23311_s1 + $0xb50] ss:$8 sps:$4 sm:$0xff]   ;;  %v18195_v2 = vrot.slane %v5410_v5, 4  ;;  %v5287_v44 = vshrl.u32 %v13213_v39, 16 }
 0x19d   : > { %6619 = vmatpush1.bf16.msra.mxu1 %v15159_v20  ;;  %v2661_v36 = vpop.f32.mrf.mxu0  ;;  %6507 = vmatprep.subr.bf16.mxu0 %v15167_v53  ;;  %v5290_v9 = vshll.u32 %v13213_v39, 16  ;;  %v5296_v55 = vshll.u32 %v13216_v24, 16  ;;  %v5328_v21 = vshrl.u32 %v13216_v24, 16  ;;  %v15176_v43 = vld [vmem:[%s23311_s1 + $0xb44] ss:$8 sps:$4 sm:$0xff]   ;;  %v5451_v24 = vor.u32 %v5450_v58, %v18172_v28 }
 0x19e   : > { %23372 = vst [vmem:[#allocation14_spill] sm:$0xff] %v18184_v7  ;;  %v18197_v7 = vadd.f32 %v2772_v38, %v2660_v48  ;;  %v2662_v33 = vadd.f32 %v2661_v36, %v17831_v45  ;;  %v2774_v37 = vpop.f32.mrf.mxu1  ;;  %6620 = vmatprep.subr.bf16.mxu1 %v15170_v35  ;;  %v23373_v45 = vcombine.low %v18081_v47, %v18088_v16  ;;  %v15174_v35 = vld [vmem:[%s23311_s1 + $0xb40] ss:$8 sps:$4 sm:$0xff]   ;;  %v15182_v20 = vld [vmem:[%s23311_s1 + $0xa34] ss:$8 sps:$4 sm:$0xff]   ;;  %v18221_v53 = vrot.slane %v5454_v59, 5 }
 0x19f   : > { %v2665_v5 = vpop.f32.mrf.mxu0  ;;  %v18223_v39 = vrot.slane %v5482_v57, 4  ;;  %v5520_v28 = vshll.u32 %v18128_v60, 16  ;;  %v15185_v3 = vld [vmem:[%s23311_s1 + $0xb34] ss:$8 sps:$4 sm:$0xff]   ;;  %v5380_v59 = vrot.slane %v5379_v27, 4  ;;  %v5413_v57 = vor.u32 %v18195_v2, %v18180_v22 }
 0x1a0   : > { %4999 = vmatmul.mubr.bf16.gmra.mxu0 %v23373_v45  ;;  %v18227_v58 = vadd.f32 %v2774_v37, %v2662_v33  ;;  %v2666_v47 = vadd.f32 %v2665_v5, %v17844_v30  ;;  %v2778_v16 = vpop.f32.mrf.mxu1  ;;  %5112 = vmatmul.mubr.bf16.gmra.mxu1 %v15164_v11  ;;  %v18235_v37 = vrot.slane %v5287_v44, 4  ;;  %v18237_v30 = vrot.slane %v5290_v9, 5 }
 0x1a1   : > { %6508 = vmatpush1.bf16.msra.mxu0 %v15165_v12  ;;  %6621 = vmatpush1.bf16.msra.mxu1 %v15168_v6  ;;  %v2667_v48 = vpop.f32.mrf.mxu0  ;;  %v18239_v33 = vrot.slane %v5296_v55, 5  ;;  %v18241_v11 = vrot.slane %v5328_v21, 4  ;;  %v23375_v2 = vcombine.high %v18091_v34, %v18094_v13  ;;  %v13219_v6 = vld [vmem:[%s16290_s29 + $0x64] sm:$0x11]  ;;  %v18251_v36 = vrot.slane %v5341_v19, 4  ;;  %v18256_v21 = vld [vmem:[%s16290_s29 + $0x78] sm:$0xff] }
 0x1a2   : > { %6509 = vmatprep.subr.bf16.mxu0 %v15173_v17  ;;  %v18243_v12 = vadd.f32 %v2778_v16, %v2666_v47  ;;  %v2668_v38 = vadd.f32 %v2667_v48, %v17855_v8  ;;  %v2780_v27 = vpop.f32.mrf.mxu1  ;;  %6622 = vmatprep.subr.bf16.mxu1 %v15176_v43  ;;  %v13220_v17 = vld [vmem:[%s16290_s29 + $0x6c] sm:$0x11]  ;;  %v5452_v44 = vrot.slane %v5451_v24, 4  ;;  %v15179_v55 = vld [vmem:[%s16290_s29 + $0xc4] ss:$20 sps:$4 sm:$0xff]   ;;  %v5485_v8 = vor.u32 %v18223_v39, %v18221_v53 }
 0x1a3   : > { %5008 = vmatprep.mubr.bf16.mxu0 %v23375_v2  ;;  %v2669_v9 = vpop.f32.mrf.mxu0  ;;  %5121 = vmatprep.mubr.bf16.mxu1 %v23371_v0  ;;  %v18260_v5 = vrot.slane %v5517_v52, 4  ;;  %v18262_v43 = vrot.slane %v5520_v28, 5  ;;  %v5526_v45 = vshll.u32 %v18131_v56, 16  ;;  %v15180_v16 = vld [vmem:[%s23311_s1 + $0xa30] ss:$8 sps:$4 sm:$0xff]   ;;  %v18277_v52 = vsel %vm16324_vm2, %v5380_v59, %v18180_v22 }
 0x1a4   : > { %23374 = vst [vmem:[#allocation15_spill] sm:$0xff] %v18243_v12  ;;  %v18265_v47 = vadd.f32 %v2780_v27, %v2668_v38  ;;  %v2670_v19 = vadd.f32 %v2669_v9, %v17864_v23  ;;  %v2782_v24 = vpop.f32.mrf.mxu1  ;;  %v15183_v39 = vld [vmem:[%s23311_s1 + $0xb30] ss:$8 sps:$4 sm:$0xff]   ;;  %v18279_v28 = vrot.slane %v5413_v57, 4  ;;  %v15188_v23 = vld [vmem:[%s23311_s1 + $0xa24] ss:$8 sps:$4 sm:$0xff]   ;;  %v5331_v38 = vor.u32 %v18241_v11, %v18239_v33 }
 0x1a5   : > { %6510 = vmatpush1.bf16.msra.mxu0 %v15171_v62  ;;  %6623 = vmatpush1.bf16.msra.mxu1 %v15174_v35  ;;  %v2671_v48 = vpop.f32.mrf.mxu0  ;;  %v5293_v62 = vor.u32 %v18237_v30, %v18235_v37  ;;  %v5334_v27 = vshll.u32 %v13219_v6, 16  ;;  %v5344_v2 = vshll.u32 %v13220_v17, 16  ;;  %v13225_v9 = vld [vmem:[%s16290_s29 + $0x8c] sm:$0xff]  ;;  %v5359_v37 = vshrl.u32 %v18256_v21, 16 }
 0x1a6   : > { %23376 = vst [vmem:[#allocation16_spill] sm:$0xff] %v18265_v47  ;;  %6511 = vmatprep.subr.bf16.mxu0 %v15182_v20  ;;  %v18289_v22 = vadd.f32 %v2782_v24, %v2670_v19  ;;  %v2672_v59 = vadd.f32 %v2671_v48, %v17883_v40  ;;  %v2784_v35 = vpop.f32.mrf.mxu1  ;;  %6624 = vmatprep.subr.bf16.mxu1 %v15185_v3  ;;  %v15186_v20 = vld [vmem:[%s23311_s1 + $0xa20] ss:$8 sps:$4 sm:$0xff]   ;;  %v15191_v57 = vld [vmem:[%s23311_s1 + $0xb24] ss:$8 sps:$4 sm:$0xff]   ;;  %v5362_v30 = vshll.u32 %v18256_v21, 16 }
 0x1a7   : > { %v2675_v11 = vpop.f32.mrf.mxu0  ;;  %v23378_v6 = vcombine.low %v18091_v34, %v18094_v13  ;;  %v15189_v40 = vld [vmem:[%s23311_s1 + $0xb20] ss:$8 sps:$4 sm:$0xff]   ;;  %v15197_v3 = vld [vmem:[%s23311_s1 + $0xa14] ss:$8 sps:$4 sm:$0xff]   ;;  %v18312_v17 = vsel %vm16324_vm2, %v5452_v44, %v18221_v53  ;;  %v18314_v21 = vrot.slane %v5485_v8, 4  ;;  %v18318_v13 = vrot.slane %v5526_v45, 5 }
 0x1a8   : > { %23377 = vst [vmem:[#allocation17_spill] sm:$0xff] %v18289_v22  ;;  %v18320_v19 = vadd.f32 %v2784_v35, %v2672_v59  ;;  %v2676_v24 = vadd.f32 %v2675_v11, %v17894_v4  ;;  %v2788_v48 = vpop.f32.mrf.mxu1  ;;  %5122 = vmatmul.mubr.bf16.gmra.mxu1 %v15179_v55  ;;  %v5400_v22 = vshrl.u32 %v13225_v9, 16  ;;  %v13231_v47 = vld [vmem:[%s16290_s29 + $0xb4] sm:$0xff]  ;;  %v13234_v53 = vld [vmem:[%s16290_s29 + $0xc8] sm:$0xff]  ;;  %v5294_v8 = vrot.slane %v5293_v62, 4 }
 0x1a9   : > { %5009 = vmatmul.mubr.bf16.gmra.mxu0 %v23378_v6  ;;  %v5368_v6 = vshll.u32 %v13225_v9, 16  ;;  %6625 = vmatpush1.bf16.msra.mxu1 %v15183_v39  ;;  %v2677_v44 = vpop.f32.mrf.mxu0  ;;  %v5332_v12 = vrot.slane %v5331_v38, 4  ;;  %v5336_v34 = vrot.slane %v5334_v27, 5  ;;  %v5346_v45 = vrot.slane %v5344_v2, 5  ;;  %v15195_v39 = vld [vmem:[%s23311_s1 + $0xa10] ss:$8 sps:$4 sm:$0xff]  }
 0x1aa   : > { %23379 = vst [vmem:[#allocation18_spill] sm:$0xff] %v18320_v19  ;;  %6512 = vmatpush1.bf16.msra.mxu0 %v15180_v16  ;;  %v18325_v59 = vadd.f32 %v2788_v48, %v2676_v24  ;;  %v2678_v4 = vadd.f32 %v2677_v44, %v17904_v15  ;;  %v2790_v35 = vpop.f32.mrf.mxu1  ;;  %6626 = vmatprep.subr.bf16.mxu1 %v15191_v57  ;;  %v15194_v16 = vld [vmem:[%s16290_s29 + $0x100] ss:$20 sps:$4 sm:$0xff]   ;;  %v18338_v62 = vrot.slane %v5359_v37, 4  ;;  %v18340_v38 = vrot.slane %v5362_v30, 5 }
 0x1ab   : > { %6513 = vmatprep.subr.bf16.mxu0 %v15188_v23  ;;  %v23381_v55 = vcombine.high %v18128_v60, %v18131_v56  ;;  %v15200_v23 = vld [vmem:[%s23311_s1 + $0xb14] ss:$8 sps:$4 sm:$0xff]   ;;  %v2679_v15 = vpop.f32.mrf.mxu0  ;;  %5131 = vmatprep.mubr.bf16.mxu1 %v23371_v0  ;;  %v15198_v27 = vld [vmem:[%s23311_s1 + $0xb10] ss:$8 sps:$4 sm:$0xff]   ;;  %v15203_v2 = vld [vmem:[%s23311_s1 + $0xa04] ss:$8 sps:$4 sm:$0xff]  }
 0x1ac   : > { %23380 = vst [vmem:[#allocation19_spill] sm:$0xff] %v18325_v59  ;;  %v18350_v9 = vld [vmem:[%s16290_s29 + $0xa8] sm:$0x11]  ;;  %v5431_v57 = vshrl.u32 %v13231_v47, 16  ;;  %v5434_v11 = vshll.u32 %v13231_v47, 16  ;;  %v5440_v37 = vshll.u32 %v13234_v53, 16  ;;  %v18352_v30 = vadd.f32 %v2790_v35, %v2678_v4  ;;  %v2792_v44 = vpop.f32.mrf.mxu1 }
 0x1ad   : > { %5018 = vmatprep.mubr.bf16.mxu0 %v23381_v55  ;;  %v5472_v24 = vshrl.u32 %v13234_v53, 16  ;;  %v2680_v48 = vadd.f32 %v2679_v15, %v17913_v31  ;;  %v15206_v55 = vld [vmem:[%s23311_s1 + $0xb04] ss:$8 sps:$4 sm:$0xff]   ;;  %v18358_v59 = vrot.slane %v5368_v6, 5  ;;  %v18360_v19 = vrot.slane %v5400_v22, 4  ;;  %6627 = vmatpush1.bf16.msra.mxu1 %v15189_v40  ;;  %v2681_v47 = vpop.f32.mrf.mxu0  ;;  %v13240_v6 = vld [vmem:[%s16290_s29 + $0xf0] sm:$0xff] }
 0x1ae   : > { %23382 = vst [vmem:[#allocation20_spill] sm:$0xff] %v18352_v30  ;;  %6514 = vmatpush1.bf16.msra.mxu0 %v15186_v20  ;;  %v18365_v53 = vsel %vm16324_vm2, %v5294_v8, %v18239_v33  ;;  %v18369_v31 = vsel %vm16324_vm2, %v5332_v12, %v5336_v34  ;;  %v18374_v20 = vsel %vm16324_vm2, %v18251_v36, %v5346_v45  ;;  %v13228_v22 = vld [vmem:[%s16290_s29 + $0xa0] sm:$0x11]  ;;  %v2794_v4 = vpop.f32.mrf.mxu1  ;;  %v15209_v33 = vld [vmem:[%s16290_s29 + $0x138] ss:$20 sps:$4 sm:$0xff]   ;;  %v5416_v12 = vshll.u32 %v18350_v9, 16 }
 0x1af   : > { %6515 = vmatprep.subr.bf16.mxu0 %v15197_v3  ;;  %v18378_v40 = vadd.f32 %v2792_v44, %v2680_v48  ;;  %v2682_v3 = vadd.f32 %v2681_v47, %v17926_v41  ;;  %6628 = vmatprep.subr.bf16.mxu1 %v15200_v23  ;;  %v5365_v8 = vor.u32 %v18340_v38, %v18338_v62  ;;  %v13238_v34 = vld [vmem:[%s16290_s29 + $0xe4] sm:$0x11]  ;;  %v2685_v35 = vpop.f32.mrf.mxu0  ;;  %v18392_v41 = vrot.slane %v5431_v57, 4  ;;  %v13237_v44 = vld [vmem:[%s16290_s29 + $0xdc] sm:$0x11] }
 0x1b0   : > { %v23384_v36 = vcombine.low %v18128_v60, %v18131_v56  ;;  %v15201_v45 = vld [vmem:[%s23311_s1 + $0xa00] ss:$8 sps:$4 sm:$0xff]   ;;  %v18394_v23 = vrot.slane %v5434_v11, 5  ;;  %v18396_v15 = vrot.slane %v5440_v37, 5  ;;  %v18398_v62 = vrot.slane %v5472_v24, 4  ;;  %v2798_v48 = vpop.f32.mrf.mxu1  ;;  %5132 = vmatmul.mubr.bf16.gmra.mxu1 %v15194_v16 }
 0x1b1   : > { %23383 = vst [vmem:[#allocation21_spill] sm:$0xff] %v18378_v40  ;;  %v18400_v38 = vadd.f32 %v2794_v4, %v2682_v3  ;;  %v2686_v9 = vadd.f32 %v2685_v35, %v17939_v49  ;;  %v15204_v60 = vld [vmem:[%s23311_s1 + $0xb00] ss:$8 sps:$4 sm:$0xff]   ;;  %v5403_v57 = vor.u32 %v18360_v19, %v18358_v59  ;;  %v5406_v11 = vshll.u32 %v13228_v22, 16  ;;  %6629 = vmatpush1.bf16.msra.mxu1 %v15198_v27  ;;  %v2687_v37 = vpop.f32.mrf.mxu0  ;;  %v15213_v49 = vld [vmem:[%s23311_s1 + $0xaf4] ss:$8 sps:$4 sm:$0xff]  }
 0x1b2   : > { %5019 = vmatmul.mubr.bf16.gmra.mxu0 %v23384_v36  ;;  %v15207_v24 = vld [vmem:[%s16290_s29 + $0x134] ss:$20 sps:$4 sm:$0xff]   ;;  %v5488_v47 = vshll.u32 %v13238_v34, 16  ;;  %v23386_v27 = vor.u32 %v18262_v43, %v18260_v5  ;;  %v2688_v3 = vadd.f32 %v2687_v37, %v17949_v25  ;;  %v2800_v4 = vpop.f32.mrf.mxu1  ;;  %6630 = vmatprep.subr.bf16.mxu1 %v15206_v55  ;;  %v15210_v35 = vld [vmem:[%s16290_s29 + $0x13c] ss:$20 sps:$4 sm:$0xff]   ;;  %v5418_v43 = vrot.slane %v5416_v12, 5 }
 0x1b3   : > { %23385 = vst [vmem:[#allocation22_spill] sm:$0xff] %v18400_v38  ;;  %6516 = vmatpush1.bf16.msra.mxu0 %v15195_v39  ;;  %v15216_v16 = vld [vmem:[%s23311_s1 + $0xbf4] ss:$8 sps:$4 sm:$0xff]   ;;  %v18423_v22 = vadd.f32 %v2798_v48, %v2686_v9  ;;  %5028 = vmatprep.mubr.bf16.mxu0 %v15209_v33  ;;  %v5366_v39 = vrot.slane %v5365_v8, 4  ;;  %v2689_v38 = vpop.f32.mrf.mxu0  ;;  %v15211_v5 = vld [vmem:[%s23311_s1 + $0xaf0] ss:$8 sps:$4 sm:$0xff]   ;;  %v5437_v25 = vor.u32 %v18394_v23, %v18392_v41 }
 0x1b4   : > { %6517 = vmatprep.subr.bf16.mxu0 %v15203_v2  ;;  %v5524_v2 = vrot.slane %v23386_v27, 4  ;;  %5141 = vmatprep.mubr.bf16.mxu1 %v23371_v0  ;;  %v5475_v55 = vor.u32 %v18398_v62, %v18396_v15  ;;  %v5478_v33 = vshll.u32 %v13237_v44, 16  ;;  %v18438_v34 = vadd.f32 %v2800_v4, %v2688_v3  ;;  %v2802_v9 = vpop.f32.mrf.mxu1  ;;  %v15214_v48 = vld [vmem:[%s23311_s1 + $0xbf0] ss:$8 sps:$4 sm:$0xff]   ;;  %v15219_v23 = vld [vmem:[%s23311_s1 + $0xae4] ss:$8 sps:$4 sm:$0xff]  }
 0x1b5   : > { %23387 = vst [vmem:[#allocation23_spill] sm:$0xff] %v18423_v22  ;;  %v2690_v8 = vadd.f32 %v2689_v38, %v17959_v32  ;;  %v5404_v37 = vrot.slane %v5403_v57, 4  ;;  %v5408_v12 = vrot.slane %v5406_v11, 5  ;;  %6631 = vmatpush1.bf16.msra.mxu1 %v15204_v60  ;;  %v2691_v41 = vpop.f32.mrf.mxu0  ;;  %v5490_v62 = vrot.slane %v5488_v47, 5  ;;  %v15217_v60 = vld [vmem:[%s23311_s1 + $0xae0] ss:$8 sps:$4 sm:$0xff]  }
 0x1b6   : > { %23388 = vst [vmem:[#allocation24_spill] sm:$0xff] %v18438_v34  ;;  %v5506_v38 = vshll.u32 %v13240_v6, 16  ;;  %v2692_v57 = vadd.f32 %v2691_v41, %v17966_v61  ;;  %v2804_v27 = vpop.f32.mrf.mxu1  ;;  %6632 = vmatprep.subr.bf16.mxu1 %v15216_v16  ;;  %v15222_v11 = vld [vmem:[%s23311_s1 + $0xbe4] ss:$8 sps:$4 sm:$0xff]   ;;  %v18462_v47 = vsel %vm16324_vm2, %v5366_v39, %v18358_v59  ;;  %v18470_v61 = vsel %vm16324_vm2, %v5524_v2, %v18318_v13  ;;  %v15220_v3 = vld [vmem:[%s23311_s1 + $0xbe0] ss:$8 sps:$4 sm:$0xff]  }
 0x1b7   : > { %6518 = vmatpush1.bf16.msra.mxu0 %v15201_v45  ;;  %v5503_v45 = vshrl.u32 %v13240_v6, 16  ;;  %v18449_v44 = vadd.f32 %v2802_v9, %v2690_v8  ;;  %v18465_v6 = vld [vmem:[%s16290_s29 + $0x104] sm:$0xff]  ;;  %v2695_v16 = vpop.f32.mrf.mxu0  ;;  %v18478_v4 = vsel %vm16324_vm2, %v18279_v28, %v5418_v43  ;;  %v5438_v59 = vrot.slane %v5437_v25, 4 }
 0x1b8   : > { %6519 = vmatprep.subr.bf16.mxu0 %v15213_v49  ;;  %v15225_v49 = vld [vmem:[%s16290_s29 + $0x174] ss:$20 sps:$4 sm:$0xff]   ;;  %v5476_v39 = vrot.slane %v5475_v55, 4  ;;  %v5480_v8 = vrot.slane %v5478_v33, 5  ;;  %v18480_v9 = vadd.f32 %v2804_v27, %v2692_v57  ;;  %v2696_v2 = vadd.f32 %v2695_v16, %v17979_v1  ;;  %v2808_v41 = vpop.f32.mrf.mxu1  ;;  %5142 = vmatmul.mubr.bf16.gmra.mxu1 %v15210_v35  ;;  %v15223_v1 = vld [vmem:[%s16290_s29 + $0x170] ss:$20 sps:$4 sm:$0xff]  }
 0x1b9   : > { %23389 = vst [vmem:[#allocation25_spill] sm:$0xff] %v18449_v44  ;;  %v18488_v36 = vsel %vm16324_vm2, %v5404_v37, %v5408_v12  ;;  %v23391_v28 = vshrl.u32 %v18131_v56, 16  ;;  %6633 = vmatpush2.bf16.msra.mxu1 %v15214_v48  ;;  %v2697_v25 = vpop.f32.mrf.mxu0  ;;  %v15232_v35 = vld [vmem:[%s23311_s1 + $0xbd4] ss:$8 sps:$4 sm:$0xff]   ;;  %v18503_v55 = vrot.slane %v5503_v45, 4  ;;  %v18505_v56 = vrot.slane %v5506_v38, 5  ;;  %5151 = vmatprep.mubr.bf16.mxu1 %v23371_v0 }
 0x1ba   : > { %5029 = vmatmul.mubr.bf16.gmra.mxu0 %v15207_v24  ;;  %23390 = vst [vmem:[#allocation26_spill] sm:$0xff] %v18480_v9  ;;  %v15229_v24 = vld [vmem:[%s23311_s1 + $0xad4] ss:$8 sps:$4 sm:$0xff]   ;;  %v5512_v33 = vshll.u32 %v18465_v6, 16  ;;  %v18508_v48 = vadd.f32 %v2808_v41, %v2696_v2  ;;  %v2698_v37 = vadd.f32 %v2697_v25, %v17984_v14  ;;  %v2810_v12 = vpop.f32.mrf.mxu1  ;;  %6634 = vmatprep.subr.bf16.mxu1 %v15222_v11  ;;  %v15226_v45 = vld [vmem:[%s16290_s29 + $0x178] ss:$20 sps:$4 sm:$0xff]  }
 0x1bb   : > { %6520 = vmatpush2.bf16.msra.mxu0 %v15211_v5  ;;  %v18492_v43 = vrot.slane %v23391_v28, 4  ;;  %v18501_v5 = vsel %vm16324_vm2, %v18314_v21, %v5490_v62  ;;  %5038 = vmatprep.mubr.bf16.mxu0 %v15225_v49  ;;  %v18514_v57 = vld [vmem:[%s16290_s29 + $0x118] sm:$0x11]  ;;  %v5544_v21 = vshrl.u32 %v18465_v6, 16  ;;  %v2699_v62 = vpop.f32.mrf.mxu0  ;;  %v18532_v49 = vsel %vm16324_vm2, %v5438_v59, %v18396_v15  ;;  %v15235_v28 = vld [vmem:[%s23311_s1 + $0xac4] ss:$8 sps:$4 sm:$0xff]  }
 0x1bc   : > { %6521 = vmatprep.subr.bf16.mxu0 %v15219_v23  ;;  %23392 = vst [vmem:[#allocation27_spill] sm:$0xff] %v18508_v48  ;;  %v15227_v14 = vld [vmem:[%s23311_s1 + $0xad0] ss:$8 sps:$4 sm:$0xff]   ;;  %v18536_v6 = vsel %vm16324_vm2, %v5476_v39, %v5480_v8  ;;  %v18538_v16 = vadd.f32 %v2810_v12, %v2698_v37  ;;  %v2700_v2 = vadd.f32 %v2699_v62, %v17993_v29  ;;  %v2812_v41 = vpop.f32.mrf.mxu1  ;;  %v13252_v39 = vld [vmem:[%s16290_s29 + $0x140] sm:$0xff]  ;;  %v18557_v12 = vrot.slane %v5512_v33, 5  ;;  %v13253_v33 = vld [vmem:[%s16290_s29 + $0x148] sm:$0xff] }
 0x1bd   : > { %v15230_v38 = vld [vmem:[%s23311_s1 + $0xbd0] ss:$8 sps:$4 sm:$0xff]   ;;  %6635 = vmatpush2.bf16.msra.mxu1 %v15220_v3  ;;  %v2701_v8 = vpop.f32.mrf.mxu0  ;;  %v15238_v29 = vld [vmem:[%s23311_s1 + $0xbc4] ss:$8 sps:$4 sm:$0xff]   ;;  %v5509_v37 = vor.u32 %v18505_v56, %v18503_v55  ;;  %v15233_v27 = vld [vmem:[%s23311_s1 + $0xac0] ss:$8 sps:$4 sm:$0xff]  }
 0x1be   : > { %23393 = vst [vmem:[#allocation28_spill] sm:$0xff] %v18538_v16  ;;  %v13249_v59 = vld [vmem:[%s16290_s29 + $0x12c] sm:$0xff]  ;;  %v13250_v15 = vld [vmem:[%s16290_s29 + $0x134] sm:$0xff]  ;;  %v18561_v3 = vadd.f32 %v2812_v41, %v2700_v2  ;;  %v2814_v23 = vpop.f32.mrf.mxu1  ;;  %6636 = vmatprep.subr.bf16.mxu1 %v15232_v35  ;;  %v18570_v55 = vrot.slane %v5544_v21, 4  ;;  %v18573_v56 = vld [vmem:[%s16290_s29 + $0x120] sm:$0x11] }
 0x1bf   : > { %6522 = vmatpush2.bf16.msra.mxu0 %v15217_v60  ;;  %v15241_v11 = vld [vmem:[%s16290_s29 + $0x1b0] ss:$20 sps:$4 sm:$0xff]   ;;  %v2705_v25 = vpop.f32.mrf.mxu0  ;;  %v5575_v2 = vshrl.u32 %v13249_v59, 16  ;;  %v5584_v41 = vshll.u32 %v13252_v39, 16  ;;  %v5616_v35 = vshrl.u32 %v13252_v39, 16  ;;  %v5589_v60 = vshrl.u32 %v13250_v15, 16 }
 0x1c0   : > { %6523 = vmatprep.subr.bf16.mxu0 %v15229_v24  ;;  %23394 = vst [vmem:[#allocation29_spill] sm:$0xff] %v18561_v3  ;;  %v2702_v24 = vadd.f32 %v2701_v8, %v18000_v63  ;;  %v5578_v63 = vshll.u32 %v13249_v59, 16  ;;  %v2706_v19 = vadd.f32 %v2705_v25, %v18013_v26  ;;  %v2818_v32 = vpop.f32.mrf.mxu1  ;;  %5152 = vmatmul.mubr.bf16.gmra.mxu1 %v15226_v45  ;;  %v15236_v21 = vld [vmem:[%s23311_s1 + $0xbc0] ss:$8 sps:$4 sm:$0xff]   ;;  %v5592_v62 = vshll.u32 %v13250_v15, 16 }
 0x1c1   : > { %6637 = vmatpush2.bf16.msra.mxu1 %v15230_v38  ;;  %v15239_v59 = vld [vmem:[%s16290_s29 + $0x1ac] ss:$20 sps:$4 sm:$0xff]   ;;  %v5510_v39 = vrot.slane %v5509_v37, 4  ;;  %v5557_v26 = vor.u32 %v18492_v43, %v18318_v13  ;;  %v5598_v45 = vshll.u32 %v13253_v33, 16  ;;  %v15242_v38 = vld [vmem:[%s16290_s29 + $0x1b4] ss:$20 sps:$4 sm:$0xff]   ;;  %v5547_v13 = vor.u32 %v18570_v55, %v18557_v12  ;;  %5161 = vmatprep.mubr.bf16.mxu1 %v23371_v0 }
 0x1c2   : > { %5039 = vmatmul.mubr.bf16.gmra.mxu0 %v15223_v1  ;;  %v18576_v8 = vadd.f32 %v2814_v23, %v2702_v24  ;;  %v2707_v1 = vpop.f32.mrf.mxu0  ;;  %v15245_v23 = vld [vmem:[%s23311_s1 + $0xab4] ss:$8 sps:$4 sm:$0xff]   ;;  %v18588_v25 = vadd.f32 %v2818_v32, %v2706_v19  ;;  %6638 = vmatprep.subr.bf16.mxu1 %v15238_v29  ;;  %v5560_v19 = vshll.u32 %v18573_v56, 16  ;;  %v15246_v32 = vld [vmem:[%s23311_s1 + $0xbb0] ss:$8 sps:$4 sm:$0xff]   ;;  %v18610_v29 = vrot.slane %v5578_v63, 5 }
 0x1c3   : > { %6524 = vmatpush2.bf16.msra.mxu0 %v15227_v14  ;;  %v5626_v14 = vshrl.u32 %v13253_v33, 16  ;;  %v2708_v24 = vadd.f32 %v2707_v1, %v18017_v42  ;;  %5048 = vmatprep.mubr.bf16.mxu0 %v15241_v11  ;;  %v15248_v15 = vld [vmem:[%s23311_s1 + $0xbb4] ss:$8 sps:$4 sm:$0xff]   ;;  %v15251_v43 = vld [vmem:[%s23311_s1 + $0xaa4] ss:$8 sps:$4 sm:$0xff]   ;;  %v18608_v11 = vrot.slane %v5575_v2, 4 }
 0x1c4   : > { %23395 = vst [vmem:[#allocation30_spill] sm:$0xff] %v18576_v8  ;;  %6525 = vmatprep.subr.bf16.mxu0 %v15235_v28  ;;  %23396 = vst [vmem:[#allocation31_spill] sm:$0xff] %v18588_v25  ;;  %v2820_v8 = vpop.f32.mrf.mxu1  ;;  %v15243_v28 = vld [vmem:[%s23311_s1 + $0xab0] ss:$8 sps:$4 sm:$0xff]   ;;  %v2709_v42 = vpop.f32.mrf.mxu0  ;;  %v18612_v37 = vrot.slane %v5584_v41, 5  ;;  %v18614_v55 = vrot.slane %v5616_v35, 4 }
 0x1c5   : > { %v18616_v56 = vadd.f32 %v2820_v8, %v2708_v24  ;;  %v2710_v33 = vadd.f32 %v2709_v42, %v18027_v54  ;;  %v15254_v25 = vld [vmem:[%s23311_s1 + $0xba4] ss:$8 sps:$4 sm:$0xff]   ;;  %v13255_v16 = vld [vmem:[%s16290_s29 + $0x154] sm:$0x11]  ;;  %v18624_v2 = vrot.slane %v5589_v60, 4  ;;  %v18626_v63 = vrot.slane %v5592_v62, 5  ;;  %6639 = vmatpush2.bf16.msra.mxu1 %v15236_v21 }
 0x1c6   : > { %v2822_v1 = vpop.f32.mrf.mxu1  ;;  %v15257_v3 = vld [vmem:[%s16290_s29 + $0x1ec] ss:$20 sps:$4 sm:$0xff]   ;;  %v2711_v41 = vpop.f32.mrf.mxu0  ;;  %v18632_v8 = vrot.slane %v5598_v45, 5  ;;  %v5628_v24 = vrot.slane %v5626_v14, 4  ;;  %6640 = vmatprep.subr.bf16.mxu1 %v15248_v15  ;;  %v18640_v62 = vsel %vm16324_vm2, %v5510_v39, %v18557_v12  ;;  %v5558_v21 = vrot.slane %v5557_v26, 4 }
 0x1c7   : > { %23397 = vst [vmem:[#allocation32_spill] sm:$0xff] %v18616_v56  ;;  %6526 = vmatpush2.bf16.msra.mxu0 %v15233_v27  ;;  %v23398_v27 = vshll.u32 %v18514_v57, 16  ;;  %v18634_v42 = vadd.f32 %v2822_v1, %v2710_v33  ;;  %v2712_v60 = vadd.f32 %v2711_v41, %v18033_v51  ;;  %v13258_v54 = vld [vmem:[%s16290_s29 + $0x168] sm:$0xff]  ;;  %v5548_v45 = vrot.slane %v5547_v13, 4  ;;  %v13261_v15 = vld [vmem:[%s16290_s29 + $0x17c] sm:$0xff] }
 0x1c8   : > { %6527 = vmatprep.subr.bf16.mxu0 %v15245_v23  ;;  %v2824_v56 = vpop.f32.mrf.mxu1  ;;  %v13256_v23 = vld [vmem:[%s16290_s29 + $0x15c] sm:$0x11]  ;;  %v2715_v57 = vpop.f32.mrf.mxu0  ;;  %v5581_v14 = vor.u32 %v18610_v29, %v18608_v11  ;;  %v5619_v51 = vor.u32 %v18614_v55, %v18612_v37  ;;  %v5622_v33 = vshll.u32 %v13255_v16, 16  ;;  %5162 = vmatmul.mubr.bf16.gmra.mxu1 %v15242_v38  ;;  %v5562_v13 = vrot.slane %v5560_v19, 5 }
 0x1c9   : > { %v5552_v35 = vrot.slane %v23398_v27, 5  ;;  %23399 = vst [vmem:[#allocation33_spill] sm:$0xff] %v18634_v42  ;;  %v18649_v1 = vadd.f32 %v2824_v56, %v2712_v60  ;;  %v2716_v12 = vadd.f32 %v2715_v57, %v18045_v18  ;;  %v15252_v26 = vld [vmem:[%s23311_s1 + $0xba0] ss:$8 sps:$4 sm:$0xff]   ;;  %v5595_v16 = vor.u32 %v18626_v63, %v18624_v2  ;;  %6641 = vmatpush2.bf16.msra.mxu1 %v15246_v32  ;;  %v15261_v38 = vld [vmem:[%s23311_s1 + $0xa94] ss:$8 sps:$4 sm:$0xff]  }
 0x1ca   : > { %5049 = vmatmul.mubr.bf16.gmra.mxu0 %v15239_v59  ;;  %v2828_v39 = vpop.f32.mrf.mxu1  ;;  %v15249_v59 = vld [vmem:[%s23311_s1 + $0xaa0] ss:$8 sps:$4 sm:$0xff]   ;;  %v2717_v11 = vpop.f32.mrf.mxu0  ;;  %v5632_v29 = vshll.u32 %v13256_v23, 16  ;;  %v5647_v55 = vshrl.u32 %v13258_v54, 16  ;;  %v5650_v56 = vshll.u32 %v13258_v54, 16  ;;  %6642 = vmatprep.subr.bf16.mxu1 %v15254_v25  ;;  %v5656_v63 = vshll.u32 %v13261_v15, 16 }
 0x1cb   : > { %23400 = vst [vmem:[#allocation34_spill] sm:$0xff] %v18649_v1  ;;  %6528 = vmatpush2.bf16.msra.mxu0 %v15243_v28  ;;  %v15255_v18 = vld [vmem:[%s16290_s29 + $0x1e8] ss:$20 sps:$4 sm:$0xff]   ;;  %v5629_v28 = vor.u32 %v5628_v24, %v18632_v8  ;;  %v18665_v41 = vadd.f32 %v2828_v39, %v2716_v12  ;;  %v2718_v19 = vadd.f32 %v2717_v11, %v18054_v50  ;;  %v15258_v32 = vld [vmem:[%s16290_s29 + $0x1f0] ss:$20 sps:$4 sm:$0xff]   ;;  %v5688_v24 = vshrl.u32 %v13261_v15, 16 }
 0x1cc   : > { %6529 = vmatprep.subr.bf16.mxu0 %v15251_v43  ;;  %v2830_v27 = vpop.f32.mrf.mxu1  ;;  %5058 = vmatprep.mubr.bf16.mxu0 %v15257_v3  ;;  %v15259_v43 = vld [vmem:[%s23311_s1 + $0xa90] ss:$8 sps:$4 sm:$0xff]   ;;  %v15264_v2 = vld [vmem:[%s23311_s1 + $0xb94] ss:$8 sps:$4 sm:$0xff]   ;;  %v2719_v60 = vpop.f32.mrf.mxu0  ;;  %v18681_v3 = vsel %vm16324_vm2, %v5548_v45, %v5552_v35  ;;  %v5582_v25 = vrot.slane %v5581_v14, 4  ;;  %v5620_v54 = vrot.slane %v5619_v51, 4  ;;  %v18694_v35 = vsel %vm16324_vm2, %v5558_v21, %v5562_v13 }
 0x1cd   : > { %23401 = vst [vmem:[#allocation35_spill] sm:$0xff] %v18665_v41  ;;  %5171 = vmatprep.mubr.bf16.mxu1 %v23371_v0  ;;  %v15262_v50 = vld [vmem:[%s23311_s1 + $0xb90] ss:$8 sps:$4 sm:$0xff]   ;;  %v5624_v23 = vrot.slane %v5622_v33, 5  ;;  %v18683_v57 = vadd.f32 %v2830_v27, %v2718_v19  ;;  %v15267_v15 = vld [vmem:[%s23311_s1 + $0xa84] ss:$8 sps:$4 sm:$0xff]   ;;  %6643 = vmatpush2.bf16.msra.mxu1 %v15252_v26 }
 0x1ce   : > { %v23403_v12 = vld [vmem:[#allocation7_spill] sm:$0xff]  ;;  %v2832_v11 = vpop.f32.mrf.mxu1  ;;  %v15270_v41 = vld [vmem:[%s23311_s1 + $0xb84] ss:$8 sps:$4 sm:$0xff]   ;;  %v5596_v45 = vrot.slane %v5595_v16, 4  ;;  %v2721_v14 = vpop.f32.mrf.mxu0  ;;  %v5630_v51 = vrot.slane %v5629_v28, 4  ;;  %v5634_v33 = vrot.slane %v5632_v29, 5  ;;  %6644 = vmatprep.subr.bf16.mxu1 %v15264_v2  ;;  %v18717_v29 = vsel %vm16324_vm2, %v5582_v25, %v18612_v37 }
 0x1cf   : > { %23402 = vst [vmem:[#allocation36_spill] sm:$0xff] %v18683_v57  ;;  %v2720_v39 = vadd.f32 %v2719_v60, %v23403_v12  ;;  %6530 = vmatpush2.bf16.msra.mxu0 %v15249_v59  ;;  %v5649_v59 = vrot.slane %v5647_v55, 4  ;;  %v5652_v19 = vrot.slane %v5650_v56, 5  ;;  %v23405_v60 = vld [vmem:[#allocation8_spill] sm:$0xff]  ;;  %v13264_v1 = vld [vmem:[%s16290_s29 + $0x190] sm:$0x11]  ;;  %v18721_v55 = vsel %vm16324_vm2, %v5620_v54, %v5624_v23 }
 0x1d0   : > { %6531 = vmatprep.subr.bf16.mxu0 %v15261_v38  ;;  %v2722_v12 = vadd.f32 %v2721_v14, %v23405_v60  ;;  %v2834_v57 = vpop.f32.mrf.mxu1  ;;  %v18700_v42 = vrot.slane %v5656_v63, 5  ;;  %v18702_v21 = vrot.slane %v5688_v24, 4  ;;  %v18705_v13 = vld [vmem:[%s16290_s29 + $0x170] sm:$0xff]  ;;  %v2725_v26 = vpop.f32.mrf.mxu0  ;;  %v15265_v16 = vld [vmem:[%s23311_s1 + $0xa80] ss:$8 sps:$4 sm:$0xff]   ;;  %5172 = vmatmul.mubr.bf16.gmra.mxu1 %v15258_v32  ;;  %v18732_v37 = vsel %vm16324_vm2, %v5596_v45, %v18632_v8 }
 0x1d1   : > { %v18696_v27 = vadd.f32 %v2832_v11, %v2720_v39  ;;  %v23407_v56 = vld [vmem:[#allocation9_spill] sm:$0xff]  ;;  %6645 = vmatpush2.bf16.msra.mxu1 %v15262_v50  ;;  %v15273_v23 = vld [vmem:[%s23311_s1 + $0xc74] ss:$8 sps:$4 sm:$0xff]   ;;  %v18740_v32 = vsel %vm16324_vm2, %v5630_v51, %v5634_v33  ;;  %v5661_v39 = vshrl.u32 %v18705_v13, 16  ;;  %v23409_v8 = vld [vmem:[#allocation10_spill] sm:$0xff]  ;;  %v23410_v50 = vcombine.high %v18365_v53, %v18369_v31 }
 0x1d2   : > { %5059 = vmatmul.mubr.bf16.gmra.mxu0 %v15255_v18  ;;  %v18723_v18 = vadd.f32 %v2834_v57, %v2722_v12  ;;  %v2726_v2 = vadd.f32 %v2725_v26, %v23407_v56  ;;  %v2838_v63 = vpop.f32.mrf.mxu1  ;;  %v15268_v24 = vld [vmem:[%s23311_s1 + $0xb80] ss:$8 sps:$4 sm:$0xff]   ;;  %v2727_v54 = vpop.f32.mrf.mxu0  ;;  %v5694_v57 = vshll.u32 %v13264_v1, 16  ;;  %6646 = vmatprep.subr.bf16.mxu1 %v15270_v41  ;;  %v5691_v51 = vor.u32 %v18702_v21, %v18700_v42  ;;  %v15271_v41 = vld [vmem:[%s23311_s1 + $0xc70] ss:$8 sps:$4 sm:$0xff]  }
 0x1d3   : > { %23404 = vst [vmem:[#allocation7_spill] sm:$0xff] %v18696_v27  ;;  %6532 = vmatpush2.bf16.msra.mxu0 %v15259_v43  ;;  %v13262_v25 = vld [vmem:[%s16290_s29 + $0x184] sm:$0xff]  ;;  %v5653_v43 = vor.u32 %v5652_v19, %v5649_v59  ;;  %v2728_v45 = vadd.f32 %v2727_v54, %v23409_v8  ;;  %6535 = vmatprep.mubr.bf16.mxu0 %v23410_v50  ;;  %v5664_v1 = vshll.u32 %v18705_v13, 16  ;;  %v23413_v13 = vld [vmem:[#allocation11_spill] sm:$0xff]  ;;  %v13270_v8 = vld [vmem:[%s16290_s29 + $0x1b8] sm:$0xff] }
 0x1d4   : > { %23406 = vst [vmem:[#allocation8_spill] sm:$0xff] %v18723_v18  ;;  %6533 = vmatprep.subr.bf16.mxu0 %v15267_v15  ;;  %v18743_v11 = vadd.f32 %v2838_v63, %v2726_v2  ;;  %v2840_v14 = vpop.f32.mrf.mxu1  ;;  %v15276_v15 = vld [vmem:[%s23311_s1 + $0xcf4] ss:$8 sps:$4 sm:$0xff]   ;;  %v2729_v33 = vpop.f32.mrf.mxu0  ;;  %v23411_v59 = vcombine.high %v18209_v46, %v18374_v20  ;;  %v5670_v12 = vshll.u32 %v13262_v25, 16  ;;  %v5698_v21 = vshrl.u32 %v13262_v25, 16  ;;  %v18790_v25 = vld [vmem:[%s16290_s29 + $0x1ac] sm:$0xff] }
 0x1d5   : > { %v18765_v26 = vadd.f32 %v2840_v14, %v2728_v45  ;;  %v2730_v56 = vadd.f32 %v2729_v33, %v23413_v13  ;;  %v15274_v63 = vld [vmem:[%s23311_s1 + $0xcf0] ss:$8 sps:$4 sm:$0xff]   ;;  %v15279_v54 = vld [vmem:[%s23311_s1 + $0xce4] ss:$8 sps:$4 sm:$0xff]   ;;  %6647 = vmatpush2.bf16.msra.mxu1 %v15268_v24  ;;  %v5654_v33 = vrot.slane %v5653_v43, 4  ;;  %v18786_v13 = vrot.slane %v5661_v39, 4 }
 0x1d6   : > { %23408 = vst [vmem:[#allocation9_spill] sm:$0xff] %v18743_v11  ;;  %6648 = vmatprep.mubr.bf16.mxu1 %v23411_v59  ;;  %v2842_v2 = vpop.f32.mrf.mxu1  ;;  %v18779_v45 = vld [vmem:[%s16290_s29 + $0x1a4] sm:$0xff]  ;;  %v2731_v14 = vpop.f32.mrf.mxu0  ;;  %v5696_v59 = vrot.slane %v5694_v57, 5  ;;  %v23415_v24 = vld [vmem:[#allocation12_spill] sm:$0xff]  ;;  %7779 = vmatprep.subr.bf16.mxu1 %v15276_v15  ;;  %v23416_v43 = vcombine.low %v18365_v53, %v18369_v31  ;;  %v18807_v39 = vrot.slane %v5670_v12, 5  ;;  %v5728_v31 = vshll.u32 %v13270_v8, 16 }
 0x1d7   : > { %23412 = vst [vmem:[#allocation10_spill] sm:$0xff] %v18765_v26  ;;  %6534 = vmatpush2.bf16.msra.mxu0 %v15265_v16  ;;  %v15282_v16 = vld [vmem:[%s23311_s1 + $0xc64] ss:$8 sps:$4 sm:$0xff]   ;;  %v18792_v19 = vadd.f32 %v2842_v2, %v2730_v56  ;;  %v2732_v38 = vadd.f32 %v2731_v14, %v23415_v24  ;;  %v18796_v28 = vld [vmem:[%s16290_s29 + $0x198] sm:$0x11]  ;;  %v18798_v26 = vrot.slane %v5664_v1, 5  ;;  %v23418_v14 = vcombine.low %v18209_v46, %v18374_v20 }
 0x1d8   : > { %6729 = vmatprep.subr.bf16.mxu0 %v15273_v23  ;;  %v2844_v60 = vpop.f32.mrf.mxu1  ;;  %v5692_v23 = vrot.slane %v5691_v51, 4  ;;  %v13271_v11 = vld [vmem:[%s16290_s29 + $0x1c0] sm:$0xff]  ;;  %v3765_v50 = vpop.f32.mrf.mxu0  ;;  %v18809_v56 = vrot.slane %v5698_v21, 4  ;;  %v5719_v15 = vshrl.u32 %v18779_v45, 16  ;;  %v5722_v51 = vshll.u32 %v18779_v45, 16 }
 0x1d9   : > { %23414 = vst [vmem:[#allocation11_spill] sm:$0xff] %v18792_v19  ;;  %v15277_v57 = vld [vmem:[%s23311_s1 + $0xce0] ss:$8 sps:$4 sm:$0xff]   ;;  %v18813_v1 = vadd.f32 %v2844_v60, %v2732_v38  ;;  %6649 = vmatmul.mubr.bf16.vlgmr.msra.gmra.mxu1 %v23418_v14  ;;  %v5760_v12 = vshrl.u32 %v13270_v8, 16  ;;  %v5733_v21 = vshrl.u32 %v18790_v25, 16  ;;  %v23419_v60 = vcombine.high %v18462_v47, %v18488_v36 }
 0x1da   : > { %6536 = vmatmul.mubr.bf16.vlgmr.msra.gmra.mxu0 %v23416_v43  ;;  %v3878_v2 = vpop.f32.mrf.mxu1  ;;  %v15280_v53 = vld [vmem:[%s23311_s1 + $0xc60] ss:$8 sps:$4 sm:$0xff]   ;;  %7780 = vmatpush1.bf16.msra.mxu1 %v15274_v63  ;;  %v3767_v38 = vpop.f32.mrf.mxu0  ;;  %v15291_v46 = vld [vmem:[%s23311_s1 + $0xc54] ss:$8 sps:$4 sm:$0xff]   ;;  %v5742_v8 = vshll.u32 %v13271_v11, 16  ;;  %v23420_v63 = vcombine.high %v18277_v52, %v18478_v4  ;;  %v18842_v43 = vsel %vm16324_vm2, %v5654_v33, %v18700_v42  ;;  %v5667_v42 = vor.u32 %v18798_v26, %v18786_v13 }
 0x1db   : > { %23417 = vst [vmem:[#allocation12_spill] sm:$0xff] %v18813_v1  ;;  %6730 = vmatpush1.bf16.msra.mxu0 %v15271_v41  ;;  %v18822_v24 = vadd.f32 %v3878_v2, %v3765_v50  ;;  %6545 = vmatprep.mubr.bf16.mxu0 %v23419_v60  ;;  %v5736_v41 = vshll.u32 %v18790_v25, 16  ;;  %v15285_v50 = vld [vmem:[%s23311_s1 + $0xcd4] ss:$8 sps:$4 sm:$0xff]   ;;  %v18846_v25 = vsel %vm16324_vm2, %v5692_v23, %v5696_v59  ;;  %v5770_v2 = vshrl.u32 %v13271_v11, 16  ;;  %v13276_v14 = vld [vmem:[%s16290_s29 + $0x1e0] sm:$0xff] }
 0x1dc   : > { %v3880_v45 = vpop.f32.mrf.mxu1  ;;  %7781 = vmatprep.subr.bf16.mxu1 %v15279_v54  ;;  %6658 = vmatprep.mubr.bf16.mxu1 %v23420_v63  ;;  %v5704_v54 = vshll.u32 %v18796_v28, 16  ;;  %v3769_v63 = vpop.f32.mrf.mxu0  ;;  %v15283_v20 = vld [vmem:[%s23311_s1 + $0xcd0] ss:$8 sps:$4 sm:$0xff]   ;;  %v5701_v33 = vor.u32 %v18809_v56, %v18807_v39  ;;  %v18862_v28 = vrot.slane %v5719_v15, 4  ;;  %v5724_v26 = vrot.slane %v5722_v51, 5 }
 0x1dd   : > { %v18850_v60 = vadd.f32 %v3880_v45, %v3767_v38  ;;  %6731 = vmatprep.subr.bf16.mxu0 %v15282_v16  ;;  %v18860_v59 = vld [vmem:[%s16290_s29 + $0x1cc] sm:$0x11]  ;;  %v18865_v11 = vld [vmem:[%s16290_s29 + $0x1f4] sm:$0xff]  ;;  %v18873_v13 = vrot.slane %v5728_v31, 5  ;;  %v18875_v56 = vrot.slane %v5760_v12, 4  ;;  %v18880_v15 = vrot.slane %v5733_v21, 4 }
 0x1de   : > { %v3882_v23 = vpop.f32.mrf.mxu1  ;;  %v15288_v16 = vld [vmem:[%s23311_s1 + $0xcc4] ss:$8 sps:$4 sm:$0xff]   ;;  %v15289_v38 = vld [vmem:[%s23311_s1 + $0xc50] ss:$8 sps:$4 sm:$0xff]   ;;  %7782 = vmatpush1.bf16.msra.mxu1 %v15277_v57  ;;  %v5738_v19 = vrot.slane %v5736_v41, 5  ;;  %v18884_v18 = vrot.slane %v5742_v8, 5  ;;  %v23421_v57 = vcombine.low %v18462_v47, %v18488_v36  ;;  %v23423_v36 = vcombine.high %v18532_v49, %v18536_v6 }
 0x1df   : > { %6732 = vmatpush1.bf16.msra.mxu0 %v15280_v53  ;;  %v18878_v45 = vld [vmem:[%s16290_s29 + $0x1d4] sm:$0x11]  ;;  %v18882_v1 = vadd.f32 %v3882_v23, %v3769_v63  ;;  %v3771_v53 = vpop.f32.mrf.mxu0  ;;  %v5791_v27 = vshrl.u32 %v13276_v14, 16  ;;  %7783 = vmatprep.subr.bf16.mxu1 %v15285_v50  ;;  %v5772_v51 = vrot.slane %v5770_v2, 4  ;;  %v5794_v31 = vshll.u32 %v13276_v14, 16 }
 0x1e0   : > { %6733 = vmatprep.subr.bf16.mxu0 %v15291_v46  ;;  %v3884_v48 = vpop.f32.mrf.mxu1  ;;  %v5800_v12 = vshll.u32 %v18865_v11, 16  ;;  %v5832_v9 = vshrl.u32 %v18865_v11, 16  ;;  %v15300_v46 = vld [vmem:[%s23311_s1 + $0xc44] ss:$8 sps:$4 sm:$0xff]   ;;  %v5668_v41 = vrot.slane %v5667_v42, 4  ;;  %v5702_v8 = vrot.slane %v5701_v33, 4 }
 0x1e1   : > { %v18888_v44 = vadd.f32 %v3884_v48, %v3771_v53  ;;  %v3775_v21 = vpop.f32.mrf.mxu0  ;;  %v5706_v50 = vrot.slane %v5704_v54, 5  ;;  %v23422_v14 = vcombine.low %v18277_v52, %v18478_v4  ;;  %v15286_v48 = vld [vmem:[%s23311_s1 + $0xcc0] ss:$8 sps:$4 sm:$0xff]   ;;  %v15294_v47 = vld [vmem:[%s23311_s1 + $0xcb4] ss:$8 sps:$4 sm:$0xff]   ;;  %v5725_v63 = vor.u32 %v5724_v26, %v18862_v28 }
 0x1e2   : > { %6546 = vmatmul.mubr.bf16.gmra.mxu0 %v23421_v57  ;;  %v3888_v2 = vpop.f32.mrf.mxu1  ;;  %v5763_v52 = vor.u32 %v18875_v56, %v18873_v13  ;;  %v5766_v4 = vshll.u32 %v18860_v59, 16  ;;  %v18915_v42 = vld [vmem:[%s16290_s29 + $0x1e8] sm:$0xff]  ;;  %7784 = vmatpush1.bf16.msra.mxu1 %v15283_v20  ;;  %v23424_v53 = vcombine.high %v18312_v17, %v18501_v5  ;;  %v5739_v57 = vor.u32 %v5738_v19, %v18880_v15 }
 0x1e3   : > { %6659 = vmatmul.mubr.bf16.gmra.mxu1 %v23422_v14  ;;  %6555 = vmatprep.mubr.bf16.mxu0 %v23423_v36  ;;  %v18917_v33 = vadd.f32 %v3888_v2, %v3775_v21  ;;  %v3777_v23 = vpop.f32.mrf.mxu0  ;;  %v5776_v14 = vshll.u32 %v18878_v45, 16  ;;  %v18924_v28 = vrot.slane %v5791_v27, 4  ;;  %v15298_v59 = vld [vmem:[%s23311_s1 + $0xc40] ss:$8 sps:$4 sm:$0xff]   ;;  %v5773_v20 = vor.u32 %v5772_v51, %v18884_v18 }
 0x1e4   : > { %6668 = vmatprep.mubr.bf16.mxu1 %v23424_v53  ;;  %v3890_v26 = vpop.f32.mrf.mxu1  ;;  %7785 = vmatprep.subr.bf16.mxu1 %v15288_v16  ;;  %v18930_v56 = vrot.slane %v5794_v31, 5  ;;  %v18932_v21 = vrot.slane %v5800_v12, 5  ;;  %v5834_v19 = vrot.slane %v5832_v9, 4  ;;  %v15292_v16 = vld [vmem:[%s23311_s1 + $0xcb0] ss:$8 sps:$4 sm:$0xff]   ;;  %v18947_v51 = vsel %vm16324_vm2, %v5668_v41, %v18807_v39 }
 0x1e5   : > { %6734 = vmatpush1.bf16.msra.mxu0 %v15289_v38  ;;  %v18934_v15 = vadd.f32 %v3890_v26, %v3777_v23  ;;  %v3779_v27 = vpop.f32.mrf.mxu0  ;;  %v15309_v38 = vld [vmem:[%s23311_s1 + $0xc34] ss:$8 sps:$4 sm:$0xff]   ;;  %v18951_v9 = vsel %vm16324_vm2, %v5702_v8, %v5706_v50  ;;  %v18954_v31 = vld [vmem:[%s16290_s29 + $0x208] sm:$0x11]  ;;  %v5726_v2 = vrot.slane %v5725_v63, 4  ;;  %v5768_v36 = vrot.slane %v5766_v4, 5 }
 0x1e6   : > { %6735 = vmatprep.subr.bf16.mxu0 %v15300_v46  ;;  %v3892_v12 = vpop.f32.mrf.mxu1  ;;  %v15297_v46 = vld [vmem:[%s23311_s1 + $0xca4] ss:$8 sps:$4 sm:$0xff]   ;;  %v13280_v23 = vld [vmem:[%s16290_s29 + $0x1fc] sm:$0xff]  ;;  %v5805_v53 = vshrl.u32 %v18915_v42, 16  ;;  %v5808_v26 = vshll.u32 %v18915_v42, 16  ;;  %7786 = vmatpush1.bf16.msra.mxu1 %v15286_v48  ;;  %v5764_v8 = vrot.slane %v5763_v52, 4  ;;  %v5797_v34 = vor.u32 %v18930_v56, %v18924_v28 }
 0x1e7   : > { %v18962_v39 = vadd.f32 %v3892_v12, %v3779_v27  ;;  %v3781_v41 = vpop.f32.mrf.mxu0  ;;  %v5740_v50 = vrot.slane %v5739_v57, 4  ;;  %v5778_v54 = vrot.slane %v5776_v14, 5  ;;  %7787 = vmatprep.subr.bf16.mxu1 %v15294_v47  ;;  %v15307_v63 = vld [vmem:[%s23311_s1 + $0xc30] ss:$8 sps:$4 sm:$0xff]   ;;  %v5774_v4 = vrot.slane %v5773_v20, 4 }
 0x1e8   : > { %v3894_v45 = vpop.f32.mrf.mxu1  ;;  %v5835_v42 = vor.u32 %v5834_v19, %v18932_v21  ;;  %v5838_v27 = vshll.u32 %v18954_v31, 16  ;;  %v23425_v47 = vcombine.low %v18532_v49, %v18536_v6  ;;  %v15295_v57 = vld [vmem:[%s23311_s1 + $0xca0] ss:$8 sps:$4 sm:$0xff]   ;;  %v15318_v28 = vld [vmem:[%s23311_s1 + $0xc24] ss:$8 sps:$4 sm:$0xff]   ;;  %v5842_v20 = vshrl.u32 %v13280_v23, 16 }
 0x1e9   : > { %6736 = vmatpush1.bf16.msra.mxu0 %v15298_v59  ;;  %v18971_v48 = vadd.f32 %v3894_v45, %v3781_v41  ;;  %v3785_v52 = vpop.f32.mrf.mxu0  ;;  %v5814_v59 = vshll.u32 %v13280_v23, 16  ;;  %v23426_v49 = vcombine.low %v18312_v17, %v18501_v5  ;;  %v23427_v6 = vcombine.high %v18640_v62, %v18681_v3  ;;  %v15303_v19 = vld [vmem:[%s23311_s1 + $0xc94] ss:$8 sps:$4 sm:$0xff]   ;;  %v15316_v45 = vld [vmem:[%s23311_s1 + $0xc20] ss:$8 sps:$4 sm:$0xff]  }
 0x1ea   : > { %6556 = vmatmul.mubr.bf16.gmra.mxu0 %v23425_v47  ;;  %6737 = vmatprep.subr.bf16.mxu0 %v15309_v38  ;;  %v3898_v56 = vpop.f32.mrf.mxu1  ;;  %v19001_v17 = vsel %vm16324_vm2, %v5726_v2, %v18873_v13  ;;  %v13283_v5 = vld [vmem:[%s16290_s29 + $0x210] sm:$0x11]  ;;  %v5807_v12 = vrot.slane %v5805_v53, 4  ;;  %v5810_v23 = vrot.slane %v5808_v26, 5  ;;  %v19005_v41 = vld [vmem:[%s16290_s29 + $0x4c] sm:$0xf]  ;;  %v19014_v14 = vsel %vm16324_vm2, %v5764_v8, %v5768_v36 }
 0x1eb   : > { %6669 = vmatmul.mubr.bf16.gmra.mxu1 %v23426_v49  ;;  %6565 = vmatprep.mubr.bf16.mxu0 %v23427_v6  ;;  %v19007_v47 = vadd.f32 %v3898_v56, %v3785_v52  ;;  %v3787_v49 = vpop.f32.mrf.mxu0  ;;  %v23428_v6 = vcombine.high %v18470_v61, %v18694_v35  ;;  %v19019_v13 = vsel %vm16324_vm2, %v5740_v50, %v18884_v18  ;;  %v5798_v53 = vrot.slane %v5797_v34, 4  ;;  %v19026_v56 = vld [vmem:[%s16290_s29 + $0x60] sm:$0xf]  ;;  %v15327_v18 = vld [vmem:[%s23311_s1 + $0xc14] ss:$8 sps:$4 sm:$0xff]  }
 0x1ec   : > { %7788 = vmatpush1.bf16.msra.mxu1 %v15292_v16  ;;  %v3900_v2 = vpop.f32.mrf.mxu1  ;;  %v19023_v16 = vsel %vm16324_vm2, %v5774_v4, %v5778_v54  ;;  %v5836_v26 = vrot.slane %v5835_v42, 4  ;;  %v5840_v52 = vrot.slane %v5838_v27, 5  ;;  %v5844_v8 = vrot.slane %v5842_v20, 4  ;;  %v15301_v34 = vld [vmem:[%s23311_s1 + $0xc90] ss:$8 sps:$4 sm:$0xff]  }
 0x1ed   : > { %6678 = vmatprep.mubr.bf16.mxu1 %v23428_v6  ;;  %7789 = vmatprep.subr.bf16.mxu1 %v15297_v46  ;;  %v19028_v6 = vadd.f32 %v3900_v2, %v3787_v49  ;;  %v3789_v36 = vpop.f32.mrf.mxu0  ;;  %v19033_v46 = vrot.slane %v5814_v59, 5  ;;  %v5848_v50 = vshll.u32 %v13283_v5, 16  ;;  %v5811_v42 = vor.u32 %v5810_v23, %v5807_v12  ;;  %v19046_v20 = vld [vmem:[%s16290_s29 + $0x3c] sm:$0xee]  ;;  %v15306_v12 = vld [vmem:[%s23311_s1 + $0xc84] ss:$8 sps:$4 sm:$0xff]  }
 0x1ee   : > { %6738 = vmatpush1.bf16.msra.mxu0 %v15307_v63  ;;  %v3902_v54 = vpop.f32.mrf.mxu1  ;;  %v5315_v27 = vshrl.u32 %v19005_v41, 16  ;;  %v5318_v5 = vshll.u32 %v19005_v41, 16  ;;  %v5324_v49 = vshll.u32 %v19026_v56, 16  ;;  %v5348_v2 = vshrl.u32 %v19026_v56, 16  ;;  %v15325_v41 = vld [vmem:[%s23311_s1 + $0xc10] ss:$8 sps:$4 sm:$0xff]  }
 0x1ef   : > { %6739 = vmatprep.subr.bf16.mxu0 %v15318_v28  ;;  %v19043_v28 = vadd.f32 %v3902_v54, %v3789_v36  ;;  %v3791_v59 = vpop.f32.mrf.mxu0  ;;  %v15336_v36 = vld [vmem:[%s23311_s1 + $0xc04] ss:$8 sps:$4 sm:$0xff]   ;;  %v15304_v63 = vld [vmem:[%s23311_s1 + $0xc80] ss:$8 sps:$4 sm:$0xff]   ;;  %v23432_v4 = vcombine.low %v18470_v61, %v18694_v35 }
 0x1f0   : > { %7790 = vmatpush1.bf16.msra.mxu1 %v15295_v57  ;;  %v3904_v38 = vpop.f32.mrf.mxu1  ;;  %v23431_v57 = vcombine.low %v18640_v62, %v18681_v3  ;;  %v23433_v62 = vcombine.high %v18717_v29, %v18721_v55  ;;  %v15312_v3 = vld [vmem:[%s23311_s1 + $0xd74] ss:$8 sps:$4 sm:$0xff]   ;;  %v19100_v61 = vrot.slane %v5315_v27, 4  ;;  %v19109_v22 = vrot.slane %v5324_v49, 5 }
 0x1f1   : > { %23429 = vst [vmem:[#allocation37_spill] sm:$0xff] %v19043_v28  ;;  %7791 = vmatprep.subr.bf16.mxu1 %v15303_v19  ;;  %v19064_v19 = vsel %vm16324_vm2, %v5798_v53, %v18932_v21  ;;  %v3795_v54 = vpop.f32.mrf.mxu0  ;;  %v19079_v21 = vsel %vm16324_vm2, %v5836_v26, %v5840_v52  ;;  %v5845_v53 = vor.u32 %v5844_v8, %v19033_v46  ;;  %v15334_v26 = vld [vmem:[%s23311_s1 + $0xc00] ss:$8 sps:$4 sm:$0xff]   ;;  %v13509_v52 = vrot.slane %v19046_v20, 9  ;;  %v15893_v8 = vld [vmem:[%s16290_s29 + $0x50] sm:$0xff] }
 0x1f2   : > { %6740 = vmatpush1.bf16.msra.mxu0 %v15316_v45  ;;  %v19069_v45 = vadd.f32 %v3904_v38, %v3791_v59  ;;  %v5850_v38 = vrot.slane %v5848_v50, 5  ;;  %v13506_v59 = vld [vmem:[%s16290_s29 + $0x1e0] sm:$0xee]  ;;  %v3908_v23 = vpop.f32.mrf.mxu1  ;;  %v6972_v50 = vrot.slane %v15893_v8, 5  ;;  %v5350_v20 = vrot.slane %v5348_v2, 4 }
 0x1f3   : > { %6566 = vmatmul.mubr.bf16.gmra.mxu0 %v23431_v57  ;;  %6741 = vmatprep.subr.bf16.mxu0 %v15327_v18  ;;  %v5812_v18 = vrot.slane %v5811_v42, 4  ;;  %v19098_v57 = vld [vmem:[%s16290_s29 + $0x74] sm:$0x1]  ;;  %v19102_v35 = vadd.f32 %v3908_v23, %v3795_v54  ;;  %v19107_v42 = vrot.slane %v5318_v5, 5  ;;  %v13530_v54 = vrot.slane %v13506_v59, 9 }
 0x1f4   : > { %23430 = vst [vmem:[#allocation38_spill] sm:$0xff] %v19069_v45  ;;  %6679 = vmatmul.mubr.bf16.gmra.mxu1 %v23432_v4  ;;  %6575 = vmatprep.mubr.bf16.mxu0 %v23433_v62  ;;  %v3797_v4 = vpop.f32.mrf.mxu0  ;;  %v23435_v62 = vcombine.high %v18732_v37, %v18740_v32  ;;  %v3910_v8 = vpop.f32.mrf.mxu1  ;;  %v15345_v23 = vld [vmem:[%s23311_s1 + $0xdf4] ss:$8 sps:$4 sm:$0xff]   ;;  %v7119_v5 = vrot.slane %v18865_v11, 5  ;;  %v5846_v2 = vrot.slane %v5845_v53, 4  ;;  %v7130_v27 = vrot.slane %v18954_v31, 5 }
 0x1f5   : > { %23434 = vst [vmem:[#allocation39_spill] sm:$0xff] %v19102_v35  ;;  %7792 = vmatpush1.bf16.msra.mxu1 %v15301_v34  ;;  %v19119_v49 = vadd.f32 %v3910_v8, %v3797_v4  ;;  %v13224_v35 = vld [vmem:[%s16290_s29 + $0x88] sm:$0xf]  ;;  %v19127_v34 = vsel %vm16324_vm2, %v5812_v18, %v19033_v46  ;;  %v6982_v59 = vrot.slane %v6972_v50, 4  ;;  %v15310_v31 = vld [vmem:[%s23311_s1 + $0xd70] ss:$8 sps:$4 sm:$0xff]   ;;  %v5321_v8 = vor.u32 %v19107_v42, %v19100_v61 }
 0x1f6   : > { %6688 = vmatprep.mubr.bf16.mxu1 %v23435_v62  ;;  %7793 = vmatprep.subr.bf16.mxu1 %v15306_v12  ;;  %v3799_v62 = vpop.f32.mrf.mxu0  ;;  %v15894_v12 = vld [vmem:[%s16290_s29 + $0x64] sm:$0x11]  ;;  %v3912_v45 = vpop.f32.mrf.mxu1  ;;  %v19131_v11 = vsel %vm17271_vm5, %v13530_v54, %v7119_v5  ;;  %v7129_v4 = vrot.slane %v7119_v5, 4  ;;  %v5351_v46 = vor.u32 %v5350_v20, %v19109_v22  ;;  %v5354_v18 = vshll.u32 %v19098_v57, 16 }
 0x1f7   : > { %6742 = vmatpush1.bf16.msra.mxu0 %v15325_v41  ;;  %23436 = vst [vmem:[#allocation40_spill] sm:$0xff] %v19119_v49  ;;  %v6983_v41 = vrot.slane %v15894_v12, 5  ;;  %23438 = vst [vmem:[#allocation41_spill] sm:$0xff] %v19131_v11  ;;  %v19133_v53 = vadd.f32 %v3912_v45, %v3799_v62  ;;  %v19143_v12 = vld [vmem:[%s16290_s29 + $0x9c] sm:$0xf]  ;;  %v19150_v45 = vsel %vm17271_vm5, %v13509_v52, %v6972_v50  ;;  %v5387_v61 = vshrl.u32 %v13224_v35, 16 }
 0x1f8   : > { %6743 = vmatprep.subr.bf16.mxu0 %v15336_v36  ;;  %v3801_v36 = vpop.f32.mrf.mxu0  ;;  %v3914_v54 = vpop.f32.mrf.mxu1  ;;  %v5390_v42 = vshll.u32 %v13224_v35, 16  ;;  %v19154_v20 = vsel %vm17271_vm5, %v7129_v4, %v7130_v27  ;;  %v19166_v52 = vsel %vm16324_vm2, %v5846_v2, %v5850_v38  ;;  %v13488_v50 = vld [vmem:[%s16290_s29 + $0x78] sm:$0xee]  ;;  %v15895_v35 = vld [vmem:[%s16290_s29 + $0x8c] sm:$0xff]  ;;  %v5396_v2 = vshll.u32 %v19143_v12, 16 }
 0x1f9   : > { %23439 = vst [vmem:[#allocation42_spill] sm:$0xff] %v19133_v53  ;;  %7794 = vmatpush1.bf16.msra.mxu1 %v15304_v63  ;;  %v15315_v63 = vld [vmem:[%s23311_s1 + $0xd64] ss:$8 sps:$4 sm:$0xff]   ;;  %23440 = vst [vmem:[#allocation43_spill] sm:$0xff] %v19154_v20  ;;  %v19156_v5 = vadd.f32 %v3914_v54, %v3801_v36  ;;  %v6993_v27 = vrot.slane %v15895_v35, 5  ;;  %v5352_v4 = vrot.slane %v5351_v46, 4 }
 0x1fa   : > { %7795 = vmatprep.subr.bf16.mxu1 %v15312_v3  ;;  %v3805_v62 = vpop.f32.mrf.mxu0  ;;  %v23442_v3 = vcombine.low %v18717_v29, %v18721_v55  ;;  %v13487_v36 = vld [vmem:[%s16290_s29 + $0x4c] sm:$0xe]  ;;  %v3918_v54 = vpop.f32.mrf.mxu1  ;;  %v23443_v29 = vcombine.low %v18732_v37, %v18740_v32  ;;  %v23444_v55 = vcombine.high %v18842_v43, %v18846_v25  ;;  %v15321_v38 = vld [vmem:[%s23311_s1 + $0xd54] ss:$8 sps:$4 sm:$0xff]   ;;  %v5389_v53 = vrot.slane %v5387_v61, 4 }
 0x1fb   : > { %6744 = vmatpush1.bf16.msra.mxu0 %v15334_v26  ;;  %23441 = vst [vmem:[#allocation44_spill] sm:$0xff] %v19156_v5  ;;  %v15313_v26 = vld [vmem:[%s23311_s1 + $0xd60] ss:$8 sps:$4 sm:$0xff]   ;;  %v19190_v32 = vadd.f32 %v3918_v54, %v3805_v62  ;;  %v13512_v5 = vrot.slane %v13488_v50, 9  ;;  %v5392_v49 = vrot.slane %v5390_v42, 5  ;;  %v13511_v28 = vrot.slane %v13487_v36, 9 }
 0x1fc   : > { %6576 = vmatmul.mubr.bf16.gmra.mxu0 %v23442_v3  ;;  %7892 = vmatprep.subr.bf16.mxu0 %v15345_v23  ;;  %v19184_v23 = vsel %vm17271_vm5, %v6982_v59, %v6983_v41  ;;  %v5420_v3 = vshrl.u32 %v19143_v12, 16  ;;  %v3807_v35 = vpop.f32.mrf.mxu0  ;;  %v5356_v41 = vrot.slane %v5354_v18, 5  ;;  %v3920_v59 = vpop.f32.mrf.mxu1  ;;  %v7003_v54 = vrot.slane %v6993_v27, 4  ;;  %v15319_v50 = vld [vmem:[%s23311_s1 + $0xd50] ss:$8 sps:$4 sm:$0xff]  }
 0x1fd   : > { %6689 = vmatmul.mubr.bf16.gmra.mxu1 %v23443_v29  ;;  %6585 = vmatprep.mubr.bf16.mxu0 %v23444_v55  ;;  %v23445_v29 = vcombine.high %v18947_v51, %v18951_v9  ;;  %v5322_v55 = vrot.slane %v5321_v8, 4  ;;  %v19195_v30 = vadd.f32 %v3920_v59, %v3807_v35  ;;  %v6980_v20 = vrot.slane %v19026_v56, 5  ;;  %v15322_v59 = vld [vmem:[%s23311_s1 + $0xd40] ss:$8 sps:$4 sm:$0xff]  }
 0x1fe   : > { %7796 = vmatpush2.bf16.msra.mxu1 %v15310_v31  ;;  %v3809_v62 = vpop.f32.mrf.mxu0  ;;  %v15896_v31 = vld [vmem:[%s16290_s29 + $0xa0] sm:$0x11]  ;;  %v3922_v11 = vpop.f32.mrf.mxu1  ;;  %v19201_v46 = vrot.slane %v5396_v2, 5  ;;  %v5422_v18 = vrot.slane %v5420_v3, 4  ;;  %v5357_v36 = vsel %vm16324_vm2, %v5352_v4, %v5356_v41  ;;  %v19215_v2 = vld [vmem:[%s16290_s29 + $0xb0] sm:$0x1]  ;;  %v5393_v35 = vor.u32 %v5392_v49, %v5389_v53 }
 0x1ff   : > { %6698 = vmatprep.mubr.bf16.mxu1 %v23445_v29  ;;  %7797 = vmatprep.subr.bf16.mxu1 %v15315_v63  ;;  %v7004_v37 = vrot.slane %v15896_v31, 5  ;;  %v6989_v63 = vrot.slane %v19098_v57, 5  ;;  %v19204_v61 = vadd.f32 %v3922_v11, %v3809_v62  ;;  %v5327_v56 = vsel %vm16324_vm2, %v5322_v55, %v19109_v22  ;;  %v15324_v11 = vld [vmem:[%s23311_s1 + $0xd44] ss:$8 sps:$4 sm:$0xff]   ;;  %v13490_v29 = vld [vmem:[%s16290_s29 + $0x88] sm:$0xe] }
 0x200   : > { %v3811_v42 = vpop.f32.mrf.mxu0  ;;  %v6988_v3 = vrot.slane %v6980_v20, 4  ;;  %v3924_v57 = vpop.f32.mrf.mxu1  ;;  %v19226_v4 = vsel %vm17271_vm5, %v13511_v28, %v6980_v20  ;;  %v19241_v49 = vsel %vm17271_vm5, %v13512_v5, %v6993_v27  ;;  %v19248_v53 = vld [vmem:[%s16290_s29 + $0xb4] sm:$0xee]  ;;  %v19251_v20 = vld [vmem:[%s16290_s29 + $0xc4] sm:$0xf]  ;;  %v23450_v31 = vcombine.high %v19001_v17, %v19014_v14 }
 0x201   : > { %23446 = vst [vmem:[#allocation45_spill] sm:$0xff] %v19226_v4  ;;  %v19229_v55 = vadd.f32 %v3924_v57, %v3811_v42  ;;  %v19245_v28 = vsel %vm17271_vm5, %v7003_v54, %v7004_v37  ;;  %v19259_v42 = vcombine.low %v5327_v56, %v5357_v36  ;;  %v5423_v5 = vor.u32 %v5422_v18, %v19201_v46  ;;  %v15330_v56 = vld [vmem:[%s23311_s1 + $0xd34] ss:$8 sps:$4 sm:$0xff]   ;;  %v15331_v4 = vld [vmem:[%s23311_s1 + $0xd20] ss:$8 sps:$4 sm:$0xff]  }
 0x202   : > { %7798 = vmatpush2.bf16.msra.mxu1 %v15313_v26  ;;  %v3815_v41 = vpop.f32.mrf.mxu0  ;;  %v5426_v27 = vshll.u32 %v19215_v2, 16  ;;  %v19265_v37 = vsel %vm17271_vm5, %v6988_v3, %v6989_v63  ;;  %v13514_v36 = vrot.slane %v13490_v29, 9  ;;  %v7001_v63 = vrot.slane %v19143_v12, 5  ;;  %v15328_v12 = vld [vmem:[%s23311_s1 + $0xd30] ss:$8 sps:$4 sm:$0xff]  }
 0x203   : > { %7799 = vmatprep.subr.bf16.mxu1 %v15321_v38  ;;  %23447 = vst [vmem:[#allocation46_spill] sm:$0xff] %v19229_v55  ;;  %v23448_v38 = vcombine.low %v18842_v43, %v18846_v25  ;;  %v3928_v43 = vpop.f32.mrf.mxu1  ;;  %v23449_v25 = vcombine.low %v18947_v51, %v18951_v9  ;;  %23451 = vst [vmem:[#allocation47_spill] sm:$0xff] %v19265_v37  ;;  %v23453_v9 = vcombine.high %v19019_v13, %v19023_v16  ;;  %v15898_v29 = vld [vmem:[%s16290_s29 + $0xdc] sm:$0x11] }
 0x204   : > { %v19267_v54 = vadd.f32 %v3928_v43, %v3815_v41  ;;  %v3817_v51 = vpop.f32.mrf.mxu0  ;;  %v19280_v57 = vrot.slane %v5393_v35, 4  ;;  %v15897_v41 = vld [vmem:[%s16290_s29 + $0xc8] sm:$0xff]  ;;  %v7010_v43 = vrot.slane %v19215_v2, 5  ;;  %v7025_v18 = vrot.slane %v15898_v29, 5 }
 0x205   : > { %6586 = vmatmul.mubr.bf16.gmra.mxu0 %v23448_v38  ;;  %6699 = vmatmul.mubr.bf16.gmra.mxu1 %v23449_v25  ;;  %v3930_v3 = vpop.f32.mrf.mxu1  ;;  %v7014_v38 = vrot.slane %v15897_v41, 5  ;;  %v13493_v25 = vld [vmem:[%s16290_s29 + $0xc4] sm:$0xe]  ;;  %v5459_v35 = vshrl.u32 %v19251_v20, 16  ;;  %v5424_v41 = vrot.slane %v5423_v5, 4  ;;  %v5428_v62 = vrot.slane %v5426_v27, 5 }
 0x206   : > { %6595 = vmatprep.mubr.bf16.mxu0 %v23450_v31  ;;  %23452 = vst [vmem:[#allocation48_spill] sm:$0xff] %v19267_v54  ;;  %7800 = vmatpush2.bf16.msra.mxu1 %v15319_v50  ;;  %v19285_v31 = vadd.f32 %v3930_v3, %v3817_v51  ;;  %v19293_v50 = vld [vmem:[%s16290_s29 + $0xd8] sm:$0xf]  ;;  %v19297_v2 = vld [vmem:[%s16290_s29 + $0xec] sm:$0x1]  ;;  %v19301_v51 = vsel %vm17271_vm5, %v13514_v36, %v7001_v63  ;;  %v7009_v3 = vrot.slane %v7001_v63, 4 }
 0x207   : > { %6708 = vmatprep.mubr.bf16.mxu1 %v23453_v9  ;;  %7801 = vmatprep.subr.bf16.mxu1 %v15324_v11  ;;  %v3819_v9 = vpop.f32.mrf.mxu0  ;;  %v13515_v11 = vrot.slane %v19248_v53, 9  ;;  %v3932_v22 = vpop.f32.mrf.mxu1  ;;  %23455 = vst [vmem:[#allocation50_spill] sm:$0xff] %v19301_v51  ;;  %v5462_v29 = vshll.u32 %v19251_v20, 16  ;;  %v13517_v26 = vrot.slane %v13493_v25, 9  ;;  %v7022_v37 = vrot.slane %v19293_v50, 5 }
 0x208   : > { %23454 = vst [vmem:[#allocation49_spill] sm:$0xff] %v19285_v31  ;;  %v19303_v8 = vadd.f32 %v3932_v22, %v3819_v9  ;;  %v15333_v27 = vld [vmem:[%s23311_s1 + $0xd24] ss:$8 sps:$4 sm:$0xff]   ;;  %v5399_v22 = vsel %vm16324_vm2, %v19280_v57, %v19201_v46  ;;  %v7024_v36 = vrot.slane %v7014_v38, 4  ;;  %v7031_v20 = vrot.slane %v19297_v2, 5 }
 0x209   : > { %v3821_v53 = vpop.f32.mrf.mxu0  ;;  %v3934_v5 = vpop.f32.mrf.mxu1  ;;  %v13496_v63 = vld [vmem:[%s16290_s29 + $0x100] sm:$0xe]  ;;  %v23459_v9 = vcombine.low %v19001_v17, %v19014_v14  ;;  %v19328_v46 = vrot.slane %v5459_v35, 4  ;;  %v5468_v57 = vshll.u32 %v19293_v50, 16  ;;  %v23461_v14 = vcombine.high %v19064_v19, %v19079_v21 }
 0x20a   : > { %23456 = vst [vmem:[#allocation51_spill] sm:$0xff] %v19303_v8  ;;  %7802 = vmatpush2.bf16.msra.mxu1 %v15322_v59  ;;  %v19316_v59 = vsel %vm17271_vm5, %v7009_v3, %v7010_v43  ;;  %v19320_v25 = vadd.f32 %v3934_v5, %v3821_v53  ;;  %v19332_v43 = vld [vmem:[%s16290_s29 + $0x114] sm:$0xf]  ;;  %v23460_v5 = vcombine.low %v19019_v13, %v19023_v16  ;;  %v5492_v35 = vshrl.u32 %v19293_v50, 16 }
 0x20b   : > { %7803 = vmatprep.subr.bf16.mxu1 %v15330_v56  ;;  %23457 = vst [vmem:[#allocation52_spill] sm:$0xff] %v19316_v59  ;;  %v3825_v56 = vpop.f32.mrf.mxu0  ;;  %v3938_v53 = vpop.f32.mrf.mxu1  ;;  %v5429_v17 = vsel %vm16324_vm2, %v5424_v41, %v5428_v62  ;;  %v23464_v16 = vcombine.high %v19127_v34, %v19166_v52  ;;  %v13520_v62 = vrot.slane %v13496_v63, 9  ;;  %v15339_v50 = vld [vmem:[%s23311_s1 + $0xd14] ss:$8 sps:$4 sm:$0xff]   ;;  %v19367_v41 = vsel %vm17271_vm5, %v13515_v11, %v7014_v38 }
 0x20c   : > { %23458 = vst [vmem:[#allocation53_spill] sm:$0xff] %v19320_v25  ;;  %v7030_v25 = vrot.slane %v7022_v37, 4  ;;  %v19349_v3 = vadd.f32 %v3938_v53, %v3825_v56  ;;  %v13499_v56 = vld [vmem:[%s16290_s29 + $0x13c] sm:$0xe]  ;;  %v19384_v38 = vsel %vm17271_vm5, %v7024_v36, %v7025_v18  ;;  %v19387_v11 = vld [vmem:[%s16290_s29 + $0xf0] sm:$0xee] }
 0x20d   : > { %6596 = vmatmul.mubr.bf16.gmra.mxu0 %v23459_v9  ;;  %6709 = vmatmul.mubr.bf16.gmra.mxu1 %v23460_v5  ;;  %v19347_v9 = vsel %vm17271_vm5, %v13517_v26, %v7022_v37  ;;  %v3827_v13 = vpop.f32.mrf.mxu0  ;;  %v19354_v5 = vrot.slane %v5462_v29, 5  ;;  %v7043_v26 = vrot.slane %v19332_v43, 5  ;;  %v3940_v37 = vpop.f32.mrf.mxu1  ;;  %v19397_v59 = vrot.slane %v5468_v57, 5 }
 0x20e   : > { %6605 = vmatprep.mubr.bf16.mxu0 %v23461_v14  ;;  %23462 = vst [vmem:[#allocation54_spill] sm:$0xff] %v19347_v9  ;;  %23463 = vst [vmem:[#allocation55_spill] sm:$0xff] %v19349_v3  ;;  %7804 = vmatpush2.bf16.msra.mxu1 %v15328_v12  ;;  %v19357_v14 = vld [vmem:[%s16290_s29 + $0x128] sm:$0x1]  ;;  %v19371_v29 = vsel %vm17271_vm5, %v7030_v25, %v7031_v20  ;;  %v19375_v53 = vadd.f32 %v3940_v37, %v3827_v13  ;;  %v19390_v20 = vld [vmem:[%s16290_s29 + $0x150] sm:$0xf] }
 0x20f   : > { %6718 = vmatprep.mubr.bf16.mxu1 %v23464_v16  ;;  %7805 = vmatprep.subr.bf16.mxu1 %v15333_v27  ;;  %23465 = vst [vmem:[#allocation56_spill] sm:$0xff] %v19371_v29  ;;  %v7052_v63 = vrot.slane %v19357_v14, 5  ;;  %v3829_v27 = vpop.f32.mrf.mxu0  ;;  %v15337_v16 = vld [vmem:[%s23311_s1 + $0xd10] ss:$8 sps:$4 sm:$0xff]   ;;  %v19380_v12 = vcombine.low %v5399_v22, %v5429_v17  ;;  %v19393_v25 = vld [vmem:[%s16290_s29 + $0x164] sm:$0x1]  ;;  %v3942_v37 = vpop.f32.mrf.mxu1  ;;  %v19401_v22 = vsel %vm17271_vm5, %v13520_v62, %v7043_v26 }
 0x210   : > { %23466 = vst [vmem:[#allocation57_spill] sm:$0xff] %v19375_v53  ;;  %v5494_v51 = vrot.slane %v5492_v35, 4  ;;  %23467 = vst [vmem:[#allocation58_spill] sm:$0xff] %v19401_v22  ;;  %v7051_v17 = vrot.slane %v7043_v26, 4  ;;  %v19403_v18 = vadd.f32 %v3942_v37, %v3829_v27  ;;  %v5465_v53 = vor.u32 %v19354_v5, %v19328_v46  ;;  %v15899_v3 = vld [vmem:[%s16290_s29 + $0x104] sm:$0xff] }
 0x211   : > { %v3831_v36 = vpop.f32.mrf.mxu0  ;;  %v7035_v8 = vrot.slane %v15899_v3, 5  ;;  %v13523_v13 = vrot.slane %v13499_v56, 9  ;;  %v3944_v57 = vpop.f32.mrf.mxu1  ;;  %v15342_v35 = vld [vmem:[%s23311_s1 + $0xd04] ss:$8 sps:$4 sm:$0xff]   ;;  %v7064_v46 = vrot.slane %v19390_v20, 5  ;;  %v7073_v3 = vrot.slane %v19393_v25, 5 }
 0x212   : > { %23468 = vst [vmem:[#allocation59_spill] sm:$0xff] %v19403_v18  ;;  %7806 = vmatpush2.bf16.msra.mxu1 %v15331_v4  ;;  %v19415_v4 = vsel %vm17271_vm5, %v7051_v17, %v7052_v63  ;;  %v19419_v5 = vadd.f32 %v3944_v57, %v3831_v36  ;;  %v15340_v56 = vld [vmem:[%s23311_s1 + $0xd00] ss:$8 sps:$4 sm:$0xff]   ;;  %v5498_v27 = vshll.u32 %v19297_v2, 16  ;;  %v13518_v63 = vrot.slane %v19387_v11, 9 }
 0x213   : > { %7807 = vmatprep.subr.bf16.mxu1 %v15339_v50  ;;  %23469 = vst [vmem:[#allocation60_spill] sm:$0xff] %v19415_v4  ;;  %v3835_v26 = vpop.f32.mrf.mxu0  ;;  %v23471_v50 = vcombine.low %v19064_v19, %v19079_v21  ;;  %v19430_v37 = vld [vmem:[%s16290_s29 + $0x100] sm:$0xf]  ;;  %v19433_v17 = vld [vmem:[%s16290_s29 + $0x18c] sm:$0xf]  ;;  %v3948_v62 = vpop.f32.mrf.mxu1  ;;  %v23472_v19 = vcombine.low %v19127_v34, %v19166_v52  ;;  %v5495_v11 = vor.u32 %v5494_v51, %v19397_v59  ;;  %v7072_v4 = vrot.slane %v7064_v46, 4 }
 0x214   : > { %23470 = vst [vmem:[#allocation61_spill] sm:$0xff] %v19419_v5  ;;  %v13502_v57 = vld [vmem:[%s16290_s29 + $0x178] sm:$0xe]  ;;  %v15348_v21 = vld [vmem:[%s23311_s1 + $0xef4] ss:$8 sps:$4 sm:$0xff]   ;;  %v19453_v36 = vsel %vm17271_vm5, %v13523_v13, %v7064_v46  ;;  %v19455_v34 = vadd.f32 %v3948_v62, %v3835_v26  ;;  %v19460_v22 = vrot.slane %v5465_v53, 4 }
 0x215   : > { %6606 = vmatmul.mubr.bf16.gmra.mxu0 %v23471_v50  ;;  %6719 = vmatmul.mubr.bf16.gmra.mxu1 %v23472_v19  ;;  %v19449_v50 = vld [vmem:[%s16290_s29 + $0x1a0] sm:$0x1]  ;;  %23473 = vst [vmem:[#allocation62_spill] sm:$0xff] %v19453_v36  ;;  %v3837_v52 = vpop.f32.mrf.mxu0  ;;  %v23475_v19 = vcombine.high %v19150_v45, %v19184_v23  ;;  %v7045_v2 = vrot.slane %v7035_v8, 4  ;;  %v15900_v51 = vld [vmem:[%s16290_s29 + $0x118] sm:$0x11]  ;;  %v3950_v9 = vpop.f32.mrf.mxu1 }
 0x216   : > { %6761 = vmatprep.mubr.bf16.mxu0 %v23371_v0  ;;  %23474 = vst [vmem:[#allocation63_spill] sm:$0xff] %v19455_v34  ;;  %7808 = vmatpush2.bf16.msra.mxu1 %v15337_v16  ;;  %v7046_v29 = vrot.slane %v15900_v51, 5  ;;  %v15343_v13 = vld [vmem:[%s23311_s1 + $0xdf0] ss:$8 sps:$4 sm:$0xff]   ;;  %v19468_v16 = vsel %vm17271_vm5, %v7072_v4, %v7073_v3  ;;  %v13526_v62 = vrot.slane %v13502_v57, 9  ;;  %v7085_v46 = vrot.slane %v19433_v17, 5 }
 0x217   : > { %7811 = vmatprep.mubr.bf16.mxu1 %v23475_v19  ;;  %7809 = vmatprep.subr.bf16.mxu1 %v15342_v35  ;;  %23476 = vst [vmem:[#allocation64_spill] sm:$0xff] %v19468_v16  ;;  %v7094_v53 = vrot.slane %v19449_v50, 5  ;;  %v13505_v26 = vld [vmem:[%s16290_s29 + $0x1b4] sm:$0xe]  ;;  %v19473_v19 = vadd.f32 %v3950_v9, %v3837_v52  ;;  %v3839_v51 = vpop.f32.mrf.mxu0  ;;  %v15346_v35 = vld [vmem:[%s23311_s1 + $0xef0] ss:$8 sps:$4 sm:$0xff]   ;;  %v19485_v3 = vsel %vm17271_vm5, %v13518_v63, %v7035_v8  ;;  %v3952_v57 = vpop.f32.mrf.mxu1 }
 0x218   : > { %v15351_v34 = vld [vmem:[%s23311_s1 + $0xde4] ss:$8 sps:$4 sm:$0xff]   ;;  %v19481_v4 = vrot.slane %v5498_v27, 5  ;;  %v19489_v52 = vrot.slane %v5495_v11, 4  ;;  %v19493_v5 = vld [vmem:[%s16290_s29 + $0x1c8] sm:$0xf]  ;;  %v19497_v18 = vsel %vm17271_vm5, %v13526_v62, %v7085_v46  ;;  %v19499_v31 = vadd.f32 %v3952_v57, %v3839_v51 }
 0x219   : > { %23477 = vst [vmem:[#allocation65_spill] sm:$0xff] %v19473_v19  ;;  %v5531_v19 = vshrl.u32 %v19430_v37, 16  ;;  %23478 = vst [vmem:[#allocation66_spill] sm:$0xff] %v19497_v18  ;;  %v7093_v27 = vrot.slane %v7085_v46, 4  ;;  %v3841_v8 = vpop.f32.mrf.mxu0  ;;  %v15357_v63 = vld [vmem:[%s23311_s1 + $0xee4] ss:$8 sps:$4 sm:$0xff]   ;;  %v3954_v46 = vpop.f32.mrf.mxu1  ;;  %v19517_v51 = vsel %vm17271_vm5, %v7045_v2, %v7046_v29 }
 0x21a   : > { %23479 = vst [vmem:[#allocation67_spill] sm:$0xff] %v19499_v31  ;;  %7810 = vmatpush2.bf16.msra.mxu1 %v15340_v56  ;;  %v5534_v9 = vshll.u32 %v19430_v37, 16  ;;  %v19510_v16 = vld [vmem:[%s16290_s29 + $0x1dc] sm:$0x1]  ;;  %v13529_v62 = vrot.slane %v13505_v26, 9  ;;  %v5540_v57 = vshll.u32 %v19332_v43, 16  ;;  %v19526_v26 = vadd.f32 %v3954_v46, %v3841_v8 }
 0x21b   : > { %8005 = vmatprep.subr.bf16.mxu1 %v15348_v21  ;;  %v15349_v56 = vld [vmem:[%s23311_s1 + $0xde0] ss:$8 sps:$4 sm:$0xff]   ;;  %v19522_v11 = vsel %vm17271_vm5, %v7093_v27, %v7094_v53  ;;  %v7106_v37 = vrot.slane %v19493_v5, 5  ;;  %v13508_v36 = vld [vmem:[%s16290_s29 + $0x1f0] sm:$0xe]  ;;  %v3991_v21 = vpop.f32.mrf.mxu0  ;;  %v5564_v2 = vshrl.u32 %v19332_v43, 16 }
 0x21c   : > { %23480 = vst [vmem:[#allocation68_spill] sm:$0xff] %v19522_v11  ;;  %23481 = vst [vmem:[#allocation69_spill] sm:$0xff] %v19526_v26  ;;  %v15354_v31 = vld [vmem:[%s23311_s1 + $0xdd4] ss:$8 sps:$4 sm:$0xff]   ;;  %v15355_v29 = vld [vmem:[%s23311_s1 + $0xee0] ss:$8 sps:$4 sm:$0xff]   ;;  %v3992_v46 = vadd.f32 %v3991_v21, %v18822_v24  ;;  %v23482_v26 = vcombine.low %v19150_v45, %v19184_v23 }
 0x21d   : > { %6762 = vmatmul.mubr.bf16.vlgmr.msra.gmra.mxu0 %v19259_v42  ;;  %v19537_v53 = vld [vmem:[%s16290_s29 + $0x204] sm:$0xf]  ;;  %v7115_v8 = vrot.slane %v19510_v16, 5  ;;  %v19543_v42 = vpop.f32.mrf.mxu1  ;;  %v19552_v54 = vrot.slane %v5531_v19, 4  ;;  %v7114_v55 = vrot.slane %v7106_v37, 4  ;;  %v3993_v27 = vpop.f32.mrf.mxu0  ;;  %v19554_v11 = vrot.slane %v5534_v9, 5 }
 0x21e   : > { %7812 = vmatmul.mubr.bf16.vlgmr.msra.gmra.mxu1 %v23482_v26  ;;  %7893 = vmatpush1.bf16.msra.mxu0 %v15343_v13  ;;  %v19558_v24 = vsel %vm17271_vm5, %v13529_v62, %v7106_v37  ;;  %v13532_v45 = vrot.slane %v13508_v36, 9  ;;  %v7127_v23 = vrot.slane %v19537_v53, 5  ;;  %v23484_v13 = vld [vmem:[#allocation13_spill] sm:$0xff]  ;;  %v3994_v19 = vadd.f32 %v3993_v27, %v18850_v60  ;;  %v15352_v36 = vld [vmem:[%s23311_s1 + $0xdd0] ss:$8 sps:$4 sm:$0xff]  }
 0x21f   : > { %8006 = vmatpush1.bf16.msra.mxu1 %v15346_v35  ;;  %7894 = vmatprep.subr.bf16.mxu0 %v15351_v34  ;;  %23483 = vst [vmem:[#allocation70_spill] sm:$0xff] %v19558_v24  ;;  %v19562_v26 = vadd.f32 %v3992_v46, %v23484_v13  ;;  %v19565_v21 = vpop.f32.mrf.mxu1  ;;  %v23485_v34 = vcombine.high %v19241_v49, %v19245_v28  ;;  %v15366_v35 = vld [vmem:[%s23311_s1 + $0xed4] ss:$8 sps:$4 sm:$0xff]   ;;  %v3995_v9 = vpop.f32.mrf.mxu0  ;;  %v19579_v62 = vrot.slane %v5540_v57, 5  ;;  %v19581_v37 = vrot.slane %v5564_v2, 4 }
 0x220   : > { %6771 = vmatprep.mubr.bf16.mxu0 %v23371_v0  ;;  %8007 = vmatprep.subr.bf16.mxu1 %v15357_v63  ;;  %v5570_v27 = vshll.u32 %v19357_v14, 16  ;;  %v19585_v46 = vld [vmem:[%s16290_s29 + $0x13c] sm:$0xf]  ;;  %v19589_v13 = vsel %vm17271_vm5, %v7114_v55, %v7115_v8  ;;  %v3996_v60 = vadd.f32 %v3995_v9, %v18882_v1  ;;  %v15360_v63 = vld [vmem:[%s23311_s1 + $0xdc4] ss:$8 sps:$4 sm:$0xff]   ;;  %v5537_v1 = vor.u32 %v19554_v11, %v19552_v54 }
 0x221   : > { %7821 = vmatprep.mubr.bf16.mxu1 %v23485_v34  ;;  %23486 = vst [vmem:[#allocation13_spill] sm:$0xff] %v19589_v13  ;;  %v23487_v34 = vld [vmem:[#allocation14_spill] sm:$0xff]  ;;  %v19595_v18 = vpop.f32.mrf.mxu1  ;;  %v19601_v14 = vld [vmem:[%s16290_s29 + $0x140] sm:$0xff]  ;;  %v19605_v2 = vld [vmem:[%s16290_s29 + $0x218] sm:$0x1]  ;;  %v3997_v8 = vpop.f32.mrf.mxu0  ;;  %v7135_v9 = vrot.slane %v7127_v23, 4 }
 0x222   : > { %v19592_v43 = vadd.f32 %v3994_v19, %v23487_v34  ;;  %7895 = vmatpush1.bf16.msra.mxu0 %v15349_v56  ;;  %v13497_v56 = vld [vmem:[%s16290_s29 + $0x12c] sm:$0xee]  ;;  %v19614_v19 = vsel %vm17271_vm5, %v13532_v45, %v7127_v23  ;;  %v7136_v34 = vrot.slane %v19605_v2, 5  ;;  %v19618_v57 = vadd.f32 %v3996_v60, %v18197_v7  ;;  %v15363_v7 = vld [vmem:[%s23311_s1 + $0xdb4] ss:$8 sps:$4 sm:$0xff]  }
 0x223   : > { %7896 = vmatprep.subr.bf16.mxu0 %v15354_v31  ;;  %8008 = vmatpush1.bf16.msra.mxu1 %v15355_v29  ;;  %23489 = vst [vmem:[#allocation71_spill] sm:$0xff] %v19614_v19  ;;  %v19621_v55 = vpop.f32.mrf.mxu1  ;;  %v15358_v31 = vld [vmem:[%s23311_s1 + $0xdc0] ss:$8 sps:$4 sm:$0xff]   ;;  %v15364_v54 = vld [vmem:[%s23311_s1 + $0xed0] ss:$8 sps:$4 sm:$0xff]   ;;  %v5603_v11 = vshrl.u32 %v19585_v46, 16  ;;  %v4001_v45 = vpop.f32.mrf.mxu0 }
 0x224   : > { %23488 = vst [vmem:[#allocation14_spill] sm:$0xff] %v19592_v43  ;;  %v3998_v43 = vadd.f32 %v3997_v8, %v18888_v44  ;;  %8009 = vmatprep.subr.bf16.mxu1 %v15366_v35  ;;  %v5606_v29 = vshll.u32 %v19585_v46, 16  ;;  %v5567_v44 = vor.u32 %v19581_v37, %v19579_v62  ;;  %v15375_v23 = vld [vmem:[%s23311_s1 + $0xec4] ss:$8 sps:$4 sm:$0xff]   ;;  %v5612_v35 = vshll.u32 %v19390_v20, 16 }
 0x225   : > { %6772 = vmatmul.mubr.bf16.gmra.mxu0 %v19380_v12  ;;  %v5636_v60 = vshrl.u32 %v19390_v20, 16  ;;  %v19644_v46 = vsel %vm17271_vm5, %v7135_v9, %v7136_v34  ;;  %v4002_v8 = vadd.f32 %v4001_v45, %v18917_v33  ;;  %v19650_v13 = vpop.f32.mrf.mxu1  ;;  %v23491_v37 = vcombine.low %v19241_v49, %v19245_v28  ;;  %v15373_v20 = vld [vmem:[%s23311_s1 + $0xec0] ss:$8 sps:$4 sm:$0xff]   ;;  %v4003_v34 = vpop.f32.mrf.mxu0  ;;  %v23494_v45 = vld [vmem:[#allocation15_spill] sm:$0xff] }
 0x226   : > { %23490 = vst [vmem:[#allocation72_spill] sm:$0xff] %v19644_v46  ;;  %v19647_v12 = vadd.f32 %v3998_v43, %v18227_v58  ;;  %7897 = vmatpush1.bf16.msra.mxu0 %v15352_v36  ;;  %v13521_v24 = vrot.slane %v13497_v56, 9  ;;  %6781 = vmatprep.mubr.bf16.mxu0 %v23371_v0  ;;  %v23492_v58 = vsel %vm16324_vm2, %v19489_v52, %v19481_v4  ;;  %v19673_v43 = vrot.slane %v5570_v27, 5  ;;  %v15902_v36 = vld [vmem:[%s16290_s29 + $0x154] sm:$0x11] }
 0x227   : > { %7822 = vmatmul.mubr.bf16.gmra.mxu1 %v23491_v37  ;;  %7898 = vmatprep.subr.bf16.mxu0 %v15360_v63  ;;  %v23493_v33 = vsel %vm16324_vm2, %v19460_v22, %v19397_v59  ;;  %v7067_v63 = vrot.slane %v15902_v36, 5  ;;  %v15384_v56 = vld [vmem:[%s23311_s1 + $0xeb4] ss:$8 sps:$4 sm:$0xff]   ;;  %v19680_v37 = vadd.f32 %v4002_v8, %v23494_v45  ;;  %v4004_v4 = vadd.f32 %v4003_v34, %v18934_v15  ;;  %v19683_v52 = vpop.f32.mrf.mxu1  ;;  %v15361_v22 = vld [vmem:[%s23311_s1 + $0xdb0] ss:$8 sps:$4 sm:$0xff]   ;;  %v4005_v36 = vpop.f32.mrf.mxu0 }
 0x228   : > { %v13379_v49 = vcombine.low %v23493_v33, %v23492_v58  ;;  %v23495_v59 = vcombine.high %v19367_v41, %v19384_v38  ;;  %8010 = vmatpush1.bf16.msra.mxu1 %v15364_v54  ;;  %v19691_v27 = vrot.slane %v5537_v1, 4  ;;  %v23496_v58 = vrot.slane %v19601_v14, 5  ;;  %v13260_v33 = vld [vmem:[%s16290_s29 + $0x178] sm:$0xf]  ;;  %v15369_v1 = vld [vmem:[%s23311_s1 + $0xda4] ss:$8 sps:$4 sm:$0xff]  }
 0x229   : > { %8011 = vmatprep.subr.bf16.mxu1 %v15375_v23  ;;  %v5605_v15 = vrot.slane %v5603_v11, 4  ;;  %v5608_v34 = vrot.slane %v5606_v29, 5  ;;  %v19696_v45 = vrot.slane %v5612_v35, 5  ;;  %v5638_v9 = vrot.slane %v5636_v60, 4  ;;  %v19702_v54 = vpop.f32.mrf.mxu1  ;;  %v19714_v29 = vld [vmem:[%s16290_s29 + $0x168] sm:$0xee]  ;;  %v4007_v35 = vpop.f32.mrf.mxu0 }
 0x22a   : > { %7831 = vmatprep.mubr.bf16.mxu1 %v23495_v59  ;;  %v7066_v8 = vrot.slane %v23496_v58, 4  ;;  %v23497_v59 = vld [vmem:[#allocation16_spill] sm:$0xff]  ;;  %v4006_v46 = vadd.f32 %v4005_v36, %v18962_v39  ;;  %7899 = vmatpush1.bf16.msra.mxu0 %v15358_v31  ;;  %v5568_v58 = vrot.slane %v5567_v44, 4  ;;  %v23498_v23 = vrot.slane %v19601_v14, 5  ;;  %v23499_v36 = vld [vmem:[#allocation17_spill] sm:$0xff] }
 0x22b   : > { %v19699_v28 = vadd.f32 %v4004_v4, %v23497_v59  ;;  %7900 = vmatprep.subr.bf16.mxu0 %v15363_v7  ;;  %v5675_v60 = vshrl.u32 %v13260_v33, 16  ;;  %v5678_v39 = vshll.u32 %v13260_v33, 16  ;;  %v5684_v4 = vshll.u32 %v19433_v17, 16  ;;  %v19722_v14 = vpop.f32.mrf.mxu1  ;;  %v15372_v33 = vld [vmem:[%s23311_s1 + $0xd94] ss:$8 sps:$4 sm:$0xff]  }
 0x22c   : > { %v19711_v11 = vsel %vm17271_vm5, %v13521_v24, %v23498_v23  ;;  %v5708_v31 = vshrl.u32 %v19433_v17, 16  ;;  %v19719_v59 = vadd.f32 %v4006_v46, %v23499_v36  ;;  %v4008_v44 = vadd.f32 %v4007_v35, %v18971_v48  ;;  %v15367_v24 = vld [vmem:[%s23311_s1 + $0xda0] ss:$8 sps:$4 sm:$0xff]   ;;  %8012 = vmatpush1.bf16.msra.mxu1 %v15373_v20  ;;  %v15382_v48 = vld [vmem:[%s23311_s1 + $0xeb0] ss:$8 sps:$4 sm:$0xff]   ;;  %v4011_v46 = vpop.f32.mrf.mxu0 }
 0x22d   : > { %v5543_v7 = vsel %vm16324_vm2, %v19691_v27, %v19579_v62  ;;  %v19733_v17 = vsel %vm17271_vm5, %v7066_v8, %v7067_v63  ;;  %6782 = vmatmul.mubr.bf16.gmra.mxu0 %v13379_v49  ;;  %v5609_v23 = vor.u32 %v5608_v34, %v5605_v15  ;;  %v5639_v35 = vor.u32 %v5638_v9, %v19696_v45  ;;  %v15393_v63 = vld [vmem:[%s23311_s1 + $0xea4] ss:$8 sps:$4 sm:$0xff]   ;;  %v19751_v36 = vpop.f32.mrf.mxu1  ;;  %v15391_v34 = vld [vmem:[%s23311_s1 + $0xea0] ss:$8 sps:$4 sm:$0xff]  }
 0x22e   : > { %v5642_v62 = vshll.u32 %v19393_v25, 16  ;;  %8013 = vmatprep.subr.bf16.mxu1 %v15384_v56  ;;  %v13524_v20 = vrot.slane %v19714_v29, 9  ;;  %v23500_v27 = vld [vmem:[#allocation18_spill] sm:$0xff]  ;;  %v4012_v49 = vadd.f32 %v4011_v46, %v19007_v47  ;;  %v23502_v9 = vcombine.low %v19367_v41, %v19384_v38  ;;  %7901 = vmatpush1.bf16.msra.mxu0 %v15361_v22  ;;  %v15903_v56 = vld [vmem:[%s16290_s29 + $0x17c] sm:$0xff]  ;;  %v4013_v29 = vpop.f32.mrf.mxu0  ;;  %v19767_v38 = vld [vmem:[%s16290_s29 + $0x1b4] sm:$0xf] }
 0x22f   : > { %v19748_v8 = vadd.f32 %v4008_v44, %v23500_v27  ;;  %v5573_v25 = vsel %vm16324_vm2, %v5568_v58, %v19673_v43  ;;  %v7077_v15 = vrot.slane %v15903_v56, 5  ;;  %7902 = vmatprep.subr.bf16.mxu0 %v15369_v1  ;;  %6791 = vmatprep.mubr.bf16.mxu0 %v23371_v0  ;;  %v5677_v47 = vrot.slane %v5675_v60, 4  ;;  %v23503_v22 = vld [vmem:[#allocation19_spill] sm:$0xff]  ;;  %v19773_v58 = vpop.f32.mrf.mxu1  ;;  %v23507_v56 = vld [vmem:[#allocation20_spill] sm:$0xff] }
 0x230   : > { %7832 = vmatmul.mubr.bf16.gmra.mxu1 %v23502_v9  ;;  %v5680_v44 = vrot.slane %v5678_v39, 5  ;;  %v19764_v46 = vrot.slane %v5684_v4, 5  ;;  %v5710_v41 = vrot.slane %v5708_v31, 4  ;;  %v19770_v27 = vadd.f32 %v4012_v49, %v23503_v22  ;;  %23505 = vst [vmem:[#allocation17_spill] sm:$0xff] %v19773_v58  ;;  %v15402_v60 = vld [vmem:[%s23311_s1 + $0xe94] ss:$8 sps:$4 sm:$0xff]   ;;  %v4015_v39 = vpop.f32.mrf.mxu0 }
 0x231   : > { %23501 = vst [vmem:[#allocation15_spill] sm:$0xff] %v19748_v8  ;;  %v4014_v43 = vadd.f32 %v4013_v29, %v19028_v6  ;;  %v23506_v9 = vcombine.high %v19485_v3, %v19517_v51  ;;  %v13634_v1 = vcombine.high %v19711_v11, %v19733_v17  ;;  %8014 = vmatpush1.bf16.msra.mxu1 %v15382_v48  ;;  %v5610_v31 = vrot.slane %v5609_v23, 4  ;;  %v23508_v22 = vld [vmem:[#allocation37_spill] sm:$0xff]  ;;  %v19787_v19 = vpop.f32.mrf.mxu1  ;;  %v15370_v48 = vld [vmem:[%s23311_s1 + $0xd90] ss:$8 sps:$4 sm:$0xff]  }
 0x232   : > { %23504 = vst [vmem:[#allocation16_spill] sm:$0xff] %v19770_v27  ;;  %v13384_v4 = vcombine.low %v5543_v7, %v5573_v25  ;;  %v5640_v49 = vrot.slane %v5639_v35, 4  ;;  %v5644_v6 = vrot.slane %v5642_v62, 5  ;;  %8015 = vmatprep.subr.bf16.mxu1 %v15393_v63  ;;  %7903 = vmatpush1.bf16.msra.mxu0 %v15367_v24  ;;  %v7087_v27 = vrot.slane %v7077_v15, 4  ;;  %v15904_v58 = vld [vmem:[%s16290_s29 + $0x190] sm:$0x11]  ;;  %v4017_v7 = vpop.f32.mrf.mxu0 }
 0x233   : > { %7841 = vmatprep.mubr.bf16.mxu1 %v23506_v9  ;;  %v19784_v29 = vadd.f32 %v4014_v43, %v23507_v56  ;;  %v4016_v9 = vadd.f32 %v4015_v39, %v23508_v22  ;;  %v7088_v8 = vrot.slane %v15904_v58, 5  ;;  %7904 = vmatprep.subr.bf16.mxu0 %v15372_v33  ;;  %v15378_v23 = vld [vmem:[%s23311_s1 + $0xd84] ss:$8 sps:$4 sm:$0xff]   ;;  %v19798_v35 = vsel %vm17271_vm5, %v13524_v20, %v7077_v15  ;;  %v19806_v56 = vpop.f32.mrf.mxu1  ;;  %v15376_v33 = vld [vmem:[%s23311_s1 + $0xd80] ss:$8 sps:$4 sm:$0xff]  }
 0x234   : > { %v5681_v62 = vor.u32 %v5680_v44, %v5677_v47  ;;  %v5711_v24 = vor.u32 %v5710_v41, %v19764_v46  ;;  %v5714_v63 = vshll.u32 %v19449_v50, 16  ;;  %v23509_v25 = vld [vmem:[#allocation21_spill] sm:$0xff]  ;;  %v23510_v39 = vld [vmem:[#allocation38_spill] sm:$0xff]  ;;  %v5747_v20 = vshrl.u32 %v19767_v38, 16  ;;  %v15400_v50 = vld [vmem:[%s23311_s1 + $0xe90] ss:$8 sps:$4 sm:$0xff]   ;;  %v4021_v47 = vpop.f32.mrf.mxu0 }
 0x235   : > { %v19803_v43 = vadd.f32 %v4016_v9, %v23509_v25  ;;  %v4018_v58 = vadd.f32 %v4017_v7, %v23510_v39  ;;  %8016 = vmatpush1.bf16.msra.mxu1 %v15391_v34  ;;  %v5750_v15 = vshll.u32 %v19767_v38, 16  ;;  %6792 = vmatmul.mubr.bf16.gmra.mxu0 %v13384_v4  ;;  %v5615_v44 = vsel %vm16324_vm2, %v5610_v31, %v19696_v45  ;;  %v15381_v34 = vld [vmem:[%s23311_s1 + $0xe74] ss:$8 sps:$4 sm:$0xff]   ;;  %v15411_v4 = vld [vmem:[%s23311_s1 + $0xe84] ss:$8 sps:$4 sm:$0xff]  }
 0x236   : > { %v5645_v41 = vsel %vm16324_vm2, %v5640_v49, %v5644_v6  ;;  %v5756_v38 = vshll.u32 %v19493_v5, 16  ;;  %v5780_v22 = vshrl.u32 %v19493_v5, 16  ;;  %8017 = vmatprep.subr.bf16.mxu1 %v15402_v60  ;;  %v23511_v9 = vld [vmem:[#allocation22_spill] sm:$0xff]  ;;  %v23512_v45 = vld [vmem:[#allocation39_spill] sm:$0xff]  ;;  %v19833_v49 = vpop.f32.mrf.mxu1  ;;  %v23513_v6 = vcombine.low %v19485_v3, %v19517_v51  ;;  %7905 = vmatpush1.bf16.msra.mxu0 %v15370_v48  ;;  %v4023_v25 = vpop.f32.mrf.mxu0 }
 0x237   : > { %v19830_v7 = vadd.f32 %v4018_v58, %v23511_v9  ;;  %v4022_v31 = vadd.f32 %v4021_v47, %v23512_v45  ;;  %v19840_v5 = vsel %vm17271_vm5, %v7087_v27, %v7088_v8  ;;  %v19843_v60 = vld [vmem:[%s16290_s29 + $0x1a4] sm:$0xee]  ;;  %7906 = vmatprep.subr.bf16.mxu0 %v15378_v23  ;;  %6801 = vmatprep.mubr.bf16.mxu0 %v23371_v0  ;;  %v19846_v39 = vrot.slane %v5681_v62, 4  ;;  %v15905_v9 = vld [vmem:[%s16290_s29 + $0x1b8] sm:$0xff]  ;;  %v23514_v51 = vld [vmem:[#allocation23_spill] sm:$0xff] }
 0x238   : > { %7842 = vmatmul.mubr.bf16.gmra.mxu1 %v23513_v6  ;;  %v19848_v58 = vrot.slane %v5711_v24, 4  ;;  %v19850_v47 = vrot.slane %v5714_v63, 5  ;;  %v7098_v3 = vrot.slane %v15905_v9, 5  ;;  %v23516_v45 = vld [vmem:[#allocation40_spill] sm:$0xff]  ;;  %v19857_v27 = vpop.f32.mrf.mxu1  ;;  %v5749_v62 = vrot.slane %v5747_v20, 4  ;;  %v4025_v63 = vpop.f32.mrf.mxu0 }
 0x239   : > { %v19854_v48 = vadd.f32 %v4022_v31, %v23514_v51  ;;  %v4024_v8 = vadd.f32 %v4023_v25, %v23516_v45  ;;  %23517 = vst [vmem:[#allocation19_spill] sm:$0xff] %v19857_v27  ;;  %7851 = vmatprep.mubr.bf16.mxu1 %v13634_v1  ;;  %v15379_v23 = vld [vmem:[%s23311_s1 + $0xe70] ss:$8 sps:$4 sm:$0xff]   ;;  %v5752_v6 = vrot.slane %v5750_v15, 5  ;;  %8018 = vmatpush1.bf16.msra.mxu1 %v15400_v50  ;;  %v15409_v24 = vld [vmem:[%s23311_s1 + $0xe80] ss:$8 sps:$4 sm:$0xff]  }
 0x23a   : > { %v13389_v31 = vcombine.low %v5615_v44, %v5645_v41  ;;  %v19865_v9 = vrot.slane %v5756_v38, 5  ;;  %v5782_v25 = vrot.slane %v5780_v22, 4  ;;  %8019 = vmatprep.subr.bf16.mxu1 %v15411_v4  ;;  %v15420_v1 = vld [vmem:[%s23311_s1 + $0x1074] ss:$8 sps:$4 sm:$0xff]   ;;  %v23520_v15 = vld [vmem:[#allocation42_spill] sm:$0xff]  ;;  %v19874_v45 = vpop.f32.mrf.mxu1  ;;  %7907 = vmatpush1.bf16.msra.mxu0 %v15376_v33  ;;  %v13633_v44 = vcombine.low %v19711_v11, %v19733_v17  ;;  %v4027_v4 = vpop.f32.mrf.mxu0  ;;  %v23522_v17 = vld [vmem:[#allocation25_spill] sm:$0xff] }
 0x23b   : > { %23515 = vst [vmem:[#allocation18_spill] sm:$0xff] %v19854_v48  ;;  %v23518_v51 = vld [vmem:[#allocation24_spill] sm:$0xff]  ;;  %v4026_v50 = vadd.f32 %v4025_v63, %v23520_v15  ;;  %23521 = vst [vmem:[#allocation37_spill] sm:$0xff] %v19874_v45  ;;  %v15387_v41 = vld [vmem:[%s23311_s1 + $0xe64] ss:$8 sps:$4 sm:$0xff]   ;;  %v13639_v38 = vcombine.high %v19798_v35, %v19840_v5  ;;  %7908 = vmatprep.subr.bf16.mxu0 %v15381_v34  ;;  %v13527_v33 = vrot.slane %v19843_v60, 9 }
 0x23c   : > { %v19871_v20 = vadd.f32 %v4024_v8, %v23518_v51  ;;  %v13278_v22 = vld [vmem:[%s16290_s29 + $0x1f0] sm:$0xf]  ;;  %v5687_v8 = vsel %vm16324_vm2, %v19846_v39, %v19764_v46  ;;  %v7108_v63 = vrot.slane %v7098_v3, 4  ;;  %v19894_v48 = vpop.f32.mrf.mxu1  ;;  %v15385_v34 = vld [vmem:[%s23311_s1 + $0xe60] ss:$8 sps:$4 sm:$0xff]   ;;  %v5717_v46 = vsel %vm16324_vm2, %v19848_v58, %v19850_v47  ;;  %v4031_v39 = vpop.f32.mrf.mxu0 }
 0x23d   : > { %v15906_v51 = vld [vmem:[%s16290_s29 + $0x1cc] sm:$0x11]  ;;  %v19891_v15 = vadd.f32 %v4026_v50, %v23522_v17  ;;  %23525 = vst [vmem:[#allocation38_spill] sm:$0xff] %v19894_v48  ;;  %v5753_v60 = vor.u32 %v5752_v6, %v5749_v62  ;;  %8020 = vmatpush1.bf16.msra.mxu1 %v15409_v24  ;;  %6802 = vmatmul.mubr.bf16.gmra.mxu0 %v13389_v31  ;;  %v5828_v58 = vshll.u32 %v19537_v53, 16  ;;  %v5852_v47 = vshrl.u32 %v19537_v53, 16 }
 0x23e   : > { %23519 = vst [vmem:[#allocation20_spill] sm:$0xff] %v19871_v20  ;;  %v7109_v11 = vrot.slane %v15906_v51, 5  ;;  %v23524_v20 = vld [vmem:[#allocation44_spill] sm:$0xff]  ;;  %v5783_v50 = vor.u32 %v5782_v25, %v19865_v9  ;;  %v5786_v51 = vshll.u32 %v19510_v16, 16  ;;  %9004 = vmatprep.subr.bf16.mxu1 %v15420_v1  ;;  %v23526_v17 = vld [vmem:[#allocation26_spill] sm:$0xff]  ;;  %v4032_v48 = vadd.f32 %v4031_v39, %v19190_v32  ;;  %v19909_v27 = vpop.f32.mrf.mxu1  ;;  %7909 = vmatpush2.bf16.msra.mxu0 %v15379_v23  ;;  %v4033_v62 = vpop.f32.mrf.mxu0  ;;  %v23527_v53 = vld [vmem:[#allocation27_spill] sm:$0xff] }
 0x23f   : > { %23523 = vst [vmem:[#allocation21_spill] sm:$0xff] %v19891_v15  ;;  %v4028_v45 = vadd.f32 %v4027_v4, %v23524_v20  ;;  %v5819_v20 = vshrl.u32 %v13278_v22, 16  ;;  %v5822_v4 = vshll.u32 %v13278_v22, 16  ;;  %7910 = vmatprep.subr.bf16.mxu0 %v15387_v41  ;;  %6811 = vmatprep.mubr.bf16.mxu0 %v23371_v0  ;;  %v13638_v16 = vcombine.low %v19798_v35, %v19840_v5  ;;  %v15390_v6 = vld [vmem:[%s23311_s1 + $0xe54] ss:$8 sps:$4 sm:$0xff]  }
 0x240   : > { %7852 = vmatmul.mubr.bf16.gmra.mxu1 %v13633_v44  ;;  %v19921_v32 = vsel %vm17271_vm5, %v13527_v33, %v7098_v3  ;;  %v19925_v23 = vsel %vm17271_vm5, %v7108_v63, %v7109_v11  ;;  %v19928_v24 = vadd.f32 %v4032_v48, %v23527_v53  ;;  %v4034_v31 = vadd.f32 %v4033_v62, %v19195_v30  ;;  %v19931_v25 = vpop.f32.mrf.mxu1  ;;  %v4035_v1 = vpop.f32.mrf.mxu0  ;;  %v23528_v22 = vld [vmem:[#allocation28_spill] sm:$0xff]  ;;  %v23531_v62 = vld [vmem:[#allocation30_spill] sm:$0xff] }
 0x241   : > { %v19906_v15 = vadd.f32 %v4028_v45, %v23526_v17  ;;  %7861 = vmatprep.mubr.bf16.mxu1 %v13639_v38  ;;  %v13394_v35 = vcombine.low %v5687_v8, %v5717_v46  ;;  %v5754_v5 = vrot.slane %v5753_v60, 4  ;;  %v5784_v45 = vrot.slane %v5783_v50, 4  ;;  %v15388_v30 = vld [vmem:[%s23311_s1 + $0xe50] ss:$8 sps:$4 sm:$0xff]   ;;  %v15396_v46 = vld [vmem:[%s23311_s1 + $0xe44] ss:$8 sps:$4 sm:$0xff]  }
 0x242   : > { %v5788_v44 = vrot.slane %v5786_v51, 5  ;;  %v5821_v41 = vrot.slane %v5819_v20, 4  ;;  %v5824_v3 = vrot.slane %v5822_v4, 5  ;;  %v19934_v33 = vadd.f32 %v4034_v31, %v23528_v22  ;;  %v19937_v11 = vpop.f32.mrf.mxu1  ;;  %7911 = vmatpush2.bf16.msra.mxu0 %v15385_v34  ;;  %v4037_v8 = vpop.f32.mrf.mxu0  ;;  %v23529_v60 = vld [vmem:[#allocation29_spill] sm:$0xff]  ;;  %v23532_v53 = vld [vmem:[#allocation48_spill] sm:$0xff] }
 0x243   : > { %v4036_v63 = vadd.f32 %v4035_v1, %v19204_v61  ;;  %v19942_v48 = vrot.slane %v5828_v58, 5  ;;  %v5854_v38 = vrot.slane %v5852_v47, 4  ;;  %7912 = vmatprep.subr.bf16.mxu0 %v15390_v6  ;;  %v23530_v61 = vld [vmem:[#allocation46_spill] sm:$0xff]  ;;  %v13644_v34 = vcombine.high %v19921_v32, %v19925_v23 }
 0x244   : > { %v4038_v50 = vadd.f32 %v4037_v8, %v23530_v61  ;;  %v19951_v51 = vpop.f32.mrf.mxu1  ;;  %v4041_v20 = vpop.f32.mrf.mxu0  ;;  %v15394_v4 = vld [vmem:[%s23311_s1 + $0xe40] ss:$8 sps:$4 sm:$0xff]   ;;  %v5759_v17 = vsel %vm16324_vm2, %v5754_v5, %v19865_v9  ;;  %v5789_v58 = vsel %vm16324_vm2, %v5784_v45, %v5788_v44  ;;  %v5825_v47 = vor.u32 %v5824_v3, %v5821_v41  ;;  %v15399_v9 = vld [vmem:[%s23311_s1 + $0xe34] ss:$8 sps:$4 sm:$0xff]  }
 0x245   : > { %v19948_v39 = vadd.f32 %v4036_v63, %v23529_v60  ;;  %6812 = vmatmul.mubr.bf16.gmra.mxu0 %v13394_v35  ;;  %v4042_v31 = vadd.f32 %v4041_v20, %v23532_v53  ;;  %v5855_v1 = vor.u32 %v5854_v38, %v19942_v48  ;;  %v5858_v22 = vshll.u32 %v19605_v2, 16  ;;  %v13486_v5 = vld [vmem:[%s16290_s29 + $0x44] sm:$0xee]  ;;  %v23533_v45 = vld [vmem:[#allocation31_spill] sm:$0xff]  ;;  %v23535_v61 = vld [vmem:[#allocation32_spill] sm:$0xff] }
 0x246   : > { %v19964_v6 = vadd.f32 %v4038_v50, %v23531_v62  ;;  %v19967_v35 = vpop.f32.mrf.mxu1  ;;  %7913 = vmatpush2.bf16.msra.mxu0 %v15388_v30  ;;  %v4043_v63 = vpop.f32.mrf.mxu0  ;;  %6821 = vmatprep.mubr.bf16.mxu0 %v23371_v0  ;;  %v23534_v41 = vld [vmem:[#allocation49_spill] sm:$0xff]  ;;  %v15907_v30 = vld [vmem:[%s16290_s29 + $0x58] sm:$0xff]  ;;  %v13643_v8 = vcombine.low %v19921_v32, %v19925_v23  ;;  %v5826_v60 = vrot.slane %v5825_v47, 4  ;;  %v23536_v20 = vld [vmem:[#allocation51_spill] sm:$0xff]  ;;  %v13510_v23 = vrot.slane %v13486_v5, 9 }
 0x247   : > { %7914 = vmatprep.subr.bf16.mxu0 %v15396_v46  ;;  %v19977_v44 = vadd.f32 %v4042_v31, %v23533_v45  ;;  %v4044_v3 = vadd.f32 %v4043_v63, %v23534_v41  ;;  %v6976_v38 = vrot.slane %v15907_v30, 5  ;;  %v13399_v46 = vcombine.low %v5759_v17, %v5789_v58  ;;  %v15405_v32 = vld [vmem:[%s23311_s1 + $0xe24] ss:$8 sps:$4 sm:$0xff]  }
 0x248   : > { %7862 = vmatmul.mubr.bf16.gmra.mxu1 %v13638_v16  ;;  %v19980_v16 = vpop.f32.mrf.mxu1  ;;  %v4045_v2 = vpop.f32.mrf.mxu0  ;;  %v5856_v31 = vrot.slane %v5855_v1, 4  ;;  %v5860_v63 = vrot.slane %v5858_v22, 5  ;;  %v23537_v17 = vld [vmem:[#allocation33_spill] sm:$0xff]  ;;  %v15908_v30 = vld [vmem:[%s16290_s29 + $0x6c] sm:$0x11]  ;;  %v5831_v22 = vsel %vm16324_vm2, %v5826_v60, %v19942_v48 }
 0x249   : > { %7871 = vmatprep.mubr.bf16.mxu1 %v13644_v34  ;;  %v19986_v50 = vadd.f32 %v4044_v3, %v23535_v61  ;;  %v4046_v62 = vadd.f32 %v4045_v2, %v23536_v20  ;;  %v15397_v34 = vld [vmem:[%s23311_s1 + $0xe30] ss:$8 sps:$4 sm:$0xff]   ;;  %v23539_v47 = vld [vmem:[#allocation53_spill] sm:$0xff]  ;;  %v6986_v2 = vrot.slane %v15908_v30, 5  ;;  %v15408_v48 = vld [vmem:[%s23311_s1 + $0xe14] ss:$8 sps:$4 sm:$0xff]  }
 0x24a   : > { %v19989_v53 = vpop.f32.mrf.mxu1  ;;  %7915 = vmatpush2.bf16.msra.mxu0 %v15394_v4  ;;  %v4047_v45 = vpop.f32.mrf.mxu0  ;;  %v6985_v4 = vrot.slane %v6976_v38, 4  ;;  %v15403_v1 = vld [vmem:[%s23311_s1 + $0xe20] ss:$8 sps:$4 sm:$0xff]   ;;  %v23543_v20 = vld [vmem:[#allocation55_spill] sm:$0xff] }
 0x24b   : > { %7916 = vmatprep.subr.bf16.mxu0 %v15399_v9  ;;  %v19998_v58 = vadd.f32 %v4046_v62, %v23537_v17  ;;  %v4048_v41 = vadd.f32 %v4047_v45, %v23539_v47  ;;  %v23541_v9 = vld [vmem:[#allocation34_spill] sm:$0xff]  ;;  %v23545_v60 = vld [vmem:[#allocation35_spill] sm:$0xff] }
 0x24c   : > { %v20001_v3 = vpop.f32.mrf.mxu1  ;;  %v4051_v61 = vpop.f32.mrf.mxu0 }
 0x24d   : > { %23538 = vst [vmem:[#allocation22_spill] sm:$0xff] %v19998_v58  ;;  %23540 = vst [vmem:[#allocation39_spill] sm:$0xff] %v20001_v3  ;;  %6822 = vmatmul.mubr.bf16.gmra.mxu0 %v13399_v46  ;;  %v20011_v5 = vadd.f32 %v4048_v41, %v23541_v9  ;;  %v4052_v62 = vadd.f32 %v4051_v61, %v23543_v20  ;;  %v5861_v46 = vsel %vm16324_vm2, %v5856_v31, %v5860_v63  ;;  %v23547_v41 = vld [vmem:[#allocation57_spill] sm:$0xff]  ;;  %v23562_v58 = vld [vmem:[#allocation63_spill] sm:$0xff] }
 0x24e   : > { %v20014_v45 = vpop.f32.mrf.mxu1  ;;  %7917 = vmatpush2.bf16.msra.mxu0 %v15397_v34  ;;  %v4053_v17 = vpop.f32.mrf.mxu0  ;;  %6831 = vmatprep.mubr.bf16.mxu0 %v23371_v0  ;;  %v23550_v34 = vld [vmem:[#allocation43_spill] sm:$0xff]  ;;  %v6977_v31 = vsel %vm17271_vm5, %v13510_v23, %v6976_v38  ;;  %v6987_v63 = vsel %vm17271_vm5, %v6985_v4, %v6986_v2  ;;  %v13404_v20 = vcombine.low %v5831_v22, %v5861_v46  ;;  %v13489_v23 = vld [vmem:[%s16290_s29 + $0x80] sm:$0xee] }
 0x24f   : > { %23542 = vst [vmem:[#allocation23_spill] sm:$0xff] %v20011_v5  ;;  %23544 = vst [vmem:[#allocation40_spill] sm:$0xff] %v20014_v45  ;;  %7918 = vmatprep.subr.bf16.mxu0 %v15405_v32  ;;  %v20023_v47 = vadd.f32 %v4052_v62, %v23545_v60  ;;  %v4054_v30 = vadd.f32 %v4053_v17, %v23547_v41  ;;  %v6997_v5 = vrot.slane %v15909_v10, 5  ;;  %v23552_v62 = vld [vmem:[#allocation36_spill] sm:$0xff]  ;;  %v23554_v17 = vld [vmem:[#allocation59_spill] sm:$0xff] }
 0x250   : > { %7872 = vmatmul.mubr.bf16.gmra.mxu1 %v13643_v8  ;;  %v20026_v61 = vpop.f32.mrf.mxu1  ;;  %v23549_v8 = vld [vmem:[#allocation41_spill] sm:$0xff]  ;;  %v4055_v32 = vpop.f32.mrf.mxu0  ;;  %v15406_v38 = vld [vmem:[%s23311_s1 + $0xe10] ss:$8 sps:$4 sm:$0xff]   ;;  %v13616_v4 = vcombine.high %v6977_v31, %v6987_v63 }
 0x251   : > { %23546 = vst [vmem:[#allocation24_spill] sm:$0xff] %v20023_v47  ;;  %23548 = vst [vmem:[#allocation42_spill] sm:$0xff] %v20026_v61  ;;  %v23551_v9 = vcombine.high %v23549_v8, %v23550_v34  ;;  %v20037_v60 = vadd.f32 %v4054_v30, %v23552_v62  ;;  %v4056_v41 = vadd.f32 %v4055_v32, %v23554_v17  ;;  %v15414_v10 = vld [vmem:[%s23311_s1 + $0xe04] ss:$8 sps:$4 sm:$0xff]   ;;  %v23556_v2 = vld [vmem:[#allocation7_spill] sm:$0xff]  ;;  %v13513_v17 = vrot.slane %v13489_v23, 9 }
 0x252   : > { %v20040_v47 = vpop.f32.mrf.mxu1  ;;  %7919 = vmatpush2.bf16.msra.mxu0 %v15403_v1  ;;  %v23558_v46 = vld [vmem:[#allocation61_spill] sm:$0xff]  ;;  %v23560_v61 = vld [vmem:[#allocation8_spill] sm:$0xff] }
 0x253   : > { %7881 = vmatprep.mubr.bf16.mxu1 %v23551_v9  ;;  %23553 = vst [vmem:[#allocation25_spill] sm:$0xff] %v20037_v60  ;;  %23555 = vst [vmem:[#allocation44_spill] sm:$0xff] %v20040_v47  ;;  %v4057_v9 = vpop.f32.mrf.mxu0  ;;  %7920 = vmatprep.subr.bf16.mxu0 %v15408_v48  ;;  %v20050_v22 = vadd.f32 %v4056_v41, %v23556_v2  ;;  %v15412_v62 = vld [vmem:[%s23311_s1 + $0xe00] ss:$8 sps:$4 sm:$0xff]   ;;  %v7006_v48 = vrot.slane %v6997_v5, 4 }
 0x254   : > { %v4058_v30 = vadd.f32 %v4057_v9, %v23558_v46  ;;  %v20053_v32 = vpop.f32.mrf.mxu1  ;;  %v15910_v60 = vld [vmem:[%s16290_s29 + $0xa8] sm:$0x11]  ;;  %v23564_v9 = vcombine.low %v23549_v8, %v23550_v34  ;;  %v15415_v8 = vld [vmem:[%s23311_s1 + $0xf70] ss:$8 sps:$4 sm:$0xff]  }
 0x255   : > { %23557 = vst [vmem:[#allocation26_spill] sm:$0xff] %v20050_v22  ;;  %23559 = vst [vmem:[#allocation27_spill] sm:$0xff] %v20053_v32  ;;  %v4061_v1 = vpop.f32.mrf.mxu0  ;;  %6832 = vmatmul.mubr.bf16.gmra.mxu0 %v13404_v20  ;;  %v7007_v47 = vrot.slane %v15910_v60, 5  ;;  %v15417_v60 = vld [vmem:[%s23311_s1 + $0xf74] ss:$8 sps:$4 sm:$0xff]  }
 0x256   : > { %v20060_v45 = vadd.f32 %v4058_v30, %v23560_v61  ;;  %v4062_v41 = vadd.f32 %v4061_v1, %v23562_v58  ;;  %v20063_v2 = vpop.f32.mrf.mxu1  ;;  %7921 = vmatpush2.bf16.msra.mxu0 %v15406_v38  ;;  %7924 = vmatprep.mubr.bf16.mxu0 %v13616_v4  ;;  %v23565_v61 = vld [vmem:[#allocation9_spill] sm:$0xff]  ;;  %v13615_v38 = vcombine.low %v6977_v31, %v6987_v63 }
 0x257   : > { %23563 = vst [vmem:[#allocation29_spill] sm:$0xff] %v20063_v2  ;;  %v4063_v20 = vpop.f32.mrf.mxu0  ;;  %7922 = vmatprep.subr.bf16.mxu0 %v15414_v10  ;;  %v23567_v58 = vld [vmem:[#allocation65_spill] sm:$0xff]  ;;  %v15418_v10 = vld [vmem:[%s23311_s1 + $0x1070] ss:$8 sps:$4 sm:$0xff]   ;;  %v20086_v4 = vsel %vm17271_vm5, %v13513_v17, %v6997_v5  ;;  %v20090_v1 = vsel %vm17271_vm5, %v7006_v48, %v7007_v47 }
 0x258   : > { %23561 = vst [vmem:[#allocation28_spill] sm:$0xff] %v20060_v45  ;;  %7882 = vmatmul.mubr.bf16.gmra.mxu1 %v23564_v9  ;;  %v20072_v23 = vadd.f32 %v4062_v41, %v23565_v61  ;;  %v4064_v46 = vadd.f32 %v4063_v20, %v23567_v58  ;;  %v20075_v30 = vpop.f32.mrf.mxu1  ;;  %v13492_v41 = vld [vmem:[%s16290_s29 + $0xbc] sm:$0xee]  ;;  %v15911_v9 = vld [vmem:[%s16290_s29 + $0xd0] sm:$0xff]  ;;  %v23569_v61 = vld [vmem:[#allocation10_spill] sm:$0xff] }
 0x259   : > { %23568 = vst [vmem:[#allocation30_spill] sm:$0xff] %v20075_v30  ;;  %8037 = vmatprep.mubr.bf16.mxu1 %v23371_v0  ;;  %v4065_v34 = vpop.f32.mrf.mxu0  ;;  %v7018_v20 = vrot.slane %v15911_v9, 5  ;;  %v15423_v5 = vld [vmem:[%s23311_s1 + $0xf64] ss:$8 sps:$4 sm:$0xff]   ;;  %v23573_v47 = vld [vmem:[#allocation11_spill] sm:$0xff] }
 0x25a   : > { %23566 = vst [vmem:[#allocation46_spill] sm:$0xff] %v20072_v23  ;;  %v20095_v58 = vadd.f32 %v4064_v46, %v23569_v61  ;;  %v23571_v23 = vld [vmem:[#allocation67_spill] sm:$0xff]  ;;  %v20098_v63 = vpop.f32.mrf.mxu1  ;;  %7923 = vmatpush2.bf16.msra.mxu0 %v15412_v62  ;;  %v23575_v48 = vld [vmem:[#allocation69_spill] sm:$0xff]  ;;  %v13516_v61 = vrot.slane %v13492_v41, 9 }
 0x25b   : > { %v4066_v31 = vadd.f32 %v4065_v34, %v23571_v23  ;;  %23572 = vst [vmem:[#allocation31_spill] sm:$0xff] %v20098_v63  ;;  %v4067_v30 = vpop.f32.mrf.mxu0  ;;  %8891 = vmatprep.subr.bf16.mxu0 %v15417_v60  ;;  %v15421_v23 = vld [vmem:[%s23311_s1 + $0xf60] ss:$8 sps:$4 sm:$0xff]   ;;  %v15426_v62 = vld [vmem:[%s23311_s1 + $0x1064] ss:$8 sps:$4 sm:$0xff]   ;;  %v13621_v60 = vcombine.high %v20086_v4, %v20090_v1 }
 0x25c   : > { %23570 = vst [vmem:[#allocation48_spill] sm:$0xff] %v20095_v58  ;;  %v4068_v9 = vadd.f32 %v4067_v30, %v23575_v48  ;;  %v20107_v45 = vpop.f32.mrf.mxu1  ;;  %v15424_v34 = vld [vmem:[%s23311_s1 + $0x1060] ss:$8 sps:$4 sm:$0xff]   ;;  %v15429_v30 = vld [vmem:[%s23311_s1 + $0xf54] ss:$8 sps:$4 sm:$0xff]  }
 0x25d   : > { %v20104_v17 = vadd.f32 %v4066_v31, %v23573_v47  ;;  %23576 = vst [vmem:[#allocation32_spill] sm:$0xff] %v20107_v45  ;;  %v4990_v46 = vpop.f32.mrf.mxu0  ;;  %7925 = vmatmul.mubr.bf16.vlgmr.msra.gmra.mxu0 %v13615_v38  ;;  %v7027_v31 = vrot.slane %v7018_v20, 4  ;;  %v15912_v47 = vld [vmem:[%s16290_s29 + $0xe4] sm:$0x11]  ;;  %v23579_v38 = vld [vmem:[#allocation47_spill] sm:$0xff] }
 0x25e   : > { %v7028_v48 = vrot.slane %v15912_v47, 5  ;;  %v4991_v58 = vadd.f32 %v4990_v46, %v19543_v42  ;;  %v5103_v63 = vpop.f32.mrf.mxu1  ;;  %v23578_v2 = vld [vmem:[#allocation45_spill] sm:$0xff]  ;;  %8892 = vmatpush1.bf16.msra.mxu0 %v15415_v8  ;;  %7934 = vmatprep.mubr.bf16.mxu0 %v13621_v60  ;;  %v15427_v42 = vld [vmem:[%s23311_s1 + $0xf50] ss:$8 sps:$4 sm:$0xff]   ;;  %v13620_v8 = vcombine.low %v20086_v4, %v20090_v1 }
 0x25f   : > { %23574 = vst [vmem:[#allocation49_spill] sm:$0xff] %v20104_v17  ;;  %v23577_v17 = vld [vmem:[#allocation12_spill] sm:$0xff]  ;;  %v23580_v22 = vcombine.low %v23578_v2, %v23579_v38  ;;  %v4992_v32 = vpop.f32.mrf.mxu0  ;;  %8893 = vmatprep.subr.bf16.mxu0 %v15423_v5  ;;  %v15913_v4 = vld [vmem:[%s16290_s29 + $0x10c] sm:$0xff] }
 0x260   : > { %v20125_v45 = vadd.f32 %v4068_v9, %v23577_v17  ;;  %v5104_v41 = vadd.f32 %v5103_v63, %v4991_v58  ;;  %v4993_v3 = vadd.f32 %v4992_v32, %v19565_v21  ;;  %v5105_v47 = vpop.f32.mrf.mxu1  ;;  %v15430_v21 = vld [vmem:[%s23311_s1 + $0x1050] ss:$8 sps:$4 sm:$0xff]   ;;  %v15435_v32 = vld [vmem:[%s23311_s1 + $0xf44] ss:$8 sps:$4 sm:$0xff]   ;;  %v20153_v58 = vsel %vm17271_vm5, %v7027_v31, %v7028_v48 }
 0x261   : > { %8038 = vmatmul.mubr.bf16.vlgmr.msra.gmra.mxu1 %v23580_v22  ;;  %v15432_v22 = vld [vmem:[%s23311_s1 + $0x1054] ss:$8 sps:$4 sm:$0xff]   ;;  %v4994_v2 = vpop.f32.mrf.mxu0  ;;  %v7039_v1 = vrot.slane %v15913_v4, 5 }
 0x262   : > { %9005 = vmatpush1.bf16.msra.mxu1 %v15418_v10  ;;  %8047 = vmatprep.mubr.bf16.mxu1 %v23371_v0  ;;  %v20149_v10 = vsel %vm17271_vm5, %v13516_v61, %v7018_v20  ;;  %v13495_v63 = vld [vmem:[%s16290_s29 + $0xf8] sm:$0xee]  ;;  %v20158_v5 = vadd.f32 %v5104_v41, %v19562_v26  ;;  %v5106_v17 = vadd.f32 %v5105_v47, %v4993_v3  ;;  %v23581_v20 = vld [vmem:[#allocation14_spill] sm:$0xff]  ;;  %v15914_v41 = vld [vmem:[%s16290_s29 + $0x120] sm:$0x11] }
 0x263   : > { %9006 = vmatprep.subr.bf16.mxu1 %v15426_v62  ;;  %v4995_v9 = vadd.f32 %v4994_v2, %v19595_v18  ;;  %v5107_v62 = vpop.f32.mrf.mxu1  ;;  %8894 = vmatpush1.bf16.msra.mxu0 %v15421_v23  ;;  %v4996_v60 = vpop.f32.mrf.mxu0  ;;  %v15433_v26 = vld [vmem:[%s23311_s1 + $0xf40] ss:$8 sps:$4 sm:$0xff]   ;;  %v15438_v18 = vld [vmem:[%s23311_s1 + $0x1044] ss:$8 sps:$4 sm:$0xff]   ;;  %v13626_v3 = vcombine.high %v20149_v10, %v20153_v58  ;;  %v7048_v38 = vrot.slane %v7039_v1, 4  ;;  %v7049_v47 = vrot.slane %v15914_v41, 5 }
 0x264   : > { %8895 = vmatprep.subr.bf16.mxu0 %v15429_v30  ;;  %v20162_v46 = vadd.f32 %v5106_v17, %v23581_v20  ;;  %v4997_v31 = vadd.f32 %v4996_v60, %v19621_v55  ;;  %v15441_v55 = vld [vmem:[%s23311_s1 + $0xf34] ss:$8 sps:$4 sm:$0xff]   ;;  %v13519_v30 = vrot.slane %v13495_v63, 9 }
 0x265   : > { %v5108_v61 = vadd.f32 %v5107_v62, %v4995_v9  ;;  %v5109_v48 = vpop.f32.mrf.mxu1  ;;  %v5000_v23 = vpop.f32.mrf.mxu0  ;;  %7935 = vmatmul.mubr.bf16.gmra.mxu0 %v13620_v8  ;;  %v23582_v8 = vld [vmem:[#allocation50_spill] sm:$0xff]  ;;  %v23583_v9 = vld [vmem:[#allocation52_spill] sm:$0xff] }
 0x266   : > { %9007 = vmatpush1.bf16.msra.mxu1 %v15424_v34  ;;  %v15436_v34 = vld [vmem:[%s23311_s1 + $0x1040] ss:$8 sps:$4 sm:$0xff]   ;;  %v5110_v2 = vadd.f32 %v5109_v48, %v4997_v31  ;;  %v5001_v4 = vadd.f32 %v5000_v23, %v19650_v13  ;;  %v23584_v62 = vcombine.low %v23582_v8, %v23583_v9  ;;  %7944 = vmatprep.mubr.bf16.mxu0 %v13626_v3  ;;  %v15439_v13 = vld [vmem:[%s23311_s1 + $0xf30] ss:$8 sps:$4 sm:$0xff]  }
 0x267   : > { %9008 = vmatprep.subr.bf16.mxu1 %v15432_v22  ;;  %v20181_v22 = vadd.f32 %v5108_v61, %v19618_v57  ;;  %v5113_v17 = vpop.f32.mrf.mxu1  ;;  %8896 = vmatpush1.bf16.msra.mxu0 %v15427_v42  ;;  %v5002_v60 = vpop.f32.mrf.mxu0  ;;  %v15444_v42 = vld [vmem:[%s23311_s1 + $0x1034] ss:$8 sps:$4 sm:$0xff]   ;;  %v20208_v31 = vsel %vm17271_vm5, %v13519_v30, %v7039_v1  ;;  %v20212_v48 = vsel %vm17271_vm5, %v7048_v38, %v7049_v47 }
 0x268   : > { %8897 = vmatprep.subr.bf16.mxu0 %v15435_v32  ;;  %v20188_v63 = vadd.f32 %v5110_v2, %v19647_v12  ;;  %v5114_v20 = vadd.f32 %v5113_v17, %v5001_v4  ;;  %v5003_v57 = vadd.f32 %v5002_v60, %v19683_v52  ;;  %v13625_v12 = vcombine.low %v20149_v10, %v20153_v58  ;;  %v15442_v52 = vld [vmem:[%s23311_s1 + $0x1030] ss:$8 sps:$4 sm:$0xff]   ;;  %v15447_v32 = vld [vmem:[%s23311_s1 + $0xf24] ss:$8 sps:$4 sm:$0xff]   ;;  %v15916_v8 = vld [vmem:[%s16290_s29 + $0x15c] sm:$0x11] }
 0x269   : > { %8048 = vmatmul.mubr.bf16.gmra.mxu1 %v23584_v62  ;;  %v5115_v61 = vpop.f32.mrf.mxu1  ;;  %v15915_v10 = vld [vmem:[%s16290_s29 + $0x148] sm:$0xff]  ;;  %v7070_v9 = vrot.slane %v15916_v8, 5 }
 0x26a   : > { %9009 = vmatpush1.bf16.msra.mxu1 %v15430_v21  ;;  %v5004_v21 = vpop.f32.mrf.mxu0  ;;  %8057 = vmatprep.mubr.bf16.mxu1 %v23371_v0  ;;  %v7060_v58 = vrot.slane %v15915_v10, 5  ;;  %v20217_v3 = vadd.f32 %v5114_v20, %v19680_v37  ;;  %v5116_v23 = vadd.f32 %v5115_v61, %v5003_v57  ;;  %v15445_v37 = vld [vmem:[%s23311_s1 + $0xf20] ss:$8 sps:$4 sm:$0xff]   ;;  %v23588_v10 = vld [vmem:[#allocation15_spill] sm:$0xff] }
 0x26b   : > { %9010 = vmatprep.subr.bf16.mxu1 %v15438_v18  ;;  %v13498_v18 = vld [vmem:[%s16290_s29 + $0x134] sm:$0xee]  ;;  %v5005_v41 = vadd.f32 %v5004_v21, %v19702_v54  ;;  %v5117_v2 = vpop.f32.mrf.mxu1  ;;  %8898 = vmatpush1.bf16.msra.mxu0 %v15433_v26  ;;  %v15450_v54 = vld [vmem:[%s23311_s1 + $0x1024] ss:$8 sps:$4 sm:$0xff]   ;;  %v13631_v26 = vcombine.high %v20208_v31, %v20212_v48 }
 0x26c   : > { %v5006_v4 = vpop.f32.mrf.mxu0  ;;  %8899 = vmatprep.subr.bf16.mxu0 %v15441_v55  ;;  %v20221_v1 = vadd.f32 %v5116_v23, %v19699_v28  ;;  %v15448_v28 = vld [vmem:[%s23311_s1 + $0x1020] ss:$8 sps:$4 sm:$0xff]   ;;  %v13522_v55 = vrot.slane %v13498_v18, 9  ;;  %v7069_v17 = vrot.slane %v7060_v58, 4 }
 0x26d   : > { %v5118_v30 = vadd.f32 %v5117_v2, %v5005_v41  ;;  %v5007_v38 = vadd.f32 %v5006_v4, %v19722_v14  ;;  %v5119_v47 = vpop.f32.mrf.mxu1  ;;  %7945 = vmatmul.mubr.bf16.gmra.mxu0 %v13625_v12  ;;  %v15453_v14 = vld [vmem:[%s23311_s1 + $0xf14] ss:$8 sps:$4 sm:$0xff]   ;;  %v23585_v61 = vld [vmem:[#allocation54_spill] sm:$0xff]  ;;  %v15454_v4 = vld [vmem:[%s23311_s1 + $0x1010] ss:$8 sps:$4 sm:$0xff]  }
 0x26e   : > { %9011 = vmatpush1.bf16.msra.mxu1 %v15436_v34  ;;  %v5010_v34 = vpop.f32.mrf.mxu0  ;;  %7954 = vmatprep.mubr.bf16.mxu0 %v13631_v26  ;;  %v23591_v26 = vld [vmem:[#allocation16_spill] sm:$0xff] }
 0x26f   : > { %9012 = vmatprep.subr.bf16.mxu1 %v15444_v42  ;;  %v20240_v62 = vadd.f32 %v5118_v30, %v19719_v59  ;;  %v5120_v60 = vadd.f32 %v5119_v47, %v5007_v38  ;;  %v5011_v20 = vadd.f32 %v5010_v34, %v19751_v36  ;;  %v5123_v57 = vpop.f32.mrf.mxu1  ;;  %v23586_v42 = vld [vmem:[#allocation56_spill] sm:$0xff]  ;;  %8900 = vmatpush1.bf16.msra.mxu0 %v15439_v13  ;;  %v23590_v59 = vld [vmem:[#allocation17_spill] sm:$0xff] }
 0x270   : > { %v23587_v21 = vcombine.low %v23585_v61, %v23586_v42  ;;  %v5012_v12 = vpop.f32.mrf.mxu0  ;;  %8901 = vmatprep.subr.bf16.mxu0 %v15447_v32  ;;  %v15451_v36 = vld [vmem:[%s23311_s1 + $0xf10] ss:$8 sps:$4 sm:$0xff]   ;;  %v15456_v13 = vld [vmem:[%s23311_s1 + $0x1014] ss:$8 sps:$4 sm:$0xff]   ;;  %v13630_v32 = vcombine.low %v20208_v31, %v20212_v48  ;;  %v15459_v30 = vld [vmem:[%s23311_s1 + $0xf04] ss:$8 sps:$4 sm:$0xff]   ;;  %v20267_v38 = vsel %vm17271_vm5, %v13522_v55, %v7060_v58  ;;  %v20271_v47 = vsel %vm17271_vm5, %v7069_v17, %v7070_v9 }
 0x271   : > { %v20247_v18 = vadd.f32 %v5120_v60, %v23588_v10  ;;  %v5124_v23 = vadd.f32 %v5123_v57, %v5011_v20  ;;  %v5013_v41 = vadd.f32 %v5012_v12, %v23590_v59  ;;  %v5125_v2 = vpop.f32.mrf.mxu1  ;;  %v15917_v31 = vld [vmem:[%s16290_s29 + $0x184] sm:$0xff] }
 0x272   : > { %8058 = vmatmul.mubr.bf16.gmra.mxu1 %v23587_v21  ;;  %v7081_v48 = vrot.slane %v15917_v31, 5  ;;  %v15457_v61 = vld [vmem:[%s23311_s1 + $0xf00] ss:$8 sps:$4 sm:$0xff]   ;;  %v15918_v21 = vld [vmem:[%s16290_s29 + $0x198] sm:$0x11] }
 0x273   : > { %9013 = vmatpush1.bf16.msra.mxu1 %v15442_v52  ;;  %23589 = vst [vmem:[#allocation51_spill] sm:$0xff] %v20247_v18  ;;  %v5014_v52 = vpop.f32.mrf.mxu0  ;;  %8067 = vmatprep.mubr.bf16.mxu1 %v23371_v0  ;;  %v20276_v34 = vadd.f32 %v5124_v23, %v23591_v26  ;;  %v5126_v8 = vadd.f32 %v5125_v2, %v5013_v41  ;;  %v5127_v20 = vpop.f32.mrf.mxu1  ;;  %v7091_v12 = vrot.slane %v15918_v21, 5  ;;  %v23595_v2 = vld [vmem:[#allocation58_spill] sm:$0xff] }
 0x274   : > { %9014 = vmatprep.subr.bf16.mxu1 %v15450_v54  ;;  %v13501_v54 = vld [vmem:[%s16290_s29 + $0x170] sm:$0xee]  ;;  %v5015_v60 = vadd.f32 %v5014_v52, %v19787_v19  ;;  %8902 = vmatpush1.bf16.msra.mxu0 %v15445_v37  ;;  %v15462_v19 = vld [vmem:[%s23311_s1 + $0x1004] ss:$8 sps:$4 sm:$0xff]   ;;  %v13636_v37 = vcombine.high %v20267_v38, %v20271_v47  ;;  %v7090_v42 = vrot.slane %v7081_v48, 4 }
 0x275   : > { %23592 = vst [vmem:[#allocation33_spill] sm:$0xff] %v20276_v34  ;;  %v5016_v57 = vpop.f32.mrf.mxu0  ;;  %8903 = vmatprep.subr.bf16.mxu0 %v15453_v14  ;;  %v20280_v58 = vadd.f32 %v5126_v8, %v19784_v29  ;;  %v5129_v9 = vpop.f32.mrf.mxu1  ;;  %7955 = vmatmul.mubr.bf16.gmra.mxu0 %v13630_v32  ;;  %v15460_v29 = vld [vmem:[%s23311_s1 + $0x1000] ss:$8 sps:$4 sm:$0xff]   ;;  %v13525_v14 = vrot.slane %v13501_v54, 9 }
 0x276   : > { %v5128_v55 = vadd.f32 %v5127_v20, %v5015_v60  ;;  %v5017_v17 = vadd.f32 %v5016_v57, %v19806_v56  ;;  %v15465_v56 = vld [vmem:[%s23311_s1 + $0xff4] ss:$8 sps:$4 sm:$0xff]   ;;  %7964 = vmatprep.mubr.bf16.mxu0 %v13636_v37  ;;  %v15471_v60 = vld [vmem:[%s23311_s1 + $0xfe4] ss:$8 sps:$4 sm:$0xff]   ;;  %v20330_v57 = vsel %vm17271_vm5, %v7090_v42, %v7091_v12 }
 0x277   : > { %9015 = vmatpush1.bf16.msra.mxu1 %v15448_v28  ;;  %23593 = vst [vmem:[#allocation53_spill] sm:$0xff] %v20280_v58  ;;  %v5020_v28 = vpop.f32.mrf.mxu0  ;;  %v5133_v41 = vpop.f32.mrf.mxu1  ;;  %v20326_v20 = vsel %vm17271_vm5, %v13525_v14, %v7081_v48  ;;  %v23602_v37 = vld [vmem:[#allocation37_spill] sm:$0xff]  ;;  %v23603_v48 = vld [vmem:[#allocation20_spill] sm:$0xff]  ;;  %v23605_v12 = vld [vmem:[#allocation38_spill] sm:$0xff] }
 0x278   : > { %9016 = vmatprep.subr.bf16.mxu1 %v15456_v13  ;;  %v20299_v10 = vadd.f32 %v5128_v55, %v19803_v43  ;;  %v5130_v23 = vadd.f32 %v5129_v9, %v5017_v17  ;;  %v5021_v59 = vadd.f32 %v5020_v28, %v19833_v49  ;;  %v23596_v13 = vld [vmem:[#allocation60_spill] sm:$0xff]  ;;  %8904 = vmatpush1.bf16.msra.mxu0 %v15451_v36  ;;  %v23599_v43 = vld [vmem:[#allocation19_spill] sm:$0xff]  ;;  %v23600_v17 = vld [vmem:[#allocation18_spill] sm:$0xff] }
 0x279   : > { %v23597_v52 = vcombine.low %v23595_v2, %v23596_v13  ;;  %v5022_v32 = vpop.f32.mrf.mxu0  ;;  %8905 = vmatprep.subr.bf16.mxu0 %v15459_v30  ;;  %v5135_v8 = vpop.f32.mrf.mxu1  ;;  %v15463_v49 = vld [vmem:[%s23311_s1 + $0xff0] ss:$8 sps:$4 sm:$0xff]   ;;  %v15468_v36 = vld [vmem:[%s23311_s1 + $0x10f4] ss:$8 sps:$4 sm:$0xff]   ;;  %v15469_v2 = vld [vmem:[%s23311_s1 + $0xfe0] ss:$8 sps:$4 sm:$0xff]  }
 0x27a   : > { %23594 = vst [vmem:[#allocation34_spill] sm:$0xff] %v20299_v10  ;;  %v20306_v54 = vadd.f32 %v5130_v23, %v19830_v7  ;;  %v5134_v31 = vadd.f32 %v5133_v41, %v5021_v59  ;;  %v5023_v26 = vadd.f32 %v5022_v32, %v23599_v43  ;;  %v13635_v7 = vcombine.low %v20267_v38, %v20271_v47  ;;  %v15466_v30 = vld [vmem:[%s23311_s1 + $0x10f0] ss:$8 sps:$4 sm:$0xff]   ;;  %v15919_v38 = vld [vmem:[%s16290_s29 + $0x1c0] sm:$0xff] }
 0x27b   : > { %8068 = vmatmul.mubr.bf16.gmra.mxu1 %v23597_v52  ;;  %v13504_v55 = vld [vmem:[%s16290_s29 + $0x1ac] sm:$0xee]  ;;  %v7102_v47 = vrot.slane %v15919_v38, 5  ;;  %v5137_v21 = vpop.f32.mrf.mxu1  ;;  %v15472_v13 = vld [vmem:[%s23311_s1 + $0x10e0] ss:$8 sps:$4 sm:$0xff]  }
 0x27c   : > { %9017 = vmatpush1.bf16.msra.mxu1 %v15454_v4  ;;  %23598 = vst [vmem:[#allocation55_spill] sm:$0xff] %v20306_v54  ;;  %v5024_v4 = vpop.f32.mrf.mxu0  ;;  %8077 = vmatprep.mubr.bf16.mxu1 %v23371_v0  ;;  %v20335_v9 = vadd.f32 %v5134_v31, %v23600_v17  ;;  %v15477_v52 = vld [vmem:[%s23311_s1 + $0xfd4] ss:$8 sps:$4 sm:$0xff]   ;;  %v13528_v32 = vrot.slane %v13504_v55, 9 }
 0x27d   : > { %9018 = vmatprep.subr.bf16.mxu1 %v15462_v19  ;;  %v5136_v19 = vadd.f32 %v5135_v8, %v5023_v26  ;;  %v5025_v28 = vadd.f32 %v5024_v4, %v23602_v37  ;;  %8906 = vmatpush1.bf16.msra.mxu0 %v15457_v61  ;;  %v5139_v41 = vpop.f32.mrf.mxu1  ;;  %v15474_v61 = vld [vmem:[%s23311_s1 + $0x10e4] ss:$8 sps:$4 sm:$0xff]   ;;  %v7111_v31 = vrot.slane %v7102_v47, 4  ;;  %v15920_v43 = vld [vmem:[%s16290_s29 + $0x1d4] sm:$0x11] }
 0x27e   : > { %23601 = vst [vmem:[#allocation35_spill] sm:$0xff] %v20335_v9  ;;  %v5026_v23 = vpop.f32.mrf.mxu0  ;;  %8907 = vmatprep.subr.bf16.mxu0 %v15465_v56  ;;  %7965 = vmatmul.mubr.bf16.gmra.mxu0 %v13635_v7  ;;  %v7112_v26 = vrot.slane %v15920_v43, 5  ;;  %v23606_v8 = vld [vmem:[#allocation21_spill] sm:$0xff]  ;;  %v23608_v7 = vld [vmem:[#allocation62_spill] sm:$0xff]  ;;  %v14016_v10 = vld [vmem:[%s16290_s29 + $0x154] sm:$0x11] }
 0x27f   : > { %v20339_v14 = vadd.f32 %v5136_v19, %v23603_v48  ;;  %v5138_v42 = vadd.f32 %v5137_v21, %v5025_v28  ;;  %v5027_v59 = vadd.f32 %v5026_v23, %v23605_v12  ;;  %v5143_v17 = vpop.f32.mrf.mxu1  ;;  %v23609_v19 = vld [vmem:[#allocation64_spill] sm:$0xff] }
 0x280   : > { %9019 = vmatpush1.bf16.msra.mxu1 %v15460_v29  ;;  %v13641_v29 = vcombine.high %v20326_v20, %v20330_v57  ;;  %v5030_v56 = vpop.f32.mrf.mxu0  ;;  %v23610_v37 = vcombine.low %v23608_v7, %v23609_v19  ;;  %v20389_v12 = vsel %vm17271_vm5, %v7111_v31, %v7112_v26 }
 0x281   : > { %23604 = vst [vmem:[#allocation57_spill] sm:$0xff] %v20339_v14  ;;  %9020 = vmatprep.subr.bf16.mxu1 %v15468_v36  ;;  %v20358_v36 = vadd.f32 %v5138_v42, %v23606_v8  ;;  %v5140_v4 = vadd.f32 %v5139_v41, %v5027_v59  ;;  %v5031_v38 = vadd.f32 %v5030_v56, %v19909_v27  ;;  %v5145_v48 = vpop.f32.mrf.mxu1  ;;  %v15475_v27 = vld [vmem:[%s23311_s1 + $0xfd0] ss:$8 sps:$4 sm:$0xff]   ;;  %v13507_v59 = vld [vmem:[%s16290_s29 + $0x1e8] sm:$0xee] }
 0x282   : > { %8908 = vmatpush2.bf16.msra.mxu0 %v15463_v49  ;;  %v5032_v28 = vpop.f32.mrf.mxu0  ;;  %7974 = vmatprep.mubr.bf16.mxu0 %v13641_v29  ;;  %v15480_v49 = vld [vmem:[%s23311_s1 + $0x10d4] ss:$8 sps:$4 sm:$0xff]   ;;  %v20385_v42 = vsel %vm17271_vm5, %v13528_v32, %v7102_v47 }
 0x283   : > { %23607 = vst [vmem:[#allocation41_spill] sm:$0xff] %v20358_v36  ;;  %8078 = vmatmul.mubr.bf16.gmra.mxu1 %v23610_v37  ;;  %8909 = vmatprep.subr.bf16.mxu0 %v15471_v60  ;;  %v20365_v55 = vadd.f32 %v5140_v4, %v19906_v15  ;;  %v5144_v21 = vadd.f32 %v5143_v17, %v5031_v38  ;;  %v15483_v60 = vld [vmem:[%s23311_s1 + $0xfc4] ss:$8 sps:$4 sm:$0xff]   ;;  %v5147_v56 = vpop.f32.mrf.mxu1  ;;  %v15922_v4 = vld [vmem:[%s16290_s29 + $0x210] sm:$0x11] }
 0x284   : > { %9021 = vmatpush2.bf16.msra.mxu1 %v15466_v30  ;;  %v5033_v23 = vadd.f32 %v5032_v28, %v19931_v25  ;;  %v5034_v30 = vpop.f32.mrf.mxu0  ;;  %v13640_v15 = vcombine.low %v20326_v20, %v20330_v57  ;;  %8087 = vmatprep.mubr.bf16.mxu1 %v23371_v0  ;;  %v15478_v25 = vld [vmem:[%s23311_s1 + $0x10d0] ss:$8 sps:$4 sm:$0xff]   ;;  %v15921_v20 = vld [vmem:[%s16290_s29 + $0x1fc] sm:$0xff]  ;;  %v7133_v38 = vrot.slane %v15922_v4, 5  ;;  %v23615_v28 = vld [vmem:[#allocation66_spill] sm:$0xff] }
 0x285   : > { %23611 = vst [vmem:[#allocation43_spill] sm:$0xff] %v20365_v55  ;;  %9022 = vmatprep.subr.bf16.mxu1 %v15474_v61  ;;  %v7123_v57 = vrot.slane %v15921_v20, 5  ;;  %v20394_v41 = vadd.f32 %v5144_v21, %v19928_v24  ;;  %v5035_v29 = vadd.f32 %v5034_v30, %v19937_v11  ;;  %v5149_v26 = vpop.f32.mrf.mxu1  ;;  %v15481_v24 = vld [vmem:[%s23311_s1 + $0xfc0] ss:$8 sps:$4 sm:$0xff]   ;;  %v15486_v11 = vld [vmem:[%s23311_s1 + $0x10c4] ss:$8 sps:$4 sm:$0xff]  }
 0x286   : > { %v5146_v61 = vadd.f32 %v5145_v48, %v5033_v23  ;;  %8910 = vmatpush2.bf16.msra.mxu0 %v15469_v2  ;;  %v5036_v43 = vpop.f32.mrf.mxu0  ;;  %v13646_v2 = vcombine.high %v20385_v42, %v20389_v12  ;;  %v23616_v21 = vld [vmem:[#allocation68_spill] sm:$0xff] }
 0x287   : > { %23612 = vst [vmem:[#allocation36_spill] sm:$0xff] %v20394_v41  ;;  %8911 = vmatprep.subr.bf16.mxu0 %v15477_v52  ;;  %v5148_v32 = vadd.f32 %v5147_v56, %v5035_v29  ;;  %v5037_v31 = vadd.f32 %v5036_v43, %v19951_v51  ;;  %7975 = vmatmul.mubr.bf16.gmra.mxu0 %v13640_v15  ;;  %v15489_v51 = vld [vmem:[%s23311_s1 + $0xfb4] ss:$8 sps:$4 sm:$0xff]   ;;  %v13531_v52 = vrot.slane %v13507_v59, 9  ;;  %v7132_v8 = vrot.slane %v7123_v57, 4  ;;  %v5153_v37 = vpop.f32.mrf.mxu1 }
 0x288   : > { %9023 = vmatpush2.bf16.msra.mxu1 %v15472_v13  ;;  %v20398_v47 = vadd.f32 %v5146_v61, %v19934_v33  ;;  %v5040_v13 = vpop.f32.mrf.mxu0  ;;  %v15484_v33 = vld [vmem:[%s23311_s1 + $0x10c0] ss:$8 sps:$4 sm:$0xff]   ;;  %v23617_v23 = vcombine.low %v23615_v28, %v23616_v21  ;;  %7984 = vmatprep.mubr.bf16.mxu0 %v13646_v2  ;;  %v23621_v56 = vld [vmem:[#allocation39_spill] sm:$0xff] }
 0x289   : > { %9024 = vmatprep.subr.bf16.mxu1 %v15480_v49  ;;  %v20417_v17 = vadd.f32 %v5148_v32, %v19948_v39  ;;  %v5150_v7 = vadd.f32 %v5149_v26, %v5037_v31  ;;  %v5041_v19 = vadd.f32 %v5040_v13, %v19967_v35  ;;  %v5155_v39 = vpop.f32.mrf.mxu1  ;;  %v15492_v35 = vld [vmem:[%s23311_s1 + $0x10b4] ss:$8 sps:$4 sm:$0xff]   ;;  %v15498_v31 = vld [vmem:[%s23311_s1 + $0x10a4] ss:$8 sps:$4 sm:$0xff]  }
 0x28a   : > { %23613 = vst [vmem:[#allocation59_spill] sm:$0xff] %v20398_v47  ;;  %8912 = vmatpush2.bf16.msra.mxu0 %v15475_v27  ;;  %v5042_v48 = vpop.f32.mrf.mxu0  ;;  %v13645_v27 = vcombine.low %v20385_v42, %v20389_v12  ;;  %v15487_v42 = vld [vmem:[%s23311_s1 + $0xfb0] ss:$8 sps:$4 sm:$0xff]  }
 0x28b   : > { %23614 = vst [vmem:[#allocation7_spill] sm:$0xff] %v20417_v17  ;;  %8088 = vmatmul.mubr.bf16.gmra.mxu1 %v23617_v23  ;;  %8913 = vmatprep.subr.bf16.mxu0 %v15483_v60  ;;  %v20424_v49 = vadd.f32 %v5150_v7, %v19964_v6  ;;  %v5154_v30 = vadd.f32 %v5153_v37, %v5041_v19  ;;  %v5157_v61 = vpop.f32.mrf.mxu1  ;;  %v15496_v19 = vld [vmem:[%s23311_s1 + $0x10a0] ss:$8 sps:$4 sm:$0xff]   ;;  %v15501_v37 = vld [vmem:[%s23311_s1 + $0xf94] ss:$8 sps:$4 sm:$0xff]  }
 0x28c   : > { %9025 = vmatpush2.bf16.msra.mxu1 %v15478_v25  ;;  %v5043_v15 = vadd.f32 %v5042_v48, %v19980_v16  ;;  %v5044_v59 = vpop.f32.mrf.mxu0  ;;  %8097 = vmatprep.mubr.bf16.mxu1 %v23371_v0  ;;  %v20435_v6 = vsel %vm17271_vm5, %v13531_v52, %v7123_v57  ;;  %v20439_v16 = vsel %vm17271_vm5, %v7132_v8, %v7133_v38  ;;  %v15490_v57 = vld [vmem:[%s23311_s1 + $0x10b0] ss:$8 sps:$4 sm:$0xff]   ;;  %v23625_v52 = vld [vmem:[#allocation70_spill] sm:$0xff]  ;;  %v23626_v8 = vld [vmem:[#allocation13_spill] sm:$0xff] }
 0x28d   : > { %23618 = vst [vmem:[#allocation61_spill] sm:$0xff] %v20424_v49  ;;  %9026 = vmatprep.subr.bf16.mxu1 %v15486_v11  ;;  %v20442_v25 = vadd.f32 %v5154_v30, %v19977_v44  ;;  %v5045_v20 = vadd.f32 %v5044_v59, %v19989_v53  ;;  %v15495_v44 = vld [vmem:[%s23311_s1 + $0xfa4] ss:$8 sps:$4 sm:$0xff]   ;;  %v5159_v32 = vpop.f32.mrf.mxu1  ;;  %v13651_v26 = vcombine.high %v20435_v6, %v20439_v16  ;;  %v15493_v38 = vld [vmem:[%s23311_s1 + $0xfa0] ss:$8 sps:$4 sm:$0xff]   ;;  %v23628_v28 = vld [vmem:[#allocation23_spill] sm:$0xff] }
 0x28e   : > { %v5156_v60 = vadd.f32 %v5155_v39, %v5043_v15  ;;  %8914 = vmatpush2.bf16.msra.mxu0 %v15481_v24  ;;  %v5046_v12 = vpop.f32.mrf.mxu0  ;;  %v23622_v11 = vld [vmem:[#allocation22_spill] sm:$0xff]  ;;  %v23627_v4 = vcombine.low %v23625_v52, %v23626_v8  ;;  %v15504_v39 = vld [vmem:[%s23311_s1 + $0x1094] ss:$8 sps:$4 sm:$0xff]   ;;  %v13650_v59 = vcombine.low %v20435_v6, %v20439_v16  ;;  %v15502_v16 = vld [vmem:[%s23311_s1 + $0x1090] ss:$8 sps:$4 sm:$0xff]  }
 0x28f   : > { %23619 = vst [vmem:[#allocation8_spill] sm:$0xff] %v20442_v25  ;;  %8915 = vmatprep.subr.bf16.mxu0 %v15489_v51  ;;  %v5158_v53 = vadd.f32 %v5157_v61, %v5045_v20  ;;  %v5047_v43 = vadd.f32 %v5046_v12, %v23621_v56  ;;  %7985 = vmatmul.mubr.bf16.gmra.mxu0 %v13645_v27  ;;  %v5163_v51 = vpop.f32.mrf.mxu1  ;;  %v23630_v48 = vld [vmem:[#allocation42_spill] sm:$0xff]  ;;  %v20490_v27 = vld [vmem:[%s16290_s29 + $0x78] sm:$0xff] }
 0x290   : > { %9027 = vmatpush2.bf16.msra.mxu1 %v15484_v33  ;;  %v20455_v29 = vadd.f32 %v5156_v60, %v19986_v50  ;;  %v5050_v24 = vpop.f32.mrf.mxu0  ;;  %v23624_v50 = vld [vmem:[#allocation40_spill] sm:$0xff]  ;;  %7994 = vmatprep.mubr.bf16.mxu0 %v13651_v26  ;;  %v20493_v60 = vld [vmem:[%s16290_s29 + $0x8c] sm:$0xff] }
 0x291   : > { %9028 = vmatprep.subr.bf16.mxu1 %v15492_v35  ;;  %v20464_v2 = vadd.f32 %v5158_v53, %v23622_v11  ;;  %v5160_v13 = vadd.f32 %v5159_v32, %v5047_v43  ;;  %v5051_v33 = vadd.f32 %v5050_v24, %v23624_v50  ;;  %v5165_v15 = vpop.f32.mrf.mxu1  ;;  %v23631_v20 = vld [vmem:[#allocation24_spill] sm:$0xff]  ;;  %v15507_v56 = vld [vmem:[%s23311_s1 + $0xf84] ss:$8 sps:$4 sm:$0xff]   ;;  %v23636_v26 = vld [vmem:[#allocation27_spill] sm:$0xff]  ;;  %v13864_v50 = vcombine.high %v20490_v27, %v20493_v60 }
 0x292   : > { %23620 = vst [vmem:[#allocation63_spill] sm:$0xff] %v20455_v29  ;;  %8916 = vmatpush2.bf16.msra.mxu0 %v15487_v42  ;;  %v5052_v7 = vpop.f32.mrf.mxu0  ;;  %v23633_v12 = vld [vmem:[#allocation44_spill] sm:$0xff]  ;;  %v23634_v43 = vld [vmem:[#allocation25_spill] sm:$0xff]  ;;  %v23637_v52 = vld [vmem:[#allocation26_spill] sm:$0xff] }
 0x293   : > { %23623 = vst [vmem:[#allocation9_spill] sm:$0xff] %v20464_v2  ;;  %8098 = vmatmul.mubr.bf16.gmra.mxu1 %v23627_v4  ;;  %8917 = vmatprep.subr.bf16.mxu0 %v15495_v44  ;;  %v20480_v21 = vadd.f32 %v5160_v13, %v23628_v28  ;;  %v5164_v23 = vadd.f32 %v5163_v51, %v5051_v33  ;;  %v5167_v44 = vpop.f32.mrf.mxu1  ;;  %v15499_v53 = vld [vmem:[%s23311_s1 + $0xf90] ss:$8 sps:$4 sm:$0xff]   ;;  %v15510_v13 = vld [vmem:[%s23311_s1 + $0x1084] ss:$8 sps:$4 sm:$0xff]  }
 0x294   : > { %9029 = vmatpush2.bf16.msra.mxu1 %v15490_v57  ;;  %v5053_v30 = vadd.f32 %v5052_v7, %v23630_v48  ;;  %v5054_v35 = vpop.f32.mrf.mxu0  ;;  %8107 = vmatprep.mubr.bf16.mxu1 %v23371_v0  ;;  %v15515_v51 = vld [vmem:[%s16290_s29 + $0x84] ss:$20 sps:$4 sm:$0xff]   ;;  %v15505_v48 = vld [vmem:[%s23311_s1 + $0xf80] ss:$8 sps:$4 sm:$0xff]  }
 0x295   : > { %23629 = vst [vmem:[#allocation65_spill] sm:$0xff] %v20480_v21  ;;  %9030 = vmatprep.subr.bf16.mxu1 %v15498_v31  ;;  %v20496_v61 = vadd.f32 %v5164_v23, %v23631_v20  ;;  %v5055_v57 = vadd.f32 %v5054_v35, %v23633_v12  ;;  %v5169_v11 = vpop.f32.mrf.mxu1  ;;  %v23641_v28 = vld [vmem:[#allocation72_spill] sm:$0xff]  ;;  %v15566_v29 = vld [vmem:[%s23311_s1 + $0x1184] ss:$8 sps:$4 sm:$0xff]  }
 0x296   : > { %v5166_v42 = vadd.f32 %v5165_v15, %v5053_v30  ;;  %8918 = vmatpush2.bf16.msra.mxu0 %v15493_v38  ;;  %v5056_v6 = vpop.f32.mrf.mxu0  ;;  %v23639_v38 = vld [vmem:[#allocation29_spill] sm:$0xff]  ;;  %v23643_v35 = vld [vmem:[#allocation28_spill] sm:$0xff] }
 0x297   : > { %23632 = vst [vmem:[#allocation10_spill] sm:$0xff] %v20496_v61  ;;  %8919 = vmatprep.subr.bf16.mxu0 %v15501_v37  ;;  %v5168_v31 = vadd.f32 %v5167_v44, %v5055_v57  ;;  %v5057_v24 = vadd.f32 %v5056_v6, %v23636_v26  ;;  %7995 = vmatmul.mubr.bf16.gmra.mxu0 %v13650_v59  ;;  %v23640_v37 = vld [vmem:[#allocation71_spill] sm:$0xff]  ;;  %v15508_v15 = vld [vmem:[%s23311_s1 + $0x1080] ss:$8 sps:$4 sm:$0xff]  }
 0x298   : > { %9031 = vmatpush2.bf16.msra.mxu1 %v15496_v19  ;;  %v20509_v32 = vadd.f32 %v5166_v42, %v23634_v43  ;;  %v5060_v33 = vpop.f32.mrf.mxu0  ;;  %v5173_v19 = vpop.f32.mrf.mxu1  ;;  %v23642_v23 = vcombine.low %v23640_v37, %v23641_v28  ;;  %v23645_v42 = vld [vmem:[#allocation30_spill] sm:$0xff]  ;;  %8923 = vmatprep.mubr.bf16.mxu0 %v13864_v50  ;;  %v15521_v44 = vld [vmem:[%s23311_s1 + $0x11f4] ss:$8 sps:$4 sm:$0xff]  }
 0x299   : > { %9032 = vmatprep.subr.bf16.mxu1 %v15504_v39  ;;  %v20519_v8 = vadd.f32 %v5168_v31, %v23637_v52  ;;  %v5170_v4 = vadd.f32 %v5169_v11, %v5057_v24  ;;  %v5061_v7 = vadd.f32 %v5060_v33, %v23639_v38  ;;  %v15518_v39 = vld [vmem:[%s23311_s1 + $0x1174] ss:$8 sps:$4 sm:$0xff]   ;;  %v20545_v6 = vld [vmem:[%s16290_s29 + $0xc8] sm:$0xff]  ;;  %v15516_v33 = vld [vmem:[%s23311_s1 + $0x1170] ss:$8 sps:$4 sm:$0xff]  }
 0x29a   : > { %23635 = vst [vmem:[#allocation67_spill] sm:$0xff] %v20509_v32  ;;  %8920 = vmatpush2.bf16.msra.mxu0 %v15499_v53  ;;  %v5062_v30 = vpop.f32.mrf.mxu0  ;;  %v5175_v57 = vpop.f32.mrf.mxu1  ;;  %v20542_v53 = vld [vmem:[%s16290_s29 + $0xb4] sm:$0xff]  ;;  %v23646_v43 = vld [vmem:[#allocation46_spill] sm:$0xff]  ;;  %v13989_v32 = vld [vmem:[%s16290_s29 + $0xa0] sm:$0x11] }
 0x29b   : > { %23638 = vst [vmem:[#allocation11_spill] sm:$0xff] %v20519_v8  ;;  %8108 = vmatmul.mubr.bf16.gmra.mxu1 %v23642_v23  ;;  %8921 = vmatprep.subr.bf16.mxu0 %v15507_v56  ;;  %v20535_v59 = vadd.f32 %v5170_v4, %v23643_v35  ;;  %v5174_v20 = vadd.f32 %v5173_v19, %v5061_v7  ;;  %v23648_v24 = vld [vmem:[#allocation31_spill] sm:$0xff]  ;;  %v23649_v38 = vld [vmem:[#allocation48_spill] sm:$0xff]  ;;  %v23652_v35 = vld [vmem:[#allocation49_spill] sm:$0xff]  ;;  %v9407_v61 = vshrl.u32 %v20542_v53, 16 }
 0x29c   : > { %9033 = vmatpush2.bf16.msra.mxu1 %v15502_v16  ;;  %v5063_v12 = vadd.f32 %v5062_v30, %v23645_v42  ;;  %v5064_v16 = vpop.f32.mrf.mxu0  ;;  %v13863_v56 = vcombine.low %v20490_v27, %v20493_v60  ;;  %9036 = vmatprep.mubr.bf16.mxu1 %v15515_v51  ;;  %v15513_v50 = vld [vmem:[%s16290_s29 + $0x80] ss:$20 sps:$4 sm:$0xff]   ;;  %v15519_v51 = vld [vmem:[%s23311_s1 + $0x11f0] ss:$8 sps:$4 sm:$0xff]   ;;  %v13869_v4 = vcombine.high %v20542_v53, %v20545_v6 }
 0x29d   : > { %23644 = vst [vmem:[#allocation69_spill] sm:$0xff] %v20535_v59  ;;  %9034 = vmatprep.subr.bf16.mxu1 %v15510_v13  ;;  %v20550_v31 = vadd.f32 %v5174_v20, %v23646_v43  ;;  %v5065_v11 = vadd.f32 %v5064_v16, %v23648_v24  ;;  %v5177_v13 = vpop.f32.mrf.mxu1  ;;  %v23651_v37 = vld [vmem:[#allocation32_spill] sm:$0xff]  ;;  %v15529_v30 = vld [vmem:[%s16290_s29 + $0xc0] ss:$20 sps:$4 sm:$0xff]  }
 0x29e   : > { %v5176_v26 = vadd.f32 %v5175_v57, %v5063_v12  ;;  %8922 = vmatpush2.bf16.msra.mxu0 %v15505_v48  ;;  %v5066_v52 = vpop.f32.mrf.mxu0  ;;  %v15524_v48 = vld [vmem:[%s23311_s1 + $0x11e4] ss:$8 sps:$4 sm:$0xff]   ;;  %v15522_v57 = vld [vmem:[%s23311_s1 + $0x11e0] ss:$8 sps:$4 sm:$0xff]   ;;  %v20585_v43 = vld [vmem:[%s16290_s29 + $0xf0] sm:$0xff] }
 0x29f   : > { %23647 = vst [vmem:[#allocation12_spill] sm:$0xff] %v20550_v31  ;;  %9117 = vmatprep.subr.bf16.mxu0 %v15518_v39  ;;  %v5178_v19 = vadd.f32 %v5177_v13, %v5065_v11  ;;  %v5067_v28 = vadd.f32 %v5066_v52, %v23651_v37  ;;  %v5179_v23 = vpop.f32.mrf.mxu1  ;;  %v15532_v39 = vld [vmem:[%s23311_s1 + $0x1164] ss:$8 sps:$4 sm:$0xff]   ;;  %v15546_v24 = vld [vmem:[%s23311_s1 + $0x1154] ss:$8 sps:$4 sm:$0xff]  }
 0x2a0   : > { %9035 = vmatpush2.bf16.msra.mxu1 %v15508_v15  ;;  %v20563_v7 = vadd.f32 %v5176_v26, %v23649_v38  ;;  %v6537_v15 = vpop.f32.mrf.mxu0  ;;  %v20588_v26 = vld [vmem:[%s16290_s29 + $0x104] sm:$0xff]  ;;  %v15527_v38 = vld [vmem:[%s16290_s29 + $0xbc] ss:$20 sps:$4 sm:$0xff]  }
 0x2a1   : > { %10551 = vmatprep.subr.bf16.mxu1 %v15521_v44  ;;  %8924 = vmatmul.mubr.bf16.vlgmr.msra.gmra.mxu0 %v13863_v56  ;;  %v20574_v20 = vadd.f32 %v5178_v19, %v23652_v35  ;;  %v5180_v42 = vadd.f32 %v5179_v23, %v5067_v28  ;;  %v6650_v12 = vpop.f32.mrf.mxu1  ;;  %v15530_v44 = vld [vmem:[%s23311_s1 + $0x1160] ss:$8 sps:$4 sm:$0xff]   ;;  %v15533_v28 = vld [vmem:[%s23311_s1 + $0x11d0] ss:$8 sps:$4 sm:$0xff]   ;;  %v9488_v9 = vshll.u32 %v20588_v26, 16 }
 0x2a2   : > { %23650 = vst [vmem:[#allocation45_spill] sm:$0xff] %v20563_v7  ;;  %9118 = vmatpush1.bf16.msra.mxu0 %v15516_v33  ;;  %v20582_v16 = vadd.f32 %v6650_v12, %v6537_v15  ;;  %v6539_v56 = vpop.f32.mrf.mxu0  ;;  %8933 = vmatprep.mubr.bf16.mxu0 %v13869_v4  ;;  %v15543_v23 = vld [vmem:[%s16290_s29 + $0xfc] ss:$20 sps:$4 sm:$0xff]  }
 0x2a3   : > { %23653 = vst [vmem:[#allocation47_spill] sm:$0xff] %v20574_v20  ;;  %9037 = vmatmul.mubr.bf16.vlgmr.msra.gmra.mxu1 %v15513_v50  ;;  %v20594_v11 = vadd.f32 %v5180_v42, %v20125_v45  ;;  %v6652_v13 = vpop.f32.mrf.mxu1  ;;  %v15535_v50 = vld [vmem:[%s23311_s1 + $0x11d4] ss:$8 sps:$4 sm:$0xff]   ;;  %9119 = vmatprep.subr.bf16.mxu0 %v15532_v39  ;;  %v13874_v45 = vcombine.high %v20585_v43, %v20588_v26  ;;  %v15544_v15 = vld [vmem:[%s23311_s1 + $0x1150] ss:$8 sps:$4 sm:$0xff]  }
 0x2a4   : > { %10552 = vmatpush1.bf16.msra.mxu1 %v15519_v51  ;;  %9046 = vmatprep.mubr.bf16.mxu1 %v15529_v30  ;;  %v20599_v33 = vadd.f32 %v6652_v13, %v6539_v56  ;;  %v6541_v52 = vpop.f32.mrf.mxu0  ;;  %v13868_v51 = vcombine.low %v20542_v53, %v20545_v6  ;;  %v15538_v30 = vld [vmem:[%s23311_s1 + $0x11c4] ss:$8 sps:$4 sm:$0xff]  }
 0x2a5   : > { %23654 = vst [vmem:[#allocation14_spill] sm:$0xff] %v20594_v11  ;;  %10553 = vmatprep.subr.bf16.mxu1 %v15524_v48  ;;  %v6654_v4 = vpop.f32.mrf.mxu1  ;;  %v15560_v42 = vld [vmem:[%s23311_s1 + $0x1144] ss:$8 sps:$4 sm:$0xff]  }
 0x2a6   : > { %9120 = vmatpush1.bf16.msra.mxu0 %v15530_v44  ;;  %v20606_v19 = vadd.f32 %v6654_v4, %v6541_v52  ;;  %v6543_v37 = vpop.f32.mrf.mxu0  ;;  %v9335_v44 = vshrl.u32 %v20490_v27, 16  ;;  %v20630_v13 = vld [vmem:[%s16290_s29 + $0x12c] sm:$0xff]  ;;  %v9338_v52 = vshll.u32 %v20490_v27, 16  ;;  %v9376_v4 = vshrl.u32 %v20493_v60, 16 }
 0x2a7   : > { %9121 = vmatprep.subr.bf16.mxu0 %v15546_v24  ;;  %v6656_v48 = vpop.f32.mrf.mxu1  ;;  %v13873_v27 = vcombine.low %v20585_v43, %v20588_v26 }
 0x2a8   : > { %10554 = vmatpush1.bf16.msra.mxu1 %v15522_v57  ;;  %v20618_v39 = vadd.f32 %v6656_v48, %v6543_v37  ;;  %v6547_v35 = vpop.f32.mrf.mxu0  ;;  %v15536_v57 = vld [vmem:[%s23311_s1 + $0x11c0] ss:$8 sps:$4 sm:$0xff]   ;;  %v15541_v48 = vld [vmem:[%s16290_s29 + $0xf8] ss:$20 sps:$4 sm:$0xff]   ;;  %v9340_v7 = vrot.slane %v9338_v52, 5  ;;  %v9378_v59 = vrot.slane %v9376_v4, 4 }
 0x2a9   : > { %10555 = vmatprep.subr.bf16.mxu1 %v15535_v50  ;;  %8934 = vmatmul.mubr.bf16.gmra.mxu0 %v13868_v51  ;;  %v6660_v12 = vpop.f32.mrf.mxu1  ;;  %v20633_v50 = vld [vmem:[%s16290_s29 + $0x140] sm:$0xff]  ;;  %v9344_v51 = vshll.u32 %v20493_v60, 16  ;;  %v15547_v60 = vld [vmem:[%s23311_s1 + $0x11b0] ss:$8 sps:$4 sm:$0xff]  }
 0x2aa   : > { %8943 = vmatprep.mubr.bf16.mxu0 %v13874_v45  ;;  %v20627_v56 = vadd.f32 %v6660_v12, %v6547_v35  ;;  %v6549_v24 = vpop.f32.mrf.mxu0  ;;  %v15549_v45 = vld [vmem:[%s23311_s1 + $0x11b4] ss:$8 sps:$4 sm:$0xff]   ;;  %9122 = vmatpush1.bf16.msra.mxu0 %v15544_v15  ;;  %v15558_v37 = vld [vmem:[%s23311_s1 + $0x1140] ss:$8 sps:$4 sm:$0xff]   ;;  %v15552_v35 = vld [vmem:[%s23311_s1 + $0x11a4] ss:$8 sps:$4 sm:$0xff]   ;;  %v13879_v12 = vcombine.high %v20630_v13, %v20633_v50 }
 0x2ab   : > { %9047 = vmatmul.mubr.bf16.gmra.mxu1 %v15527_v38  ;;  %v6662_v38 = vpop.f32.mrf.mxu1  ;;  %9123 = vmatprep.subr.bf16.mxu0 %v15560_v42  ;;  %v15572_v42 = vld [vmem:[%s23311_s1 + $0x1130] ss:$8 sps:$4 sm:$0xff]   ;;  %v20666_v31 = vrot.slane %v9344_v51, 5  ;;  %v15588_v51 = vld [vmem:[%s23311_s1 + $0x1124] ss:$8 sps:$4 sm:$0xff]  }
 0x2ac   : > { %10556 = vmatpush1.bf16.msra.mxu1 %v15533_v28  ;;  %9056 = vmatprep.mubr.bf16.mxu1 %v15543_v23  ;;  %v20644_v28 = vadd.f32 %v6662_v38, %v6549_v24  ;;  %v6551_v23 = vpop.f32.mrf.mxu0  ;;  %v15557_v24 = vld [vmem:[%s16290_s29 + $0x138] ss:$20 sps:$4 sm:$0xff]   ;;  %v9337_v38 = vrot.slane %v9335_v44, 4  ;;  %v9410_v44 = vshll.u32 %v20542_v53, 16  ;;  %v15550_v53 = vld [vmem:[%s23311_s1 + $0x11a0] ss:$8 sps:$4 sm:$0xff]  }
 0x2ad   : > { %10557 = vmatprep.subr.bf16.mxu1 %v15538_v30  ;;  %v15574_v30 = vld [vmem:[%s23311_s1 + $0x1134] ss:$8 sps:$4 sm:$0xff]   ;;  %v6664_v15 = vpop.f32.mrf.mxu1 }
 0x2ae   : > { %v20661_v11 = vadd.f32 %v6664_v15, %v6551_v23  ;;  %v6553_v20 = vpop.f32.mrf.mxu0  ;;  %9124 = vmatpush1.bf16.msra.mxu0 %v15558_v37  ;;  %v9416_v23 = vshll.u32 %v20545_v6, 16  ;;  %v20690_v37 = vld [vmem:[%s16290_s29 + $0x17c] sm:$0xff] }
 0x2af   : > { %v6666_v8 = vpop.f32.mrf.mxu1  ;;  %9125 = vmatprep.subr.bf16.mxu0 %v15574_v30  ;;  %v9382_v30 = vshll.u32 %v13989_v32, 16  ;;  %v13878_v32 = vcombine.low %v20630_v13, %v20633_v50 }
 0x2b0   : > { %10558 = vmatpush1.bf16.msra.mxu1 %v15536_v57  ;;  %v9448_v57 = vshrl.u32 %v20545_v6, 16  ;;  %v20673_v15 = vadd.f32 %v6666_v8, %v6553_v20  ;;  %v6557_v52 = vpop.f32.mrf.mxu0  ;;  %v15563_v8 = vld [vmem:[%s23311_s1 + $0x1194] ss:$8 sps:$4 sm:$0xff]   ;;  %v20687_v20 = vld [vmem:[%s16290_s29 + $0x168] sm:$0xff] }
 0x2b1   : > { %10559 = vmatprep.subr.bf16.mxu1 %v15549_v45  ;;  %8944 = vmatmul.mubr.bf16.gmra.mxu0 %v13873_v27  ;;  %v6670_v4 = vpop.f32.mrf.mxu1  ;;  %v9341_v27 = vor.u32 %v9340_v7, %v9337_v38 }
 0x2b2   : > { %8953 = vmatprep.mubr.bf16.mxu0 %v13879_v12  ;;  %v20681_v45 = vadd.f32 %v6670_v4, %v6557_v52  ;;  %v6559_v6 = vpop.f32.mrf.mxu0  ;;  %9126 = vmatpush1.bf16.msra.mxu0 %v15572_v42  ;;  %v9412_v52 = vrot.slane %v9410_v44, 5  ;;  %v20696_v4 = vrot.slane %v9416_v23, 5  ;;  %v9450_v21 = vrot.slane %v9448_v57, 4  ;;  %v15555_v42 = vld [vmem:[%s16290_s29 + $0x134] ss:$20 sps:$4 sm:$0xff]  }
 0x2b3   : > { %9057 = vmatmul.mubr.bf16.gmra.mxu1 %v15541_v48  ;;  %v9379_v48 = vor.u32 %v9378_v59, %v20666_v31  ;;  %v6672_v12 = vpop.f32.mrf.mxu1  ;;  %9127 = vmatprep.subr.bf16.mxu0 %v15588_v51  ;;  %v15602_v59 = vld [vmem:[%s23311_s1 + $0x1114] ss:$8 sps:$4 sm:$0xff]   ;;  %v15561_v57 = vld [vmem:[%s23311_s1 + $0x1190] ss:$8 sps:$4 sm:$0xff]   ;;  %v9342_v51 = vrot.slane %v9341_v27, 4 }
 0x2b4   : > { %23655 = vst [vmem:[#allocation50_spill] sm:$0xff] %v20681_v45  ;;  %10560 = vmatpush1.bf16.msra.mxu1 %v15547_v60  ;;  %9066 = vmatprep.mubr.bf16.mxu1 %v15557_v24  ;;  %v15586_v60 = vld [vmem:[%s23311_s1 + $0x1120] ss:$8 sps:$4 sm:$0xff]   ;;  %v9409_v24 = vrot.slane %v9407_v61, 4  ;;  %v20698_v2 = vadd.f32 %v6672_v12, %v6559_v6  ;;  %v6561_v7 = vpop.f32.mrf.mxu0  ;;  %v13884_v61 = vcombine.high %v20687_v20, %v20690_v37  ;;  %v9384_v12 = vrot.slane %v9382_v30, 5 }
 0x2b5   : > { %10561 = vmatprep.subr.bf16.mxu1 %v15552_v35  ;;  %v13998_v35 = vld [vmem:[%s16290_s29 + $0xdc] sm:$0x11]  ;;  %v6674_v38 = vpop.f32.mrf.mxu1  ;;  %v15571_v6 = vld [vmem:[%s16290_s29 + $0x174] ss:$20 sps:$4 sm:$0xff]   ;;  %v9451_v25 = vor.u32 %v9450_v21, %v20696_v4  ;;  %v9482_v21 = vshll.u32 %v20585_v43, 16  ;;  %v20757_v47 = vsel %vm16324_vm2, %v9342_v51, %v20666_v31 }
 0x2b6   : > { %23656 = vst [vmem:[#allocation52_spill] sm:$0xff] %v20698_v2  ;;  %v20709_v44 = vadd.f32 %v6674_v38, %v6561_v7  ;;  %v6563_v23 = vpop.f32.mrf.mxu0  ;;  %9128 = vmatpush1.bf16.msra.mxu0 %v15586_v60  ;;  %v15600_v7 = vld [vmem:[%s23311_s1 + $0x1110] ss:$8 sps:$4 sm:$0xff]   ;;  %v9413_v38 = vor.u32 %v9412_v52, %v9409_v24  ;;  %v9454_v49 = vshll.u32 %v13998_v35, 16  ;;  %v9479_v60 = vshrl.u32 %v20585_v43, 16  ;;  %v20736_v52 = vld [vmem:[%s16290_s29 + $0x1a4] sm:$0xff] }
 0x2b7   : > { %v6676_v40 = vpop.f32.mrf.mxu1  ;;  %9129 = vmatprep.subr.bf16.mxu0 %v15602_v59  ;;  %v15577_v24 = vld [vmem:[%s23311_s1 + $0x1274] ss:$8 sps:$4 sm:$0xff]   ;;  %v20746_v43 = vld [vmem:[%s16290_s29 + $0x1e0] sm:$0xff]  ;;  %v9452_v55 = vrot.slane %v9451_v25, 4  ;;  %v9520_v25 = vshrl.u32 %v20588_v26, 16  ;;  %v9592_v26 = vshrl.u32 %v20633_v50, 16 }
 0x2b8   : > { %23657 = vst [vmem:[#allocation54_spill] sm:$0xff] %v20709_v44  ;;  %10562 = vmatpush1.bf16.msra.mxu1 %v15550_v53  ;;  %v9380_v53 = vrot.slane %v9379_v48, 4  ;;  %v20722_v27 = vadd.f32 %v6676_v40, %v6563_v23  ;;  %v6567_v30 = vpop.f32.mrf.mxu0  ;;  %v15616_v48 = vld [vmem:[%s23311_s1 + $0x1104] ss:$8 sps:$4 sm:$0xff]   ;;  %v13883_v23 = vcombine.low %v20687_v20, %v20690_v37  ;;  %v9456_v36 = vrot.slane %v9454_v49, 5 }
 0x2b9   : > { %10563 = vmatprep.subr.bf16.mxu1 %v15563_v8  ;;  %8954 = vmatmul.mubr.bf16.gmra.mxu0 %v13878_v32  ;;  %v15564_v8 = vld [vmem:[%s23311_s1 + $0x1180] ss:$8 sps:$4 sm:$0xff]   ;;  %v6680_v40 = vpop.f32.mrf.mxu1  ;;  %v20739_v32 = vld [vmem:[%s16290_s29 + $0x1b8] sm:$0xff]  ;;  %v20774_v51 = vrot.slane %v9479_v60, 4 }
 0x2ba   : > { %23658 = vst [vmem:[#allocation56_spill] sm:$0xff] %v20722_v27  ;;  %8963 = vmatprep.mubr.bf16.mxu0 %v13884_v61  ;;  %v20741_v59 = vadd.f32 %v6680_v40, %v6567_v30  ;;  %v6569_v35 = vpop.f32.mrf.mxu0  ;;  %v20752_v61 = vld [vmem:[%s16290_s29 + $0x21c] sm:$0xff]  ;;  %9130 = vmatpush1.bf16.msra.mxu0 %v15600_v7  ;;  %v20767_v30 = vsel %vm16324_vm2, %v9380_v53, %v9384_v12  ;;  %v9414_v40 = vrot.slane %v9413_v38, 4  ;;  %v20776_v7 = vrot.slane %v9482_v21, 5  ;;  %v15569_v53 = vld [vmem:[%s16290_s29 + $0x170] ss:$20 sps:$4 sm:$0xff]  }
 0x2bb   : > { %9067 = vmatmul.mubr.bf16.gmra.mxu1 %v15555_v42  ;;  %v20749_v42 = vld [vmem:[%s16290_s29 + $0x1f4] sm:$0xff]  ;;  %v6682_v41 = vpop.f32.mrf.mxu1  ;;  %9131 = vmatprep.subr.bf16.mxu0 %v15616_v48  ;;  %v20812_v49 = vsel %vm16324_vm2, %v9452_v55, %v9456_v36  ;;  %v9554_v36 = vshll.u32 %v20630_v13, 16  ;;  %v9560_v55 = vshll.u32 %v20633_v50, 16  ;;  %v15583_v50 = vld [vmem:[%s16290_s29 + $0x1ac] ss:$20 sps:$4 sm:$0xff]  }
 0x2bc   : > { %23659 = vst [vmem:[#allocation15_spill] sm:$0xff] %v20741_v59  ;;  %10564 = vmatpush1.bf16.msra.mxu1 %v15561_v57  ;;  %9076 = vmatprep.mubr.bf16.mxu1 %v15571_v6  ;;  %v20760_v57 = vld [vmem:[%s16290_s29 + $0x230] sm:$0xff]  ;;  %v15614_v6 = vld [vmem:[%s23311_s1 + $0x1100] ss:$8 sps:$4 sm:$0xff]   ;;  %v20769_v14 = vadd.f32 %v6682_v41, %v6569_v35  ;;  %v6571_v31 = vpop.f32.mrf.mxu0  ;;  %v13889_v41 = vcombine.high %v20736_v52, %v20739_v32 }
 0x2bd   : > { %10565 = vmatprep.subr.bf16.mxu1 %v15566_v29  ;;  %v15626_v29 = vld [vmem:[%s23311_s1 + $0x12f4] ss:$8 sps:$4 sm:$0xff]   ;;  %v6684_v12 = vpop.f32.mrf.mxu1  ;;  %v15575_v21 = vld [vmem:[%s23311_s1 + $0x1270] ss:$8 sps:$4 sm:$0xff]   ;;  %v15599_v59 = vld [vmem:[%s16290_s29 + $0x1ec] ss:$20 sps:$4 sm:$0xff]  }
 0x2be   : > { %23661 = vst [vmem:[#allocation17_spill] sm:$0xff] %v20769_v14  ;;  %v20788_v48 = vadd.f32 %v6684_v12, %v6571_v31  ;;  %v6573_v60 = vpop.f32.mrf.mxu0  ;;  %v15585_v35 = vld [vmem:[%s16290_s29 + $0x1b0] ss:$20 sps:$4 sm:$0xff]   ;;  %9132 = vmatpush1.bf16.msra.mxu0 %v15614_v6  ;;  %v20808_v12 = vsel %vm16324_vm2, %v9414_v40, %v20696_v4  ;;  %v14007_v6 = vld [vmem:[%s16290_s29 + $0x118] sm:$0x11]  ;;  %v9485_v31 = vor.u32 %v20776_v7, %v20774_v51  ;;  %v9551_v4 = vshrl.u32 %v20630_v13, 16 }
 0x2bf   : > { %v6686_v38 = vpop.f32.mrf.mxu1  ;;  %10664 = vmatprep.subr.bf16.mxu0 %v15626_v29  ;;  %v9626_v7 = vshll.u32 %v20687_v20, 16  ;;  %v9664_v13 = vshrl.u32 %v20690_v37, 16 }
 0x2c0   : > { %23662 = vst [vmem:[#allocation16_spill] sm:$0xff] %v20788_v48  ;;  %10566 = vmatpush1.bf16.msra.mxu1 %v15564_v8  ;;  %v15580_v8 = vld [vmem:[%s23311_s1 + $0x1264] ss:$8 sps:$4 sm:$0xff]   ;;  %v6577_v14 = vpop.f32.mrf.mxu0  ;;  %v20820_v48 = vrot.slane %v9488_v9, 5  ;;  %v15578_v9 = vld [vmem:[%s23311_s1 + $0x1260] ss:$8 sps:$4 sm:$0xff]  }
 0x2c1   : > { %10567 = vmatprep.subr.bf16.mxu1 %v15577_v24  ;;  %v20815_v24 = vadd.f32 %v6686_v38, %v6573_v60  ;;  %8964 = vmatmul.mubr.bf16.gmra.mxu0 %v13883_v23  ;;  %v6690_v40 = vpop.f32.mrf.mxu1  ;;  %v9623_v23 = vshrl.u32 %v20687_v20, 16  ;;  %v20839_v38 = vrot.slane %v9520_v25, 4  ;;  %v9526_v60 = vshll.u32 %v14007_v6, 16  ;;  %v15594_v6 = vld [vmem:[%s23311_s1 + $0x1244] ss:$8 sps:$4 sm:$0xff]  }
 0x2c2   : > { %8973 = vmatprep.mubr.bf16.mxu0 %v13889_v41  ;;  %v20827_v29 = vadd.f32 %v6690_v40, %v6577_v14  ;;  %v6579_v51 = vpop.f32.mrf.mxu0  ;;  %v15591_v14 = vld [vmem:[%s23311_s1 + $0x1254] ss:$8 sps:$4 sm:$0xff]   ;;  %v9628_v44 = vrot.slane %v9626_v7, 5  ;;  %v9666_v2 = vrot.slane %v9664_v13, 4 }
 0x2c3   : > { %23663 = vst [vmem:[#allocation58_spill] sm:$0xff] %v20815_v24  ;;  %9077 = vmatmul.mubr.bf16.gmra.mxu1 %v15569_v53  ;;  %v9632_v53 = vshll.u32 %v20690_v37, 16  ;;  %v6692_v41 = vpop.f32.mrf.mxu1  ;;  %v15589_v37 = vld [vmem:[%s23311_s1 + $0x1250] ss:$8 sps:$4 sm:$0xff]   ;;  %v9736_v24 = vshrl.u32 %v20739_v32, 16  ;;  %v9625_v54 = vrot.slane %v9623_v23, 4 }
 0x2c4   : > { %23664 = vst [vmem:[#allocation60_spill] sm:$0xff] %v20827_v29  ;;  %10568 = vmatpush2.bf16.msra.mxu1 %v15575_v21  ;;  %9086 = vmatprep.mubr.bf16.mxu1 %v15585_v35  ;;  %v9695_v21 = vshrl.u32 %v20736_v52, 16  ;;  %v9698_v35 = vshll.u32 %v20736_v52, 16  ;;  %v20843_v20 = vadd.f32 %v6692_v41, %v6579_v51  ;;  %v6581_v40 = vpop.f32.mrf.mxu0  ;;  %v9704_v29 = vshll.u32 %v20739_v32, 16 }
 0x2c5   : > { %10569 = vmatprep.subr.bf16.mxu1 %v15580_v8  ;;  %v9553_v8 = vrot.slane %v9551_v4, 4  ;;  %v6694_v25 = vpop.f32.mrf.mxu1  ;;  %v9556_v51 = vrot.slane %v9554_v36, 5  ;;  %v20854_v41 = vrot.slane %v9560_v55, 5  ;;  %v20859_v58 = vrot.slane %v9632_v53, 5  ;;  %v14025_v55 = vld [vmem:[%s16290_s29 + $0x190] sm:$0x11] }
 0x2c6   : > { %23665 = vst [vmem:[#allocation19_spill] sm:$0xff] %v20843_v20  ;;  %v9594_v20 = vrot.slane %v9592_v26, 4  ;;  %v20856_v27 = vadd.f32 %v6694_v25, %v6581_v40  ;;  %v6583_v4 = vpop.f32.mrf.mxu0  ;;  %v20863_v36 = vrot.slane %v9485_v31, 4  ;;  %v9697_v26 = vrot.slane %v9695_v21, 4  ;;  %v14034_v53 = vld [vmem:[%s16290_s29 + $0x1cc] sm:$0x11] }
 0x2c7   : > { %v6696_v34 = vpop.f32.mrf.mxu1  ;;  %v9700_v23 = vrot.slane %v9698_v35, 5  ;;  %v23668_v25 = vcombine.low %v20736_v52, %v20739_v32  ;;  %v20871_v7 = vrot.slane %v9526_v60, 5  ;;  %v20874_v13 = vrot.slane %v9704_v29, 5 }
 0x2c8   : > { %23666 = vst [vmem:[#allocation18_spill] sm:$0xff] %v20856_v27  ;;  %10570 = vmatpush2.bf16.msra.mxu1 %v15578_v9  ;;  %v20866_v40 = vadd.f32 %v6696_v34, %v6583_v4  ;;  %v6587_v9 = vpop.f32.mrf.mxu0  ;;  %v23669_v31 = vcombine.high %v20746_v43, %v20749_v42  ;;  %v9523_v34 = vor.u32 %v20839_v38, %v20820_v48  ;;  %v9598_v52 = vshll.u32 %v14016_v10, 16  ;;  %v15605_v10 = vld [vmem:[%s23311_s1 + $0x1234] ss:$8 sps:$4 sm:$0xff]  }
 0x2c9   : > { %10571 = vmatprep.subr.bf16.mxu1 %v15591_v14  ;;  %8974 = vmatmul.mubr.bf16.gmra.mxu0 %v23668_v25  ;;  %v9738_v14 = vrot.slane %v9736_v24, 4  ;;  %v6700_v27 = vpop.f32.mrf.mxu1  ;;  %v9557_v21 = vor.u32 %v9556_v51, %v9553_v8  ;;  %v9595_v35 = vor.u32 %v9594_v20, %v20854_v41  ;;  %v15592_v24 = vld [vmem:[%s23311_s1 + $0x1240] ss:$8 sps:$4 sm:$0xff]   ;;  %v9667_v60 = vor.u32 %v9666_v2, %v20859_v58 }
 0x2ca   : > { %23667 = vst [vmem:[#allocation37_spill] sm:$0xff] %v20866_v40  ;;  %8983 = vmatprep.mubr.bf16.mxu0 %v23669_v31  ;;  %v20882_v32 = vadd.f32 %v6700_v27, %v6587_v9  ;;  %v6589_v29 = vpop.f32.mrf.mxu0  ;;  %v9670_v4 = vshll.u32 %v14025_v55, 16  ;;  %v9701_v27 = vor.u32 %v9700_v23, %v9697_v26  ;;  %v9742_v38 = vshll.u32 %v14034_v53, 16  ;;  %v15603_v55 = vld [vmem:[%s23311_s1 + $0x1230] ss:$8 sps:$4 sm:$0xff]  }
 0x2cb   : > { %9087 = vmatmul.mubr.bf16.gmra.mxu1 %v15583_v50  ;;  %v9629_v50 = vor.u32 %v9628_v44, %v9625_v54  ;;  %v6702_v25 = vpop.f32.mrf.mxu1  ;;  %v9767_v20 = vshrl.u32 %v20746_v43, 16  ;;  %v15597_v54 = vld [vmem:[%s16290_s29 + $0x1e8] ss:$20 sps:$4 sm:$0xff]   ;;  %v9739_v2 = vor.u32 %v9738_v14, %v20874_v13  ;;  %v9776_v44 = vshll.u32 %v20749_v42, 16  ;;  %v15608_v40 = vld [vmem:[%s23311_s1 + $0x1224] ss:$8 sps:$4 sm:$0xff]  }
 0x2cc   : > { %23670 = vst [vmem:[#allocation20_spill] sm:$0xff] %v20882_v32  ;;  %10572 = vmatpush2.bf16.msra.mxu1 %v15589_v37  ;;  %9096 = vmatprep.mubr.bf16.mxu1 %v15599_v59  ;;  %v9770_v37 = vshll.u32 %v20746_v43, 16  ;;  %v20893_v8 = vadd.f32 %v6702_v25, %v6589_v29  ;;  %v6591_v59 = vpop.f32.mrf.mxu0  ;;  %v9524_v26 = vrot.slane %v9523_v34, 4  ;;  %v9558_v23 = vrot.slane %v9557_v21, 4  ;;  %v15613_v25 = vld [vmem:[%s16290_s29 + $0x228] ss:$20 sps:$4 sm:$0xff]  }
 0x2cd   : > { %10573 = vmatprep.subr.bf16.mxu1 %v15594_v6  ;;  %v9808_v6 = vshrl.u32 %v20749_v42, 16  ;;  %v6704_v51 = vpop.f32.mrf.mxu1  ;;  %v9596_v9 = vrot.slane %v9595_v35, 4  ;;  %v9600_v53 = vrot.slane %v9598_v52, 5  ;;  %v9630_v14 = vrot.slane %v9629_v50, 4 }
 0x2ce   : > { %23671 = vst [vmem:[#allocation38_spill] sm:$0xff] %v20893_v8  ;;  %v20902_v31 = vadd.f32 %v6704_v51, %v6591_v59  ;;  %v6593_v29 = vpop.f32.mrf.mxu0  ;;  %v9668_v45 = vrot.slane %v9667_v60, 4  ;;  %v9672_v8 = vrot.slane %v9670_v4, 5  ;;  %v9702_v18 = vrot.slane %v9701_v27, 4  ;;  %v14043_v60 = vld [vmem:[%s16290_s29 + $0x208] sm:$0x11] }
 0x2cf   : > { %v6706_v32 = vpop.f32.mrf.mxu1  ;;  %v9744_v34 = vrot.slane %v9742_v38, 5  ;;  %v9769_v21 = vrot.slane %v9767_v20, 4  ;;  %v9772_v35 = vrot.slane %v9770_v37, 5  ;;  %v9740_v50 = vrot.slane %v9739_v2, 4  ;;  %v15606_v37 = vld [vmem:[%s23311_s1 + $0x1220] ss:$8 sps:$4 sm:$0xff]  }
 0x2d0   : > { %10574 = vmatpush2.bf16.msra.mxu1 %v15592_v24  ;;  %v20908_v52 = vadd.f32 %v6706_v32, %v6593_v29  ;;  %v6597_v59 = vpop.f32.mrf.mxu0  ;;  %v23673_v24 = vcombine.low %v20746_v43, %v20749_v42  ;;  %v20914_v4 = vrot.slane %v9776_v44, 5  ;;  %v23674_v27 = vcombine.high %v20752_v61, %v20760_v57 }
 0x2d1   : > { %10575 = vmatprep.subr.bf16.mxu1 %v15605_v10  ;;  %v9810_v10 = vrot.slane %v9808_v6, 4  ;;  %v6710_v51 = vpop.f32.mrf.mxu1  ;;  %v20925_v43 = vsel %vm16324_vm2, %v20863_v36, %v20820_v48  ;;  %v20930_v42 = vsel %vm16324_vm2, %v9524_v26, %v20871_v7  ;;  %v20940_v48 = vsel %vm16324_vm2, %v9558_v23, %v20854_v41 }
 0x2d2   : > { %23672 = vst [vmem:[#allocation21_spill] sm:$0xff] %v20908_v52  ;;  %8984 = vmatmul.mubr.bf16.gmra.mxu0 %v23673_v24  ;;  %v20932_v38 = vadd.f32 %v6710_v51, %v6597_v59  ;;  %v6599_v20 = vpop.f32.mrf.mxu0  ;;  %v20944_v36 = vsel %vm16324_vm2, %v9596_v9, %v9600_v53  ;;  %v20952_v2 = vsel %vm16324_vm2, %v9630_v14, %v20859_v58  ;;  %v9814_v6 = vshll.u32 %v14043_v60, 16  ;;  %v15617_v14 = vld [vmem:[%s23311_s1 + $0x1210] ss:$8 sps:$4 sm:$0xff]   ;;  %v13984_v59 = vld [vmem:[%s16290_s29 + $0x80] sm:$0xff] }
 0x2d3   : > { %9097 = vmatmul.mubr.bf16.gmra.mxu1 %v15597_v54  ;;  %8993 = vmatprep.mubr.bf16.mxu0 %v23674_v27  ;;  %v6712_v7 = vpop.f32.mrf.mxu1  ;;  %v15619_v54 = vld [vmem:[%s23311_s1 + $0x1214] ss:$8 sps:$4 sm:$0xff]   ;;  %v20956_v44 = vsel %vm16324_vm2, %v9668_v45, %v9672_v8  ;;  %v9773_v41 = vor.u32 %v9772_v35, %v9769_v21  ;;  %v20967_v23 = vsel %vm16324_vm2, %v9740_v50, %v9744_v34  ;;  %v15611_v45 = vld [vmem:[%s16290_s29 + $0x224] ss:$20 sps:$4 sm:$0xff]   ;;  %v9839_v29 = vshrl.u32 %v20752_v61, 16 }
 0x2d4   : > { %23675 = vst [vmem:[#allocation62_spill] sm:$0xff] %v20932_v38  ;;  %10576 = vmatpush2.bf16.msra.mxu1 %v15603_v55  ;;  %9106 = vmatprep.mubr.bf16.mxu1 %v15613_v25  ;;  %v20958_v55 = vadd.f32 %v6712_v7, %v6599_v20  ;;  %v6601_v26 = vpop.f32.mrf.mxu0  ;;  %v9811_v58 = vor.u32 %v9810_v10, %v20914_v4  ;;  %v15622_v50 = vld [vmem:[%s23311_s1 + $0x1204] ss:$8 sps:$4 sm:$0xff]   ;;  %v9816_v27 = vrot.slane %v9814_v6, 5  ;;  %v13987_v20 = vld [vmem:[%s16290_s29 + $0x94] sm:$0xff]  ;;  %v9848_v35 = vshll.u32 %v20760_v57, 16 }
 0x2d5   : > { %10577 = vmatprep.subr.bf16.mxu1 %v15608_v40  ;;  %v20963_v40 = vsel %vm16324_vm2, %v9702_v18, %v20874_v13  ;;  %v6714_v9 = vpop.f32.mrf.mxu1  ;;  %v9842_v18 = vshll.u32 %v20752_v61, 16  ;;  %v9774_v51 = vrot.slane %v9773_v41, 4  ;;  %v13985_v60 = vld [vmem:[%s16290_s29 + $0x88] sm:$0xf]  ;;  %v13988_v34 = vld [vmem:[%s16290_s29 + $0x9c] sm:$0xf] }
 0x2d6   : > { %23676 = vst [vmem:[#allocation64_spill] sm:$0xff] %v20958_v55  ;;  %v20977_v13 = vadd.f32 %v6714_v9, %v6601_v26  ;;  %v6603_v25 = vpop.f32.mrf.mxu0  ;;  %v23679_v26 = vcombine.low %v20752_v61, %v20760_v57  ;;  %v9812_v9 = vrot.slane %v9811_v58, 4  ;;  %v15620_v41 = vld [vmem:[%s23311_s1 + $0x1200] ss:$8 sps:$4 sm:$0xff]   ;;  %v9841_v6 = vrot.slane %v9839_v29, 4 }
 0x2d7   : > { %v6716_v24 = vpop.f32.mrf.mxu1  ;;  %v9844_v61 = vrot.slane %v9842_v18, 5  ;;  %v9352_v21 = vshll.u32 %v13984_v59, 16  ;;  %v9358_v8 = vshll.u32 %v13987_v20, 16  ;;  %v9386_v53 = vshrl.u32 %v13987_v20, 16 }
 0x2d8   : > { %23677 = vst [vmem:[#allocation66_spill] sm:$0xff] %v20977_v13  ;;  %10578 = vmatpush2.bf16.msra.mxu1 %v15606_v37  ;;  %v20997_v37 = vadd.f32 %v6716_v24, %v6603_v25  ;;  %v6607_v7 = vpop.f32.mrf.mxu0  ;;  %v9880_v25 = vshrl.u32 %v20760_v57, 16  ;;  %v9349_v24 = vshrl.u32 %v13984_v59, 16  ;;  %v15629_v57 = vld [vmem:[%s23311_s1 + $0x13f4] ss:$8 sps:$4 sm:$0xff]   ;;  %v21026_v29 = vsel %vm16324_vm2, %v9774_v51, %v20914_v4 }
 0x2d9   : > { %10579 = vmatprep.subr.bf16.mxu1 %v15619_v54  ;;  %v6720_v10 = vpop.f32.mrf.mxu1  ;;  %v23681_v54 = vcombine.high %v20757_v47, %v20767_v30  ;;  %v9363_v18 = vshrl.u32 %v13985_v60, 16  ;;  %v21036_v20 = vsel %vm16324_vm2, %v9812_v9, %v9816_v27  ;;  %v9396_v4 = vshrl.u32 %v13988_v34, 16  ;;  %v13993_v13 = vld [vmem:[%s16290_s29 + $0xbc] sm:$0xff] }
 0x2da   : > { %23678 = vst [vmem:[#allocation68_spill] sm:$0xff] %v20997_v37  ;;  %8994 = vmatmul.mubr.bf16.gmra.mxu0 %v23679_v26  ;;  %v21012_v26 = vadd.f32 %v6720_v10, %v6607_v7  ;;  %v6609_v58 = vpop.f32.mrf.mxu0  ;;  %v9372_v10 = vshll.u32 %v13988_v34, 16  ;;  %v21046_v37 = vrot.slane %v9349_v24, 4  ;;  %v15632_v34 = vld [vmem:[%s23311_s1 + $0x12e4] ss:$8 sps:$4 sm:$0xff]   ;;  %v21054_v27 = vrot.slane %v9352_v21, 5 }
 0x2db   : > { %9107 = vmatmul.mubr.bf16.gmra.mxu1 %v15611_v45  ;;  %9149 = vmatprep.mubr.bf16.mxu0 %v23371_v0  ;;  %v21018_v45 = vld [vmem:[%s16290_s29 + $0x244] sm:$0x11]  ;;  %v6722_v32 = vpop.f32.mrf.mxu1  ;;  %v21056_v9 = vrot.slane %v9358_v8, 5  ;;  %v21065_v24 = vrot.slane %v9363_v18, 4  ;;  %v13996_v21 = vld [vmem:[%s16290_s29 + $0xd0] sm:$0xff]  ;;  %v9424_v38 = vshll.u32 %v13993_v13, 16  ;;  %v23684_v18 = vcombine.low %v20757_v47, %v20767_v30 }
 0x2dc   : > { %23680 = vst [vmem:[#allocation39_spill] sm:$0xff] %v21012_v26  ;;  %10580 = vmatpush2.bf16.msra.mxu1 %v15617_v14  ;;  %10583 = vmatprep.mubr.bf16.mxu1 %v23681_v54  ;;  %v9366_v14 = vshll.u32 %v13985_v60, 16  ;;  %v21028_v7 = vadd.f32 %v6722_v32, %v6609_v58  ;;  %v6611_v59 = vpop.f32.mrf.mxu0  ;;  %v15623_v54 = vld [vmem:[%s16290_s29 + $0x88] ss:$20 sps:$4 sm:$0xff]   ;;  %v21038_v26 = vrot.slane %v9848_v35, 5  ;;  %v9845_v32 = vor.u32 %v9844_v61, %v9841_v6 }
 0x2dd   : > { %10581 = vmatprep.subr.bf16.mxu1 %v15622_v50  ;;  %v15624_v50 = vld [vmem:[%s23311_s1 + $0x12f0] ss:$8 sps:$4 sm:$0xff]   ;;  %v6724_v51 = vpop.f32.mrf.mxu1  ;;  %v21043_v58 = vrot.slane %v9880_v25, 4  ;;  %v21058_v6 = vrot.slane %v9386_v53, 4  ;;  %v15639_v25 = vld [vmem:[%s23311_s1 + $0x13e4] ss:$8 sps:$4 sm:$0xff]  }
 0x2de   : > { %23682 = vst [vmem:[#allocation22_spill] sm:$0xff] %v21028_v7  ;;  %v15627_v60 = vld [vmem:[%s23311_s1 + $0x13f0] ss:$8 sps:$4 sm:$0xff]   ;;  %v21049_v55 = vadd.f32 %v6724_v51, %v6611_v59  ;;  %v6613_v35 = vpop.f32.mrf.mxu0  ;;  %v21067_v59 = vrot.slane %v9366_v14, 5  ;;  %v21069_v51 = vrot.slane %v9372_v10, 5  ;;  %v21075_v7 = vrot.slane %v9396_v4, 4 }
 0x2df   : > { %v6726_v61 = vpop.f32.mrf.mxu1  ;;  %v15630_v14 = vld [vmem:[%s23311_s1 + $0x12e0] ss:$8 sps:$4 sm:$0xff]   ;;  %v13991_v4 = vld [vmem:[%s16290_s29 + $0xb0] sm:$0x1]  ;;  %v15636_v47 = vld [vmem:[%s23311_s1 + $0x12d4] ss:$8 sps:$4 sm:$0xff]  }
 0x2e0   : > { %23683 = vst [vmem:[#allocation40_spill] sm:$0xff] %v21049_v55  ;;  %10582 = vmatpush2.bf16.msra.mxu1 %v15620_v41  ;;  %v21072_v8 = vadd.f32 %v6726_v61, %v6613_v35  ;;  %v6763_v53 = vpop.f32.mrf.mxu0  ;;  %v9421_v55 = vshrl.u32 %v13993_v13, 16  ;;  %v9883_v13 = vor.u32 %v21043_v58, %v21038_v26  ;;  %v15637_v30 = vld [vmem:[%s23311_s1 + $0x13e0] ss:$8 sps:$4 sm:$0xff]   ;;  %v9430_v58 = vshll.u32 %v13996_v21, 16 }
 0x2e1   : > { %10777 = vmatprep.subr.bf16.mxu1 %v15629_v57  ;;  %v13990_v57 = vld [vmem:[%s16290_s29 + $0xa8] sm:$0x11]  ;;  %v6764_v52 = vadd.f32 %v6763_v53, %v20582_v16  ;;  %v21078_v41 = vpop.f32.mrf.mxu1  ;;  %v9458_v35 = vshrl.u32 %v13996_v21, 16  ;;  %v23685_v53 = vcombine.high %v20808_v12, %v20812_v49  ;;  %v9402_v21 = vshll.u32 %v13991_v4, 16 }
 0x2e2   : > { %9150 = vmatmul.mubr.bf16.vlgmr.msra.gmra.mxu0 %v15623_v54  ;;  %v9846_v54 = vrot.slane %v9845_v32, 4  ;;  %v6765_v16 = vpop.f32.mrf.mxu0  ;;  %v9389_v32 = vor.u32 %v21058_v6, %v21056_v9  ;;  %v9369_v6 = vor.u32 %v21067_v59, %v21065_v24  ;;  %v9884_v24 = vrot.slane %v9883_v13, 4 }
 0x2e3   : > { %10584 = vmatmul.mubr.bf16.vlgmr.msra.gmra.mxu1 %v23684_v18  ;;  %10665 = vmatpush1.bf16.msra.mxu0 %v15624_v50  ;;  %v9355_v50 = vor.u32 %v21054_v27, %v21046_v37  ;;  %v21105_v61 = vpop.f32.mrf.mxu1  ;;  %v15649_v37 = vld [vmem:[%s23311_s1 + $0x13d4] ss:$8 sps:$4 sm:$0xff]   ;;  %v9392_v27 = vshll.u32 %v13990_v57, 16  ;;  %v21119_v18 = vrot.slane %v9421_v55, 4  ;;  %v15642_v55 = vld [vmem:[%s23311_s1 + $0x12c4] ss:$8 sps:$4 sm:$0xff]  }
 0x2e4   : > { %10778 = vmatpush1.bf16.msra.mxu1 %v15627_v60  ;;  %10666 = vmatprep.subr.bf16.mxu0 %v15632_v34  ;;  %v21102_v60 = vadd.f32 %v6764_v52, %v20158_v5  ;;  %v6766_v34 = vadd.f32 %v6765_v16, %v20599_v33  ;;  %v6767_v5 = vpop.f32.mrf.mxu0  ;;  %v15633_v52 = vld [vmem:[%s16290_s29 + $0xc4] ss:$20 sps:$4 sm:$0xff]   ;;  %v9399_v33 = vor.u32 %v21075_v7, %v21069_v51  ;;  %v21121_v16 = vrot.slane %v9424_v38, 5 }
 0x2e5   : > { %9159 = vmatprep.mubr.bf16.mxu0 %v23371_v0  ;;  %10593 = vmatprep.mubr.bf16.mxu1 %v23685_v53  ;;  %v6768_v57 = vadd.f32 %v6767_v5, %v20606_v19  ;;  %v21127_v10 = vpop.f32.mrf.mxu1  ;;  %v21138_v38 = vsel %vm16324_vm2, %v9846_v54, %v21038_v26  ;;  %v9356_v59 = vrot.slane %v9355_v50, 4  ;;  %v9460_v4 = vrot.slane %v9458_v35, 4 }
 0x2e6   : > { %10779 = vmatprep.subr.bf16.mxu1 %v15639_v25  ;;  %v21124_v53 = vadd.f32 %v6766_v34, %v20162_v46  ;;  %v15634_v25 = vld [vmem:[%s23311_s1 + $0x12d0] ss:$8 sps:$4 sm:$0xff]   ;;  %v23687_v46 = vshll.u32 %v21018_v45, 16  ;;  %v6769_v19 = vpop.f32.mrf.mxu0  ;;  %v13994_v34 = vld [vmem:[%s16290_s29 + $0xc4] sm:$0xf]  ;;  %v9390_v54 = vrot.slane %v9389_v32, 4  ;;  %v9427_v35 = vor.u32 %v21121_v16, %v21119_v18 }
 0x2e7   : > { %10667 = vmatpush1.bf16.msra.mxu0 %v15630_v14  ;;  %v21142_v14 = vrot.slane %v9430_v58, 5  ;;  %v21146_v5 = vadd.f32 %v6768_v57, %v20181_v22  ;;  %v21149_v26 = vpop.f32.mrf.mxu1  ;;  %v15647_v45 = vld [vmem:[%s23311_s1 + $0x13d0] ss:$8 sps:$4 sm:$0xff]   ;;  %v9394_v13 = vrot.slane %v9392_v27, 5  ;;  %v15659_v22 = vld [vmem:[%s23311_s1 + $0x13c4] ss:$8 sps:$4 sm:$0xff]  }
 0x2e8   : > { %23686 = vst [vmem:[#allocation70_spill] sm:$0xff] %v21124_v53  ;;  %v9888_v7 = vrot.slane %v23687_v46, 5  ;;  %10668 = vmatprep.subr.bf16.mxu0 %v15636_v47  ;;  %10780 = vmatpush1.bf16.msra.mxu1 %v15637_v30  ;;  %v6770_v53 = vadd.f32 %v6769_v19, %v20618_v39  ;;  %v13999_v47 = vld [vmem:[%s16290_s29 + $0xe4] sm:$0x11]  ;;  %v6773_v30 = vpop.f32.mrf.mxu0  ;;  %v21158_v50 = vrot.slane %v9369_v6, 4  ;;  %v21160_v39 = vrot.slane %v9399_v33, 4 }
 0x2e9   : > { %10781 = vmatprep.subr.bf16.mxu1 %v15649_v37  ;;  %v21162_v58 = vrot.slane %v9402_v21, 5  ;;  %v6774_v37 = vadd.f32 %v6773_v30, %v20627_v56  ;;  %v21170_v27 = vpop.f32.mrf.mxu1  ;;  %v15640_v6 = vld [vmem:[%s23311_s1 + $0x12c0] ss:$8 sps:$4 sm:$0xff]   ;;  %v21179_v33 = vld [vmem:[%s16290_s29 + $0xd8] sm:$0xf]  ;;  %v9435_v21 = vshrl.u32 %v13994_v34, 16  ;;  %v23690_v46 = vcombine.high %v20925_v43, %v20930_v42 }
 0x2ea   : > { %9160 = vmatmul.mubr.bf16.gmra.mxu0 %v15633_v52  ;;  %v21167_v32 = vadd.f32 %v6770_v53, %v20188_v63  ;;  %v23688_v52 = vcombine.low %v20808_v12, %v20812_v49  ;;  %v9438_v18 = vshll.u32 %v13994_v34, 16  ;;  %v6775_v16 = vpop.f32.mrf.mxu0  ;;  %v15646_v63 = vld [vmem:[%s23311_s1 + $0x12b4] ss:$8 sps:$4 sm:$0xff]   ;;  %v21187_v56 = vsel %vm16324_vm2, %v9884_v24, %v9888_v7 }
 0x2eb   : > { %10669 = vmatpush1.bf16.msra.mxu0 %v15634_v25  ;;  %9169 = vmatprep.mubr.bf16.mxu0 %v23371_v0  ;;  %v21192_v49 = vsel %vm16324_vm2, %v9356_v59, %v21056_v9  ;;  %v9461_v12 = vor.u32 %v9460_v4, %v21142_v14  ;;  %v9464_v53 = vshll.u32 %v13999_v47, 16  ;;  %v21196_v57 = vadd.f32 %v6774_v37, %v20217_v3  ;;  %v15657_v9 = vld [vmem:[%s23311_s1 + $0x13c0] ss:$8 sps:$4 sm:$0xff]   ;;  %v15652_v47 = vld [vmem:[%s23311_s1 + $0x12a4] ss:$8 sps:$4 sm:$0xff]  }
 0x2ec   : > { %10594 = vmatmul.mubr.bf16.gmra.mxu1 %v23688_v52  ;;  %10670 = vmatprep.subr.bf16.mxu0 %v15642_v55  ;;  %v6776_v25 = vadd.f32 %v6775_v16, %v20644_v28  ;;  %v21199_v55 = vpop.f32.mrf.mxu1  ;;  %v21209_v7 = vsel %vm16324_vm2, %v9390_v54, %v9394_v13  ;;  %v6777_v19 = vpop.f32.mrf.mxu0  ;;  %v15643_v3 = vld [vmem:[%s16290_s29 + $0x100] ss:$20 sps:$4 sm:$0xff]   ;;  %v9375_v24 = vsel %vm16324_vm2, %v21158_v50, %v21069_v51  ;;  %v9428_v4 = vrot.slane %v9427_v35, 4  ;;  %v15644_v51 = vld [vmem:[%s23311_s1 + $0x12b0] ss:$8 sps:$4 sm:$0xff]  }
 0x2ed   : > { %23689 = vst [vmem:[#allocation13_spill] sm:$0xff] %v21196_v57  ;;  %10603 = vmatprep.mubr.bf16.mxu1 %v23690_v46  ;;  %10782 = vmatpush1.bf16.msra.mxu1 %v15647_v45  ;;  %v15669_v28 = vld [vmem:[%s23311_s1 + $0x13b4] ss:$8 sps:$4 sm:$0xff]   ;;  %v9405_v59 = vsel %vm16324_vm2, %v21160_v39, %v21162_v58  ;;  %v9444_v34 = vshll.u32 %v21179_v33, 16  ;;  %v6778_v54 = vadd.f32 %v6777_v19, %v20661_v11  ;;  %v21236_v30 = vrot.slane %v9435_v21, 4 }
 0x2ee   : > { %10783 = vmatprep.subr.bf16.mxu1 %v15659_v22  ;;  %v21225_v45 = vadd.f32 %v6776_v25, %v20221_v1  ;;  %v21228_v13 = vpop.f32.mrf.mxu1  ;;  %v21238_v22 = vrot.slane %v9438_v18, 5  ;;  %v6779_v1 = vpop.f32.mrf.mxu0  ;;  %v9462_v50 = vrot.slane %v9461_v12, 4  ;;  %v9466_v39 = vrot.slane %v9464_v53, 5  ;;  %v14000_v58 = vld [vmem:[%s16290_s29 + $0xec] sm:$0x1]  ;;  %v23695_v19 = vld [vmem:[#allocation51_spill] sm:$0xff] }
 0x2ef   : > { %23692 = vst [vmem:[#allocation42_spill] sm:$0xff] %v21228_v13  ;;  %10671 = vmatpush1.bf16.msra.mxu0 %v15640_v6  ;;  %v9468_v35 = vshrl.u32 %v21179_v33, 16  ;;  %v21245_v37 = vadd.f32 %v6778_v54, %v20240_v62  ;;  %v6780_v52 = vadd.f32 %v6779_v1, %v20673_v15  ;;  %v15667_v21 = vld [vmem:[%s23311_s1 + $0x13b0] ss:$8 sps:$4 sm:$0xff]   ;;  %v15650_v62 = vld [vmem:[%s23311_s1 + $0x12a0] ss:$8 sps:$4 sm:$0xff]   ;;  %v21266_v53 = vcombine.low %v9375_v24, %v9405_v59 }
 0x2f0   : > { %23691 = vst [vmem:[#allocation23_spill] sm:$0xff] %v21225_v45  ;;  %10672 = vmatprep.subr.bf16.mxu0 %v15646_v63  ;;  %v21248_v6 = vpop.f32.mrf.mxu1  ;;  %v14002_v33 = vld [vmem:[%s16290_s29 + $0xf8] sm:$0xff]  ;;  %v6783_v63 = vpop.f32.mrf.mxu0  ;;  %v15679_v15 = vld [vmem:[%s23311_s1 + $0x13a4] ss:$8 sps:$4 sm:$0xff]   ;;  %v21271_v25 = vsel %vm16324_vm2, %v9428_v4, %v21142_v14  ;;  %v21273_v46 = vrot.slane %v9444_v34, 5  ;;  %v23699_v16 = vcombine.low %v20925_v43, %v20930_v42  ;;  %v9474_v14 = vshll.u32 %v14000_v58, 16 }
 0x2f1   : > { %23693 = vst [vmem:[#allocation24_spill] sm:$0xff] %v21245_v37  ;;  %23694 = vst [vmem:[#allocation44_spill] sm:$0xff] %v21248_v6  ;;  %10784 = vmatpush1.bf16.msra.mxu1 %v15657_v9  ;;  %v14005_v9 = vld [vmem:[%s16290_s29 + $0x10c] sm:$0xff]  ;;  %v14003_v59 = vld [vmem:[%s16290_s29 + $0x100] sm:$0xf]  ;;  %v21295_v43 = vsel %vm16324_vm2, %v9462_v50, %v9466_v39  ;;  %v21297_v42 = vrot.slane %v9468_v35, 4  ;;  %v23704_v12 = vcombine.high %v20940_v48, %v20944_v36 }
 0x2f2   : > { %9170 = vmatmul.mubr.bf16.gmra.mxu0 %v15643_v3  ;;  %10785 = vmatprep.subr.bf16.mxu1 %v15669_v28  ;;  %v21277_v3 = vadd.f32 %v6780_v52, %v23695_v19  ;;  %v23697_v28 = vld [vmem:[#allocation50_spill] sm:$0xff]  ;;  %v21280_v1 = vpop.f32.mrf.mxu1  ;;  %v14006_v4 = vld [vmem:[%s16290_s29 + $0x114] sm:$0xf]  ;;  %v6785_v34 = vpop.f32.mrf.mxu0  ;;  %v23702_v19 = vld [vmem:[#allocation52_spill] sm:$0xff]  ;;  %v9502_v39 = vshll.u32 %v14005_v9, 16  ;;  %v9530_v35 = vshrl.u32 %v14005_v9, 16 }
 0x2f3   : > { %v6784_v54 = vadd.f32 %v6783_v63, %v23697_v28  ;;  %23698 = vst [vmem:[#allocation27_spill] sm:$0xff] %v21280_v1  ;;  %10673 = vmatpush1.bf16.msra.mxu0 %v15644_v51  ;;  %9179 = vmatprep.mubr.bf16.mxu0 %v23371_v0  ;;  %v15656_v52 = vld [vmem:[%s23311_s1 + $0x1294] ss:$8 sps:$4 sm:$0xff]   ;;  %v9493_v51 = vshrl.u32 %v14002_v33, 16  ;;  %v23700_v63 = vld [vmem:[#allocation33_spill] sm:$0xff]  ;;  %v6786_v28 = vadd.f32 %v6785_v34, %v23702_v19  ;;  %v9507_v34 = vshrl.u32 %v14003_v59, 16 }
 0x2f4   : > { %23696 = vst [vmem:[#allocation25_spill] sm:$0xff] %v21277_v3  ;;  %10604 = vmatmul.mubr.bf16.gmra.mxu1 %v23699_v16  ;;  %10674 = vmatprep.subr.bf16.mxu0 %v15652_v47  ;;  %v9496_v16 = vshll.u32 %v14002_v33, 16  ;;  %v21303_v47 = vpop.f32.mrf.mxu1  ;;  %v15653_v11 = vld [vmem:[%s16290_s29 + $0x13c] ss:$20 sps:$4 sm:$0xff]   ;;  %v15677_v50 = vld [vmem:[%s23311_s1 + $0x13a0] ss:$8 sps:$4 sm:$0xff]   ;;  %v6787_v33 = vpop.f32.mrf.mxu0 }
 0x2f5   : > { %v21300_v58 = vadd.f32 %v6784_v54, %v23700_v63  ;;  %23703 = vst [vmem:[#allocation29_spill] sm:$0xff] %v21303_v47  ;;  %10613 = vmatprep.mubr.bf16.mxu1 %v23704_v12  ;;  %10786 = vmatpush1.bf16.msra.mxu1 %v15667_v21  ;;  %v15689_v54 = vld [vmem:[%s23311_s1 + $0x1394] ss:$8 sps:$4 sm:$0xff]   ;;  %v9510_v63 = vshll.u32 %v14003_v59, 16  ;;  %v9516_v19 = vshll.u32 %v14006_v4, 16  ;;  %v9540_v18 = vshrl.u32 %v14006_v4, 16 }
 0x2f6   : > { %10787 = vmatprep.subr.bf16.mxu1 %v15679_v15  ;;  %v23705_v24 = vld [vmem:[#allocation53_spill] sm:$0xff]  ;;  %v23707_v21 = vld [vmem:[#allocation54_spill] sm:$0xff]  ;;  %v21319_v47 = vpop.f32.mrf.mxu1  ;;  %v15654_v15 = vld [vmem:[%s23311_s1 + $0x1290] ss:$8 sps:$4 sm:$0xff]   ;;  %v21329_v4 = vrot.slane %v9474_v14, 5  ;;  %v21348_v6 = vrot.slane %v9502_v39, 5 }
 0x2f7   : > { %23701 = vst [vmem:[#allocation26_spill] sm:$0xff] %v21300_v58  ;;  %v21316_v12 = vadd.f32 %v6786_v28, %v23705_v24  ;;  %v6788_v58 = vadd.f32 %v6787_v33, %v23707_v21  ;;  %23708 = vst [vmem:[#allocation72_spill] sm:$0xff] %v21319_v47  ;;  %10675 = vmatpush1.bf16.msra.mxu0 %v15650_v62  ;;  %v15662_v9 = vld [vmem:[%s23311_s1 + $0x1284] ss:$8 sps:$4 sm:$0xff]   ;;  %v6789_v24 = vpop.f32.mrf.mxu0  ;;  %v15687_v62 = vld [vmem:[%s23311_s1 + $0x1390] ss:$8 sps:$4 sm:$0xff]   ;;  %v9471_v33 = vor.u32 %v21297_v42, %v21273_v46 }
 0x2f8   : > { %10676 = vmatprep.subr.bf16.mxu0 %v15656_v52  ;;  %v21338_v21 = vrot.slane %v9493_v51, 4  ;;  %v14011_v47 = vld [vmem:[%s16290_s29 + $0x134] sm:$0xff]  ;;  %v23709_v59 = vld [vmem:[#allocation34_spill] sm:$0xff]  ;;  %v21345_v52 = vpop.f32.mrf.mxu1  ;;  %v14008_v37 = vld [vmem:[%s16290_s29 + $0x120] sm:$0x11]  ;;  %v21350_v45 = vrot.slane %v9530_v35, 4 }
 0x2f9   : > { %23706 = vst [vmem:[#allocation71_spill] sm:$0xff] %v21316_v12  ;;  %v9498_v12 = vrot.slane %v9496_v16, 5  ;;  %v21342_v14 = vadd.f32 %v6788_v58, %v23709_v59  ;;  %v23711_v3 = vld [vmem:[#allocation56_spill] sm:$0xff]  ;;  %23712 = vst [vmem:[#allocation30_spill] sm:$0xff] %v21345_v52  ;;  %10788 = vmatpush1.bf16.msra.mxu1 %v15677_v50  ;;  %v14014_v28 = vld [vmem:[%s16290_s29 + $0x148] sm:$0xff]  ;;  %v6793_v42 = vpop.f32.mrf.mxu0  ;;  %v21356_v16 = vrot.slane %v9507_v34, 4 }
 0x2fa   : > { %v6790_v1 = vadd.f32 %v6789_v24, %v23711_v3  ;;  %9180 = vmatmul.mubr.bf16.gmra.mxu0 %v15653_v11  ;;  %10789 = vmatprep.subr.bf16.mxu1 %v15689_v54  ;;  %v15699_v51 = vld [vmem:[%s23311_s1 + $0x1384] ss:$8 sps:$4 sm:$0xff]   ;;  %v9512_v3 = vrot.slane %v9510_v63, 5  ;;  %v21358_v58 = vrot.slane %v9516_v19, 5  ;;  %v9542_v50 = vrot.slane %v9540_v18, 4  ;;  %v23713_v59 = vld [vmem:[#allocation55_spill] sm:$0xff] }
 0x2fb   : > { %23710 = vst [vmem:[#allocation28_spill] sm:$0xff] %v21342_v14  ;;  %v23715_v35 = vld [vmem:[#allocation15_spill] sm:$0xff]  ;;  %v21364_v14 = vpop.f32.mrf.mxu1  ;;  %v23717_v11 = vcombine.low %v20940_v48, %v20944_v36  ;;  %10677 = vmatpush1.bf16.msra.mxu0 %v15654_v15  ;;  %v15660_v54 = vld [vmem:[%s23311_s1 + $0x1280] ss:$8 sps:$4 sm:$0xff]   ;;  %v9565_v63 = vshrl.u32 %v14011_v47, 16  ;;  %v9568_v18 = vshll.u32 %v14011_v47, 16  ;;  %v6795_v19 = vpop.f32.mrf.mxu0  ;;  %9189 = vmatprep.mubr.bf16.mxu0 %v23371_v0  ;;  %v9499_v48 = vor.u32 %v9498_v12, %v21338_v21 }
 0x2fc   : > { %v21361_v39 = vadd.f32 %v6790_v1, %v23713_v59  ;;  %v6794_v24 = vadd.f32 %v6793_v42, %v23715_v35  ;;  %23716 = vst [vmem:[#allocation31_spill] sm:$0xff] %v21364_v14  ;;  %v14009_v34 = vld [vmem:[%s16290_s29 + $0x128] sm:$0x1]  ;;  %10678 = vmatprep.subr.bf16.mxu0 %v15662_v9  ;;  %v15666_v1 = vld [vmem:[%s23311_s1 + $0x1374] ss:$8 sps:$4 sm:$0xff]   ;;  %v9536_v36 = vshll.u32 %v14008_v37, 16  ;;  %v23722_v9 = vcombine.high %v20952_v2, %v20956_v44 }
 0x2fd   : > { %10614 = vmatmul.mubr.bf16.gmra.mxu1 %v23717_v11  ;;  %v9574_v15 = vshll.u32 %v14014_v28, 16  ;;  %v9602_v42 = vshrl.u32 %v14014_v28, 16  ;;  %v23718_v59 = vld [vmem:[#allocation35_spill] sm:$0xff]  ;;  %v23720_v11 = vld [vmem:[#allocation17_spill] sm:$0xff]  ;;  %v21382_v47 = vpop.f32.mrf.mxu1  ;;  %v15663_v14 = vld [vmem:[%s16290_s29 + $0x178] ss:$20 sps:$4 sm:$0xff]   ;;  %v23723_v12 = vor.u32 %v21238_v22, %v21236_v30 }
 0x2fe   : > { %23714 = vst [vmem:[#allocation46_spill] sm:$0xff] %v21361_v39  ;;  %v21379_v35 = vadd.f32 %v6794_v24, %v23718_v59  ;;  %v6796_v39 = vadd.f32 %v6795_v19, %v23720_v11  ;;  %23721 = vst [vmem:[#allocation32_spill] sm:$0xff] %v21382_v47  ;;  %10623 = vmatprep.mubr.bf16.mxu1 %v23722_v9  ;;  %10790 = vmatpush1.bf16.msra.mxu1 %v15687_v62  ;;  %v15697_v37 = vld [vmem:[%s23311_s1 + $0x1380] ss:$8 sps:$4 sm:$0xff]   ;;  %v21396_v21 = vrot.slane %v9471_v33, 4  ;;  %v6797_v24 = vpop.f32.mrf.mxu0  ;;  %v23726_v33 = vld [vmem:[#allocation16_spill] sm:$0xff] }
 0x2ff   : > { %v21394_v28 = vrot.slane %v23723_v12, 4  ;;  %10791 = vmatprep.subr.bf16.mxu1 %v15699_v51  ;;  %v15708_v19 = vld [vmem:[%s23311_s1 + $0x1574] ss:$8 sps:$4 sm:$0xff]   ;;  %v9533_v62 = vor.u32 %v21350_v45, %v21348_v6  ;;  %v9513_v59 = vor.u32 %v9512_v3, %v21356_v16  ;;  %v9543_v11 = vor.u32 %v9542_v50, %v21358_v58  ;;  %v23724_v30 = vld [vmem:[#allocation57_spill] sm:$0xff]  ;;  %v21410_v47 = vpop.f32.mrf.mxu1  ;;  %10679 = vmatpush1.bf16.msra.mxu0 %v15660_v54  ;;  %v15664_v51 = vld [vmem:[%s23311_s1 + $0x1370] ss:$8 sps:$4 sm:$0xff]  }
 0x300   : > { %23719 = vst [vmem:[#allocation48_spill] sm:$0xff] %v21379_v35  ;;  %v9546_v9 = vshll.u32 %v14009_v34, 16  ;;  %v14012_v35 = vld [vmem:[%s16290_s29 + $0x13c] sm:$0xf]  ;;  %v21407_v22 = vadd.f32 %v6796_v39, %v23724_v30  ;;  %v6798_v12 = vadd.f32 %v6797_v24, %v23726_v33  ;;  %23727 = vst [vmem:[#allocation5_spill] sm:$0xff] %v21410_v47  ;;  %v9567_v45 = vrot.slane %v9565_v63, 4  ;;  %v6799_v16 = vpop.f32.mrf.mxu0  ;;  %10680 = vmatprep.subr.bf16.mxu0 %v15666_v1 }
 0x301   : > { %v9570_v52 = vrot.slane %v9568_v18, 5  ;;  %v15672_v3 = vld [vmem:[%s23311_s1 + $0x1364] ss:$8 sps:$4 sm:$0xff]   ;;  %v9500_v50 = vrot.slane %v9499_v48, 4  ;;  %v9538_v39 = vrot.slane %v9536_v36, 5  ;;  %v21418_v34 = vrot.slane %v9574_v15, 5  ;;  %v21424_v47 = vpop.f32.mrf.mxu1 }
 0x302   : > { %23725 = vst [vmem:[#allocation49_spill] sm:$0xff] %v21407_v22  ;;  %v9604_v24 = vrot.slane %v9602_v42, 4  ;;  %v23728_v30 = vld [vmem:[#allocation41_spill] sm:$0xff]  ;;  %v23730_v54 = vld [vmem:[#allocation58_spill] sm:$0xff]  ;;  %23731 = vst [vmem:[#allocation50_spill] sm:$0xff] %v21424_v47  ;;  %10792 = vmatpush1.bf16.msra.mxu1 %v15697_v37  ;;  %v9579_v18 = vshrl.u32 %v14012_v35, 16  ;;  %v6803_v13 = vpop.f32.mrf.mxu0  ;;  %9190 = vmatmul.mubr.bf16.gmra.mxu0 %v15663_v14 }
 0x303   : > { %v21421_v33 = vadd.f32 %v6798_v12, %v23728_v30  ;;  %v6800_v22 = vadd.f32 %v6799_v16, %v23730_v54  ;;  %v14017_v63 = vld [vmem:[%s16290_s29 + $0x15c] sm:$0x11]  ;;  %v9582_v1 = vshll.u32 %v14012_v35, 16  ;;  %11940 = vmatprep.subr.bf16.mxu1 %v15708_v19  ;;  %v9534_v57 = vrot.slane %v9533_v62, 4  ;;  %v23732_v42 = vld [vmem:[#allocation43_spill] sm:$0xff]  ;;  %v21437_v37 = vpop.f32.mrf.mxu1  ;;  %10681 = vmatpush2.bf16.msra.mxu0 %v15664_v51 }
 0x304   : > { %v21427_v48 = vrot.slane %v9513_v59, 4  ;;  %v21429_v36 = vrot.slane %v9543_v11, 4  ;;  %v21431_v15 = vrot.slane %v9546_v9, 5  ;;  %v23734_v16 = vld [vmem:[#allocation60_spill] sm:$0xff]  ;;  %23735 = vst [vmem:[#allocation52_spill] sm:$0xff] %v21437_v37  ;;  %v23736_v35 = vcombine.low %v20952_v2, %v20956_v44  ;;  %v6805_v62 = vpop.f32.mrf.mxu0  ;;  %10682 = vmatprep.subr.bf16.mxu0 %v15672_v3  ;;  %9199 = vmatprep.mubr.bf16.mxu0 %v23371_v0  ;;  %v23739_v51 = vld [vmem:[#allocation19_spill] sm:$0xff] }
 0x305   : > { %23729 = vst [vmem:[#allocation51_spill] sm:$0xff] %v21421_v33  ;;  %v21434_v12 = vadd.f32 %v6800_v22, %v23732_v42  ;;  %v6804_v30 = vadd.f32 %v6803_v13, %v23734_v16  ;;  %v15670_v14 = vld [vmem:[%s23311_s1 + $0x1360] ss:$8 sps:$4 sm:$0xff]   ;;  %v9571_v19 = vor.u32 %v9570_v52, %v9567_v45  ;;  %v15676_v13 = vld [vmem:[%s23311_s1 + $0x1354] ss:$8 sps:$4 sm:$0xff]   ;;  %v9447_v2 = vsel %vm16324_vm2, %v21394_v28, %v21273_v46  ;;  %v21463_v3 = vpop.f32.mrf.mxu1 }
 0x306   : > { %10624 = vmatmul.mubr.bf16.gmra.mxu1 %v23736_v35  ;;  %v9477_v44 = vsel %vm16324_vm2, %v21396_v21, %v21329_v4  ;;  %v9605_v52 = vor.u32 %v9604_v24, %v21418_v34  ;;  %v9608_v59 = vshll.u32 %v14017_v63, 16  ;;  %v14015_v11 = vld [vmem:[%s16290_s29 + $0x150] sm:$0xf]  ;;  %v23737_v9 = vld [vmem:[#allocation36_spill] sm:$0xff]  ;;  %v6806_v45 = vadd.f32 %v6805_v62, %v23739_v51  ;;  %23740 = vst [vmem:[#allocation54_spill] sm:$0xff] %v21463_v3  ;;  %v6807_v4 = vpop.f32.mrf.mxu0 }
 0x307   : > { %23733 = vst [vmem:[#allocation33_spill] sm:$0xff] %v21434_v12  ;;  %v21460_v22 = vadd.f32 %v6804_v30, %v23737_v9  ;;  %v23741_v46 = vcombine.high %v20963_v40, %v20967_v23  ;;  %v14018_v28 = vld [vmem:[%s16290_s29 + $0x164] sm:$0x1]  ;;  %v9581_v54 = vrot.slane %v9579_v18, 4  ;;  %v9584_v42 = vrot.slane %v9582_v1, 5  ;;  %v14020_v1 = vld [vmem:[%s16290_s29 + $0x170] sm:$0xff]  ;;  %v21492_v62 = vpop.f32.mrf.mxu1  ;;  %10683 = vmatpush2.bf16.msra.mxu0 %v15670_v14 }
 0x308   : > { %v15673_v21 = vld [vmem:[%s16290_s29 + $0x1b4] ss:$20 sps:$4 sm:$0xff]   ;;  %v21473_v24 = vsel %vm16324_vm2, %v9500_v50, %v21348_v6  ;;  %v21477_v63 = vsel %vm16324_vm2, %v9534_v57, %v9538_v39  ;;  %v9519_v16 = vsel %vm16324_vm2, %v21427_v48, %v21358_v58  ;;  %v9549_v18 = vsel %vm16324_vm2, %v21429_v36, %v21431_v15  ;;  %23745 = vst [vmem:[#allocation56_spill] sm:$0xff] %v21492_v62  ;;  %v15674_v57 = vld [vmem:[%s23311_s1 + $0x1350] ss:$8 sps:$4 sm:$0xff]   ;;  %v6809_v48 = vpop.f32.mrf.mxu0  ;;  %v23748_v14 = vld [vmem:[#allocation37_spill] sm:$0xff] }
 0x309   : > { %23738 = vst [vmem:[#allocation53_spill] sm:$0xff] %v21460_v22  ;;  %10633 = vmatprep.mubr.bf16.mxu1 %v23741_v46  ;;  %v23742_v30 = vld [vmem:[#allocation59_spill] sm:$0xff]  ;;  %v23744_v6 = vld [vmem:[#allocation18_spill] sm:$0xff]  ;;  %v9572_v39 = vrot.slane %v9571_v19, 4  ;;  %v9588_v58 = vshll.u32 %v14015_v11, 16  ;;  %10684 = vmatprep.subr.bf16.mxu0 %v15676_v13  ;;  %v9606_v15 = vrot.slane %v9605_v52, 4  ;;  %v21506_v13 = vcombine.low %v9447_v2, %v9477_v44 }
 0x30a   : > { %v21489_v35 = vadd.f32 %v6806_v45, %v23742_v30  ;;  %v6808_v50 = vadd.f32 %v6807_v4, %v23744_v6  ;;  %v15682_v36 = vld [vmem:[%s23311_s1 + $0x1344] ss:$8 sps:$4 sm:$0xff]   ;;  %v9610_v9 = vrot.slane %v9608_v59, 5  ;;  %v9612_v51 = vshrl.u32 %v14015_v11, 16  ;;  %v23746_v46 = vld [vmem:[#allocation7_spill] sm:$0xff]  ;;  %v21504_v6 = vpop.f32.mrf.mxu1  ;;  %v6813_v62 = vpop.f32.mrf.mxu0  ;;  %9200 = vmatmul.mubr.bf16.gmra.mxu0 %v15673_v21  ;;  %v23789_v12 = vld [vmem:[#allocation68_spill] sm:$0xff] }
 0x30b   : > { %v9618_v45 = vshll.u32 %v14018_v28, 16  ;;  %v6810_v30 = vadd.f32 %v6809_v48, %v23748_v14  ;;  %23749 = vst [vmem:[#allocation15_spill] sm:$0xff] %v21504_v6  ;;  %v9637_v19 = vshrl.u32 %v14020_v1, 16  ;;  %v9640_v11 = vshll.u32 %v14020_v1, 16  ;;  %v23750_v28 = vld [vmem:[#allocation61_spill] sm:$0xff]  ;;  %v23752_v48 = vld [vmem:[#allocation20_spill] sm:$0xff]  ;;  %10685 = vmatpush2.bf16.msra.mxu0 %v15674_v57  ;;  %9209 = vmatprep.mubr.bf16.mxu0 %v23371_v0 }
 0x30c   : > { %23743 = vst [vmem:[#allocation34_spill] sm:$0xff] %v21489_v35  ;;  %v21501_v4 = vadd.f32 %v6808_v50, %v23746_v46  ;;  %v9585_v35 = vor.u32 %v9584_v42, %v9581_v54  ;;  %v6814_v46 = vadd.f32 %v6813_v62, %v23752_v48  ;;  %v21516_v54 = vpop.f32.mrf.mxu1  ;;  %v23754_v42 = vcombine.low %v20963_v40, %v20967_v23  ;;  %v15680_v2 = vld [vmem:[%s23311_s1 + $0x1340] ss:$8 sps:$4 sm:$0xff]   ;;  %v14271_v1 = vld [vmem:[%s16290_s29 + $0x1ac] sm:$0xee]  ;;  %v6815_v14 = vpop.f32.mrf.mxu0 }
 0x30d   : > { %v21513_v50 = vadd.f32 %v6810_v30, %v23750_v28  ;;  %23753 = vst [vmem:[#allocation17_spill] sm:$0xff] %v21516_v54  ;;  %v21524_v44 = vcombine.low %v9519_v16, %v9549_v18  ;;  %v21526_v21 = vrot.slane %v9588_v58, 5  ;;  %10686 = vmatprep.subr.bf16.mxu0 %v15682_v36  ;;  %v15683_v62 = vld [vmem:[%s16290_s29 + $0x1f0] ss:$20 sps:$4 sm:$0xff]   ;;  %v15686_v40 = vld [vmem:[%s23311_s1 + $0x1334] ss:$8 sps:$4 sm:$0xff]   ;;  %v21537_v23 = vsel %vm16324_vm2, %v9572_v39, %v21418_v34 }
 0x30e   : > { %23747 = vst [vmem:[#allocation55_spill] sm:$0xff] %v21501_v4  ;;  %10634 = vmatmul.mubr.bf16.gmra.mxu1 %v23754_v42  ;;  %v21541_v16 = vsel %vm16324_vm2, %v9606_v15, %v9610_v9  ;;  %v21543_v18 = vrot.slane %v9612_v51, 4  ;;  %v21545_v57 = vrot.slane %v9618_v45, 5  ;;  %v21548_v58 = vld [vmem:[%s16290_s29 + $0x184] sm:$0xff]  ;;  %v23755_v36 = vld [vmem:[#allocation8_spill] sm:$0xff]  ;;  %v21554_v42 = vpop.f32.mrf.mxu1  ;;  %v23759_v34 = vcombine.high %v21026_v29, %v21036_v20  ;;  %v6817_v45 = vpop.f32.mrf.mxu0  ;;  %v23760_v59 = vld [vmem:[#allocation63_spill] sm:$0xff] }
 0x30f   : > { %23751 = vst [vmem:[#allocation35_spill] sm:$0xff] %v21513_v50  ;;  %v21551_v30 = vadd.f32 %v6814_v46, %v23755_v36  ;;  %v23757_v28 = vld [vmem:[#allocation38_spill] sm:$0xff]  ;;  %23758 = vst [vmem:[#allocation16_spill] sm:$0xff] %v21554_v42  ;;  %v21559_v39 = vrot.slane %v9585_v35, 4  ;;  %v21561_v15 = vrot.slane %v9637_v19, 4  ;;  %v21564_v9 = vld [vmem:[%s16290_s29 + $0x1c0] sm:$0xff]  ;;  %v6818_v35 = vadd.f32 %v6817_v45, %v20902_v31  ;;  %10687 = vmatpush2.bf16.msra.mxu0 %v15680_v2 }
 0x310   : > { %v6816_v48 = vadd.f32 %v6815_v14, %v23757_v28  ;;  %10643 = vmatprep.mubr.bf16.mxu1 %v23759_v34  ;;  %v21567_v51 = vld [vmem:[%s16290_s29 + $0x1d4] sm:$0x11]  ;;  %v21569_v52 = vrot.slane %v9640_v11, 5  ;;  %v14295_v46 = vrot.slane %v14271_v1, 9  ;;  %v11129_v14 = vrot.slane %v21564_v9, 5  ;;  %v21578_v19 = vpop.f32.mrf.mxu1  ;;  %v6819_v42 = vpop.f32.mrf.mxu0  ;;  %10688 = vmatprep.subr.bf16.mxu0 %v15686_v40  ;;  %v23767_v40 = vld [vmem:[#allocation21_spill] sm:$0xff] }
 0x311   : > { %23756 = vst [vmem:[#allocation57_spill] sm:$0xff] %v21551_v30  ;;  %v11139_v36 = vrot.slane %v21567_v51, 5  ;;  %v14274_v28 = vld [vmem:[%s16290_s29 + $0x1e8] sm:$0xee]  ;;  %23762 = vst [vmem:[#allocation58_spill] sm:$0xff] %v21578_v19  ;;  %v9646_v34 = vshll.u32 %v21548_v58, 16  ;;  %v9615_v2 = vor.u32 %v21543_v18, %v21526_v21  ;;  %v6820_v50 = vadd.f32 %v6819_v42, %v23767_v40 }
 0x312   : > { %v21575_v30 = vadd.f32 %v6816_v48, %v23760_v59  ;;  %v15684_v11 = vld [vmem:[%s23311_s1 + $0x1330] ss:$8 sps:$4 sm:$0xff]   ;;  %v15692_v31 = vld [vmem:[%s23311_s1 + $0x1324] ss:$8 sps:$4 sm:$0xff]   ;;  %v21595_v45 = vsel %vm17271_vm5, %v14295_v46, %v11129_v14  ;;  %v11138_v1 = vrot.slane %v11129_v14, 4  ;;  %v21601_v54 = vpop.f32.mrf.mxu1  ;;  %v21608_v4 = vld [vmem:[%s16290_s29 + $0x1fc] sm:$0xff]  ;;  %v6823_v6 = vpop.f32.mrf.mxu0  ;;  %9210 = vmatmul.mubr.bf16.gmra.mxu0 %v15683_v62 }
 0x313   : > { %23764 = vst [vmem:[#allocation43_spill] sm:$0xff] %v21595_v45  ;;  %23768 = vst [vmem:[#allocation36_spill] sm:$0xff] %v21601_v54  ;;  %v14298_v18 = vrot.slane %v14274_v28, 9  ;;  %v21611_v46 = vld [vmem:[%s16290_s29 + $0x198] sm:$0x11]  ;;  %v9674_v42 = vshrl.u32 %v21548_v58, 16  ;;  %10689 = vmatpush2.bf16.msra.mxu0 %v15684_v11  ;;  %9219 = vmatprep.mubr.bf16.mxu0 %v23371_v0 }
 0x314   : > { %23761 = vst [vmem:[#allocation41_spill] sm:$0xff] %v21575_v30  ;;  %v23765_v30 = vld [vmem:[#allocation9_spill] sm:$0xff]  ;;  %v21617_v14 = vld [vmem:[%s16290_s29 + $0x210] sm:$0x11]  ;;  %v11150_v40 = vrot.slane %v21608_v4, 5  ;;  %v23772_v28 = vld [vmem:[#allocation62_spill] sm:$0xff]  ;;  %v21628_v54 = vpop.f32.mrf.mxu1  ;;  %10690 = vmatprep.subr.bf16.mxu0 %v15692_v31 }
 0x315   : > { %v21598_v19 = vadd.f32 %v6818_v35, %v23765_v30  ;;  %v9643_v30 = vor.u32 %v21569_v52, %v21561_v15  ;;  %v21621_v35 = vsel %vm17271_vm5, %v11138_v1, %v11139_v36  ;;  %v23770_v59 = vld [vmem:[#allocation65_spill] sm:$0xff]  ;;  %v6824_v62 = vadd.f32 %v6823_v6, %v23772_v28  ;;  %23773 = vst [vmem:[#allocation18_spill] sm:$0xff] %v21628_v54  ;;  %v14021_v15 = vld [vmem:[%s16290_s29 + $0x178] sm:$0xf]  ;;  %v6825_v6 = vpop.f32.mrf.mxu0  ;;  %v23776_v28 = vld [vmem:[#allocation10_spill] sm:$0xff] }
 0x316   : > { %23769 = vst [vmem:[#allocation19_spill] sm:$0xff] %v21621_v35  ;;  %v23774_v52 = vcombine.low %v21026_v29, %v21036_v20  ;;  %v15690_v58 = vld [vmem:[%s23311_s1 + $0x1320] ss:$8 sps:$4 sm:$0xff]   ;;  %v15696_v29 = vld [vmem:[%s23311_s1 + $0x1314] ss:$8 sps:$4 sm:$0xff]   ;;  %v21644_v20 = vrot.slane %v9646_v34, 5  ;;  %v21650_v1 = vsel %vm17271_vm5, %v14298_v18, %v11150_v40  ;;  %v23780_v54 = vcombine.high %v21138_v38, %v21187_v56 }
 0x317   : > { %23766 = vst [vmem:[#allocation60_spill] sm:$0xff] %v21598_v19  ;;  %v21625_v19 = vadd.f32 %v6820_v50, %v23770_v59  ;;  %v11160_v50 = vrot.slane %v21617_v14, 5  ;;  %23775 = vst [vmem:[#allocation7_spill] sm:$0xff] %v21650_v1  ;;  %v11159_v59 = vrot.slane %v11150_v40, 4  ;;  %v23778_v31 = vld [vmem:[#allocation64_spill] sm:$0xff]  ;;  %v21662_v22 = vrot.slane %v9615_v2, 4  ;;  %v6827_v35 = vpop.f32.mrf.mxu0  ;;  %10691 = vmatpush2.bf16.msra.mxu0 %v15690_v58 }
 0x318   : > { %10644 = vmatmul.mubr.bf16.gmra.mxu1 %v23774_v52  ;;  %v21653_v52 = vadd.f32 %v6824_v62, %v23776_v28  ;;  %v6826_v36 = vadd.f32 %v6825_v6, %v23778_v31  ;;  %v15693_v34 = vld [vmem:[%s16290_s29 + $0x22c] ss:$20 sps:$4 sm:$0xff]   ;;  %v14277_v18 = vld [vmem:[%s16290_s29 + $0x224] sm:$0xee]  ;;  %v21666_v40 = vrot.slane %v9674_v42, 4  ;;  %v9651_v28 = vshrl.u32 %v14021_v15, 16  ;;  %10692 = vmatprep.subr.bf16.mxu0 %v15696_v29 }
 0x319   : > { %23771 = vst [vmem:[#allocation59_spill] sm:$0xff] %v21625_v19  ;;  %v21656_v19 = vpop.f32.mrf.mxu1  ;;  %10653 = vmatprep.mubr.bf16.mxu1 %v23780_v54  ;;  %v21669_v62 = vld [vmem:[%s16290_s29 + $0x18c] sm:$0xf]  ;;  %v9654_v6 = vshll.u32 %v14021_v15, 16  ;;  %v21673_v31 = vsel %vm17271_vm5, %v11159_v59, %v11160_v50  ;;  %v23782_v54 = vld [vmem:[#allocation67_spill] sm:$0xff]  ;;  %v21688_v11 = vld [vmem:[%s16290_s29 + $0x238] sm:$0xff] }
 0x31a   : > { %23777 = vst [vmem:[#allocation37_spill] sm:$0xff] %v21653_v52  ;;  %23779 = vst [vmem:[#allocation61_spill] sm:$0xff] %v21656_v19  ;;  %v21676_v45 = vadd.f32 %v6826_v36, %v23782_v54  ;;  %v23784_v2 = vld [vmem:[#allocation66_spill] sm:$0xff]  ;;  %v15694_v42 = vld [vmem:[%s23311_s1 + $0x1310] ss:$8 sps:$4 sm:$0xff]   ;;  %v21694_v59 = vrot.slane %v9643_v30, 4  ;;  %9220 = vmatmul.mubr.bf16.gmra.mxu0 %v15693_v34  ;;  %v23796_v34 = vcombine.low %v21138_v38, %v21187_v56 }
 0x31b   : > { %23781 = vst [vmem:[#allocation20_spill] sm:$0xff] %v21673_v31  ;;  %v6828_v52 = vadd.f32 %v6827_v35, %v23784_v2  ;;  %v21679_v19 = vpop.f32.mrf.mxu1  ;;  %v15702_v15 = vld [vmem:[%s23311_s1 + $0x1304] ss:$8 sps:$4 sm:$0xff]   ;;  %v6829_v35 = vpop.f32.mrf.mxu0  ;;  %v11112_v58 = vrot.slane %v21669_v62, 5  ;;  %v14301_v2 = vrot.slane %v14277_v18, 9  ;;  %v9660_v36 = vshll.u32 %v21669_v62, 16  ;;  %10693 = vmatpush2.bf16.msra.mxu0 %v15694_v42 }
 0x31c   : > { %23783 = vst [vmem:[#allocation8_spill] sm:$0xff] %v21676_v45  ;;  %23785 = vst [vmem:[#allocation38_spill] sm:$0xff] %v21679_v19  ;;  %v21698_v54 = vld [vmem:[%s16290_s29 + $0x24c] sm:$0x11]  ;;  %v11171_v45 = vrot.slane %v21688_v11, 5  ;;  %v6830_v37 = vadd.f32 %v6829_v35, %v23789_v12  ;;  %v21713_v31 = vrot.slane %v9651_v28, 4  ;;  %10694 = vmatprep.subr.bf16.mxu0 %v15702_v15  ;;  %v23797_v38 = vcombine.high %v21192_v49, %v21209_v7 }
 0x31d   : > { %23786 = vst [vmem:[#allocation63_spill] sm:$0xff] %v21698_v54  ;;  %v23787_v19 = vld [vmem:[#allocation11_spill] sm:$0xff]  ;;  %v21705_v50 = vpop.f32.mrf.mxu1  ;;  %v11181_v30 = vrot.slane %v21698_v54, 5  ;;  %v6833_v29 = vpop.f32.mrf.mxu0  ;;  %v15700_v28 = vld [vmem:[%s23311_s1 + $0x1300] ss:$8 sps:$4 sm:$0xff]   ;;  %v9684_v42 = vshrl.u32 %v21669_v62, 16 }
 0x31e   : > { %v21702_v3 = vadd.f32 %v6828_v52, %v23787_v19  ;;  %23790 = vst [vmem:[#allocation9_spill] sm:$0xff] %v21705_v50  ;;  %v21717_v12 = vsel %vm17271_vm5, %v14301_v2, %v11171_v45  ;;  %v11180_v19 = vrot.slane %v11171_v45, 4  ;;  %v23792_v52 = vld [vmem:[#allocation69_spill] sm:$0xff]  ;;  %v23794_v1 = vld [vmem:[#allocation39_spill] sm:$0xff]  ;;  %v9677_v2 = vor.u32 %v21666_v40, %v21644_v20  ;;  %10696 = vmatprep.mubr.bf16.mxu0 %v23797_v38  ;;  %v23801_v15 = vld [vmem:[#allocation22_spill] sm:$0xff] }
 0x31f   : > { %23791 = vst [vmem:[#allocation21_spill] sm:$0xff] %v21717_v12  ;;  %v21720_v35 = vadd.f32 %v6830_v37, %v23792_v52  ;;  %v21723_v50 = vpop.f32.mrf.mxu1  ;;  %v21734_v45 = vld [vmem:[%s16290_s29 + $0x1a0] sm:$0x1]  ;;  %v21736_v37 = vrot.slane %v9654_v6, 5  ;;  %v15705_v56 = vld [vmem:[%s23311_s1 + $0x1474] ss:$8 sps:$4 sm:$0xff]   ;;  %10695 = vmatpush2.bf16.msra.mxu0 %v15700_v28 }
 0x320   : > { %23788 = vst [vmem:[#allocation6_spill] sm:$0xff] %v21702_v3  ;;  %v6834_v3 = vadd.f32 %v6833_v29, %v23794_v1  ;;  %23795 = vst [vmem:[#allocation62_spill] sm:$0xff] %v21723_v50  ;;  %10654 = vmatmul.mubr.bf16.gmra.mxu1 %v23796_v34  ;;  %v14029_v1 = vld [vmem:[%s16290_s29 + $0x1ac] sm:$0xff]  ;;  %v6835_v29 = vpop.f32.mrf.mxu0  ;;  %v11120_v52 = vrot.slane %v11112_v58, 4  ;;  %v11121_v40 = vrot.slane %v21734_v45, 5  ;;  %v21749_v6 = vsel %vm17271_vm5, %v11180_v19, %v11181_v30  ;;  %v23799_v34 = vld [vmem:[#allocation12_spill] sm:$0xff] }
 0x321   : > { %23793 = vst [vmem:[#allocation65_spill] sm:$0xff] %v21720_v35  ;;  %23798 = vst [vmem:[#allocation10_spill] sm:$0xff] %v21749_v6  ;;  %v6836_v35 = vadd.f32 %v6835_v29, %v23801_v15  ;;  %v21755_v50 = vpop.f32.mrf.mxu1  ;;  %10809 = vmatprep.mubr.bf16.mxu1 %v23371_v0  ;;  %v14269_v54 = vld [vmem:[%s16290_s29 + $0x178] sm:$0xe]  ;;  %v21763_v47 = vrot.slane %v9660_v36, 5  ;;  %v9709_v30 = vshrl.u32 %v14029_v1, 16  ;;  %11827 = vmatprep.subr.bf16.mxu0 %v15705_v56 }
 0x322   : > { %v21752_v18 = vadd.f32 %v6834_v3, %v23799_v34  ;;  %23802 = vst [vmem:[#allocation67_spill] sm:$0xff] %v21755_v50  ;;  %v6837_v33 = vpop.f32.mrf.mxu0  ;;  %v9712_v19 = vshll.u32 %v14029_v1, 16  ;;  %v14293_v3 = vrot.slane %v14269_v54, 9  ;;  %v23803_v34 = vld [vmem:[#allocation45_spill] sm:$0xff]  ;;  %v23804_v29 = vld [vmem:[#allocation40_spill] sm:$0xff]  ;;  %v9718_v62 = vshll.u32 %v21564_v9, 16 }
 0x323   : > { %v6838_v15 = vadd.f32 %v6837_v33, %v23804_v29  ;;  %v21769_v50 = vpop.f32.mrf.mxu1  ;;  %v15703_v38 = vld [vmem:[%s23311_s1 + $0x1470] ss:$8 sps:$4 sm:$0xff]   ;;  %v9746_v36 = vshrl.u32 %v21564_v9, 16  ;;  %v15711_v33 = vld [vmem:[%s23311_s1 + $0x1464] ss:$8 sps:$4 sm:$0xff]   ;;  %v21784_v28 = vrot.slane %v9684_v42, 4  ;;  %v21792_v9 = vsel %vm17271_vm5, %v11120_v52, %v11121_v40 }
 0x324   : > { %23800 = vst [vmem:[#allocation64_spill] sm:$0xff] %v21752_v18  ;;  %v21766_v18 = vadd.f32 %v6836_v35, %v23803_v34  ;;  %v6839_v6 = vpop.f32.mrf.mxu0  ;;  %v15706_v54 = vld [vmem:[%s23311_s1 + $0x1570] ss:$8 sps:$4 sm:$0xff]   ;;  %v9657_v35 = vor.u32 %v21736_v37, %v21713_v31  ;;  %v21788_v1 = vsel %vm17271_vm5, %v14293_v3, %v11112_v58  ;;  %v15714_v31 = vld [vmem:[%s23311_s1 + $0x1564] ss:$8 sps:$4 sm:$0xff]   ;;  %v9690_v37 = vshll.u32 %v21734_v45, 16 }
 0x325   : > { %v23805_v56 = vld [vmem:[#allocation47_spill] sm:$0xff]  ;;  %v6840_v29 = vadd.f32 %v6839_v6, %v21072_v8  ;;  %v21798_v12 = vpop.f32.mrf.mxu1  ;;  %v23808_v52 = vcombine.low %v21192_v49, %v21209_v7  ;;  %v9678_v40 = vrot.slane %v9677_v2, 4  ;;  %v23809_v8 = vshll.u32 %v21611_v46, 16  ;;  %v15709_v49 = vld [vmem:[%s23311_s1 + $0x1460] ss:$8 sps:$4 sm:$0xff]  }
 0x326   : > { %v21795_v34 = vadd.f32 %v6838_v15, %v23805_v56  ;;  %23807 = vst [vmem:[#allocation11_spill] sm:$0xff] %v21798_v12  ;;  %v7926_v42 = vpop.f32.mrf.mxu0  ;;  %v9711_v3 = vrot.slane %v9709_v30, 4  ;;  %v9714_v15 = vrot.slane %v9712_v19, 5  ;;  %v23810_v56 = vld [vmem:[#allocation14_spill] sm:$0xff]  ;;  %v21819_v7 = vrot.slane %v9718_v62, 5 }
 0x327   : > { %10697 = vmatmul.mubr.bf16.vlgmr.msra.gmra.mxu0 %v23808_v52  ;;  %v9682_v6 = vrot.slane %v23809_v8, 5  ;;  %v7927_v45 = vadd.f32 %v7926_v42, %v21078_v41  ;;  %v8039_v12 = vpop.f32.mrf.mxu1  ;;  %v21821_v2 = vrot.slane %v9746_v36, 4  ;;  %v14030_v46 = vld [vmem:[%s16290_s29 + $0x1b4] sm:$0xf]  ;;  %v15712_v41 = vld [vmem:[%s23311_s1 + $0x1560] ss:$8 sps:$4 sm:$0xff]   ;;  %v23812_v62 = vsel %vm16324_vm2, %v21559_v39, %v21526_v21 }
 0x328   : > { %23806 = vst [vmem:[#allocation66_spill] sm:$0xff] %v21795_v34  ;;  %v21812_v34 = vadd.f32 %v6840_v29, %v23810_v56  ;;  %10810 = vmatmul.mubr.bf16.vlgmr.msra.gmra.mxu1 %v21266_v53  ;;  %11828 = vmatpush1.bf16.msra.mxu0 %v15703_v38  ;;  %v7928_v30 = vpop.f32.mrf.mxu0  ;;  %v15717_v53 = vld [vmem:[%s23311_s1 + $0x1454] ss:$8 sps:$4 sm:$0xff]   ;;  %v23811_v38 = vsel %vm16324_vm2, %v21662_v22, %v21545_v57  ;;  %v9726_v42 = vshll.u32 %v14030_v46, 16 }
 0x329   : > { %11941 = vmatpush1.bf16.msra.mxu1 %v15706_v54  ;;  %11829 = vmatprep.subr.bf16.mxu0 %v15711_v33  ;;  %v21840_v19 = vcombine.low %v23812_v62, %v23811_v38  ;;  %v21846_v36 = vsel %vm16324_vm2, %v21694_v59, %v21644_v20  ;;  %v21848_v54 = vrot.slane %v9657_v35, 4  ;;  %v9687_v33 = vor.u32 %v21784_v28, %v21763_v47  ;;  %v8041_v57 = vpop.f32.mrf.mxu1  ;;  %v15720_v39 = vld [vmem:[%s23311_s1 + $0x1554] ss:$8 sps:$4 sm:$0xff]   ;;  %v14033_v35 = vld [vmem:[%s16290_s29 + $0x1c8] sm:$0xf] }
 0x32a   : > { %v8040_v29 = vadd.f32 %v8039_v12, %v7927_v45  ;;  %v7929_v22 = vadd.f32 %v7928_v30, %v21105_v61  ;;  %11942 = vmatprep.subr.bf16.mxu1 %v15714_v31  ;;  %v23813_v21 = vcombine.high %v21271_v25, %v21295_v43  ;;  %v21859_v20 = vrot.slane %v9690_v37, 5  ;;  %v7930_v28 = vpop.f32.mrf.mxu0  ;;  %10819 = vmatprep.mubr.bf16.mxu1 %v23371_v0  ;;  %v23814_v30 = vld [vmem:[#allocation70_spill] sm:$0xff] }
 0x32b   : > { %v9752_v59 = vshll.u32 %v21567_v51, 16  ;;  %v21866_v61 = vsel %vm16324_vm2, %v9678_v40, %v9682_v6  ;;  %v9715_v12 = vor.u32 %v9714_v15, %v9711_v3  ;;  %v9723_v31 = vshrl.u32 %v14030_v46, 16  ;;  %v8043_v56 = vpop.f32.mrf.mxu1  ;;  %v15715_v51 = vld [vmem:[%s23311_s1 + $0x1450] ss:$8 sps:$4 sm:$0xff]   ;;  %v21881_v3 = vld [vmem:[%s16290_s29 + $0x1e8] sm:$0xff] }
 0x32c   : > { %10706 = vmatprep.mubr.bf16.mxu0 %v23813_v21  ;;  %v21869_v52 = vadd.f32 %v8040_v29, %v21102_v60  ;;  %v8042_v8 = vadd.f32 %v8041_v57, %v7929_v22  ;;  %v7931_v37 = vadd.f32 %v7930_v28, %v21127_v10  ;;  %11830 = vmatpush1.bf16.msra.mxu0 %v15709_v49  ;;  %v15718_v40 = vld [vmem:[%s23311_s1 + $0x1550] ss:$8 sps:$4 sm:$0xff]   ;;  %v7932_v60 = vpop.f32.mrf.mxu0  ;;  %v15723_v10 = vld [vmem:[%s23311_s1 + $0x1444] ss:$8 sps:$4 sm:$0xff]   ;;  %v21890_v45 = vrot.slane %v9687_v33, 4 }
 0x32d   : > { %v9749_v6 = vor.u32 %v21821_v2, %v21819_v7  ;;  %11943 = vmatpush1.bf16.msra.mxu1 %v15712_v41  ;;  %11831 = vmatprep.subr.bf16.mxu0 %v15717_v53  ;;  %v9663_v15 = vsel %vm16324_vm2, %v21848_v54, %v21763_v47  ;;  %v9732_v49 = vshll.u32 %v14033_v35, 16  ;;  %v9756_v46 = vshrl.u32 %v14033_v35, 16  ;;  %v8045_v53 = vpop.f32.mrf.mxu1  ;;  %v15726_v62 = vld [vmem:[%s23311_s1 + $0x1544] ss:$8 sps:$4 sm:$0xff]   ;;  %v15721_v57 = vld [vmem:[%s23311_s1 + $0x1440] ss:$8 sps:$4 sm:$0xff]  }
 0x32e   : > { %v21893_v2 = vadd.f32 %v8042_v8, %v23814_v30  ;;  %v8044_v38 = vadd.f32 %v8043_v56, %v7931_v37  ;;  %v7933_v41 = vadd.f32 %v7932_v60, %v21149_v26  ;;  %11944 = vmatprep.subr.bf16.mxu1 %v15720_v39  ;;  %v9754_v29 = vrot.slane %v9752_v59, 5  ;;  %v7936_v22 = vpop.f32.mrf.mxu0  ;;  %v14039_v47 = vld [vmem:[%s16290_s29 + $0x1f0] sm:$0xf]  ;;  %v22008_v54 = vld [vmem:[%s16290_s29 + $0x204] sm:$0xf] }
 0x32f   : > { %v23815_v33 = vcombine.low %v21271_v25, %v21295_v43  ;;  %v9716_v21 = vrot.slane %v9715_v12, 4  ;;  %v21905_v35 = vrot.slane %v9723_v31, 4  ;;  %v9728_v26 = vrot.slane %v9726_v42, 5  ;;  %v8049_v37 = vpop.f32.mrf.mxu1  ;;  %v15724_v25 = vld [vmem:[%s23311_s1 + $0x1540] ss:$8 sps:$4 sm:$0xff]  }
 0x330   : > { %v9781_v39 = vshrl.u32 %v21881_v3, 16  ;;  %v21909_v28 = vadd.f32 %v8044_v38, %v21146_v5  ;;  %v8046_v59 = vadd.f32 %v8045_v53, %v7933_v41  ;;  %v7937_v8 = vadd.f32 %v7936_v22, %v21170_v27  ;;  %10820 = vmatmul.mubr.bf16.gmra.mxu1 %v21506_v13  ;;  %11832 = vmatpush1.bf16.msra.mxu0 %v15715_v51  ;;  %v14036_v12 = vld [vmem:[%s16290_s29 + $0x1dc] sm:$0x1]  ;;  %v7938_v31 = vpop.f32.mrf.mxu0  ;;  %v23818_v41 = vld [vmem:[#allocation42_spill] sm:$0xff]  ;;  %v15727_v22 = vld [vmem:[%s23311_s1 + $0x1430] ss:$8 sps:$4 sm:$0xff]  }
 0x331   : > { %10707 = vmatmul.mubr.bf16.gmra.mxu0 %v23815_v33  ;;  %v9750_v43 = vrot.slane %v9749_v6, 4  ;;  %11945 = vmatpush1.bf16.msra.mxu1 %v15718_v40  ;;  %v15729_v5 = vld [vmem:[%s23311_s1 + $0x1434] ss:$8 sps:$4 sm:$0xff]   ;;  %v9693_v27 = vsel %vm16324_vm2, %v21890_v45, %v21859_v20  ;;  %v21924_v13 = vrot.slane %v9732_v49, 5  ;;  %v9758_v42 = vrot.slane %v9756_v46, 4  ;;  %v8051_v60 = vpop.f32.mrf.mxu1  ;;  %v23817_v46 = vld [vmem:[#allocation13_spill] sm:$0xff] }
 0x332   : > { %11833 = vmatprep.subr.bf16.mxu0 %v15723_v10  ;;  %v9784_v56 = vshll.u32 %v21881_v3, 16  ;;  %v21928_v51 = vadd.f32 %v8046_v59, %v21167_v32  ;;  %v8050_v40 = vadd.f32 %v8049_v37, %v7937_v8  ;;  %v7939_v6 = vadd.f32 %v7938_v31, %v21199_v55  ;;  %11946 = vmatprep.subr.bf16.mxu1 %v15726_v62  ;;  %v15732_v20 = vld [vmem:[%s23311_s1 + $0x1534] ss:$8 sps:$4 sm:$0xff]   ;;  %v7940_v45 = vpop.f32.mrf.mxu0  ;;  %v15738_v31 = vld [vmem:[%s23311_s1 + $0x1524] ss:$8 sps:$4 sm:$0xff]  }
 0x333   : > { %v23816_v10 = vcombine.high %v21473_v24, %v21477_v63  ;;  %10829 = vmatprep.mubr.bf16.mxu1 %v23371_v0  ;;  %v21941_v32 = vsel %vm16324_vm2, %v9716_v21, %v21819_v7  ;;  %v9729_v55 = vor.u32 %v9728_v26, %v21905_v35  ;;  %v9762_v3 = vshll.u32 %v14036_v12, 16  ;;  %v8053_v62 = vpop.f32.mrf.mxu1  ;;  %v15730_v7 = vld [vmem:[%s23311_s1 + $0x1530] ss:$8 sps:$4 sm:$0xff]   ;;  %v15735_v35 = vld [vmem:[%s23311_s1 + $0x1424] ss:$8 sps:$4 sm:$0xff]  }
 0x334   : > { %v21944_v49 = vrot.slane %v9781_v39, 4  ;;  %v21947_v30 = vadd.f32 %v8050_v40, %v23817_v46  ;;  %v8052_v38 = vadd.f32 %v8051_v60, %v7939_v6  ;;  %v7941_v53 = vadd.f32 %v7940_v45, %v23818_v41  ;;  %11834 = vmatpush1.bf16.msra.mxu0 %v15721_v57  ;;  %v7942_v21 = vpop.f32.mrf.mxu0  ;;  %v23819_v8 = vld [vmem:[#allocation23_spill] sm:$0xff]  ;;  %v15736_v40 = vld [vmem:[%s23311_s1 + $0x1520] ss:$8 sps:$4 sm:$0xff]  }
 0x335   : > { %10716 = vmatprep.mubr.bf16.mxu0 %v23816_v10  ;;  %v21958_v33 = vsel %vm16324_vm2, %v9750_v43, %v9754_v29  ;;  %11947 = vmatpush1.bf16.msra.mxu1 %v15724_v25  ;;  %v9759_v57 = vor.u32 %v9758_v42, %v21924_v13  ;;  %v21964_v26 = vrot.slane %v9784_v56, 5  ;;  %v9790_v39 = vshll.u32 %v21608_v4, 16  ;;  %v23820_v43 = vld [vmem:[#allocation44_spill] sm:$0xff]  ;;  %v8055_v12 = vpop.f32.mrf.mxu1  ;;  %v15733_v56 = vld [vmem:[%s23311_s1 + $0x1420] ss:$8 sps:$4 sm:$0xff]   ;;  %v23823_v46 = vld [vmem:[#allocation27_spill] sm:$0xff] }
 0x336   : > { %11835 = vmatprep.subr.bf16.mxu0 %v15729_v5  ;;  %v9818_v59 = vshrl.u32 %v21608_v4, 16  ;;  %v21969_v37 = vadd.f32 %v8052_v38, %v23819_v8  ;;  %v8054_v29 = vadd.f32 %v8053_v62, %v7941_v53  ;;  %v7943_v25 = vadd.f32 %v7942_v21, %v23820_v43  ;;  %11948 = vmatprep.subr.bf16.mxu1 %v15732_v20  ;;  %v7946_v42 = vpop.f32.mrf.mxu0  ;;  %v23822_v10 = vld [vmem:[#allocation24_spill] sm:$0xff] }
 0x337   : > { %v14157_v5 = vcombine.low %v21846_v36, %v21866_v61  ;;  %v23821_v4 = vcombine.low %v21473_v24, %v21477_v63  ;;  %v14158_v6 = vcombine.high %v21846_v36, %v21866_v61  ;;  %v21993_v60 = vcombine.low %v9663_v15, %v9693_v27  ;;  %v8059_v41 = vpop.f32.mrf.mxu1  ;;  %v15741_v27 = vld [vmem:[%s23311_s1 + $0x1414] ss:$8 sps:$4 sm:$0xff]  }
 0x338   : > { %v21997_v63 = vrot.slane %v9729_v55, 4  ;;  %v22000_v20 = vadd.f32 %v8054_v29, %v23822_v10  ;;  %v8056_v45 = vadd.f32 %v8055_v12, %v7943_v25  ;;  %v7947_v38 = vadd.f32 %v7946_v42, %v23823_v46  ;;  %10830 = vmatmul.mubr.bf16.gmra.mxu1 %v21524_v44  ;;  %11836 = vmatpush1.bf16.msra.mxu0 %v15727_v22  ;;  %v7948_v15 = vpop.f32.mrf.mxu0  ;;  %v23825_v29 = vld [vmem:[#allocation29_spill] sm:$0xff]  ;;  %v23827_v12 = vld [vmem:[#allocation26_spill] sm:$0xff]  ;;  %v15739_v46 = vld [vmem:[%s23311_s1 + $0x1410] ss:$8 sps:$4 sm:$0xff]  }
 0x339   : > { %10717 = vmatmul.mubr.bf16.gmra.mxu0 %v23821_v4  ;;  %v22004_v53 = vrot.slane %v9762_v3, 5  ;;  %11949 = vmatpush1.bf16.msra.mxu1 %v15730_v7  ;;  %v22013_v55 = vrot.slane %v9759_v57, 4  ;;  %v9787_v62 = vor.u32 %v21964_v26, %v21944_v49  ;;  %v22017_v21 = vrot.slane %v9790_v39, 5  ;;  %v23824_v3 = vld [vmem:[#allocation25_spill] sm:$0xff]  ;;  %v8061_v43 = vpop.f32.mrf.mxu1  ;;  %v15744_v57 = vld [vmem:[%s23311_s1 + $0x1514] ss:$8 sps:$4 sm:$0xff]  }
 0x33a   : > { %11837 = vmatprep.subr.bf16.mxu0 %v15735_v35  ;;  %v9820_v44 = vrot.slane %v9818_v59, 4  ;;  %v22020_v22 = vadd.f32 %v8056_v45, %v23824_v3  ;;  %v8060_v8 = vadd.f32 %v8059_v41, %v7947_v38  ;;  %v7949_v7 = vadd.f32 %v7948_v15, %v23825_v29  ;;  %11950 = vmatprep.subr.bf16.mxu1 %v15738_v31  ;;  %v7950_v49 = vpop.f32.mrf.mxu0  ;;  %v23828_v4 = vld [vmem:[#allocation72_spill] sm:$0xff]  ;;  %v14047_v3 = vld [vmem:[%s16290_s29 + $0x224] sm:$0xff] }
 0x33b   : > { %v23826_v35 = vcombine.high %v21537_v23, %v21541_v16  ;;  %10839 = vmatprep.mubr.bf16.mxu1 %v23371_v0  ;;  %v9824_v26 = vshll.u32 %v21617_v14, 16  ;;  %v9795_v39 = vshrl.u32 %v14039_v47, 16  ;;  %v9798_v59 = vshll.u32 %v14039_v47, 16  ;;  %v8063_v45 = vpop.f32.mrf.mxu1  ;;  %v15742_v41 = vld [vmem:[%s23311_s1 + $0x1510] ss:$8 sps:$4 sm:$0xff]  }
 0x33c   : > { %v9804_v25 = vshll.u32 %v22008_v54, 16  ;;  %v22033_v42 = vadd.f32 %v8060_v8, %v23827_v12  ;;  %v8062_v31 = vadd.f32 %v8061_v43, %v7949_v7  ;;  %v7951_v10 = vadd.f32 %v7950_v49, %v23828_v4  ;;  %11838 = vmatpush1.bf16.msra.mxu0 %v15733_v56  ;;  %v7952_v38 = vpop.f32.mrf.mxu0  ;;  %v15747_v47 = vld [vmem:[%s23311_s1 + $0x1404] ss:$8 sps:$4 sm:$0xff]   ;;  %v23829_v8 = vld [vmem:[#allocation71_spill] sm:$0xff]  ;;  %v23832_v4 = vld [vmem:[#allocation28_spill] sm:$0xff] }
 0x33d   : > { %10726 = vmatprep.mubr.bf16.mxu0 %v23826_v35  ;;  %v14163_v14 = vcombine.high %v21941_v32, %v21958_v33  ;;  %11951 = vmatpush1.bf16.msra.mxu1 %v15736_v40  ;;  %v9735_v56 = vsel %vm16324_vm2, %v21997_v63, %v21924_v13  ;;  %v9765_v40 = vsel %vm16324_vm2, %v22013_v55, %v22004_v53  ;;  %v9788_v15 = vrot.slane %v9787_v62, 4  ;;  %v23830_v43 = vld [vmem:[#allocation30_spill] sm:$0xff]  ;;  %v8065_v49 = vpop.f32.mrf.mxu1 }
 0x33e   : > { %11839 = vmatprep.subr.bf16.mxu0 %v15741_v27  ;;  %v9821_v27 = vor.u32 %v9820_v44, %v22017_v21  ;;  %v22058_v29 = vadd.f32 %v8062_v31, %v23829_v8  ;;  %v8064_v7 = vadd.f32 %v8063_v45, %v7951_v10  ;;  %v7953_v35 = vadd.f32 %v7952_v38, %v23830_v43  ;;  %v15750_v13 = vld [vmem:[%s23311_s1 + $0x1504] ss:$8 sps:$4 sm:$0xff]   ;;  %v7956_v53 = vpop.f32.mrf.mxu0  ;;  %v15745_v62 = vld [vmem:[%s23311_s1 + $0x1400] ss:$8 sps:$4 sm:$0xff]   ;;  %v23833_v45 = vld [vmem:[#allocation31_spill] sm:$0xff] }
 0x33f   : > { %11952 = vmatprep.subr.bf16.mxu1 %v15744_v57  ;;  %v9828_v63 = vshrl.u32 %v22008_v54, 16  ;;  %v23831_v55 = vcombine.low %v21537_v23, %v21541_v16  ;;  %v9826_v44 = vrot.slane %v9824_v26, 5  ;;  %v22071_v12 = vrot.slane %v9795_v39, 4  ;;  %v8069_v8 = vpop.f32.mrf.mxu1  ;;  %v15748_v23 = vld [vmem:[%s23311_s1 + $0x1500] ss:$8 sps:$4 sm:$0xff]  }
 0x340   : > { %v22073_v57 = vrot.slane %v9798_v59, 5  ;;  %v22075_v31 = vrot.slane %v9804_v25, 5  ;;  %v22078_v10 = vadd.f32 %v8064_v7, %v23832_v4  ;;  %v8066_v54 = vadd.f32 %v8065_v49, %v7953_v35  ;;  %10840 = vmatmul.mubr.bf16.gmra.mxu1 %v21840_v19  ;;  %11840 = vmatpush1.bf16.msra.mxu0 %v15739_v46  ;;  %v14045_v16 = vld [vmem:[%s16290_s29 + $0x218] sm:$0x1]  ;;  %v7958_v39 = vpop.f32.mrf.mxu0  ;;  %v15753_v59 = vld [vmem:[%s23311_s1 + $0x14f4] ss:$8 sps:$4 sm:$0xff]  }
 0x341   : > { %10727 = vmatmul.mubr.bf16.gmra.mxu0 %v23831_v55  ;;  %v7957_v38 = vadd.f32 %v7956_v53, %v23833_v45  ;;  %v9853_v26 = vshrl.u32 %v14047_v3, 16  ;;  %11953 = vmatpush1.bf16.msra.mxu1 %v15742_v41  ;;  %v9822_v25 = vrot.slane %v9821_v27, 4  ;;  %v9856_v7 = vshll.u32 %v14047_v3, 16  ;;  %v23834_v46 = vld [vmem:[#allocation46_spill] sm:$0xff]  ;;  %v23835_v53 = vld [vmem:[#allocation32_spill] sm:$0xff]  ;;  %v8071_v4 = vpop.f32.mrf.mxu1 }
 0x342   : > { %11841 = vmatprep.subr.bf16.mxu0 %v15747_v47  ;;  %v9862_v43 = vshll.u32 %v21688_v11, 16  ;;  %v9890_v19 = vshrl.u32 %v21688_v11, 16  ;;  %v22092_v35 = vadd.f32 %v8066_v54, %v23834_v46  ;;  %v7959_v55 = vadd.f32 %v7958_v39, %v23835_v53  ;;  %11954 = vmatprep.subr.bf16.mxu1 %v15750_v13  ;;  %v15756_v41 = vld [vmem:[%s23311_s1 + $0x15f4] ss:$8 sps:$4 sm:$0xff]   ;;  %v7960_v11 = vpop.f32.mrf.mxu0  ;;  %v15751_v27 = vld [vmem:[%s23311_s1 + $0x14f0] ss:$8 sps:$4 sm:$0xff]  }
 0x343   : > { %v8070_v49 = vadd.f32 %v8069_v8, %v7957_v38  ;;  %10736 = vmatprep.mubr.bf16.mxu0 %v14158_v6  ;;  %v9830_v47 = vrot.slane %v9828_v63, 4  ;;  %10849 = vmatprep.mubr.bf16.mxu1 %v23371_v0  ;;  %v15754_v3 = vld [vmem:[%s23311_s1 + $0x15f0] ss:$8 sps:$4 sm:$0xff]   ;;  %v22108_v13 = vcombine.low %v9735_v56, %v9765_v40  ;;  %v22113_v6 = vsel %vm16324_vm2, %v9788_v15, %v22017_v21  ;;  %v23837_v39 = vld [vmem:[#allocation5_spill] sm:$0xff]  ;;  %v8073_v53 = vpop.f32.mrf.mxu1  ;;  %v14048_v56 = vld [vmem:[%s16290_s29 + $0x22c] sm:$0xf] }
 0x344   : > { %v9801_v63 = vor.u32 %v22073_v57, %v22071_v12  ;;  %v9834_v54 = vshll.u32 %v14045_v16, 16  ;;  %v23836_v45 = vld [vmem:[#allocation48_spill] sm:$0xff]  ;;  %v8072_v8 = vadd.f32 %v8071_v4, %v7959_v55  ;;  %v7961_v46 = vadd.f32 %v7960_v11, %v23837_v39  ;;  %11842 = vmatpush1.bf16.msra.mxu0 %v15745_v62  ;;  %v14051_v40 = vld [vmem:[%s16290_s29 + $0x240] sm:$0xf]  ;;  %v7962_v24 = vpop.f32.mrf.mxu0  ;;  %v15759_v21 = vld [vmem:[%s23311_s1 + $0x14e4] ss:$8 sps:$4 sm:$0xff]  }
 0x345   : > { %v22118_v38 = vadd.f32 %v8070_v49, %v23836_v45  ;;  %v22121_v58 = vrot.slane %v9853_v26, 4  ;;  %11955 = vmatpush1.bf16.msra.mxu1 %v15748_v23  ;;  %11843 = vmatprep.subr.bf16.mxu0 %v15753_v59  ;;  %v22130_v15 = vsel %vm16324_vm2, %v9822_v25, %v9826_v44  ;;  %v9858_v12 = vrot.slane %v9856_v7, 5  ;;  %v23838_v62 = vld [vmem:[#allocation49_spill] sm:$0xff]  ;;  %v23839_v55 = vld [vmem:[#allocation50_spill] sm:$0xff]  ;;  %v8075_v4 = vpop.f32.mrf.mxu1  ;;  %v23840_v45 = vld [vmem:[#allocation51_spill] sm:$0xff] }
 0x346   : > { %v22132_v57 = vrot.slane %v9862_v43, 5  ;;  %v9892_v16 = vrot.slane %v9890_v19, 4  ;;  %v22135_v26 = vadd.f32 %v8072_v8, %v23838_v62  ;;  %v8074_v49 = vadd.f32 %v8073_v53, %v7961_v46  ;;  %11956 = vmatprep.subr.bf16.mxu1 %v15756_v41  ;;  %v15762_v59 = vld [vmem:[%s23311_s1 + $0x15e4] ss:$8 sps:$4 sm:$0xff]   ;;  %v7966_v44 = vpop.f32.mrf.mxu0  ;;  %v23841_v41 = vld [vmem:[#allocation52_spill] sm:$0xff] }
 0x347   : > { %v7963_v23 = vadd.f32 %v7962_v24, %v23839_v55  ;;  %v9831_v11 = vor.u32 %v9830_v47, %v22075_v31  ;;  %v9867_v25 = vshrl.u32 %v14048_v56, 16  ;;  %v9870_v7 = vshll.u32 %v14048_v56, 16  ;;  %v8079_v46 = vpop.f32.mrf.mxu1  ;;  %v15757_v47 = vld [vmem:[%s23311_s1 + $0x14e0] ss:$8 sps:$4 sm:$0xff]   ;;  %v15765_v53 = vld [vmem:[%s23311_s1 + $0x14d4] ss:$8 sps:$4 sm:$0xff]  }
 0x348   : > { %v9876_v43 = vshll.u32 %v14051_v40, 16  ;;  %v9900_v19 = vshrl.u32 %v14051_v40, 16  ;;  %v22146_v8 = vadd.f32 %v8074_v49, %v23840_v45  ;;  %v7967_v39 = vadd.f32 %v7966_v44, %v23841_v41  ;;  %10850 = vmatmul.mubr.bf16.gmra.mxu1 %v21993_v60  ;;  %11844 = vmatpush2.bf16.msra.mxu0 %v15751_v27  ;;  %v7968_v61 = vpop.f32.mrf.mxu0  ;;  %v23842_v40 = vld [vmem:[#allocation63_spill] sm:$0xff] }
 0x349   : > { %10737 = vmatmul.mubr.bf16.gmra.mxu0 %v14157_v5  ;;  %v8076_v24 = vadd.f32 %v8075_v4, %v7963_v23  ;;  %v22153_v36 = vrot.slane %v9834_v54, 5  ;;  %11957 = vmatpush2.bf16.msra.mxu1 %v15754_v3  ;;  %v15760_v5 = vld [vmem:[%s23311_s1 + $0x15e0] ss:$8 sps:$4 sm:$0xff]   ;;  %v9802_v56 = vrot.slane %v9801_v63, 4  ;;  %v9859_v60 = vor.u32 %v9858_v12, %v22121_v58  ;;  %v8081_v23 = vpop.f32.mrf.mxu1  ;;  %v15768_v58 = vld [vmem:[%s23311_s1 + $0x15d4] ss:$8 sps:$4 sm:$0xff]  }
 0x34a   : > { %11845 = vmatprep.subr.bf16.mxu0 %v15759_v21  ;;  %v9893_v27 = vor.u32 %v9892_v16, %v22132_v57  ;;  %v9896_v62 = vshll.u32 %v23842_v40, 16  ;;  %v23843_v54 = vld [vmem:[#allocation33_spill] sm:$0xff]  ;;  %v8080_v3 = vadd.f32 %v8079_v46, %v7967_v39  ;;  %v23844_v21 = vld [vmem:[#allocation54_spill] sm:$0xff]  ;;  %11958 = vmatprep.subr.bf16.mxu1 %v15762_v59  ;;  %v9832_v63 = vrot.slane %v9831_v11, 4  ;;  %v7970_v12 = vpop.f32.mrf.mxu0  ;;  %v23846_v39 = vld [vmem:[#allocation56_spill] sm:$0xff] }
 0x34b   : > { %v22165_v49 = vadd.f32 %v8076_v24, %v23843_v54  ;;  %v7969_v55 = vadd.f32 %v7968_v61, %v23844_v21  ;;  %10746 = vmatprep.mubr.bf16.mxu0 %v14163_v14  ;;  %10859 = vmatprep.mubr.bf16.mxu1 %v23371_v0  ;;  %v9869_v16 = vrot.slane %v9867_v25, 4  ;;  %v9872_v4 = vrot.slane %v9870_v7, 5  ;;  %v23845_v24 = vld [vmem:[#allocation53_spill] sm:$0xff]  ;;  %v8083_v46 = vpop.f32.mrf.mxu1  ;;  %v15763_v11 = vld [vmem:[%s23311_s1 + $0x14d0] ss:$8 sps:$4 sm:$0xff]   ;;  %v23847_v21 = vld [vmem:[#allocation34_spill] sm:$0xff] }
 0x34c   : > { %v22175_v44 = vrot.slane %v9876_v43, 5  ;;  %v9902_v45 = vrot.slane %v9900_v19, 4  ;;  %v22178_v59 = vadd.f32 %v8080_v3, %v23845_v24  ;;  %v7971_v14 = vadd.f32 %v7970_v12, %v23846_v39  ;;  %11846 = vmatpush2.bf16.msra.mxu0 %v15757_v47  ;;  %v15766_v25 = vld [vmem:[%s23311_s1 + $0x15d0] ss:$8 sps:$4 sm:$0xff]   ;;  %v14054_v43 = vld [vmem:[%s16290_s29 + $0x254] sm:$0x1]  ;;  %v7972_v19 = vpop.f32.mrf.mxu0 }
 0x34d   : > { %v8082_v41 = vadd.f32 %v8081_v23, %v7969_v55  ;;  %v14168_v7 = vcombine.high %v22113_v6, %v22130_v15  ;;  %11959 = vmatpush2.bf16.msra.mxu1 %v15760_v5  ;;  %11847 = vmatprep.subr.bf16.mxu0 %v15765_v53  ;;  %v15771_v61 = vld [vmem:[%s23311_s1 + $0x14c4] ss:$8 sps:$4 sm:$0xff]   ;;  %v9807_v47 = vsel %vm16324_vm2, %v9802_v56, %v22075_v31  ;;  %v9860_v40 = vrot.slane %v9859_v60, 4  ;;  %v23849_v12 = vld [vmem:[#allocation15_spill] sm:$0xff]  ;;  %v8085_v5 = vpop.f32.mrf.mxu1 }
 0x34e   : > { %v9894_v54 = vrot.slane %v9893_v27, 4  ;;  %v9898_v3 = vrot.slane %v9896_v62, 5  ;;  %v8084_v23 = vadd.f32 %v8083_v46, %v7971_v14  ;;  %v7973_v24 = vadd.f32 %v7972_v19, %v23849_v12  ;;  %11960 = vmatprep.subr.bf16.mxu1 %v15768_v58  ;;  %v15774_v53 = vld [vmem:[%s23311_s1 + $0x15c4] ss:$8 sps:$4 sm:$0xff]   ;;  %v7976_v31 = vpop.f32.mrf.mxu0 }
 0x34f   : > { %v22197_v55 = vadd.f32 %v8082_v41, %v23847_v21  ;;  %v9837_v39 = vsel %vm16324_vm2, %v9832_v63, %v22153_v36  ;;  %v23850_v56 = vcombine.low %v21941_v32, %v21958_v33  ;;  %v14167_v60 = vcombine.low %v22113_v6, %v22130_v15  ;;  %v23851_v41 = vld [vmem:[#allocation55_spill] sm:$0xff]  ;;  %v23853_v19 = vld [vmem:[#allocation17_spill] sm:$0xff]  ;;  %v8089_v12 = vpop.f32.mrf.mxu1 }
 0x350   : > { %v9873_v27 = vor.u32 %v9872_v4, %v9869_v16  ;;  %v9903_v62 = vor.u32 %v9902_v45, %v22175_v44  ;;  %v9906_v58 = vshll.u32 %v14054_v43, 16  ;;  %v22213_v14 = vadd.f32 %v8084_v23, %v23851_v41  ;;  %10860 = vmatmul.mubr.bf16.gmra.mxu1 %v22108_v13  ;;  %11848 = vmatpush2.bf16.msra.mxu0 %v15763_v11  ;;  %v15769_v32 = vld [vmem:[%s23311_s1 + $0x14c0] ss:$8 sps:$4 sm:$0xff]   ;;  %v7978_v33 = vpop.f32.mrf.mxu0  ;;  %v15777_v36 = vld [vmem:[%s23311_s1 + $0x14b4] ss:$8 sps:$4 sm:$0xff]  }
 0x351   : > { %23848 = vst [vmem:[#allocation68_spill] sm:$0xff] %v22197_v55  ;;  %10747 = vmatmul.mubr.bf16.gmra.mxu0 %v23850_v56  ;;  %v8086_v46 = vadd.f32 %v8085_v5, %v7973_v24  ;;  %v7977_v21 = vadd.f32 %v7976_v31, %v23853_v19  ;;  %11961 = vmatpush2.bf16.msra.mxu1 %v15766_v25  ;;  %v15772_v6 = vld [vmem:[%s23311_s1 + $0x15c0] ss:$8 sps:$4 sm:$0xff]   ;;  %v23854_v16 = vld [vmem:[#allocation35_spill] sm:$0xff]  ;;  %v23856_v11 = vld [vmem:[#allocation16_spill] sm:$0xff]  ;;  %v8091_v43 = vpop.f32.mrf.mxu1 }
 0x352   : > { %23852 = vst [vmem:[#allocation69_spill] sm:$0xff] %v22213_v14  ;;  %11849 = vmatprep.subr.bf16.mxu0 %v15771_v61  ;;  %v14169_v15 = vcombine.low %v9807_v47, %v9837_v39  ;;  %v22229_v13 = vsel %vm16324_vm2, %v9860_v40, %v22132_v57  ;;  %v22233_v63 = vsel %vm16324_vm2, %v9894_v54, %v9898_v3  ;;  %v15780_v61 = vld [vmem:[%s23311_s1 + $0x15b4] ss:$8 sps:$4 sm:$0xff]   ;;  %v14256_v47 = vld [vmem:[%s16290_s29 + $0x80] sm:$0xee]  ;;  %v7980_v40 = vpop.f32.mrf.mxu0  ;;  %v22245_v54 = vrot.slane %v9873_v27, 4 }
 0x353   : > { %v22236_v4 = vadd.f32 %v8086_v46, %v23854_v16  ;;  %v8090_v45 = vadd.f32 %v8089_v12, %v7977_v21  ;;  %v7979_v25 = vadd.f32 %v7978_v33, %v23856_v11  ;;  %11962 = vmatprep.subr.bf16.mxu1 %v15774_v53  ;;  %10756 = vmatprep.mubr.bf16.mxu0 %v14168_v7  ;;  %v14255_v57 = vld [vmem:[%s16290_s29 + $0x78] sm:$0xee]  ;;  %v22247_v3 = vrot.slane %v9903_v62, 4  ;;  %v15923_v24 = vld [vmem:[%s16290_s29 + $0x8c] sm:$0xff]  ;;  %v23857_v53 = vld [vmem:[#allocation57_spill] sm:$0xff]  ;;  %v8093_v41 = vpop.f32.mrf.mxu1 }
 0x354   : > { %10869 = vmatprep.mubr.bf16.mxu1 %v23371_v0  ;;  %v22249_v23 = vrot.slane %v9906_v58, 5  ;;  %v11020_v5 = vrot.slane %v15923_v24, 5  ;;  %v23859_v31 = vld [vmem:[#allocation58_spill] sm:$0xff]  ;;  %11850 = vmatpush2.bf16.msra.mxu0 %v15769_v32  ;;  %v15775_v46 = vld [vmem:[%s23311_s1 + $0x14b0] ss:$8 sps:$4 sm:$0xff]   ;;  %v7982_v62 = vpop.f32.mrf.mxu0  ;;  %v14173_v32 = vcombine.high %v22229_v13, %v22233_v63  ;;  %v14279_v33 = vrot.slane %v14255_v57, 9 }
 0x355   : > { %23855 = vst [vmem:[#allocation39_spill] sm:$0xff] %v22236_v4  ;;  %v22253_v7 = vadd.f32 %v8090_v45, %v23857_v53  ;;  %v8092_v39 = vadd.f32 %v8091_v43, %v7979_v25  ;;  %v7981_v56 = vadd.f32 %v7980_v40, %v23859_v31  ;;  %v15924_v27 = vld [vmem:[%s16290_s29 + $0x94] sm:$0xff]  ;;  %11963 = vmatpush2.bf16.msra.mxu1 %v15772_v6  ;;  %v15783_v21 = vld [vmem:[%s23311_s1 + $0x14a4] ss:$8 sps:$4 sm:$0xff]   ;;  %v14280_v16 = vrot.slane %v14256_v47, 9  ;;  %v8095_v43 = vpop.f32.mrf.mxu1 }
 0x356   : > { %v11024_v19 = vrot.slane %v15924_v27, 5  ;;  %11851 = vmatprep.subr.bf16.mxu0 %v15777_v36  ;;  %v15778_v58 = vld [vmem:[%s23311_s1 + $0x15b0] ss:$8 sps:$4 sm:$0xff]   ;;  %v23860_v6 = vld [vmem:[#allocation41_spill] sm:$0xff]  ;;  %11964 = vmatprep.subr.bf16.mxu1 %v15780_v61  ;;  %v7986_v31 = vpop.f32.mrf.mxu0  ;;  %v9879_v57 = vsel %vm16324_vm2, %v22245_v54, %v22175_v44  ;;  %v9909_v47 = vsel %vm16324_vm2, %v22247_v3, %v22249_v23  ;;  %v11030_v61 = vrot.slane %v11020_v5, 4 }
 0x357   : > { %23858 = vst [vmem:[#allocation12_spill] sm:$0xff] %v22253_v7  ;;  %v22271_v45 = vadd.f32 %v8092_v39, %v23860_v6  ;;  %v8094_v36 = vadd.f32 %v8093_v41, %v7981_v56  ;;  %v23862_v11 = vld [vmem:[#allocation36_spill] sm:$0xff]  ;;  %v15786_v40 = vld [vmem:[%s23311_s1 + $0x15a4] ss:$8 sps:$4 sm:$0xff]   ;;  %v15781_v44 = vld [vmem:[%s23311_s1 + $0x14a0] ss:$8 sps:$4 sm:$0xff]  }
 0x358   : > { %v7983_v25 = vadd.f32 %v7982_v62, %v23862_v11  ;;  %v15925_v24 = vld [vmem:[%s16290_s29 + $0xa0] sm:$0x11]  ;;  %v15926_v39 = vld [vmem:[%s16290_s29 + $0xa8] sm:$0x11]  ;;  %v23863_v41 = vld [vmem:[#allocation60_spill] sm:$0xff]  ;;  %v8099_v11 = vpop.f32.mrf.mxu1  ;;  %10870 = vmatmul.mubr.bf16.gmra.mxu1 %v14169_v15  ;;  %11852 = vmatpush2.bf16.msra.mxu0 %v15775_v46  ;;  %v11033_v17 = vrot.slane %v11024_v19, 4  ;;  %v7988_v3 = vpop.f32.mrf.mxu0  ;;  %v22303_v15 = vsel %vm17271_vm5, %v14279_v33, %v11020_v5  ;;  %v22307_v46 = vsel %vm17271_vm5, %v14280_v16, %v11024_v19 }
 0x359   : > { %23861 = vst [vmem:[#allocation22_spill] sm:$0xff] %v22271_v45  ;;  %v11031_v53 = vrot.slane %v15925_v24, 5  ;;  %10757 = vmatmul.mubr.bf16.gmra.mxu0 %v14167_v60  ;;  %v11034_v56 = vrot.slane %v15926_v39, 5  ;;  %v22288_v27 = vadd.f32 %v8094_v36, %v23863_v41  ;;  %v23865_v6 = vld [vmem:[#allocation18_spill] sm:$0xff]  ;;  %v14258_v54 = vld [vmem:[%s16290_s29 + $0xb4] sm:$0xee]  ;;  %11965 = vmatpush2.bf16.msra.mxu1 %v15778_v58  ;;  %v14174_v16 = vcombine.low %v9879_v57, %v9909_v47 }
 0x35a   : > { %v8096_v62 = vadd.f32 %v8095_v43, %v7983_v25  ;;  %v7987_v60 = vadd.f32 %v7986_v31, %v23865_v6  ;;  %11853 = vmatprep.subr.bf16.mxu0 %v15783_v21  ;;  %v15784_v23 = vld [vmem:[%s23311_s1 + $0x15a0] ss:$8 sps:$4 sm:$0xff]   ;;  %v15789_v36 = vld [vmem:[%s23311_s1 + $0x1494] ss:$8 sps:$4 sm:$0xff]   ;;  %v8101_v12 = vpop.f32.mrf.mxu1  ;;  %11966 = vmatprep.subr.bf16.mxu1 %v15786_v40  ;;  %v7990_v33 = vpop.f32.mrf.mxu0  ;;  %v15787_v57 = vld [vmem:[%s23311_s1 + $0x1490] ss:$8 sps:$4 sm:$0xff]  }
 0x35b   : > { %23864 = vst [vmem:[#allocation45_spill] sm:$0xff] %v22288_v27  ;;  %v15927_v58 = vld [vmem:[%s16290_s29 + $0xc8] sm:$0xff]  ;;  %v15928_v21 = vld [vmem:[%s16290_s29 + $0xd0] sm:$0xff]  ;;  %v23868_v41 = vld [vmem:[#allocation61_spill] sm:$0xff]  ;;  %10766 = vmatprep.mubr.bf16.mxu0 %v14173_v32  ;;  %10879 = vmatprep.mubr.bf16.mxu1 %v23371_v0  ;;  %v22337_v47 = vsel %vm17271_vm5, %v11033_v17, %v11034_v56 }
 0x35c   : > { %v11041_v25 = vrot.slane %v15927_v58, 5  ;;  %v11045_v43 = vrot.slane %v15928_v21, 5  ;;  %v23866_v24 = vld [vmem:[#allocation59_spill] sm:$0xff]  ;;  %v8100_v39 = vadd.f32 %v8099_v11, %v7987_v60  ;;  %v7989_v6 = vadd.f32 %v7988_v3, %v23868_v41  ;;  %v14259_v19 = vld [vmem:[%s16290_s29 + $0xbc] sm:$0xee]  ;;  %v23871_v21 = vld [vmem:[#allocation38_spill] sm:$0xff]  ;;  %v8103_v41 = vpop.f32.mrf.mxu1  ;;  %11854 = vmatpush2.bf16.msra.mxu0 %v15781_v44 }
 0x35d   : > { %v22312_v31 = vadd.f32 %v8096_v62, %v23866_v24  ;;  %v15792_v5 = vld [vmem:[%s23311_s1 + $0x1594] ss:$8 sps:$4 sm:$0xff]   ;;  %v22322_v58 = vsel %vm17271_vm5, %v11030_v61, %v11031_v53  ;;  %v14282_v62 = vrot.slane %v14258_v54, 9  ;;  %v23869_v3 = vld [vmem:[#allocation37_spill] sm:$0xff]  ;;  %v7991_v24 = vadd.f32 %v7990_v33, %v23871_v21  ;;  %v15790_v53 = vld [vmem:[%s23311_s1 + $0x1590] ss:$8 sps:$4 sm:$0xff]   ;;  %11967 = vmatpush2.bf16.msra.mxu1 %v15784_v23  ;;  %v7992_v61 = vpop.f32.mrf.mxu0  ;;  %11855 = vmatprep.subr.bf16.mxu0 %v15789_v36 }
 0x35e   : > { %v15929_v60 = vld [vmem:[%s16290_s29 + $0xdc] sm:$0x11]  ;;  %v22326_v40 = vadd.f32 %v8100_v39, %v23869_v3  ;;  %v8102_v32 = vadd.f32 %v8101_v12, %v7989_v6  ;;  %v15795_v12 = vld [vmem:[%s23311_s1 + $0x1484] ss:$8 sps:$4 sm:$0xff]   ;;  %v11051_v44 = vrot.slane %v11041_v25, 4  ;;  %v14283_v54 = vrot.slane %v14259_v19, 9  ;;  %v8105_v56 = vpop.f32.mrf.mxu1  ;;  %11968 = vmatprep.subr.bf16.mxu1 %v15792_v5 }
 0x35f   : > { %23867 = vst [vmem:[#allocation40_spill] sm:$0xff] %v22312_v31  ;;  %v11052_v11 = vrot.slane %v15929_v60, 5  ;;  %v11054_v39 = vrot.slane %v11045_v43, 4  ;;  %v15930_v6 = vld [vmem:[%s16290_s29 + $0xe4] sm:$0x11]  ;;  %v23872_v60 = vld [vmem:[#allocation8_spill] sm:$0xff]  ;;  %v8104_v21 = vadd.f32 %v8103_v41, %v7991_v24  ;;  %v14384_v23 = vcombine.high %v22303_v15, %v22322_v58  ;;  %v7996_v36 = vpop.f32.mrf.mxu0 }
 0x360   : > { %23870 = vst [vmem:[#allocation47_spill] sm:$0xff] %v22326_v40  ;;  %v11055_v33 = vrot.slane %v15930_v6, 5  ;;  %v22344_v3 = vadd.f32 %v8102_v32, %v23872_v60  ;;  %v23874_v40 = vld [vmem:[#allocation9_spill] sm:$0xff]  ;;  %v23875_v19 = vcombine.low %v22229_v13, %v22233_v63  ;;  %v14386_v32 = vcombine.high %v22307_v46, %v22337_v47  ;;  %v23876_v5 = vld [vmem:[#allocation6_spill] sm:$0xff]  ;;  %v8109_v60 = vpop.f32.mrf.mxu1  ;;  %10880 = vmatmul.mubr.bf16.gmra.mxu1 %v14174_v16  ;;  %v22369_v63 = vld [vmem:[%s16290_s29 + $0xf0] sm:$0xee] }
 0x361   : > { %v7993_v31 = vadd.f32 %v7992_v61, %v23874_v40  ;;  %v15798_v17 = vld [vmem:[%s23311_s1 + $0x1584] ss:$8 sps:$4 sm:$0xff]   ;;  %v22359_v40 = vsel %vm17271_vm5, %v14282_v62, %v11041_v25  ;;  %v22362_v24 = vadd.f32 %v8104_v21, %v23876_v5  ;;  %11856 = vmatpush2.bf16.msra.mxu0 %v15787_v57  ;;  %v15793_v13 = vld [vmem:[%s23311_s1 + $0x1480] ss:$8 sps:$4 sm:$0xff]   ;;  %11969 = vmatpush2.bf16.msra.mxu1 %v15790_v53  ;;  %v7998_v25 = vpop.f32.mrf.mxu0  ;;  %v15801_v16 = vld [vmem:[%s23311_s1 + $0x1674] ss:$8 sps:$4 sm:$0xff]  }
 0x362   : > { %23873 = vst [vmem:[#allocation14_spill] sm:$0xff] %v22344_v3  ;;  %10767 = vmatmul.mubr.bf16.gmra.mxu0 %v23875_v19  ;;  %v23878_v61 = vld [vmem:[#allocation62_spill] sm:$0xff]  ;;  %11857 = vmatprep.subr.bf16.mxu0 %v15795_v12  ;;  %v22379_v62 = vsel %vm17271_vm5, %v11051_v44, %v11052_v11  ;;  %v22383_v57 = vsel %vm17271_vm5, %v14283_v54, %v11045_v43  ;;  %v23881_v5 = vld [vmem:[#allocation67_spill] sm:$0xff]  ;;  %v14262_v11 = vld [vmem:[%s16290_s29 + $0xf8] sm:$0xee] }
 0x363   : > { %23877 = vst [vmem:[#allocation70_spill] sm:$0xff] %v22362_v24  ;;  %v8106_v41 = vadd.f32 %v8105_v56, %v7993_v31  ;;  %v7997_v6 = vadd.f32 %v7996_v36, %v23878_v61  ;;  %v15796_v31 = vld [vmem:[%s23311_s1 + $0x1580] ss:$8 sps:$4 sm:$0xff]   ;;  %v22387_v53 = vsel %vm17271_vm5, %v11054_v39, %v11055_v33  ;;  %v7999_v61 = vadd.f32 %v7998_v25, %v23881_v5  ;;  %v8111_v24 = vpop.f32.mrf.mxu1  ;;  %v15932_v44 = vld [vmem:[%s16290_s29 + $0x10c] sm:$0xff]  ;;  %v8000_v54 = vpop.f32.mrf.mxu0  ;;  %v23882_v25 = vld [vmem:[#allocation64_spill] sm:$0xff] }
 0x364   : > { %v15931_v12 = vld [vmem:[%s16290_s29 + $0x104] sm:$0xff]  ;;  %11970 = vmatprep.subr.bf16.mxu1 %v15798_v17  ;;  %11859 = vmatprep.mubr.bf16.mxu0 %v14384_v23  ;;  %v11066_v43 = vrot.slane %v15932_v44, 5  ;;  %v14383_v39 = vcombine.low %v22303_v15, %v22322_v58  ;;  %v14385_v33 = vcombine.low %v22307_v46, %v22337_v47  ;;  %v8001_v23 = vadd.f32 %v8000_v54, %v21769_v50  ;;  %v15799_v15 = vld [vmem:[%s23311_s1 + $0x1670] ss:$8 sps:$4 sm:$0xff]  }
 0x365   : > { %v11062_v21 = vrot.slane %v15931_v12, 5  ;;  %v23879_v56 = vld [vmem:[#allocation65_spill] sm:$0xff]  ;;  %v8110_v19 = vadd.f32 %v8109_v60, %v7997_v6  ;;  %11972 = vmatprep.mubr.bf16.mxu1 %v14386_v32  ;;  %v15933_v6 = vld [vmem:[%s16290_s29 + $0x118] sm:$0x11]  ;;  %v8112_v17 = vadd.f32 %v8111_v24, %v7999_v61  ;;  %11858 = vmatpush2.bf16.msra.mxu0 %v15793_v13  ;;  %v14389_v46 = vcombine.high %v22359_v40, %v22379_v62  ;;  %v8002_v58 = vpop.f32.mrf.mxu0  ;;  %v23885_v5 = vld [vmem:[#allocation11_spill] sm:$0xff] }
 0x366   : > { %v22391_v36 = vadd.f32 %v8106_v41, %v23879_v56  ;;  %v14285_v41 = vrot.slane %v22369_v63, 9  ;;  %v11073_v60 = vrot.slane %v15933_v6, 5  ;;  %v8113_v56 = vpop.f32.mrf.mxu1  ;;  %11971 = vmatpush2.bf16.msra.mxu1 %v15796_v31  ;;  %12053 = vmatprep.subr.bf16.mxu0 %v15801_v16  ;;  %v14391_v47 = vcombine.high %v22383_v57, %v22387_v53  ;;  %v15934_v24 = vld [vmem:[%s16290_s29 + $0x120] sm:$0x11]  ;;  %v15946_v3 = vld [vmem:[%s16290_s29 + $0x208] sm:$0x11] }
 0x367   : > { %v22403_v12 = vadd.f32 %v8110_v19, %v23882_v25  ;;  %v11072_v32 = vrot.slane %v11062_v21, 4  ;;  %v14286_v63 = vrot.slane %v14262_v11, 9  ;;  %v11076_v19 = vrot.slane %v15934_v24, 5  ;;  %14512 = vmatprep.subr.bf16.mxu1 %v15801_v16  ;;  %v15804_v31 = vld [vmem:[%s23311_s1 + $0x1664] ss:$8 sps:$4 sm:$0xff]   ;;  %v8925_v6 = vpop.f32.mrf.mxu0 }
 0x368   : > { %23880 = vst [vmem:[#allocation13_spill] sm:$0xff] %v22391_v36  ;;  %v22415_v50 = vadd.f32 %v8112_v17, %v21766_v18  ;;  %v8114_v13 = vadd.f32 %v8113_v56, %v8001_v23  ;;  %v8003_v61 = vadd.f32 %v8002_v58, %v23885_v5  ;;  %v8115_v44 = vpop.f32.mrf.mxu1  ;;  %v11075_v54 = vrot.slane %v11066_v43, 4  ;;  %v23886_v11 = vld [vmem:[#allocation66_spill] sm:$0xff]  ;;  %v15945_v36 = vld [vmem:[%s16290_s29 + $0x1f4] sm:$0xff] }
 0x369   : > { %23883 = vst [vmem:[#allocation42_spill] sm:$0xff] %v22403_v12  ;;  %11973 = vmatmul.mubr.bf16.vlgmr.msra.gmra.mxu1 %v14385_v33  ;;  %v15802_v16 = vld [vmem:[%s23311_s1 + $0x1660] ss:$8 sps:$4 sm:$0xff]   ;;  %v8927_v23 = vpop.f32.mrf.mxu0  ;;  %v22435_v56 = vsel %vm17271_vm5, %v11072_v32, %v11073_v60  ;;  %v15807_v33 = vld [vmem:[%s23311_s1 + $0x1654] ss:$8 sps:$4 sm:$0xff]  }
 0x36a   : > { %23884 = vst [vmem:[#allocation23_spill] sm:$0xff] %v22415_v50  ;;  %11860 = vmatmul.mubr.bf16.vlgmr.msra.gmra.mxu0 %v14383_v39  ;;  %v22422_v25 = vadd.f32 %v8114_v13, %v23886_v11  ;;  %v8116_v24 = vadd.f32 %v8115_v44, %v8003_v61  ;;  %v9038_v18 = vpop.f32.mrf.mxu1  ;;  %14520 = vmatpush1.bf16.msra.mxu1 %v15799_v15  ;;  %v14264_v58 = vld [vmem:[%s16290_s29 + $0x12c] sm:$0xee]  ;;  %v15935_v13 = vld [vmem:[%s16290_s29 + $0x140] sm:$0xff] }
 0x36b   : > { %12054 = vmatpush1.bf16.msra.mxu0 %v15799_v15  ;;  %v22427_v17 = vadd.f32 %v9038_v18, %v8925_v6  ;;  %11869 = vmatprep.mubr.bf16.mxu0 %v14389_v46  ;;  %v22431_v39 = vsel %vm17271_vm5, %v14285_v41, %v11062_v21  ;;  %v11083_v5 = vrot.slane %v15935_v13, 5  ;;  %v22447_v21 = vsel %vm17271_vm5, %v14286_v63, %v11066_v43  ;;  %v15936_v60 = vld [vmem:[%s16290_s29 + $0x148] sm:$0xff]  ;;  %v8929_v44 = vpop.f32.mrf.mxu0 }
 0x36c   : > { %23887 = vst [vmem:[#allocation44_spill] sm:$0xff] %v22422_v25  ;;  %v22443_v15 = vadd.f32 %v8116_v24, %v21812_v34  ;;  %v9040_v46 = vpop.f32.mrf.mxu1  ;;  %11982 = vmatprep.mubr.bf16.mxu1 %v14391_v47  ;;  %12055 = vmatprep.subr.bf16.mxu0 %v15804_v31  ;;  %v22451_v41 = vsel %vm17271_vm5, %v11075_v54, %v11076_v19  ;;  %v11087_v32 = vrot.slane %v15936_v60, 5  ;;  %v14265_v47 = vld [vmem:[%s16290_s29 + $0x134] sm:$0xee]  ;;  %v14288_v19 = vrot.slane %v14264_v58, 9 }
 0x36d   : > { %v22454_v61 = vadd.f32 %v9040_v46, %v8927_v23  ;;  %v14388_v34 = vcombine.low %v22359_v40, %v22379_v62  ;;  %14513 = vmatprep.subr.bf16.mxu1 %v15804_v31  ;;  %v14390_v43 = vcombine.low %v22383_v57, %v22387_v53  ;;  %v14394_v63 = vcombine.high %v22431_v39, %v22435_v56  ;;  %v8931_v11 = vpop.f32.mrf.mxu0  ;;  %v15805_v40 = vld [vmem:[%s23311_s1 + $0x1650] ss:$8 sps:$4 sm:$0xff]   ;;  %v15938_v58 = vld [vmem:[%s16290_s29 + $0x15c] sm:$0x11]  ;;  %v15948_v14 = vld [vmem:[%s16290_s29 + $0x244] sm:$0x11] }
 0x36e   : > { %23888 = vst [vmem:[#allocation24_spill] sm:$0xff] %v22443_v15  ;;  %v9042_v6 = vpop.f32.mrf.mxu1  ;;  %14521 = vmatpush1.bf16.msra.mxu1 %v15802_v16  ;;  %v14396_v24 = vcombine.high %v22447_v21, %v22451_v41  ;;  %v11093_v62 = vrot.slane %v11083_v5, 4  ;;  %v15937_v57 = vld [vmem:[%s16290_s29 + $0x154] sm:$0x11]  ;;  %v14289_v18 = vrot.slane %v14265_v47, 9  ;;  %v11096_v23 = vrot.slane %v11087_v32, 4 }
 0x36f   : > { %12056 = vmatpush1.bf16.msra.mxu0 %v15802_v16  ;;  %v22463_v54 = vadd.f32 %v9042_v6, %v8929_v44  ;;  %v11094_v53 = vrot.slane %v15937_v57, 5  ;;  %14514 = vmatprep.subr.bf16.mxu1 %v15807_v33  ;;  %v11097_v13 = vrot.slane %v15938_v58, 5  ;;  %v15810_v16 = vld [vmem:[%s23311_s1 + $0x1644] ss:$8 sps:$4 sm:$0xff]   ;;  %v8935_v60 = vpop.f32.mrf.mxu0  ;;  %v22481_v47 = vsel %vm17271_vm5, %v14288_v19, %v11083_v5  ;;  %v15942_v25 = vld [vmem:[%s16290_s29 + $0x198] sm:$0x11] }
 0x370   : > { %12057 = vmatprep.subr.bf16.mxu0 %v15807_v33  ;;  %v9044_v31 = vpop.f32.mrf.mxu1  ;;  %v15940_v19 = vld [vmem:[%s16290_s29 + $0x184] sm:$0xff] }
 0x371   : > { %v22475_v46 = vadd.f32 %v9044_v31, %v8931_v11  ;;  %11983 = vmatmul.mubr.bf16.gmra.mxu1 %v14390_v43  ;;  %v8937_v33 = vpop.f32.mrf.mxu0  ;;  %v22485_v57 = vsel %vm17271_vm5, %v11093_v62, %v11094_v53  ;;  %v14267_v43 = vld [vmem:[%s16290_s29 + $0x168] sm:$0xee]  ;;  %v22498_v5 = vsel %vm17271_vm5, %v11096_v23, %v11097_v13  ;;  %v11108_v62 = vrot.slane %v15940_v19, 5  ;;  %v15813_v53 = vld [vmem:[%s23311_s1 + $0x1634] ss:$8 sps:$4 sm:$0xff]  }
 0x372   : > { %11870 = vmatmul.mubr.bf16.gmra.mxu0 %v14388_v34  ;;  %v9048_v44 = vpop.f32.mrf.mxu1  ;;  %11992 = vmatprep.mubr.bf16.mxu1 %v14396_v24  ;;  %v15808_v34 = vld [vmem:[%s23311_s1 + $0x1640] ss:$8 sps:$4 sm:$0xff]   ;;  %v22494_v24 = vsel %vm17271_vm5, %v14289_v18, %v11087_v32  ;;  %v14268_v32 = vld [vmem:[%s16290_s29 + $0x170] sm:$0xee]  ;;  %v14395_v23 = vcombine.low %v22447_v21, %v22451_v41  ;;  %v14399_v13 = vcombine.high %v22481_v47, %v22485_v57 }
 0x373   : > { %11879 = vmatprep.mubr.bf16.mxu0 %v14394_v63  ;;  %v22477_v6 = vadd.f32 %v9048_v44, %v8935_v60  ;;  %12058 = vmatpush1.bf16.msra.mxu0 %v15805_v40  ;;  %v15939_v63 = vld [vmem:[%s16290_s29 + $0x17c] sm:$0xff]  ;;  %v8939_v60 = vpop.f32.mrf.mxu0  ;;  %v14291_v44 = vrot.slane %v14267_v43, 9  ;;  %v14292_v21 = vrot.slane %v14268_v32, 9  ;;  %v11117_v41 = vrot.slane %v11108_v62, 4 }
 0x374   : > { %v11104_v11 = vrot.slane %v15939_v63, 5  ;;  %v9050_v31 = vpop.f32.mrf.mxu1  ;;  %14522 = vmatpush1.bf16.msra.mxu1 %v15805_v40  ;;  %12059 = vmatprep.subr.bf16.mxu0 %v15810_v16  ;;  %v14393_v40 = vcombine.low %v22431_v39, %v22435_v56  ;;  %v15941_v39 = vld [vmem:[%s16290_s29 + $0x190] sm:$0x11]  ;;  %v11118_v43 = vrot.slane %v15942_v25, 5 }
 0x375   : > { %v22504_v58 = vadd.f32 %v9050_v31, %v8937_v33  ;;  %14515 = vmatprep.subr.bf16.mxu1 %v15810_v16  ;;  %v8941_v19 = vpop.f32.mrf.mxu0  ;;  %v14401_v33 = vcombine.high %v22494_v24, %v22498_v5  ;;  %v11115_v56 = vrot.slane %v15941_v39, 5  ;;  %v15811_v16 = vld [vmem:[%s23311_s1 + $0x1630] ss:$8 sps:$4 sm:$0xff]  }
 0x376   : > { %v9052_v18 = vpop.f32.mrf.mxu1  ;;  %v11114_v31 = vrot.slane %v11104_v11, 4  ;;  %v22531_v25 = vsel %vm17271_vm5, %v14291_v44, %v11104_v11  ;;  %v22548_v11 = vsel %vm17271_vm5, %v11117_v41, %v11118_v43 }
 0x377   : > { %v22513_v63 = vadd.f32 %v9052_v18, %v8939_v60  ;;  %12060 = vmatpush1.bf16.msra.mxu0 %v15808_v34  ;;  %v15816_v60 = vld [vmem:[%s23311_s1 + $0x1624] ss:$8 sps:$4 sm:$0xff]   ;;  %v8945_v39 = vpop.f32.mrf.mxu0 }
 0x378   : > { %v9054_v15 = vpop.f32.mrf.mxu1  ;;  %14523 = vmatpush1.bf16.msra.mxu1 %v15808_v34  ;;  %12061 = vmatprep.subr.bf16.mxu0 %v15813_v53  ;;  %v22535_v12 = vsel %vm17271_vm5, %v11114_v31, %v11115_v56  ;;  %v14398_v31 = vcombine.low %v22481_v47, %v22485_v57  ;;  %v14400_v56 = vcombine.low %v22494_v24, %v22498_v5  ;;  %v15817_v47 = vld [vmem:[%s23311_s1 + $0x1610] ss:$8 sps:$4 sm:$0xff]   ;;  %v15822_v24 = vld [vmem:[%s23311_s1 + $0x1604] ss:$8 sps:$4 sm:$0xff]  }
 0x379   : > { %v22525_v18 = vadd.f32 %v9054_v15, %v8941_v19  ;;  %14516 = vmatprep.subr.bf16.mxu1 %v15813_v53  ;;  %11993 = vmatmul.mubr.bf16.gmra.mxu1 %v14395_v23  ;;  %v8947_v32 = vpop.f32.mrf.mxu0  ;;  %v14270_v15 = vld [vmem:[%s16290_s29 + $0x1a4] sm:$0xee]  ;;  %v15943_v19 = vld [vmem:[%s16290_s29 + $0x1b8] sm:$0xff]  ;;  %v22544_v23 = vsel %vm17271_vm5, %v14292_v21, %v11108_v62  ;;  %v14404_v21 = vcombine.high %v22531_v25, %v22535_v12 }
 0x37a   : > { %11880 = vmatmul.mubr.bf16.gmra.mxu0 %v14393_v40  ;;  %v9058_v50 = vpop.f32.mrf.mxu1  ;;  %12002 = vmatprep.mubr.bf16.mxu1 %v14401_v33  ;;  %v11125_v40 = vrot.slane %v15943_v19, 5  ;;  %v15814_v53 = vld [vmem:[%s23311_s1 + $0x1620] ss:$8 sps:$4 sm:$0xff]   ;;  %v15944_v19 = vld [vmem:[%s16290_s29 + $0x1cc] sm:$0x11] }
 0x37b   : > { %11889 = vmatprep.mubr.bf16.mxu0 %v14399_v13  ;;  %v22527_v34 = vadd.f32 %v9058_v50, %v8945_v39  ;;  %12062 = vmatpush1.bf16.msra.mxu0 %v15811_v16  ;;  %v15819_v13 = vld [vmem:[%s23311_s1 + $0x1614] ss:$8 sps:$4 sm:$0xff]   ;;  %v8949_v33 = vpop.f32.mrf.mxu0  ;;  %v14406_v39 = vcombine.high %v22544_v23, %v22548_v11 }
 0x37c   : > { %v9060_v50 = vpop.f32.mrf.mxu1  ;;  %14524 = vmatpush1.bf16.msra.mxu1 %v15811_v16  ;;  %12063 = vmatprep.subr.bf16.mxu0 %v15816_v60  ;;  %v14294_v16 = vrot.slane %v14270_v15, 9 }
 0x37d   : > { %v22553_v44 = vadd.f32 %v9060_v50, %v8947_v32  ;;  %14517 = vmatprep.subr.bf16.mxu1 %v15816_v60  ;;  %v8951_v43 = vpop.f32.mrf.mxu0  ;;  %v11135_v32 = vrot.slane %v11125_v40, 4  ;;  %v11136_v50 = vrot.slane %v15944_v19, 5 }
 0x37e   : > { %v9062_v62 = vpop.f32.mrf.mxu1 }
 0x37f   : > { %v22561_v41 = vadd.f32 %v9062_v62, %v8949_v33  ;;  %12064 = vmatpush1.bf16.msra.mxu0 %v15814_v53  ;;  %v8955_v60 = vpop.f32.mrf.mxu0  ;;  %v11137_v19 = vsel %vm17271_vm5, %v11135_v32, %v11136_v50 }
 0x380   : > { %v9064_v57 = vpop.f32.mrf.mxu1  ;;  %14525 = vmatpush1.bf16.msra.mxu1 %v15814_v53  ;;  %12065 = vmatprep.subr.bf16.mxu0 %v15819_v13  ;;  %v11126_v53 = vsel %vm17271_vm5, %v14294_v16, %v11125_v40  ;;  %v14403_v40 = vcombine.low %v22531_v25, %v22535_v12 }
 0x381   : > { %v22572_v5 = vadd.f32 %v9064_v57, %v8951_v43  ;;  %14518 = vmatprep.subr.bf16.mxu1 %v15819_v13  ;;  %12003 = vmatmul.mubr.bf16.gmra.mxu1 %v14400_v56  ;;  %v8957_v62 = vpop.f32.mrf.mxu0  ;;  %v11146_v43 = vrot.slane %v15945_v36, 5  ;;  %v15820_v13 = vld [vmem:[%s23311_s1 + $0x1600] ss:$8 sps:$4 sm:$0xff]   ;;  %v14405_v36 = vcombine.low %v22544_v23, %v22548_v11  ;;  %v14409_v32 = vcombine.high %v11126_v53, %v11137_v19 }
 0x382   : > { %11890 = vmatmul.mubr.bf16.gmra.mxu0 %v14398_v31  ;;  %v9068_v15 = vpop.f32.mrf.mxu1  ;;  %12012 = vmatprep.mubr.bf16.mxu1 %v14406_v39  ;;  %v14273_v56 = vld [vmem:[%s16290_s29 + $0x1e0] sm:$0xee] }
 0x383   : > { %11899 = vmatprep.mubr.bf16.mxu0 %v14404_v21  ;;  %v22574_v33 = vadd.f32 %v9068_v15, %v8955_v60  ;;  %12066 = vmatpush1.bf16.msra.mxu0 %v15817_v47  ;;  %v8959_v39 = vpop.f32.mrf.mxu0  ;;  %v14297_v60 = vrot.slane %v14273_v56, 9  ;;  %v11156_v15 = vrot.slane %v11146_v43, 4  ;;  %v23890_v56 = vld [vmem:[#allocation19_spill] sm:$0xff] }
 0x384   : > { %v9070_v31 = vpop.f32.mrf.mxu1  ;;  %14526 = vmatpush1.bf16.msra.mxu1 %v15817_v47  ;;  %12067 = vmatprep.subr.bf16.mxu0 %v15822_v24  ;;  %v11157_v47 = vrot.slane %v15946_v3, 5 }
 0x385   : > { %v22585_v21 = vadd.f32 %v9070_v31, %v8957_v62  ;;  %14519 = vmatprep.subr.bf16.mxu1 %v15822_v24  ;;  %v8961_v57 = vpop.f32.mrf.mxu0  ;;  %v23889_v24 = vld [vmem:[#allocation43_spill] sm:$0xff]  ;;  %v11147_v3 = vsel %vm17271_vm5, %v14297_v60, %v11146_v43  ;;  %v11178_v43 = vrot.slane %v15948_v14, 5 }
 0x386   : > { %v9072_v16 = vpop.f32.mrf.mxu1 }
 0x387   : > { %v22591_v50 = vadd.f32 %v9072_v16, %v8959_v39  ;;  %12068 = vmatpush1.bf16.msra.mxu0 %v15820_v13  ;;  %v8965_v12 = vpop.f32.mrf.mxu0  ;;  %v23891_v39 = vcombine.high %v23889_v24, %v23890_v56  ;;  %v15947_v16 = vld [vmem:[%s16290_s29 + $0x230] sm:$0xff] }
 0x388   : > { %v9074_v62 = vpop.f32.mrf.mxu1  ;;  %14527 = vmatpush1.bf16.msra.mxu1 %v15820_v13  ;;  %v11158_v13 = vsel %vm17271_vm5, %v11156_v15, %v11157_v47 }
 0x389   : > { %v22594_v31 = vadd.f32 %v9074_v62, %v8961_v57  ;;  %12013 = vmatmul.mubr.bf16.gmra.mxu1 %v14405_v36  ;;  %v8967_v11 = vpop.f32.mrf.mxu0  ;;  %v11167_v57 = vrot.slane %v15947_v16, 5  ;;  %v14276_v62 = vld [vmem:[%s16290_s29 + $0x21c] sm:$0xee]  ;;  %v14414_v27 = vcombine.high %v11147_v3, %v11158_v13  ;;  %v23894_v16 = vld [vmem:[#allocation7_spill] sm:$0xff] }
 0x38a   : > { %11900 = vmatmul.mubr.bf16.gmra.mxu0 %v14403_v40  ;;  %v9078_v25 = vpop.f32.mrf.mxu1  ;;  %12022 = vmatprep.mubr.bf16.mxu1 %v23891_v39  ;;  %v14300_v7 = vrot.slane %v14276_v62, 9 }
 0x38b   : > { %11909 = vmatprep.mubr.bf16.mxu0 %v14409_v32  ;;  %v22596_v23 = vadd.f32 %v9078_v25, %v8965_v12  ;;  %v8969_v32 = vpop.f32.mrf.mxu0  ;;  %v14408_v12 = vcombine.low %v11126_v53, %v11137_v19  ;;  %v11177_v4 = vrot.slane %v11167_v57, 4 }
 0x38c   : > { %v9080_v40 = vpop.f32.mrf.mxu1  ;;  %v11168_v14 = vsel %vm17271_vm5, %v14300_v7, %v11167_v57  ;;  %v15949_v7 = vld [vmem:[%s16290_s29 + $0x9c] sm:$0xf] }
 0x38d   : > { %v22607_v36 = vadd.f32 %v9080_v40, %v8967_v11  ;;  %v8971_v39 = vpop.f32.mrf.mxu0  ;;  %v23892_v11 = vcombine.low %v23889_v24, %v23890_v56  ;;  %v23895_v40 = vld [vmem:[#allocation20_spill] sm:$0xff]  ;;  %v11028_v57 = vrot.slane %v15949_v7, 5 }
 0x38e   : > { %v9082_v25 = vpop.f32.mrf.mxu1  ;;  %v23896_v62 = vcombine.high %v23894_v16, %v23895_v40 }
 0x38f   : > { %v22609_v45 = vadd.f32 %v9082_v25, %v8969_v32  ;;  %v8975_v15 = vpop.f32.mrf.mxu0  ;;  %v11179_v32 = vsel %vm17271_vm5, %v11177_v4, %v11178_v43  ;;  %v23900_v43 = vcombine.low %v23894_v16, %v23895_v40  ;;  %v11036_v16 = vrot.slane %v11028_v57, 4  ;;  %v15950_v40 = vld [vmem:[%s16290_s29 + $0xb0] sm:$0x1] }
 0x390   : > { %v9084_v60 = vpop.f32.mrf.mxu1 }
 0x391   : > { %v22612_v55 = vadd.f32 %v9084_v60, %v8971_v39  ;;  %12023 = vmatmul.mubr.bf16.gmra.mxu1 %v23892_v11  ;;  %v8977_v19 = vpop.f32.mrf.mxu0  ;;  %v14419_v39 = vcombine.high %v11168_v14, %v11179_v32 }
 0x392   : > { %11910 = vmatmul.mubr.bf16.gmra.mxu0 %v14408_v12  ;;  %v9088_v47 = vpop.f32.mrf.mxu1  ;;  %12032 = vmatprep.mubr.bf16.mxu1 %v23896_v62 }
 0x393   : > { %11919 = vmatprep.mubr.bf16.mxu0 %v14414_v27  ;;  %v22617_v53 = vadd.f32 %v9088_v47, %v8975_v15  ;;  %v8979_v24 = vpop.f32.mrf.mxu0  ;;  %v14413_v27 = vcombine.low %v11147_v3, %v11158_v13  ;;  %v14257_v3 = vld [vmem:[%s16290_s29 + $0x88] sm:$0xe] }
 0x394   : > { %v9090_v12 = vpop.f32.mrf.mxu1 }
 0x395   : > { %23893 = vst [vmem:[#allocation27_spill] sm:$0xff] %v22617_v53  ;;  %v22626_v25 = vadd.f32 %v9090_v12, %v8977_v19  ;;  %v8981_v15 = vpop.f32.mrf.mxu0  ;;  %v23902_v12 = vld [vmem:[#allocation21_spill] sm:$0xff] }
 0x396   : > { %v9092_v56 = vpop.f32.mrf.mxu1 }
 0x397   : > { %23897 = vst [vmem:[#allocation25_spill] sm:$0xff] %v22626_v25  ;;  %v22628_v60 = vadd.f32 %v9092_v56, %v8979_v24  ;;  %v8985_v62 = vpop.f32.mrf.mxu0  ;;  %v23903_v24 = vld [vmem:[#allocation10_spill] sm:$0xff] }
 0x398   : > { %v9094_v47 = vpop.f32.mrf.mxu1  ;;  %v23904_v56 = vcombine.high %v23902_v12, %v23903_v24 }
 0x399   : > { %23898 = vst [vmem:[#allocation29_spill] sm:$0xff] %v22628_v60  ;;  %v22630_v11 = vadd.f32 %v9094_v47, %v8981_v15  ;;  %12033 = vmatmul.mubr.bf16.gmra.mxu1 %v23900_v43  ;;  %v8987_v19 = vpop.f32.mrf.mxu0 }
 0x39a   : > { %11920 = vmatmul.mubr.bf16.gmra.mxu0 %v14413_v27  ;;  %v9098_v4 = vpop.f32.mrf.mxu1  ;;  %12042 = vmatprep.mubr.bf16.mxu1 %v23904_v56  ;;  %v14418_v27 = vcombine.low %v11168_v14, %v11179_v32 }
 0x39b   : > { %23899 = vst [vmem:[#allocation26_spill] sm:$0xff] %v22630_v11  ;;  %11929 = vmatprep.mubr.bf16.mxu0 %v14419_v39  ;;  %v22637_v13 = vadd.f32 %v9098_v4, %v8985_v62  ;;  %v8989_v7 = vpop.f32.mrf.mxu0  ;;  %v14281_v11 = vrot.slane %v14257_v3, 9  ;;  %v11037_v39 = vrot.slane %v15950_v40, 5 }
 0x39c   : > { %v9100_v15 = vpop.f32.mrf.mxu1 }
 0x39d   : > { %23901 = vst [vmem:[#allocation72_spill] sm:$0xff] %v22637_v13  ;;  %v22642_v47 = vadd.f32 %v9100_v15, %v8987_v19  ;;  %v8991_v62 = vpop.f32.mrf.mxu0  ;;  %v15951_v13 = vld [vmem:[%s16290_s29 + $0xd8] sm:$0xf]  ;;  %v11029_v32 = vsel %vm17271_vm5, %v14281_v11, %v11028_v57  ;;  %v11038_v3 = vsel %vm17271_vm5, %v11036_v16, %v11037_v39  ;;  %v14260_v19 = vld [vmem:[%s16290_s29 + $0xc4] sm:$0xe] }
 0x39e   : > { %v9102_v43 = vpop.f32.mrf.mxu1  ;;  %v11049_v25 = vrot.slane %v15951_v13, 5  ;;  %v15952_v15 = vld [vmem:[%s16290_s29 + $0x1c8] sm:$0xf]  ;;  %v14272_v13 = vld [vmem:[%s16290_s29 + $0x1b4] sm:$0xe]  ;;  %v14387_v57 = vcombine.low %v11029_v32, %v11038_v3  ;;  %v14284_v16 = vrot.slane %v14260_v19, 9 }
 0x39f   : > { %23905 = vst [vmem:[#allocation71_spill] sm:$0xff] %v22642_v47  ;;  %v22645_v60 = vadd.f32 %v9102_v43, %v8989_v7  ;;  %v8995_v14 = vpop.f32.mrf.mxu0  ;;  %v11133_v7 = vrot.slane %v15952_v15, 5  ;;  %v23908_v43 = vcombine.low %v23902_v12, %v23903_v24  ;;  %v14296_v12 = vrot.slane %v14272_v13, 9 }
 0x3a0   : > { %v9104_v4 = vpop.f32.mrf.mxu1  ;;  %v11057_v39 = vrot.slane %v11049_v25, 4  ;;  %v11050_v32 = vsel %vm17271_vm5, %v14284_v16, %v11049_v25  ;;  %v23912_v25 = vcombine.low %v21788_v1, %v21792_v9  ;;  %v15956_v16 = vld [vmem:[%s16290_s29 + $0x204] sm:$0xf] }
 0x3a1   : > { %23906 = vst [vmem:[#allocation30_spill] sm:$0xff] %v22645_v60  ;;  %v22648_v56 = vadd.f32 %v9104_v4, %v8991_v62  ;;  %12043 = vmatmul.mubr.bf16.gmra.mxu1 %v23908_v43  ;;  %v8997_v62 = vpop.f32.mrf.mxu0  ;;  %v15953_v4 = vld [vmem:[%s16290_s29 + $0xec] sm:$0x1]  ;;  %v11141_v24 = vrot.slane %v11133_v7, 4  ;;  %v15954_v43 = vld [vmem:[%s16290_s29 + $0x1dc] sm:$0x1] }
 0x3a2   : > { %11930 = vmatmul.mubr.bf16.gmra.mxu0 %v14418_v27  ;;  %v9108_v40 = vpop.f32.mrf.mxu1  ;;  %12125 = vmatprep.mubr.bf16.mxu1 %v23371_v0  ;;  %v11058_v15 = vrot.slane %v15953_v4, 5  ;;  %v11142_v47 = vrot.slane %v15954_v43, 5 }
 0x3a3   : > { %23907 = vst [vmem:[#allocation28_spill] sm:$0xff] %v22648_v56  ;;  %12085 = vmatprep.mubr.bf16.mxu0 %v23371_v0  ;;  %v22661_v27 = vadd.f32 %v9108_v40, %v8995_v14  ;;  %v8999_v60 = vpop.f32.mrf.mxu0 }
 0x3a4   : > { %v9110_v11 = vpop.f32.mrf.mxu1  ;;  %v11059_v3 = vsel %vm17271_vm5, %v11057_v39, %v11058_v15 }
 0x3a5   : > { %23909 = vst [vmem:[#allocation31_spill] sm:$0xff] %v22661_v27  ;;  %v22665_v56 = vadd.f32 %v9110_v11, %v8997_v62  ;;  %v9001_v40 = vpop.f32.mrf.mxu0  ;;  %v11134_v62 = vsel %vm17271_vm5, %v14296_v12, %v11133_v7  ;;  %v11154_v7 = vrot.slane %v15956_v16, 5  ;;  %v14392_v1 = vcombine.low %v11050_v32, %v11059_v3 }
 0x3a6   : > { %v9112_v53 = vpop.f32.mrf.mxu1 }
 0x3a7   : > { %v22668_v14 = vadd.f32 %v9112_v53, %v8999_v60  ;;  %v9151_v13 = vpop.f32.mrf.mxu0  ;;  %v11143_v53 = vsel %vm17271_vm5, %v11141_v24, %v11142_v47  ;;  %v15955_v60 = vld [vmem:[%s16290_s29 + $0x114] sm:$0xf] }
 0x3a8   : > { %v9114_v27 = vpop.f32.mrf.mxu1  ;;  %v11070_v11 = vrot.slane %v15955_v60, 5  ;;  %v9152_v4 = vadd.f32 %v9151_v13, %v22427_v17  ;;  %v14412_v9 = vcombine.low %v11134_v62, %v11143_v53  ;;  %v15957_v13 = vld [vmem:[%s16290_s29 + $0x128] sm:$0x1] }
 0x3a9   : > { %v22674_v19 = vadd.f32 %v9114_v27, %v9001_v40  ;;  %12126 = vmatmul.mubr.bf16.vlgmr.msra.gmra.mxu1 %v23912_v25  ;;  %v14263_v27 = vld [vmem:[%s16290_s29 + $0x100] sm:$0xe]  ;;  %v9153_v39 = vpop.f32.mrf.mxu0  ;;  %v11079_v60 = vrot.slane %v15957_v13, 5 }
 0x3aa   : > { %12086 = vmatmul.mubr.bf16.vlgmr.msra.gmra.mxu0 %v14387_v57  ;;  %v22682_v43 = vpop.f32.mrf.mxu1  ;;  %v14275_v57 = vld [vmem:[%s16290_s29 + $0x1f0] sm:$0xe]  ;;  %12135 = vmatprep.mubr.bf16.mxu1 %v23371_v0  ;;  %v22693_v47 = vadd.f32 %v9152_v4, %v21869_v52  ;;  %v9154_v17 = vadd.f32 %v9153_v39, %v22454_v61  ;;  %v14287_v24 = vrot.slane %v14263_v27, 9  ;;  %v11078_v40 = vrot.slane %v11070_v11, 4  ;;  %v15958_v4 = vld [vmem:[%s16290_s29 + $0x218] sm:$0x1] }
 0x3ab   : > { %23910 = vst [vmem:[#allocation46_spill] sm:$0xff] %v22674_v19  ;;  %23911 = vst [vmem:[#allocation32_spill] sm:$0xff] %v22682_v43  ;;  %12095 = vmatprep.mubr.bf16.mxu0 %v23371_v0  ;;  %v9155_v12 = vpop.f32.mrf.mxu0  ;;  %v14299_v25 = vrot.slane %v14275_v57, 9  ;;  %v11162_v52 = vrot.slane %v11154_v7, 4  ;;  %v11163_v61 = vrot.slane %v15958_v4, 5 }
 0x3ac   : > { %v22696_v15 = vpop.f32.mrf.mxu1  ;;  %v22700_v16 = vadd.f32 %v9154_v17, %v21893_v2  ;;  %v9156_v43 = vadd.f32 %v9155_v12, %v22463_v54  ;;  %v11071_v2 = vsel %vm17271_vm5, %v14287_v24, %v11070_v11  ;;  %v11080_v54 = vsel %vm17271_vm5, %v11078_v40, %v11079_v60  ;;  %v15959_v17 = vld [vmem:[%s16290_s29 + $0x150] sm:$0xf]  ;;  %v14278_v40 = vld [vmem:[%s16290_s29 + $0x22c] sm:$0xe] }
 0x3ad   : > { %v9157_v39 = vpop.f32.mrf.mxu0  ;;  %v11155_v27 = vsel %vm17271_vm5, %v14299_v25, %v11154_v7  ;;  %v11164_v11 = vsel %vm17271_vm5, %v11162_v52, %v11163_v61  ;;  %v14397_v60 = vcombine.low %v11071_v2, %v11080_v54 }
 0x3ae   : > { %v22703_v19 = vpop.f32.mrf.mxu1  ;;  %v22707_v32 = vadd.f32 %v9156_v43, %v21909_v28  ;;  %v9158_v3 = vadd.f32 %v9157_v39, %v22475_v46  ;;  %v14266_v43 = vld [vmem:[%s16290_s29 + $0x13c] sm:$0xe]  ;;  %v14417_v25 = vcombine.low %v11155_v27, %v11164_v11 }
 0x3af   : > { %v9161_v53 = vpop.f32.mrf.mxu0  ;;  %v14290_v52 = vrot.slane %v14266_v43, 9 }
 0x3b0   : > { %v22710_v62 = vpop.f32.mrf.mxu1  ;;  %v22719_v57 = vadd.f32 %v9158_v3, %v21928_v51  ;;  %v9162_v28 = vadd.f32 %v9161_v53, %v22477_v6  ;;  %v15960_v51 = vld [vmem:[%s16290_s29 + $0x240] sm:$0xf] }
 0x3b1   : > { %12136 = vmatmul.mubr.bf16.gmra.mxu1 %v14412_v9  ;;  %v9163_v12 = vpop.f32.mrf.mxu0  ;;  %v11175_v7 = vrot.slane %v15960_v51, 5 }
 0x3b2   : > { %12096 = vmatmul.mubr.bf16.gmra.mxu0 %v14392_v1  ;;  %v22722_v46 = vpop.f32.mrf.mxu1  ;;  %v11091_v1 = vrot.slane %v15959_v17, 5  ;;  %12145 = vmatprep.mubr.bf16.mxu1 %v23371_v0  ;;  %v22732_v24 = vadd.f32 %v9162_v28, %v21947_v30  ;;  %v9164_v6 = vadd.f32 %v9163_v12, %v22504_v58  ;;  %v15961_v30 = vld [vmem:[%s16290_s29 + $0x164] sm:$0x1]  ;;  %v14302_v58 = vrot.slane %v14278_v40, 9  ;;  %v15962_v12 = vld [vmem:[%s16290_s29 + $0x254] sm:$0x1] }
 0x3b3   : > { %12105 = vmatprep.mubr.bf16.mxu0 %v23371_v0  ;;  %v9165_v13 = vpop.f32.mrf.mxu0  ;;  %v11100_v53 = vrot.slane %v15961_v30, 5  ;;  %v11183_v17 = vrot.slane %v11175_v7, 4  ;;  %v11184_v51 = vrot.slane %v15962_v12, 5  ;;  %s15967_s29 = sshll.u32 %s16058_s28, 4  ;;  %s15968_s29 = int_to_ptr.vmem [resolvable:$false] %s15967_s29 }
 0x3b4   : > { %23913 = vst [vmem:[#allocation48_spill] sm:$0xff] %v22732_v24  ;;  %v22735_v9 = vpop.f32.mrf.mxu1  ;;  %v22739_v4 = vadd.f32 %v9164_v6, %v21969_v37  ;;  %v9166_v61 = vadd.f32 %v9165_v13, %v22513_v63  ;;  %v11099_v3 = vrot.slane %v11091_v1, 4  ;;  %v11092_v63 = vsel %vm17271_vm5, %v14290_v52, %v11091_v1  ;;  %s15969_s9 = scalar_lea.vmem %s15968_s29, 8192  ;;  %p15970_p2 = scmp.lt.s32.totalorder %s23252_s7, %s15968_s29 }
 0x3b5   : > { %v9167_v28 = vpop.f32.mrf.mxu0  ;;  %v11176_v6 = vsel %vm17271_vm5, %v14302_v58, %v11175_v7  ;;  %p15971_p4 = scmp.lt.s32.totalorder %s15969_s9, %s15963_s21 }
 0x3b6   : > { %v22742_v39 = vpop.f32.mrf.mxu1  ;;  %v22747_v24 = vadd.f32 %v9166_v61, %v22000_v20  ;;  %v9168_v2 = vadd.f32 %v9167_v28, %v22525_v18  ;;  %v11101_v20 = vsel %vm17271_vm5, %v11099_v3, %v11100_v53 }
 0x3b7   : > { %v9171_v37 = vpop.f32.mrf.mxu0  ;;  %p15972_p5 = por %p15971_p4, %p15970_p2 }
 0x3b8   : > { %v22750_v54 = vpop.f32.mrf.mxu1  ;;  %v22755_v27 = vadd.f32 %v9168_v2, %v22020_v22  ;;  %v9172_v11 = vadd.f32 %v9171_v37, %v22527_v34  ;;  %v11185_v22 = vsel %vm17271_vm5, %v11183_v17, %v11184_v51 }
 0x3b9   : > { %12146 = vmatmul.mubr.bf16.gmra.mxu1 %v14417_v25  ;;  %v9173_v18 = vpop.f32.mrf.mxu0  ;;  %v14422_v7 = vcombine.low %v11176_v6, %v11185_v22  ;;  %p15973_p6 = pnand %p15972_p5, %p15966_p1 }
 0x3ba   : > { %12106 = vmatmul.mubr.bf16.gmra.mxu0 %v14397_v60  ;;  %v22758_v43 = vpop.f32.mrf.mxu1  ;;  %12155 = vmatprep.mubr.bf16.mxu1 %v23371_v0  ;;  %v22769_v1 = vadd.f32 %v9172_v11, %v22033_v42  ;;  %v9174_v34 = vadd.f32 %v9173_v18, %v22553_v44  ;;  %v14402_v60 = vcombine.low %v11092_v63, %v11101_v20 }
 0x3bb   : > { %12115 = vmatprep.mubr.bf16.mxu0 %v23371_v0  ;;  %v9175_v13 = vpop.f32.mrf.mxu0 }
 0x3bc   : > { %v22772_v40 = vpop.f32.mrf.mxu1  ;;  %v22775_v25 = vadd.f32 %v9174_v34, %v22058_v29  ;;  %v9176_v0 = vadd.f32 %v9175_v13, %v22561_v41 }
 0x3bd   : > { %v9177_v61 = vpop.f32.mrf.mxu0 }
 0x3be   : > { %v22778_v52 = vpop.f32.mrf.mxu1  ;;  %v22781_v48 = vadd.f32 %v9176_v0, %v22078_v10  ;;  %v9178_v42 = vadd.f32 %v9177_v61, %v22572_v5  ;;  %v23917_v61 = vld [vmem:[#allocation27_spill] sm:$0xff] }
 0x3bf   : > { %v9181_v44 = vpop.f32.mrf.mxu0 }
 0x3c0   : > { %v22784_v3 = vpop.f32.mrf.mxu1  ;;  %v22787_v30 = vadd.f32 %v9178_v42, %v22092_v35  ;;  %v9182_v29 = vadd.f32 %v9181_v44, %v22574_v33 }
 0x3c1   : > { %12156 = vmatmul.mubr.bf16.gmra.mxu1 %v14422_v7  ;;  %v9183_v41 = vpop.f32.mrf.mxu0 }
 0x3c2   : > { %12116 = vmatmul.mubr.bf16.gmra.mxu0 %v14402_v60  ;;  %v22790_v53 = vpop.f32.mrf.mxu1  ;;  %v22793_v28 = vadd.f32 %v9182_v29, %v22118_v38  ;;  %v9184_v10 = vadd.f32 %v9183_v41, %v22585_v21 }
 0x3c3   : > { %v9185_v5 = vpop.f32.mrf.mxu0 }
 0x3c4   : > { %v22796_v58 = vpop.f32.mrf.mxu1  ;;  %v22799_v17 = vadd.f32 %v9184_v10, %v22135_v26  ;;  %v9186_v35 = vadd.f32 %v9185_v5, %v22591_v50  ;;  %v23919_v10 = vld [vmem:[#allocation25_spill] sm:$0xff] }
 0x3c5   : > { %v9187_v33 = vpop.f32.mrf.mxu0 }
 0x3c6   : > { %v22802_v12 = vpop.f32.mrf.mxu1  ;;  %v22805_v51 = vadd.f32 %v9186_v35, %v22146_v8  ;;  %v9188_v2 = vadd.f32 %v9187_v33, %v22594_v31  ;;  %v23914_v31 = vld [vmem:[#allocation68_spill] sm:$0xff] }
 0x3c7   : > { %v9191_v37 = vpop.f32.mrf.mxu0 }
 0x3c8   : > { %v22808_v38 = vpop.f32.mrf.mxu1  ;;  %v22811_v21 = vadd.f32 %v9188_v2, %v22165_v49  ;;  %v9192_v63 = vadd.f32 %v9191_v37, %v22596_v23  ;;  %v23915_v23 = vld [vmem:[#allocation69_spill] sm:$0xff] }
 0x3c9   : > { %v9193_v11 = vpop.f32.mrf.mxu0  ;;  %v23921_v37 = vld [vmem:[#allocation29_spill] sm:$0xff] }
 0x3ca   : > { %v22814_v26 = vpop.f32.mrf.mxu1  ;;  %v22817_v50 = vadd.f32 %v9192_v63, %v22178_v59  ;;  %v9194_v20 = vadd.f32 %v9193_v11, %v22607_v36  ;;  %v23916_v36 = vld [vmem:[#allocation39_spill] sm:$0xff] }
 0x3cb   : > { %v9195_v18 = vpop.f32.mrf.mxu0 }
 0x3cc   : > { %v22820_v8 = vpop.f32.mrf.mxu1  ;;  %v22823_v6 = vadd.f32 %v9194_v20, %v23914_v31  ;;  %v9196_v22 = vadd.f32 %v9195_v18, %v22609_v45  ;;  %v23918_v45 = vld [vmem:[#allocation12_spill] sm:$0xff]  ;;  %v23922_v18 = vld [vmem:[#allocation45_spill] sm:$0xff] }
 0x3cd   : > { %v9197_v34 = vpop.f32.mrf.mxu0 }
 0x3ce   : > { %v22826_v49 = vpop.f32.mrf.mxu1  ;;  %v22829_v13 = vadd.f32 %v9196_v22, %v23915_v23  ;;  %v9198_v60 = vadd.f32 %v9197_v34, %v22612_v55  ;;  %v23920_v55 = vld [vmem:[#allocation22_spill] sm:$0xff] }
 0x3cf   : > { %v9201_v0 = vpop.f32.mrf.mxu0  ;;  %v23924_v22 = vld [vmem:[#allocation26_spill] sm:$0xff] }
 0x3d0   : > { %v22832_v59 = vpop.f32.mrf.mxu1  ;;  %v22835_v7 = vadd.f32 %v9198_v60, %v23916_v36  ;;  %v9202_v42 = vadd.f32 %v9201_v0, %v23917_v61  ;;  %v23925_v0 = vld [vmem:[#allocation40_spill] sm:$0xff] }
 0x3d1   : > { %v9203_v29 = vpop.f32.mrf.mxu0  ;;  %v23927_v61 = vld [vmem:[#allocation72_spill] sm:$0xff] }
 0x3d2   : > { %v22838_v44 = vpop.f32.mrf.mxu1  ;;  %v22841_v41 = vadd.f32 %v9202_v42, %v23918_v45  ;;  %v9204_v5 = vadd.f32 %v9203_v29, %v23919_v10  ;;  %v23929_v10 = vld [vmem:[#allocation47_spill] sm:$0xff] }
 0x3d3   : > { %v9205_v33 = vpop.f32.mrf.mxu0 }
 0x3d4   : > { %v22844_v35 = vpop.f32.mrf.mxu1  ;;  %v22847_v2 = vadd.f32 %v9204_v5, %v23920_v55  ;;  %v9206_v63 = vadd.f32 %v9205_v33, %v23921_v37  ;;  %v23931_v33 = vld [vmem:[#allocation71_spill] sm:$0xff] }
 0x3d5   : > { %v9207_v20 = vpop.f32.mrf.mxu0 }
 0x3d6   : > { %v22850_v11 = vpop.f32.mrf.mxu1  ;;  %v22853_v31 = vadd.f32 %v9206_v63, %v23922_v18  ;;  %v9208_v34 = vadd.f32 %v9207_v20, %v23924_v22  ;;  %v23933_v20 = vld [vmem:[#allocation14_spill] sm:$0xff] }
 0x3d7   : > { %v9211_v60 = vpop.f32.mrf.mxu0  ;;  %v23935_v22 = vld [vmem:[#allocation30_spill] sm:$0xff] }
 0x3d8   : > { %23923 = vst [vmem:[#allocation5_spill] sm:$0xff] %v22853_v31  ;;  %v22856_v23 = vpop.f32.mrf.mxu1  ;;  %v22859_v36 = vadd.f32 %v9208_v34, %v23925_v0  ;;  %v9212_v42 = vadd.f32 %v9211_v60, %v23927_v61  ;;  %v23936_v60 = vld [vmem:[#allocation70_spill] sm:$0xff] }
 0x3d9   : > { %v9213_v45 = vpop.f32.mrf.mxu0 }
 0x3da   : > { %23926 = vst [vmem:[#allocation49_spill] sm:$0xff] %v22859_v36  ;;  %v22862_v29 = vpop.f32.mrf.mxu1  ;;  %v22865_v5 = vadd.f32 %v9212_v42, %v23929_v10  ;;  %v9214_v55 = vadd.f32 %v9213_v45, %v23931_v33  ;;  %v23938_v36 = vld [vmem:[#allocation28_spill] sm:$0xff]  ;;  %v23939_v45 = vld [vmem:[#allocation13_spill] sm:$0xff] }
 0x3db   : > { %23928 = vst [vmem:[#allocation50_spill] sm:$0xff] %v22862_v29  ;;  %v9215_v63 = vpop.f32.mrf.mxu0 }
 0x3dc   : > { %23930 = vst [vmem:[#allocation51_spill] sm:$0xff] %v22865_v5  ;;  %v22868_v37 = vpop.f32.mrf.mxu1  ;;  %v22871_v18 = vadd.f32 %v9214_v55, %v23933_v20  ;;  %v9216_v31 = vadd.f32 %v9215_v63, %v23935_v22  ;;  %v23941_v5 = vld [vmem:[#allocation31_spill] sm:$0xff]  ;;  %v23943_v63 = vld [vmem:[#allocation42_spill] sm:$0xff] }
 0x3dd   : > { %23932 = vst [vmem:[#allocation52_spill] sm:$0xff] %v22868_v37  ;;  %v9217_v0 = vpop.f32.mrf.mxu0 }
 0x3de   : > { %23934 = vst [vmem:[#allocation63_spill] sm:$0xff] %v22871_v18  ;;  %v22874_v34 = vpop.f32.mrf.mxu1  ;;  %v22877_v61 = vadd.f32 %v9216_v31, %v23936_v60  ;;  %v9218_v29 = vadd.f32 %v9217_v0, %v23938_v36  ;;  %v23946_v36 = vld [vmem:[#allocation23_spill] sm:$0xff] }
 0x3df   : > { %v9221_v10 = vpop.f32.mrf.mxu0 }
 0x3e0   : > { %23937 = vst [vmem:[#allocation33_spill] sm:$0xff] %v22877_v61  ;;  %v22880_v42 = vpop.f32.mrf.mxu1  ;;  %v22883_v33 = vadd.f32 %v9218_v29, %v23939_v45  ;;  %v9222_v37 = vadd.f32 %v9221_v10, %v23941_v5  ;;  %v23949_v5 = vld [vmem:[#allocation44_spill] sm:$0xff] }
 0x3e1   : > { %v9223_v20 = vpop.f32.mrf.mxu0 }
 0x3e2   : > { %23940 = vst [vmem:[#allocation54_spill] sm:$0xff] %v22883_v33  ;;  %v22886_v55 = vpop.f32.mrf.mxu1  ;;  %v22889_v22 = vadd.f32 %v9222_v37, %v23943_v63  ;;  %v9224_v18 = vadd.f32 %v9223_v20, %v22665_v56  ;;  %v23951_v33 = vld [vmem:[#allocation46_spill] sm:$0xff]  ;;  %v23952_v56 = vld [vmem:[#allocation24_spill] sm:$0xff] }
 0x3e3   : > { %23942 = vst [vmem:[#allocation53_spill] sm:$0xff] %v22886_v55  ;;  %v9225_v60 = vpop.f32.mrf.mxu0 }
 0x3e4   : > { %23944 = vst [vmem:[#allocation56_spill] sm:$0xff] %v22889_v22  ;;  %v22892_v31 = vpop.f32.mrf.mxu1  ;;  %v22895_v0 = vadd.f32 %v9224_v18, %v23946_v36  ;;  %v9226_v61 = vadd.f32 %v9225_v60, %v22668_v14  ;;  %v23953_v22 = vld [vmem:[#allocation32_spill] sm:$0xff] }
 0x3e5   : > { %23945 = vst [vmem:[#allocation34_spill] sm:$0xff] %v22892_v31  ;;  %v9227_v45 = vpop.f32.mrf.mxu0 }
 0x3e6   : > { %23947 = vst [vmem:[#allocation15_spill] sm:$0xff] %v22895_v0  ;;  %v22898_v29 = vpop.f32.mrf.mxu1  ;;  %v22901_v10 = vadd.f32 %v9226_v61, %v23949_v5  ;;  %v9228_v55 = vadd.f32 %v9227_v45, %v23951_v33 }
 0x3e7   : > { %23948 = vst [vmem:[#allocation55_spill] sm:$0xff] %v22898_v29  ;;  %v10698_v63 = vpop.f32.mrf.mxu0 }
 0x3e8   : > { %23950 = vst [vmem:[#allocation17_spill] sm:$0xff] %v22901_v10  ;;  %v22904_v37 = vpop.f32.mrf.mxu1  ;;  %v22907_v20 = vadd.f32 %v9228_v55, %v23952_v56  ;;  %v10699_v31 = vadd.f32 %v10698_v63, %v23953_v22 }
 0x3e9   : > { %v10700_v36 = vpop.f32.mrf.mxu0 }
 0x3ea   : > { %v10811_v18 = vpop.f32.mrf.mxu1  ;;  %v10701_v14 = vadd.f32 %v10700_v36, %v22696_v15 }
 0x3eb   : > { %v10812_v0 = vadd.f32 %v10811_v18, %v10699_v31  ;;  %v10702_v29 = vpop.f32.mrf.mxu0 }
 0x3ec   : > { %v10813_v60 = vpop.f32.mrf.mxu1  ;;  %v10703_v33 = vadd.f32 %v10702_v29, %v22703_v19 }
 0x3ed   : > { %v22912_v61 = vadd.f32 %v10812_v0, %v22693_v47  ;;  %v10814_v5 = vadd.f32 %v10813_v60, %v10701_v14  ;;  %v10704_v10 = vpop.f32.mrf.mxu0 }
 0x3ee   : > { %v10815_v45 = vpop.f32.mrf.mxu1  ;;  %v10705_v22 = vadd.f32 %v10704_v10, %v22710_v62 }
 0x3ef   : > { %23954 = vst [vmem:[#allocation35_spill] sm:$0xff] %v22912_v61  ;;  %v22916_v55 = vadd.f32 %v10814_v5, %v22700_v16  ;;  %v10816_v56 = vadd.f32 %v10815_v45, %v10703_v33  ;;  %v23958_v5 = vld [vmem:[#allocation48_spill] sm:$0xff] }
 0x3f0   : > { %v10817_v63 = vpop.f32.mrf.mxu1 }
 0x3f1   : > { %23955 = vst [vmem:[#allocation16_spill] sm:$0xff] %v22916_v55  ;;  %v10708_v31 = vpop.f32.mrf.mxu0  ;;  %v22920_v15 = vadd.f32 %v10816_v56, %v22707_v32  ;;  %v10818_v18 = vadd.f32 %v10817_v63, %v10705_v22  ;;  %v12198_v55 = vld [vmem:[%s23312_s2] sm:$0x3] }
 0x3f2   : > { %v10709_v47 = vadd.f32 %v10708_v31, %v22722_v46  ;;  %v10821_v0 = vpop.f32.mrf.mxu1 }
 0x3f3   : > { %23956 = vst [vmem:[#allocation57_spill] sm:$0xff] %v22920_v15  ;;  %v10710_v36 = vpop.f32.mrf.mxu0  ;;  %v22924_v19 = vadd.f32 %v10818_v18, %v22719_v57 }
 0x3f4   : > { %v10822_v29 = vadd.f32 %v10821_v0, %v10709_v47  ;;  %v10711_v16 = vadd.f32 %v10710_v36, %v22735_v9  ;;  %v10823_v14 = vpop.f32.mrf.mxu1 }
 0x3f5   : > { %23957 = vst [vmem:[#allocation58_spill] sm:$0xff] %v22924_v19  ;;  %v10712_v60 = vpop.f32.mrf.mxu0 }
 0x3f6   : > { %v22928_v62 = vadd.f32 %v10822_v29, %v23958_v5  ;;  %v10824_v10 = vadd.f32 %v10823_v14, %v10711_v16  ;;  %v10713_v32 = vadd.f32 %v10712_v60, %v22742_v39  ;;  %v10825_v33 = vpop.f32.mrf.mxu1 }
 0x3f7   : > { %v10714_v45 = vpop.f32.mrf.mxu0 }
 0x3f8   : > { %23959 = vst [vmem:[#allocation41_spill] sm:$0xff] %v22928_v62  ;;  %v22932_v46 = vadd.f32 %v10824_v10, %v22739_v4  ;;  %v10826_v56 = vadd.f32 %v10825_v33, %v10713_v32  ;;  %v10715_v57 = vadd.f32 %v10714_v45, %v22750_v54  ;;  %v10827_v22 = vpop.f32.mrf.mxu1 }
 0x3f9   : > { %v10718_v63 = vpop.f32.mrf.mxu0 }
 0x3fa   : > { %23960 = vst [vmem:[#allocation36_spill] sm:$0xff] %v22932_v46  ;;  %v22936_v9 = vadd.f32 %v10826_v56, %v22747_v24  ;;  %v10828_v31 = vadd.f32 %v10827_v22, %v10715_v57  ;;  %v10719_v18 = vadd.f32 %v10718_v63, %v22758_v43  ;;  %v10831_v47 = vpop.f32.mrf.mxu1 }
 0x3fb   : > { %v10720_v0 = vpop.f32.mrf.mxu0 }
 0x3fc   : > { %23961 = vst [vmem:[#allocation60_spill] sm:$0xff] %v22936_v9  ;;  %v22940_v39 = vadd.f32 %v10828_v31, %v22755_v27  ;;  %v10832_v36 = vadd.f32 %v10831_v47, %v10719_v18  ;;  %v10721_v4 = vadd.f32 %v10720_v0, %v22772_v40  ;;  %v10833_v29 = vpop.f32.mrf.mxu1 }
 0x3fd   : > { %v10722_v16 = vpop.f32.mrf.mxu0 }
 0x3fe   : > { %23962 = vst [vmem:[#allocation18_spill] sm:$0xff] %v22940_v39  ;;  %v22944_v54 = vadd.f32 %v10832_v36, %v22769_v1  ;;  %v10834_v14 = vadd.f32 %v10833_v29, %v10721_v4  ;;  %v10723_v24 = vadd.f32 %v10722_v16, %v22778_v52  ;;  %v10835_v60 = vpop.f32.mrf.mxu1 }
 0x3ff   : > { %v10724_v5 = vpop.f32.mrf.mxu0 }
 0x400   : > { %23963 = vst [vmem:[#allocation59_spill] sm:$0xff] %v22944_v54  ;;  %v22948_v43 = vadd.f32 %v10834_v14, %v22775_v25  ;;  %v10836_v10 = vadd.f32 %v10835_v60, %v10723_v24  ;;  %v10725_v27 = vadd.f32 %v10724_v5, %v22784_v3  ;;  %v10837_v32 = vpop.f32.mrf.mxu1 }
 0x401   : > { %v10728_v33 = vpop.f32.mrf.mxu0 }
 0x402   : > { %23964 = vst [vmem:[#allocation61_spill] sm:$0xff] %v22948_v43  ;;  %v22952_v40 = vadd.f32 %v10836_v10, %v22781_v48  ;;  %v10838_v45 = vadd.f32 %v10837_v32, %v10725_v27  ;;  %v10729_v1 = vadd.f32 %v10728_v33, %v22790_v53  ;;  %v10841_v56 = vpop.f32.mrf.mxu1 }
 0x403   : > { %v10730_v57 = vpop.f32.mrf.mxu0 }
 0x404   : > { %23965 = vst [vmem:[#allocation37_spill] sm:$0xff] %v22952_v40  ;;  %v22956_v52 = vadd.f32 %v10838_v45, %v22787_v30  ;;  %v10842_v22 = vadd.f32 %v10841_v56, %v10729_v1  ;;  %v10731_v25 = vadd.f32 %v10730_v57, %v22796_v58  ;;  %v10843_v63 = vpop.f32.mrf.mxu1 }
 0x405   : > { %v10732_v31 = vpop.f32.mrf.mxu0 }
 0x406   : > { %23966 = vst [vmem:[#allocation38_spill] sm:$0xff] %v22956_v52  ;;  %v22960_v3 = vadd.f32 %v10842_v22, %v22793_v28  ;;  %v10844_v18 = vadd.f32 %v10843_v63, %v10731_v25  ;;  %v10733_v48 = vadd.f32 %v10732_v31, %v22802_v12  ;;  %v10845_v47 = vpop.f32.mrf.mxu1 }
 0x407   : > { %v10734_v0 = vpop.f32.mrf.mxu0 }
 0x408   : > { %23967 = vst [vmem:[#allocation8_spill] sm:$0xff] %v22960_v3  ;;  %v22964_v53 = vadd.f32 %v10844_v18, %v22799_v17  ;;  %v10846_v36 = vadd.f32 %v10845_v47, %v10733_v48  ;;  %v10735_v30 = vadd.f32 %v10734_v0, %v22808_v38  ;;  %v10847_v4 = vpop.f32.mrf.mxu1 }
 0x409   : > { %v10738_v29 = vpop.f32.mrf.mxu0 }
 0x40a   : > { %23968 = vst [vmem:[#allocation9_spill] sm:$0xff] %v22964_v53  ;;  %v22968_v58 = vadd.f32 %v10846_v36, %v22805_v51  ;;  %v10848_v16 = vadd.f32 %v10847_v4, %v10735_v30  ;;  %v10739_v28 = vadd.f32 %v10738_v29, %v22814_v26  ;;  %v10851_v14 = vpop.f32.mrf.mxu1  ;;  %v23977_v29 = vld [vmem:[#allocation5_spill] sm:$0xff] }
 0x40b   : > { %v10740_v24 = vpop.f32.mrf.mxu0 }
 0x40c   : > { %23969 = vst [vmem:[#allocation6_spill] sm:$0xff] %v22968_v58  ;;  %v22972_v12 = vadd.f32 %v10848_v16, %v22811_v21  ;;  %v10852_v60 = vadd.f32 %v10851_v14, %v10739_v28  ;;  %v10741_v17 = vadd.f32 %v10740_v24, %v22820_v8  ;;  %v10853_v5 = vpop.f32.mrf.mxu1  ;;  %v23979_v28 = vld [vmem:[#allocation50_spill] sm:$0xff] }
 0x40d   : > { %v10742_v10 = vpop.f32.mrf.mxu0 }
 0x40e   : > { %23970 = vst [vmem:[#allocation62_spill] sm:$0xff] %v22972_v12  ;;  %v22976_v38 = vadd.f32 %v10852_v60, %v22817_v50  ;;  %v10854_v27 = vadd.f32 %v10853_v5, %v10741_v17  ;;  %v10743_v51 = vadd.f32 %v10742_v10, %v22826_v49  ;;  %v10855_v32 = vpop.f32.mrf.mxu1  ;;  %v23980_v60 = vld [vmem:[#allocation49_spill] sm:$0xff]  ;;  %v23982_v5 = vld [vmem:[#allocation52_spill] sm:$0xff] }
 0x40f   : > { %v10744_v33 = vpop.f32.mrf.mxu0 }
 0x410   : > { %23971 = vst [vmem:[#allocation65_spill] sm:$0xff] %v22976_v38  ;;  %v22980_v26 = vadd.f32 %v10854_v27, %v22823_v6  ;;  %v10856_v45 = vadd.f32 %v10855_v32, %v10743_v51  ;;  %v10745_v21 = vadd.f32 %v10744_v33, %v22832_v59  ;;  %v10857_v1 = vpop.f32.mrf.mxu1  ;;  %v23983_v51 = vld [vmem:[#allocation51_spill] sm:$0xff] }
 0x411   : > { %v10748_v56 = vpop.f32.mrf.mxu0 }
 0x412   : > { %23972 = vst [vmem:[#allocation67_spill] sm:$0xff] %v22980_v26  ;;  %v22984_v8 = vadd.f32 %v10856_v45, %v22829_v13  ;;  %v10858_v57 = vadd.f32 %v10857_v1, %v10745_v21  ;;  %v10749_v50 = vadd.f32 %v10748_v56, %v22838_v44  ;;  %v10861_v22 = vpop.f32.mrf.mxu1  ;;  %v23985_v1 = vld [vmem:[#allocation63_spill] sm:$0xff] }
 0x413   : > { %v10750_v25 = vpop.f32.mrf.mxu0 }
 0x414   : > { %23973 = vst [vmem:[#allocation64_spill] sm:$0xff] %v22984_v8  ;;  %v22988_v49 = vadd.f32 %v10858_v57, %v22835_v7  ;;  %v10862_v63 = vadd.f32 %v10861_v22, %v10749_v50  ;;  %v10751_v6 = vadd.f32 %v10750_v25, %v22844_v35  ;;  %v10863_v31 = vpop.f32.mrf.mxu1 }
 0x415   : > { %v10752_v18 = vpop.f32.mrf.mxu0 }
 0x416   : > { %23974 = vst [vmem:[#allocation11_spill] sm:$0xff] %v22988_v49  ;;  %v22992_v59 = vadd.f32 %v10862_v63, %v22841_v41  ;;  %v10864_v48 = vadd.f32 %v10863_v31, %v10751_v6  ;;  %v10753_v13 = vadd.f32 %v10752_v18, %v22850_v11  ;;  %v10865_v47 = vpop.f32.mrf.mxu1  ;;  %v23987_v63 = vld [vmem:[#allocation33_spill] sm:$0xff] }
 0x417   : > { %v10754_v0 = vpop.f32.mrf.mxu0  ;;  %v23989_v18 = vld [vmem:[#allocation53_spill] sm:$0xff] }
 0x418   : > { %23975 = vst [vmem:[#allocation66_spill] sm:$0xff] %v22992_v59  ;;  %v22996_v44 = vadd.f32 %v10864_v48, %v22847_v2  ;;  %v10866_v36 = vadd.f32 %v10865_v47, %v10753_v13  ;;  %v10755_v7 = vadd.f32 %v10754_v0, %v22856_v23  ;;  %v10867_v30 = vpop.f32.mrf.mxu1  ;;  %v23990_v0 = vld [vmem:[#allocation54_spill] sm:$0xff] }
 0x419   : > { %v10758_v4 = vpop.f32.mrf.mxu0 }
 0x41a   : > { %23976 = vst [vmem:[#allocation43_spill] sm:$0xff] %v22996_v44  ;;  %v23000_v35 = vadd.f32 %v10866_v36, %v23977_v29  ;;  %v10868_v16 = vadd.f32 %v10867_v30, %v10755_v7  ;;  %v10759_v41 = vadd.f32 %v10758_v4, %v23979_v28  ;;  %v10871_v14 = vpop.f32.mrf.mxu1  ;;  %v23992_v7 = vld [vmem:[#allocation34_spill] sm:$0xff] }
 0x41b   : > { %v10760_v24 = vpop.f32.mrf.mxu0 }
 0x41c   : > { %23978 = vst [vmem:[#allocation19_spill] sm:$0xff] %v23000_v35  ;;  %v23004_v11 = vadd.f32 %v10868_v16, %v23980_v60  ;;  %v10872_v17 = vadd.f32 %v10871_v14, %v10759_v41  ;;  %v10761_v2 = vadd.f32 %v10760_v24, %v23982_v5  ;;  %v10873_v10 = vpop.f32.mrf.mxu1  ;;  %v23993_v16 = vld [vmem:[#allocation56_spill] sm:$0xff]  ;;  %v23995_v41 = vld [vmem:[#allocation55_spill] sm:$0xff] }
 0x41d   : > { %v10762_v27 = vpop.f32.mrf.mxu0 }
 0x41e   : > { %23981 = vst [vmem:[#allocation7_spill] sm:$0xff] %v23004_v11  ;;  %v23008_v23 = vadd.f32 %v10872_v17, %v23983_v51  ;;  %v10874_v32 = vadd.f32 %v10873_v10, %v10761_v2  ;;  %v10763_v33 = vadd.f32 %v10762_v27, %v22874_v34  ;;  %v10875_v45 = vpop.f32.mrf.mxu1  ;;  %v23996_v17 = vld [vmem:[#allocation15_spill] sm:$0xff]  ;;  %v12200_v11 = vlaneseq }
 0x41f   : > { %v10764_v21 = vpop.f32.mrf.mxu0 }
 0x420   : > { %23984 = vst [vmem:[#allocation20_spill] sm:$0xff] %v23008_v23  ;;  %v23012_v56 = vadd.f32 %v10874_v32, %v23985_v1  ;;  %v10876_v57 = vadd.f32 %v10875_v45, %v10763_v33  ;;  %v10765_v50 = vadd.f32 %v10764_v21, %v22880_v42  ;;  %v10877_v22 = vpop.f32.mrf.mxu1  ;;  %v23998_v32 = vld [vmem:[#allocation17_spill] sm:$0xff]  ;;  %v12201_v46 = vshrl.u32 %v12200_v11, 7 }
 0x422   : > { %23986 = vst [vmem:[#allocation21_spill] sm:$0xff] %v23012_v56  ;;  %v10768_v25 = vpop.f32.mrf.mxu0  ;;  %v23016_v6 = vadd.f32 %v10876_v57, %v23987_v63  ;;  %v10878_v31 = vadd.f32 %v10877_v22, %v10765_v50  ;;  %v10881_v13 = vpop.f32.mrf.mxu1  ;;  %v12202_v8 = vsub.s32 0, %v12201_v46  ;;  %v12206_v15 = vsub.s32 1, %v12201_v46 }
 0x423   : > { %v10769_v48 = vadd.f32 %v10768_v25, %v23989_v18 }
 0x424   : > { %23988 = vst [vmem:[#allocation10_spill] sm:$0xff] %v23016_v6  ;;  %v10770_v47 = vpop.f32.mrf.mxu0  ;;  %v23020_v34 = vadd.f32 %v10878_v31, %v23990_v0  ;;  %v10883_v4 = vpop.f32.mrf.mxu1 }
 0x425   : > { %v10882_v36 = vadd.f32 %v10881_v13, %v10769_v48  ;;  %v10771_v30 = vadd.f32 %v10770_v47, %v23992_v7 }
 0x426   : > { %23991 = vst [vmem:[#allocation68_spill] sm:$0xff] %v23020_v34  ;;  %v10772_v29 = vpop.f32.mrf.mxu0  ;;  %v10885_v24 = vpop.f32.mrf.mxu1 }
 0x427   : > { %v23024_v42 = vadd.f32 %v10882_v36, %v23993_v16  ;;  %v10884_v28 = vadd.f32 %v10883_v4, %v10771_v30  ;;  %v10773_v14 = vadd.f32 %v10772_v29, %v23995_v41 }
 0x428   : > { %v10774_v60 = vpop.f32.mrf.mxu0  ;;  %v10887_v27 = vpop.f32.mrf.mxu1 }
 0x429   : > { %23994 = vst [vmem:[#allocation69_spill] sm:$0xff] %v23024_v42  ;;  %v23028_v5 = vadd.f32 %v10884_v28, %v23996_v17  ;;  %v10886_v2 = vadd.f32 %v10885_v24, %v10773_v14  ;;  %v10775_v10 = vadd.f32 %v10774_v60, %v22904_v37 }
 0x42a   : > { %v23031_v51 = vpop.f32.mrf.mxu0  ;;  %v23036_v21 = vpop.f32.mrf.mxu1 }
 0x42b   : > { %23997 = vst [vmem:[#allocation39_spill] sm:$0xff] %v23028_v5  ;;  %v23034_v33 = vadd.f32 %v10886_v2, %v23998_v32  ;;  %v10888_v45 = vadd.f32 %v10887_v27, %v10775_v10  ;;  %v11975_v11 = vadd.f32 %v23036_v21, %v23031_v51 }
 0x42c   : > { %v23038_v1 = vpop.f32.mrf.mxu0  ;;  %v23043_v50 = vpop.f32.mrf.mxu1 }
 0x42d   : > { %23999 = vst [vmem:[#allocation27_spill] sm:$0xff] %v23034_v33  ;;  %v23041_v57 = vadd.f32 %v10888_v45, %v22907_v20 }
 0x42e   : > { %v23045_v22 = vpop.f32.mrf.mxu0  ;;  %v23047_v25 = vpop.f32.mrf.mxu1 }
 0x42f   : > { %24000 = vst [vmem:[#allocation12_spill] sm:$0xff] %v23041_v57  ;;  %v11979_v46 = vadd.f32 %v23047_v25, %v23045_v22 }
 0x430   : > { %v23049_v37 = vpop.f32.mrf.mxu0  ;;  %v23051_v63 = vpop.f32.mrf.mxu1 }
 0x431   : > { %24001 = vst [vmem:[#allocation25_spill] sm:$0xff] %v23051_v63  ;;  %v11977_v63 = vadd.f32 %v23043_v50, %v23038_v1 }
 0x432   : > { %v23053_v31 = vpop.f32.mrf.mxu0  ;;  %v23055_v18 = vpop.f32.mrf.mxu1 }
 0x433   : > { %24002 = vst [vmem:[#allocation22_spill] sm:$0xff] %v23053_v31  ;;  %24003 = vst [vmem:[#allocation29_spill] sm:$0xff] %v23055_v18  ;;  %v23062_v18 = vrot.slane %v12198_v55, %v12202_v8  ;;  %v23064_v31 = vrot.slane %v12198_v55, %v12206_v15 }
 0x434   : > { %v23057_v48 = vpop.f32.mrf.mxu0  ;;  %v11986_v13 = vpop.f32.mrf.mxu1 }
 0x435   : > { %24004 = vst [vmem:[#allocation45_spill] sm:$0xff] %v23057_v48  ;;  %24005 = vst [vmem:[#allocation26_spill] sm:$0xff] %v23062_v18 }
 0x436   : > { %v11875_v47 = vpop.f32.mrf.mxu0  ;;  %v11988_v20 = vpop.f32.mrf.mxu1  ;;  %24006 = vst [vmem:[#allocation40_spill] sm:$0xff] %v23064_v31 }
 0x437   : > { %v23081_v50 = vadd.f32 %v11988_v20, %v11875_v47 }
 0x438   : > { %v11877_v0 = vpop.f32.mrf.mxu0  ;;  %v11990_v36 = vpop.f32.mrf.mxu1  ;;  %v24007_v8 = vld [vmem:[#allocation25_spill] sm:$0xff] }
 0x439   : > { %v11981_v18 = vadd.f32 %v24007_v8, %v23049_v37  ;;  %v23083_v22 = vadd.f32 %v11990_v36, %v11877_v0 }
 0x43a   : > { %v11881_v7 = vpop.f32.mrf.mxu0  ;;  %v11994_v30 = vpop.f32.mrf.mxu1  ;;  %v24008_v55 = vld [vmem:[#allocation22_spill] sm:$0xff]  ;;  %v24009_v31 = vld [vmem:[#allocation29_spill] sm:$0xff] }
 0x43b   : > { %v23076_v21 = vadd.f32 %v24009_v31, %v24008_v55  ;;  %v23085_v8 = vadd.f32 %v11994_v30, %v11881_v7 }
 0x43c   : > { %v11883_v4 = vpop.f32.mrf.mxu0  ;;  %v11996_v29 = vpop.f32.mrf.mxu1  ;;  %v24011_v51 = vld [vmem:[#allocation45_spill] sm:$0xff] }
 0x43d   : > { %24010 = vst [vmem:[#allocation72_spill] sm:$0xff] %v23076_v21  ;;  %v23079_v1 = vadd.f32 %v11986_v13, %v24011_v51  ;;  %v23087_v37 = vadd.f32 %v11996_v29, %v11883_v4 }
 0x43e   : > { %v11885_v16 = vpop.f32.mrf.mxu0  ;;  %v11998_v28 = vpop.f32.mrf.mxu1 }
 0x43f   : > { %24012 = vst [vmem:[#allocation47_spill] sm:$0xff] %v23079_v1  ;;  %v23089_v31 = vadd.f32 %v11998_v28, %v11885_v16 }
 0x440   : > { %v11887_v41 = vpop.f32.mrf.mxu0  ;;  %v12000_v14 = vpop.f32.mrf.mxu1 }
 0x441   : > { %v23091_v55 = vadd.f32 %v12000_v14, %v11887_v41 }
 0x442   : > { %v11891_v24 = vpop.f32.mrf.mxu0  ;;  %v12004_v60 = vpop.f32.mrf.mxu1 }
 0x443   : > { %v23093_v13 = vadd.f32 %v12004_v60, %v11891_v24 }
 0x444   : > { %v11893_v17 = vpop.f32.mrf.mxu0  ;;  %v12006_v2 = vpop.f32.mrf.mxu1 }
 0x445   : > { %v23095_v51 = vadd.f32 %v12006_v2, %v11893_v17 }
 0x446   : > { %v11895_v10 = vpop.f32.mrf.mxu0  ;;  %v12008_v27 = vpop.f32.mrf.mxu1 }
 0x447   : > { %v23097_v1 = vadd.f32 %v12008_v27, %v11895_v10  ;;  %v24019_v10 = vld [vmem:[#allocation57_spill] sm:$0xff] }
 0x448   : > { %v11897_v32 = vpop.f32.mrf.mxu0  ;;  %v12010_v45 = vpop.f32.mrf.mxu1 }
 0x449   : > { %v23099_v47 = vadd.f32 %v12010_v45, %v11897_v32 }
 0x44a   : > { %v11901_v57 = vpop.f32.mrf.mxu0  ;;  %v12014_v12 = vpop.f32.mrf.mxu1 }
 0x44b   : > { %v12015_v0 = vadd.f32 %v12014_v12, %v11901_v57 }
 0x44c   : > { %v11903_v33 = vpop.f32.mrf.mxu0  ;;  %v12016_v58 = vpop.f32.mrf.mxu1 }
 0x44d   : > { %v12017_v36 = vadd.f32 %v12016_v58, %v11903_v33 }
 0x44e   : > { %v11905_v5 = vpop.f32.mrf.mxu0  ;;  %v12018_v53 = vpop.f32.mrf.mxu1 }
 0x44f   : > { %v12019_v7 = vadd.f32 %v12018_v53, %v11905_v5 }
 0x450   : > { %v11907_v42 = vpop.f32.mrf.mxu0  ;;  %v12020_v3 = vpop.f32.mrf.mxu1 }
 0x451   : > { %v12021_v30 = vadd.f32 %v12020_v3, %v11907_v42 }
 0x452   : > { %v11911_v34 = vpop.f32.mrf.mxu0  ;;  %v12024_v52 = vpop.f32.mrf.mxu1 }
 0x453   : > { %v12025_v29 = vadd.f32 %v12024_v52, %v11911_v34 }
 0x454   : > { %v11913_v6 = vpop.f32.mrf.mxu0  ;;  %v12026_v40 = vpop.f32.mrf.mxu1 }
 0x455   : > { %v23102_v16 = vadd.f32 %v12026_v40, %v11913_v6  ;;  %v24013_v40 = vld [vmem:[#allocation35_spill] sm:$0xff] }
 0x456   : > { %v11915_v56 = vpop.f32.mrf.mxu0  ;;  %v12028_v43 = vpop.f32.mrf.mxu1 }
 0x457   : > { %v23104_v28 = vadd.f32 %v12028_v43, %v11915_v56 }
 0x458   : > { %v11917_v23 = vpop.f32.mrf.mxu0  ;;  %v12030_v54 = vpop.f32.mrf.mxu1 }
 0x459   : > { %v23106_v24 = vadd.f32 %v12030_v54, %v11917_v23 }
 0x45a   : > { %v11921_v39 = vpop.f32.mrf.mxu0  ;;  %v12034_v35 = vpop.f32.mrf.mxu1 }
 0x45b   : > { %v23108_v60 = vadd.f32 %v12034_v35, %v11921_v39  ;;  %v24014_v39 = vld [vmem:[#allocation65_spill] sm:$0xff] }
 0x45c   : > { %v11923_v9 = vpop.f32.mrf.mxu0  ;;  %v12036_v44 = vpop.f32.mrf.mxu1 }
 0x45d   : > { %v23110_v17 = vadd.f32 %v12036_v44, %v11923_v9 }
 0x45e   : > { %v11925_v59 = vpop.f32.mrf.mxu0  ;;  %v12038_v62 = vpop.f32.mrf.mxu1 }
 0x45f   : > { %v23112_v53 = vadd.f32 %v12038_v62, %v11925_v59  ;;  %v24015_v62 = vld [vmem:[#allocation26_spill] sm:$0xff] }
 0x460   : > { %v11927_v49 = vpop.f32.mrf.mxu0  ;;  %v12040_v19 = vpop.f32.mrf.mxu1 }
 0x461   : > { %v23114_v3 = vadd.f32 %v12040_v19, %v11927_v49  ;;  %v24016_v19 = vld [vmem:[#allocation16_spill] sm:$0xff] }
 0x462   : > { %v11931_v26 = vpop.f32.mrf.mxu0  ;;  %v12044_v38 = vpop.f32.mrf.mxu1 }
 0x463   : > { %v23119_v6 = vadd.f32 %v12044_v38, %v11931_v26  ;;  %v24017_v38 = vld [vmem:[#allocation67_spill] sm:$0xff] }
 0x464   : > { %v11933_v61 = vpop.f32.mrf.mxu0  ;;  %v12046_v48 = vpop.f32.mrf.mxu1 }
 0x465   : > { %v23121_v54 = vadd.f32 %v12046_v48, %v11933_v61  ;;  %v24018_v48 = vld [vmem:[#allocation40_spill] sm:$0xff] }
 0x466   : > { %v11935_v15 = vpop.f32.mrf.mxu0  ;;  %v12048_v25 = vpop.f32.mrf.mxu1 }
 0x467   : > { %v23124_v23 = vadd.f32 %v12048_v25, %v11935_v15 }
 0x468   : > { %v11937_v21 = vpop.f32.mrf.mxu0  ;;  %v12050_v20 = vpop.f32.mrf.mxu1 }
 0x469   : > { %v23128_v5 = vadd.f32 %v12050_v20, %v11937_v21 }
 0x46a   : > { %v12087_v4 = vpop.f32.mrf.mxu0  ;;  %v12127_v14 = vpop.f32.mrf.mxu1 }
 0x46b   : > { %v12088_v41 = vadd.f32 %v12087_v4, %v11975_v11  ;;  %v12128_v12 = vadd.f32 %v12127_v14, %v12015_v0  ;;  %v24022_v4 = vld [vmem:[#allocation72_spill] sm:$0xff] }
 0x46c   : > { %v12089_v58 = vpop.f32.mrf.mxu0  ;;  %v12129_v56 = vpop.f32.mrf.mxu1 }
 0x46d   : > { %v12166_v52 = vadd.f32 %v12088_v41, %v24013_v40  ;;  %v12090_v43 = vadd.f32 %v12089_v58, %v11977_v63  ;;  %v12182_v35 = vadd.f32 %v12128_v12, %v24014_v39  ;;  %v12130_v9 = vadd.f32 %v12129_v56, %v12017_v36  ;;  %v24023_v58 = vld [vmem:[#allocation11_spill] sm:$0xff] }
 0x46e   : > { %v12091_v44 = vpop.f32.mrf.mxu0  ;;  %v12131_v42 = vpop.f32.mrf.mxu1 }
 0x46f   : > { %v12210_v59 = vadd.f32 %v24015_v62, %v12166_v52  ;;  %v12167_v49 = vadd.f32 %v12090_v43, %v24016_v19  ;;  %v12092_v34 = vadd.f32 %v12091_v44, %v11979_v46  ;;  %v12226_v33 = vadd.f32 %v24015_v62, %v12182_v35  ;;  %v24020_v46 = vld [vmem:[#allocation64_spill] sm:$0xff]  ;;  %v24024_v35 = vld [vmem:[#allocation41_spill] sm:$0xff]  ;;  %v24025_v44 = vld [vmem:[#allocation47_spill] sm:$0xff] }
 0x470   : > { %v12183_v26 = vadd.f32 %v12130_v9, %v24017_v38  ;;  %v12132_v61 = vadd.f32 %v12131_v42, %v12019_v7  ;;  %v12093_v57 = vpop.f32.mrf.mxu0  ;;  %v12133_v45 = vpop.f32.mrf.mxu1  ;;  %v24021_v7 = vld [vmem:[#allocation58_spill] sm:$0xff] }
 0x471   : > { %v12242_v63 = vmax.f32 %v12210_v59, 0.0  ;;  %v12211_v2 = vadd.f32 %v24018_v48, %v12167_v49  ;;  %v12168_v27 = vadd.f32 %v12092_v34, %v24019_v10  ;;  %v12094_v32 = vadd.f32 %v12093_v57, %v11981_v18  ;;  %v24026_v42 = vld [vmem:[#allocation66_spill] sm:$0xff]  ;;  %v24027_v57 = vld [vmem:[#allocation36_spill] sm:$0xff] }
 0x472   : > { %v12258_v11 = vmax.f32 %v12226_v33, 0.0  ;;  %v12227_v15 = vadd.f32 %v24018_v48, %v12183_v26  ;;  %v12184_v25 = vadd.f32 %v12132_v61, %v24020_v46  ;;  %v12134_v21 = vadd.f32 %v12133_v45, %v12021_v30  ;;  %v12097_v20 = vpop.f32.mrf.mxu0  ;;  %v12137_v14 = vpop.f32.mrf.mxu1  ;;  %v24028_v45 = vld [vmem:[#allocation43_spill] sm:$0xff] }
 0x473   : > { %12274 = vst [vmem:[%s23136_s24] sm:$0xff] %v12242_v63  ;;  %v12243_v0 = vmax.f32 %v12211_v2, 0.0  ;;  %v12212_v36 = vadd.f32 %v24015_v62, %v12168_v27  ;;  %v12169_v18 = vadd.f32 %v12094_v32, %v24021_v7  ;;  %v12098_v41 = vadd.f32 %v12097_v20, %v24022_v4 }
 0x474   : > { %12290 = vst [vmem:[%s23136_s24 + $0x80] sm:$0xff] %v12258_v11  ;;  %v12259_v12 = vmax.f32 %v12227_v15, 0.0  ;;  %v12228_v30 = vadd.f32 %v24015_v62, %v12184_v25  ;;  %v12185_v40 = vadd.f32 %v12134_v21, %v24023_v58  ;;  %v12138_v52 = vadd.f32 %v12137_v14, %v12025_v29  ;;  %v12099_v43 = vpop.f32.mrf.mxu0  ;;  %v12139_v19 = vpop.f32.mrf.mxu1  ;;  %v24029_v21 = vld [vmem:[#allocation60_spill] sm:$0xff] }
 0x475   : > { %12275 = vst [vmem:[%s23136_s24 + $0x8] sm:$0xff] %v12243_v0  ;;  %v12244_v56 = vmax.f32 %v12212_v36, 0.0  ;;  %v12213_v39 = vadd.f32 %v24018_v48, %v12169_v18  ;;  %v12170_v9 = vadd.f32 %v12098_v41, %v24024_v35  ;;  %v12100_v59 = vadd.f32 %v12099_v43, %v24025_v44  ;;  %v24030_v18 = vld [vmem:[#allocation19_spill] sm:$0xff] }
 0x476   : > { %12291 = vst [vmem:[%s23136_s24 + $0x88] sm:$0xff] %v12259_v12  ;;  %v12260_v49 = vmax.f32 %v12228_v30, 0.0  ;;  %v12229_v34 = vadd.f32 %v24018_v48, %v12185_v40  ;;  %v12186_v33 = vadd.f32 %v12138_v52, %v24026_v42  ;;  %v12140_v29 = vadd.f32 %v12139_v19, %v23102_v16  ;;  %v12101_v38 = vpop.f32.mrf.mxu0  ;;  %v12141_v10 = vpop.f32.mrf.mxu1  ;;  %v24031_v30 = vld [vmem:[#allocation18_spill] sm:$0xff] }
 0x477   : > { %12276 = vst [vmem:[%s23136_s24 + $0x10] sm:$0xff] %v12244_v56  ;;  %v12245_v26 = vmax.f32 %v12213_v39, 0.0  ;;  %v12214_v61 = vadd.f32 %v24015_v62, %v12170_v9  ;;  %v12171_v63 = vadd.f32 %v12100_v59, %v24027_v57  ;;  %v12102_v2 = vadd.f32 %v12101_v38, %v23081_v50  ;;  %v24032_v56 = vld [vmem:[#allocation7_spill] sm:$0xff]  ;;  %v24035_v57 = vld [vmem:[#allocation61_spill] sm:$0xff] }
 0x478   : > { %12292 = vst [vmem:[%s23136_s24 + $0x90] sm:$0xff] %v12260_v49  ;;  %v12261_v27 = vmax.f32 %v12229_v34, 0.0  ;;  %v12230_v32 = vadd.f32 %v24015_v62, %v12186_v33  ;;  %v12187_v11 = vadd.f32 %v12140_v29, %v24028_v45  ;;  %v12142_v16 = vadd.f32 %v12141_v10, %v23104_v28  ;;  %v12103_v15 = vpop.f32.mrf.mxu0  ;;  %v12143_v0 = vpop.f32.mrf.mxu1  ;;  %v24033_v59 = vld [vmem:[#allocation59_spill] sm:$0xff]  ;;  %v24034_v33 = vld [vmem:[#allocation20_spill] sm:$0xff] }
 0x479   : > { %12277 = vst [vmem:[%s23136_s24 + $0x18] sm:$0xff] %v12245_v26  ;;  %v12246_v46 = vmax.f32 %v12214_v61, 0.0  ;;  %v12215_v25 = vadd.f32 %v24018_v48, %v12171_v63  ;;  %v12172_v20 = vadd.f32 %v12102_v2, %v24029_v21  ;;  %v12104_v50 = vadd.f32 %v12103_v15, %v23083_v22 }
 0x47a   : > { %12293 = vst [vmem:[%s23136_s24 + $0x98] sm:$0xff] %v12261_v27  ;;  %v12262_v36 = vmax.f32 %v12230_v32, 0.0  ;;  %v12231_v7 = vadd.f32 %v24018_v48, %v12187_v11  ;;  %v12188_v4 = vadd.f32 %v12142_v16, %v24030_v18  ;;  %v12144_v28 = vadd.f32 %v12143_v0, %v23106_v24  ;;  %v12107_v41 = vpop.f32.mrf.mxu0  ;;  %v12147_v40 = vpop.f32.mrf.mxu1  ;;  %v24036_v32 = vld [vmem:[#allocation21_spill] sm:$0xff]  ;;  %v24038_v0 = vld [vmem:[#allocation10_spill] sm:$0xff] }
 0x47b   : > { %12278 = vst [vmem:[%s23136_s24 + $0x20] sm:$0xff] %v12246_v46  ;;  %v12247_v14 = vmax.f32 %v12215_v25, 0.0  ;;  %v12216_v12 = vadd.f32 %v24015_v62, %v12172_v20  ;;  %v12173_v58 = vadd.f32 %v12104_v50, %v24031_v30  ;;  %v12108_v22 = vadd.f32 %v12107_v41, %v23085_v8  ;;  %v24037_v46 = vld [vmem:[#allocation37_spill] sm:$0xff] }
 0x47c   : > { %12294 = vst [vmem:[%s23136_s24 + $0xa0] sm:$0xff] %v12262_v36  ;;  %v12263_v52 = vmax.f32 %v12231_v7, 0.0  ;;  %v12232_v43 = vadd.f32 %v24015_v62, %v12188_v4  ;;  %v12189_v39 = vadd.f32 %v12144_v28, %v24032_v56  ;;  %v12148_v24 = vadd.f32 %v12147_v40, %v23108_v60  ;;  %v12109_v35 = vpop.f32.mrf.mxu0  ;;  %v12149_v49 = vpop.f32.mrf.mxu1  ;;  %v24039_v28 = vld [vmem:[#allocation38_spill] sm:$0xff]  ;;  %v24041_v56 = vld [vmem:[#allocation8_spill] sm:$0xff] }
 0x47d   : > { %12279 = vst [vmem:[%s23136_s24 + $0x28] sm:$0xff] %v12247_v14  ;;  %v12248_v9 = vmax.f32 %v12216_v12, 0.0  ;;  %v12217_v44 = vadd.f32 %v24018_v48, %v12173_v58  ;;  %v12174_v19 = vadd.f32 %v12108_v22, %v24033_v59  ;;  %v12110_v8 = vadd.f32 %v12109_v35, %v23087_v37  ;;  %v24040_v58 = vld [vmem:[#allocation68_spill] sm:$0xff] }
 0x47e   : > { %12295 = vst [vmem:[%s23136_s24 + $0xa8] sm:$0xff] %v12263_v52  ;;  %v12264_v34 = vmax.f32 %v12232_v43, 0.0  ;;  %v12233_v42 = vadd.f32 %v24018_v48, %v12189_v39  ;;  %v12190_v29 = vadd.f32 %v12148_v24, %v24034_v33  ;;  %v12150_v60 = vadd.f32 %v12149_v49, %v23110_v17  ;;  %v12111_v38 = vpop.f32.mrf.mxu0  ;;  %v12151_v2 = vpop.f32.mrf.mxu1 }
 0x47f   : > { %12280 = vst [vmem:[%s23136_s24 + $0x30] sm:$0xff] %v12248_v9  ;;  %v12249_v26 = vmax.f32 %v12217_v44, 0.0  ;;  %v12218_v61 = vadd.f32 %v24015_v62, %v12174_v19  ;;  %v12175_v63 = vadd.f32 %v12110_v8, %v24035_v57  ;;  %v12112_v37 = vadd.f32 %v12111_v38, %v23089_v31  ;;  %v24042_v44 = vld [vmem:[#allocation69_spill] sm:$0xff]  ;;  %v24044_v38 = vld [vmem:[#allocation39_spill] sm:$0xff] }
 0x480   : > { %12296 = vst [vmem:[%s23136_s24 + $0xb0] sm:$0xff] %v12264_v34  ;;  %v12265_v10 = vmax.f32 %v12233_v42, 0.0  ;;  %v12234_v27 = vadd.f32 %v24015_v62, %v12190_v29  ;;  %v12191_v45 = vadd.f32 %v12150_v60, %v24036_v32  ;;  %v12152_v17 = vadd.f32 %v12151_v2, %v23112_v53  ;;  %v12113_v11 = vpop.f32.mrf.mxu0  ;;  %v12153_v21 = vpop.f32.mrf.mxu1  ;;  %v24043_v34 = vld [vmem:[#allocation9_spill] sm:$0xff] }
 0x481   : > { %12281 = vst [vmem:[%s23136_s24 + $0x38] sm:$0xff] %v12249_v26  ;;  %v12250_v16 = vmax.f32 %v12218_v61, 0.0  ;;  %v12219_v15 = vadd.f32 %v24018_v48, %v12175_v63  ;;  %v12176_v25 = vadd.f32 %v12112_v37, %v24037_v46  ;;  %v12114_v31 = vadd.f32 %v12113_v11, %v23091_v55  ;;  %v24045_v37 = vld [vmem:[#allocation6_spill] sm:$0xff] }
 0x482   : > { %12297 = vst [vmem:[%s23136_s24 + $0xb8] sm:$0xff] %v12265_v10  ;;  %v12266_v20 = vmax.f32 %v12234_v27, 0.0  ;;  %v12235_v50 = vadd.f32 %v24018_v48, %v12191_v45  ;;  %v12192_v36 = vadd.f32 %v12152_v17, %v24038_v0  ;;  %v12154_v53 = vadd.f32 %v12153_v21, %v23114_v3  ;;  %v12117_v7 = vpop.f32.mrf.mxu0  ;;  %v12157_v14 = vpop.f32.mrf.mxu1  ;;  %v24046_v45 = vld [vmem:[#allocation27_spill] sm:$0xff] }
 0x483   : > { %12282 = vst [vmem:[%s23136_s24 + $0x40] sm:$0xff] %v12250_v16  ;;  %v12251_v18 = vmax.f32 %v12219_v15, 0.0  ;;  %v12220_v4 = vadd.f32 %v24015_v62, %v12176_v25  ;;  %v12177_v41 = vadd.f32 %v12114_v31, %v24039_v28  ;;  %v12118_v55 = vadd.f32 %v12117_v7, %v23093_v13  ;;  %v24047_v15 = vld [vmem:[#allocation62_spill] sm:$0xff]  ;;  %v24048_v31 = vld [vmem:[#allocation12_spill] sm:$0xff] }
 0x484   : > { %12298 = vst [vmem:[%s23136_s24 + $0xc0] sm:$0xff] %v12266_v20  ;;  %v12267_v12 = vmax.f32 %v12235_v50, 0.0  ;;  %v12236_v30 = vadd.f32 %v24015_v62, %v12192_v36  ;;  %v12193_v22 = vadd.f32 %v12154_v53, %v24040_v58  ;;  %v12158_v3 = vadd.f32 %v12157_v14, %v23119_v6  ;;  %v12119_v40 = vpop.f32.mrf.mxu0  ;;  %v12159_v24 = vpop.f32.mrf.mxu1 }
 0x485   : > { %12283 = vst [vmem:[%s23136_s24 + $0x48] sm:$0xff] %v12251_v18  ;;  %v12252_v52 = vmax.f32 %v12220_v4, 0.0  ;;  %v12221_v43 = vadd.f32 %v24018_v48, %v12177_v41  ;;  %v12178_v39 = vadd.f32 %v12118_v55, %v24041_v56  ;;  %v12120_v13 = vadd.f32 %v12119_v40, %v23095_v51 }
 0x486   : > { %12299 = vst [vmem:[%s23136_s24 + $0xc8] sm:$0xff] %v12267_v12  ;;  %v12268_v35 = vmax.f32 %v12236_v30, 0.0  ;;  %v12237_v9 = vadd.f32 %v24018_v48, %v12193_v22  ;;  %v12194_v59 = vadd.f32 %v12158_v3, %v24042_v44  ;;  %v12160_v6 = vadd.f32 %v12159_v24, %v23121_v54  ;;  %v12121_v19 = vpop.f32.mrf.mxu0  ;;  %v12161_v33 = vpop.f32.mrf.mxu1 }
 0x487   : > { %12284 = vst [vmem:[%s23136_s24 + $0x50] sm:$0xff] %v12252_v52  ;;  %v12253_v8 = vmax.f32 %v12221_v43, 0.0  ;;  %v12222_v49 = vadd.f32 %v24015_v62, %v12178_v39  ;;  %v12179_v51 = vadd.f32 %v12120_v13, %v24043_v34  ;;  %v12122_v42 = vadd.f32 %v12121_v19, %v23097_v1 }
 0x488   : > { %12300 = vst [vmem:[%s23136_s24 + $0xd0] sm:$0xff] %v12268_v35  ;;  %v12269_v29 = vmax.f32 %v12237_v9, 0.0  ;;  %v12238_v60 = vadd.f32 %v24015_v62, %v12194_v59  ;;  %v12195_v54 = vadd.f32 %v12160_v6, %v24044_v38  ;;  %v12162_v26 = vadd.f32 %v12161_v33, %v23124_v23  ;;  %v12123_v61 = vpop.f32.mrf.mxu0  ;;  %v12163_v10 = vpop.f32.mrf.mxu1 }
 0x489   : > { %12285 = vst [vmem:[%s23136_s24 + $0x58] sm:$0xff] %v12253_v8  ;;  %v12254_v57 = vmax.f32 %v12222_v49, 0.0  ;;  %v12223_v63 = vadd.f32 %v24018_v48, %v12179_v51  ;;  %v12180_v2 = vadd.f32 %v12122_v42, %v24045_v37  ;;  %v12124_v1 = vadd.f32 %v12123_v61, %v23099_v47 }
 0x48a   : > { %12301 = vst [vmem:[%s23136_s24 + $0xd8] sm:$0xff] %v12269_v29  ;;  %v12270_v27 = vmax.f32 %v12238_v60, 0.0  ;;  %v12239_v32 = vadd.f32 %v24018_v48, %v12195_v54  ;;  %v12196_v23 = vadd.f32 %v12162_v26, %v24046_v45  ;;  %v12164_v17 = vadd.f32 %v12163_v10, %v23128_v5 }
 0x48b   : > { %12286 = vst [vmem:[%s23136_s24 + $0x60] sm:$0xff] %v12254_v57  ;;  %v12255_v11 = vmax.f32 %v12223_v63, 0.0  ;;  %v12224_v16 = vadd.f32 %v24015_v62, %v12180_v2  ;;  %v12181_v47 = vadd.f32 %v12124_v1, %v24047_v15 }
 0x48c   : > { %12302 = vst [vmem:[%s23136_s24 + $0xe0] sm:$0xff] %v12270_v27  ;;  %v12271_v46 = vmax.f32 %v12239_v32, 0.0  ;;  %v12240_v25 = vadd.f32 %v24015_v62, %v12196_v23  ;;  %v12197_v21 = vadd.f32 %v12164_v17, %v24048_v31 }
 0x48d   : > { %12287 = vst [vmem:[%s23136_s24 + $0x68] sm:$0xff] %v12255_v11  ;;  %v12256_v5 = vmax.f32 %v12224_v16, 0.0  ;;  %v12225_v20 = vadd.f32 %v24018_v48, %v12181_v47 }
 0x48e   : > { %12303 = vst [vmem:[%s23136_s24 + $0xe8] sm:$0xff] %v12271_v46  ;;  %v12272_v50 = vmax.f32 %v12240_v25, 0.0  ;;  %v12241_v0 = vadd.f32 %v24018_v48, %v12197_v21 }
 0x48f   : > { %12288 = vst [vmem:[%s23136_s24 + $0x70] sm:$0xff] %v12256_v5  ;;  %v12257_v36 = vmax.f32 %v12225_v20, 0.0 }
 0x490   : > { %12304 = vst [vmem:[%s23136_s24 + $0xf0] sm:$0xff] %v12272_v50  ;;  %v12273_v62 = vmax.f32 %v12241_v0, 0.0 }
 0x491   : > { %12289 = vst [vmem:[%s23136_s24 + $0x78] sm:$0xff] %v12257_v36 }
 0x492   : > { %12305 = vst [vmem:[%s23136_s24 + $0xf8] sm:$0xff] %v12273_v62 }
 0x493   : > { %15976 = shalt.err (!%p15973_p6)
}
 0x494   : > { %s15977_s4 = scalar_lea.hbm %s23250_s11, 4096  ;;  %s15981_s27 = scalar_lea.hbm %s23313_s3, 16384 }
 0x495   : > { %p15978_p7 = scmp.ne.s32.totalorder %s23250_s11, %s15977_s4  ;;  %p15982_p11 = scmp.lt.s32.totalorder %s23250_s11, %s23313_s3 }
 0x496   : > { %p15983_p12 = scmp.lt.s32.totalorder %s15981_s27, %s15977_s4 }
 0x497   : > { %p15979_p9 = pnand %p15978_p7, %p16132_p3 }
 0x498   : > { %p15984_p13 = por %p15983_p12, %p15982_p11 }
 0x499   : > { %p15980_p10 = pneg %p15979_p9 }
 0x49b   : > { %p15985_p0 = pnand %p15984_p13, %p15980_p10 }
 0x49d   : > { %15988 = shalt.err (!%p15985_p0)
}
 0x49e   : > { %s16059_s16 = smov 256   ;;  %s16060_s8 = smov 16  }
 0x49f   : > { %14529 = dma.vmem_to_hbm [thread:$0]  (%p16132_p3), %s23252_s7, 4096, %s23250_s11, %s23259_s20, %s16059_s16, %s16059_s16, %s16060_s8  }
 0x4a0 PF: > { %p14535_p1 = scmp.ge.s32.totalorder %s16055_s19, 2  ;;  %s12338_s10 = sand.u32 1, %s16027_s12  }
 0x4a1   : > { %s12339_s21 = scalar_lea.sflag [#allocation3], %s12338_s10 }
 0x4a2   : > { %p14532_p2 = pnand %p14535_p1, %p16141_p8 }
 0x4a4   : > { %p14533_p4 = pneg %p14532_p2 }
 0x4a6   : > { %16022 = dma.done.wait (%p14533_p4), %s12339_s21, 4096  }
 0x4a7   : > { %16024 = vsyncadd (%p14533_p4), %s12339_s21, 4294963200  ;;  %s16_s19 = sadd.s32 1, %s16055_s19   ;;  %s24049_s12 = smov %s16031_s13 }
 0x4a8   : > { %p13_p5 = scmp.ge.s32.totalorder %s16_s19, 6   ;;  %s24050_s13 = smov %s16035_s14 }
 0x4a9   : > { %s24051_s14 = smov %s16150_s30  ;;  %s24052_s15 = smov %s16047_s17 }
 0x4aa   : > { %s24053_s16 = smov %s16051_s18  ;;  %s24054_s17 = smov %s24057_s22 }
 0x4ab   : > { %s24055_s18 = smov %s24061_s23  ;;  %15 = sbr.rel (!%p13_p5) target bundleno = 5 (0x5), region = 78 }
 0x4b0   :  { %12344 = vsyncpa [#allocation3], 1 }
 0x4b1   :  { %12346 = vsyncpa [#allocation3 + $0x1], 1 }

</bundles_post_ra>
